<compile_context>
chip_gen: v5e
topology: v5e:2x2
jax: 0.10.0
libtpu: 0.0.40
codegen_flags: <defaults>
</compile_context>

<pallas_src>
import math
from functools import partial

import jax
import jax.numpy as jnp
from jax import lax
from jax.experimental import pallas as pl
from jax.experimental.pallas import tpu as pltpu


_INV_SQRT2 = 1.0 / math.sqrt(2.0)

# BatchNorm eps values fixed by the PyTorch module definition.
_EPS_BN1 = 1e-5   # DWCONV.bn_s1 (default eps)
_EPS_BN2 = 1e-5   # DWCONV.bn_s2 (default eps)
_EPS_BN3 = 1e-3   # Conv2d_1.bn of conv2
_EPS_BN4 = 1e-3   # Conv2d_1.bn of conv3


def _gelu(z):
    # exact GELU (nn.GELU default, approximate='none')
    return 0.5 * z * (1.0 + lax.erf(z * _INV_SQRT2))


def _vmem_limit_bytes():
    """Generation-aware scoped-VMEM limit (~50 MiB on v7x, ~100 MiB on v5e/v6e)."""
    cap = 64 * 1024 * 1024                      # conservative default (v7x physical)
    try:
        info = pltpu.get_tpu_info()
        v = getattr(info, "vmem_capacity_bytes", None)
        if isinstance(v, (int, float)) and v > 0:
            cap = int(v)
    except Exception:
        pass
    return max(32 * 1024 * 1024, int(cap * 0.78))


# ----------------------------------------------------------------------------
# Shared in-kernel building blocks
# ----------------------------------------------------------------------------
def _dwconv_one_image(xc, hh, ww, dwb, H, W, KH, KW):
    """Depthwise KHxKW conv of one image held lane-dense as (C, H*W).

    Each tap is a pltpu.roll along the flattened lane axis (rides the XLU slot)
    plus a precomputed halo mask -> no padded copy, no lane-offset sub-window
    slices, halo handled entirely in-kernel."""
    HW = H * W
    xc = xc.astype(jnp.float32)
    acc = jnp.zeros(xc.shape, jnp.float32)
    for kh in range(KH):
        dh = kh - KH // 2
        mh = jnp.logical_and(hh + dh >= 0, hh + dh < H)
        for kw in range(KW):
            dwo = kw - KW // 2
            m = jnp.logical_and(mh, jnp.logical_and(ww + dwo >= 0, ww + dwo < W))
            off = dh * W + dwo
            shifted = xc if off == 0 else pltpu.roll(xc, shift=(-off) % HW, axis=1)
            tap = jnp.where(m, shifted, 0.0)
            acc = acc + dwb[:, kh * KW + kw:kh * KW + kw + 1] * tap
    return acc


def _mix1x1(w, g):
    """1x1 conv as (Cout,Cin) x (Cin,T).  Tiny Cin -> exact f32 VPU FMAs
    (the op is memory bound); larger Cin -> MXU at HIGHEST precision."""
    cout, cin = w.shape
    if cin > 16:
        # TODO(synk): per-generation crossover (v5e breaks even at lower Cin).
        return jnp.dot(w, g, preferred_element_type=jnp.float32,
                       precision=lax.Precision.HIGHEST)
    u = w[:, 0:1] * g[0:1, :]
    for ci in range(1, cin):
        u = u + w[:, ci:ci + 1] * g[ci:ci + 1, :]
    return u


def _bn_fold(csum, csq, inv_count, gamma_col, beta_col, eps):
    """Training-mode BN folded to per-channel (C,1) scale/shift.
    TODO(synk): E[y^2]-E[y]^2 in plain f32 can cancel badly for huge N*H*W;
    switch to two-pass mean/variance or Welford in that regime."""
    mean = csum * inv_count
    var = jnp.maximum(csq * inv_count - mean * mean, 0.0)   # biased variance
    scale = gamma_col * lax.rsqrt(var + jnp.float32(eps))
    shift = beta_col - mean * scale
    return scale, shift


# ----------------------------------------------------------------------------
# FAST PATH: the whole block as a single fused kernel (everything in VMEM).
# ----------------------------------------------------------------------------
def _fused_block_kernel(x_ref, hh_ref, ww_ref, dwb_ref,
                        w1_ref, w2_ref, w3_ref,
                        g1_ref, b1_ref, g2_ref, b2_ref,
                        g3_ref, b3_ref, g4_ref, b4_ref,
                        out_ref, *, N, H, W, KH, KW):
    HW = H * W
    inv_cnt = jnp.float32(1.0 / (N * HW))
    hh = hh_ref[...]
    ww = ww_ref[...]
    dwb = dwb_ref[...]

    # ---- DWCONV.conv_s1: depthwise KHxKW + BN1 batch stats ------------------
    y, s, q = [], None, None
    for n in range(N):
        acc = _dwconv_one_image(x_ref[n], hh, ww, dwb, H, W, KH, KW)
        y.append(acc)
        sn = jnp.sum(acc, axis=1, keepdims=True)
        qn = jnp.sum(acc * acc, axis=1, keepdims=True)
        s = sn if s is None else s + sn
        q = qn if q is None else q + qn

    def stage(y_in, s_in, q_in, g_ref, b_ref, eps, w_ref):
        scale, shift = _bn_fold(s_in, q_in, inv_cnt, g_ref[...], b_ref[...], eps)
        w = w_ref[...]
        y_out, s_out, q_out = [], None, None
        for n in range(N):
            u = _mix1x1(w, _gelu(y_in[n] * scale + shift))
            y_out.append(u)
            sn = jnp.sum(u, axis=1, keepdims=True)
            qn = jnp.sum(u * u, axis=1, keepdims=True)
            s_out = sn if s_out is None else s_out + sn
            q_out = qn if q_out is None else q_out + qn
        return y_out, s_out, q_out

    y, s, q = stage(y, s, q, g1_ref, b1_ref, _EPS_BN1, w1_ref)   # conv_s2 (C->C)
    y, s, q = stage(y, s, q, g2_ref, b2_ref, _EPS_BN2, w2_ref)   # conv2   (C->2C)
    y, s, q = stage(y, s, q, g3_ref, b3_ref, _EPS_BN3, w3_ref)   # conv3   (2C->Co)

    scale4, shift4 = _bn_fold(s, q, inv_cnt, g4_ref[...], b4_ref[...], _EPS_BN4)
    for n in range(N):
        out_ref[n] = _gelu(y[n] * scale4 + shift4).astype(out_ref.dtype)


# ----------------------------------------------------------------------------
# STREAMING PATH kernels (large problems)
# ----------------------------------------------------------------------------
def _dwconv_stats_kernel(x_ref, hh_ref, ww_ref, dwb_ref,
                         y_ref, s_ref, q_ref, *, H, W, KH, KW):
    acc = _dwconv_one_image(x_ref[0], hh_ref[...], ww_ref[...], dwb_ref[...],
                            H, W, KH, KW)
    y_ref[0] = acc.astype(y_ref.dtype)
    # Per-batch-element stat partials (de-aliased, so the n grid axis can be
    # 'parallel' -> both TensorCores on v7x); reduced in the wrapper.
    s_ref[0] = jnp.sum(acc, axis=1, keepdims=True)
    q_ref[0] = jnp.sum(acc * acc, axis=1, keepdims=True)


def _bn_gelu_conv_stats_kernel(t_ref, scale_ref, shift_ref, w_ref,
                               u_ref, s_ref, q_ref):
    @pl.when(pl.program_id(1) == 0)
    def _():
        s_ref[...] = jnp.zeros_like(s_ref)
        q_ref[...] = jnp.zeros_like(q_ref)

    z = t_ref[0].astype(jnp.float32) * scale_ref[...] + shift_ref[...]
    u = _mix1x1(w_ref[...], _gelu(z))
    u_ref[0] = u.astype(u_ref.dtype)
    s_ref[0] += jnp.sum(u, axis=1, keepdims=True)
    q_ref[0] += jnp.sum(u * u, axis=1, keepdims=True)


def _bn_gelu_kernel(t_ref, scale_ref, shift_ref, o_ref):
    z = t_ref[0].astype(jnp.float32) * scale_ref[...] + shift_ref[...]
    o_ref[0] = _gelu(z).astype(o_ref.dtype)


# ----------------------------------------------------------------------------
# Tiling helpers (streaming path)
# ----------------------------------------------------------------------------
def _pick_tile_hw(hw, max_lanes):
    """Largest lane tile that divides hw, is a multiple of 128 and <= max_lanes."""
    if hw <= max_lanes:
        return hw
    t = (max_lanes // 128) * 128
    while t >= 128:
        if hw % t == 0:
            return t
        t -= 128
    # TODO(synk): pad/mask the lane axis instead of falling back to the full
    # extent when hw has no 128-multiple divisor (robustness for huge images).
    return hw


def _stage_tile(hw, cin, cout, in_bytes, out_bytes, vmem_limit):
    budget = vmem_limit // 2                       # headroom for weights/stats
    per_lane = 2 * (cin * in_bytes + cout * out_bytes)   # double-buffered in+out
    return _pick_tile_hw(hw, max(128, budget // max(per_lane, 1)))


def _fused_stage(t, scale, shift, w, tile_hw, out_dtype, vmem_limit):
    """BN(scale/shift)+GELU -> 1x1 conv -> output + next-layer batch stats."""
    N, Cin, HW = t.shape
    Cout = w.shape[0]
    y, s, q = pl.pallas_call(
        _bn_gelu_conv_stats_kernel,
        grid=(N, HW // tile_hw),
        in_specs=[
            pl.BlockSpec((1, Cin, tile_hw), lambda n, j: (n, 0, j)),
            pl.BlockSpec((Cin, 1), lambda n, j: (0, 0)),
            pl.BlockSpec((Cin, 1), lambda n, j: (0, 0)),
            pl.BlockSpec((Cout, Cin), lambda n, j: (0, 0)),
        ],
        out_specs=[
            pl.BlockSpec((1, Cout, tile_hw), lambda n, j: (n, 0, j)),
            pl.BlockSpec((1, Cout, 1), lambda n, j: (n, 0, 0)),   # per-n partial
            pl.BlockSpec((1, Cout, 1), lambda n, j: (n, 0, 0)),   # per-n partial
        ],
        out_shape=(
            jax.ShapeDtypeStruct((N, Cout, HW), out_dtype),
            jax.ShapeDtypeStruct((N, Cout, 1), jnp.float32),
            jax.ShapeDtypeStruct((N, Cout, 1), jnp.float32),
        ),
        compiler_params=pltpu.CompilerParams(
            dimension_semantics=("parallel", "arbitrary"),
            vmem_limit_bytes=vmem_limit),
    )(t, scale, shift, w)
    return y, jnp.sum(s, axis=0), jnp.sum(q, axis=0)


def _streaming_forward(x3, hh, ww, dwb, w1, w2, w3,
                       g1, b1, g2, b2, g3, b3, g4, b4,
                       H, W, KH, KW, interm_dtype, vmem_limit):
    N, C, HW = x3.shape
    C2, Cout = w2.shape[0], w3.shape[0]
    inv_cnt = jnp.float32(1.0 / (N * HW))
    ib = jnp.dtype(interm_dtype).itemsize

    # ---- Pass A: depthwise conv + BN1 partial stats --------------------------
    # TODO(synk): for very large C*H*W, band over H with a (KH//2)-row halo
    # instead of one whole image per grid step.
    y1, s1, q1 = pl.pallas_call(
        partial(_dwconv_stats_kernel, H=H, W=W, KH=KH, KW=KW),
        grid=(N,),
        in_specs=[
            pl.BlockSpec((1, C, HW), lambda n: (n, 0, 0)),
            pl.BlockSpec((1, HW), lambda n: (0, 0)),
            pl.BlockSpec((1, HW), lambda n: (0, 0)),
            pl.BlockSpec((C, KH * KW), lambda n: (0, 0)),
        ],
        out_specs=[
            pl.BlockSpec((1, C, HW), lambda n: (n, 0, 0)),
            pl.BlockSpec((1, C, 1), lambda n: (n, 0, 0)),
            pl.BlockSpec((1, C, 1), lambda n: (n, 0, 0)),
        ],
        out_shape=(
            jax.ShapeDtypeStruct((N, C, HW), interm_dtype),
            jax.ShapeDtypeStruct((N, C, 1), jnp.float32),
            jax.ShapeDtypeStruct((N, C, 1), jnp.float32),
        ),
        compiler_params=pltpu.CompilerParams(
            dimension_semantics=("parallel",),
            vmem_limit_bytes=vmem_limit),
    )(x3, hh, ww, dwb)

    sc1, sh1 = _bn_fold(jnp.sum(s1, axis=0), jnp.sum(q1, axis=0),
                        inv_cnt, g1, b1, _EPS_BN1)

    # ---- Pass B1/B2/B3: BN+GELU -> 1x1 conv -> stats --------------------------
    t1 = _stage_tile(HW, C, C, ib, ib, vmem_limit)
    y2, s2, q2 = _fused_stage(y1, sc1, sh1, w1, t1, interm_dtype, vmem_limit)
    sc2, sh2 = _bn_fold(s2, q2, inv_cnt, g2, b2, _EPS_BN2)

    t2 = _stage_tile(HW, C, C2, ib, ib, vmem_limit)
    y3, s3, q3 = _fused_stage(y2, sc2, sh2, w2, t2, interm_dtype, vmem_limit)
    sc3, sh3 = _bn_fold(s3, q3, inv_cnt, g3, b3, _EPS_BN3)

    t3 = _stage_tile(HW, C2, Cout, ib, ib, vmem_limit)
    y4, s4, q4 = _fused_stage(y3, sc3, sh3, w3, t3, interm_dtype, vmem_limit)
    sc4, sh4 = _bn_fold(s4, q4, inv_cnt, g4, b4, _EPS_BN4)

    # ---- Pass C: final BN + GELU ----------------------------------------------
    t4 = _stage_tile(HW, Cout, Cout, ib, 4, vmem_limit)
    out = pl.pallas_call(
        _bn_gelu_kernel,
        grid=(N, HW // t4),
        in_specs=[
            pl.BlockSpec((1, Cout, t4), lambda n, j: (n, 0, j)),
            pl.BlockSpec((Cout, 1), lambda n, j: (0, 0)),
            pl.BlockSpec((Cout, 1), lambda n, j: (0, 0)),
        ],
        out_specs=pl.BlockSpec((1, Cout, t4), lambda n, j: (n, 0, j)),
        out_shape=jax.ShapeDtypeStruct((N, Cout, HW), jnp.float32),
        compiler_params=pltpu.CompilerParams(
            dimension_semantics=("parallel", "parallel"),
            vmem_limit_bytes=vmem_limit),
    )(y4, sc4, sh4)
    return out


# ----------------------------------------------------------------------------
# Public wrapper
# ----------------------------------------------------------------------------
def block_dwconv_forward(x, dw_w, bn1_g, bn1_b, w_s2, bn2_g, bn2_b,
                         w_c2, bn3_g, bn3_b, w_c3, bn4_g, bn4_b,
                         *, force_streaming=False, interm_dtype=jnp.bfloat16):
    """Forward of bolck_DWCONV (training-mode BN, exact GELU).
    x: (N, C, H, W) f32.  Conv weights in PyTorch layout:
    dw_w (C,1,7,7); w_s2 (C,C,1,1); w_c2 (2C,C,1,1); w_c3 (Cout,2C,1,1)."""
    N, C, H, W = x.shape
    KH, KW = int(dw_w.shape[-2]), int(dw_w.shape[-1])
    HW = H * W
    C2 = w_c2.shape[0]
    Cout = w_c3.shape[0]

    f32 = jnp.float32
    x3 = x.astype(f32).reshape(N, C, HW)                       # free reshape
    dwb = dw_w.reshape(C, KH * KW).astype(f32)
    w1 = w_s2.reshape(w_s2.shape[0], -1).astype(f32)           # (C, C)
    w2 = w_c2.reshape(C2, -1).astype(f32)                      # (2C, C)
    w3 = w_c3.reshape(Cout, -1).astype(f32)                    # (Cout, 2C)
    g1 = bn1_g.astype(f32).reshape(C, 1);   b1 = bn1_b.astype(f32).reshape(C, 1)
    g2 = bn2_g.astype(f32).reshape(C, 1);   b2 = bn2_b.astype(f32).reshape(C, 1)
    g3 = bn3_g.astype(f32).reshape(C2, 1);  b3 = bn3_b.astype(f32).reshape(C2, 1)
    g4 = bn4_g.astype(f32).reshape(Cout, 1); b4 = bn4_b.astype(f32).reshape(Cout, 1)

    # Static per-position (h, w) indices for the halo masks of the depthwise conv
    # (computed by XLA outside the kernel; avoids in-kernel vector int div/mod).
    p = jnp.arange(HW, dtype=jnp.int32)
    hh = (p // W).reshape(1, HW)
    ww = (p % W).reshape(1, HW)

    vmem_limit = _vmem_limit_bytes()

    # Small-problem fast path: whole block resident in VMEM, ONE pallas_call.
    # TODO(synk): with C < 8 only half the sublanes carry data; a packed
    # (C*HW/128, 128) view would recover VPU throughput if ever compute bound.
    fused_bytes = 4 * N * HW * (3 * C + C2 + 2 * Cout) + 4 * C * KH * KW
    if (not force_streaming) and fused_bytes <= vmem_limit // 4:
        out = pl.pallas_call(
            partial(_fused_block_kernel, N=N, H=H, W=W, KH=KH, KW=KW),
            out_shape=jax.ShapeDtypeStruct((N, Cout, HW), f32),
            compiler_params=pltpu.CompilerParams(vmem_limit_bytes=vmem_limit),
        )(x3, hh, ww, dwb, w1, w2, w3, g1, b1, g2, b2, g3, b3, g4, b4)
    else:
        out = _streaming_forward(x3, hh, ww, dwb, w1, w2, w3,
                                 g1, b1, g2, b2, g3, b3, g4, b4,
                                 H, W, KH, KW, interm_dtype, vmem_limit)

    return out.reshape(N, Cout, H, W)                          # free reshape


# ----------------------------------------------------------------------------
# Pure-JAX reference (training-mode BN, exact GELU)
# ----------------------------------------------------------------------------
def _reference(x, dw_w, bn1_g, bn1_b, w_s2, bn2_g, bn2_b,
               w_c2, bn3_g, bn3_b, w_c3, bn4_g, bn4_b):
    C = x.shape[1]

    def bn_gelu(y, gamma, beta, eps):
        mean = jnp.mean(y, axis=(0, 2, 3), keepdims=True)
        var = jnp.mean((y - mean) ** 2, axis=(0, 2, 3), keepdims=True)  # biased
        z = (y - mean) * lax.rsqrt(var + eps)
        z = z * gamma[None, :, None, None] + beta[None, :, None, None]
        return 0.5 * z * (1.0 + lax.erf(z * _INV_SQRT2))

    def conv1x1(y, w):
        return jnp.einsum("oc,nchw->nohw", w[:, :, 0, 0], y,
                          precision=lax.Precision.HIGHEST)

    y = lax.conv_general_dilated(
        x, dw_w, window_strides=(1, 1), padding=((3, 3), (3, 3)),
        dimension_numbers=("NCHW", "OIHW", "NCHW"),
        feature_group_count=C, precision=lax.Precision.HIGHEST)
    y = bn_gelu(y, bn1_g, bn1_b, _EPS_BN1)
    y = conv1x1(y, w_s2)
    y = bn_gelu(y, bn2_g, bn2_b, _EPS_BN2)
    y = conv1x1(y, w_c2)
    y = bn_gelu(y, bn3_g, bn3_b, _EPS_BN3)
    y = conv1x1(y, w_c3)
    y = bn_gelu(y, bn4_g, bn4_b, _EPS_BN4)
    return y


if __name__ == "__main__":
    key = jax.random.PRNGKey(0)
    ks = jax.random.split(key, 13)

    N, in_planes, H, W = 2, 4, 16, 16
    out_planes = 8
    mid = in_planes * 2

    x = jax.random.normal(ks[0], (N, in_planes, H, W), dtype=jnp.float32)
    dw_w = 0.3 * jax.random.normal(ks[1], (in_planes, 1, 7, 7), dtype=jnp.float32)
    w_s2 = 0.5 * jax.random.normal(ks[2], (in_planes, in_planes, 1, 1), dtype=jnp.float32)
    w_c2 = 0.5 * jax.random.normal(ks[3], (mid, in_planes, 1, 1), dtype=jnp.float32)
    w_c3 = 0.5 * jax.random.normal(ks[4], (out_planes, mid, 1, 1), dtype=jnp.float32)

    bn1_g = 1.0 + 0.1 * jax.random.normal(ks[5], (in_planes,), dtype=jnp.float32)
    bn1_b = 0.1 * jax.random.normal(ks[6], (in_planes,), dtype=jnp.float32)
    bn2_g = 1.0 + 0.1 * jax.random.normal(ks[7], (in_planes,), dtype=jnp.float32)
    bn2_b = 0.1 * jax.random.normal(ks[8], (in_planes,), dtype=jnp.float32)
    bn3_g = 1.0 + 0.1 * jax.random.normal(ks[9], (mid,), dtype=jnp.float32)
    bn3_b = 0.1 * jax.random.normal(ks[10], (mid,), dtype=jnp.float32)
    bn4_g = 1.0 + 0.1 * jax.random.normal(ks[11], (out_planes,), dtype=jnp.float32)
    bn4_b = 0.1 * jax.random.normal(ks[12], (out_planes,), dtype=jnp.float32)

    args = (x, dw_w, bn1_g, bn1_b, w_s2, bn2_g, bn2_b,
            w_c2, bn3_g, bn3_b, w_c3, bn4_g, bn4_b)

    ref = _reference(*args)

    # --- fast path: single fused pallas_call, all-f32 -> tight tolerance -----
    out_fused = jax.block_until_ready(jax.jit(block_dwconv_forward)(*args))
    assert out_fused.shape == (N, out_planes, H, W)
    diff_fused = float(jnp.max(jnp.abs(out_fused - ref)))
    assert jnp.allclose(out_fused, ref, atol=1e-3, rtol=1e-3), (
        f"fused path mismatch vs reference, max abs diff = {diff_fused}")

    # --- streaming path (5 fused passes, bf16 intermediates) -----------------
    # bf16 intermediate activations drift a little from the all-f32 reference;
    # tolerance chosen for bf16 while still catching structural errors (~O(1)).
    out_stream = jax.block_until_ready(
        jax.jit(partial(block_dwconv_forward, force_streaming=True))(*args))
    diff_stream = float(jnp.max(jnp.abs(out_stream - ref)))
    assert jnp.allclose(out_stream, ref, atol=0.15, rtol=0.05), (
        f"streaming path mismatch vs reference, max abs diff = {diff_stream}")

    print("KERNEL_OK")
</pallas_src>

<mosaic_0001>
module attributes {stable_mosaic.version = 11 : i64} {
  func.func @_fused_block_kernel(%arg0: memref<2x4x256xf32, #tpu.memory_space<vmem>>, %arg1: memref<1x256xi32, #tpu.memory_space<vmem>>, %arg2: memref<1x256xi32, #tpu.memory_space<vmem>>, %arg3: memref<4x49xf32, #tpu.memory_space<vmem>>, %arg4: memref<4x4xf32, #tpu.memory_space<vmem>>, %arg5: memref<8x4xf32, #tpu.memory_space<vmem>>, %arg6: memref<8x8xf32, #tpu.memory_space<vmem>>, %arg7: memref<4x1xf32, #tpu.memory_space<vmem>>, %arg8: memref<4x1xf32, #tpu.memory_space<vmem>>, %arg9: memref<4x1xf32, #tpu.memory_space<vmem>>, %arg10: memref<4x1xf32, #tpu.memory_space<vmem>>, %arg11: memref<8x1xf32, #tpu.memory_space<vmem>>, %arg12: memref<8x1xf32, #tpu.memory_space<vmem>>, %arg13: memref<8x1xf32, #tpu.memory_space<vmem>>, %arg14: memref<8x1xf32, #tpu.memory_space<vmem>>, %arg15: memref<2x8x256xf32, #tpu.memory_space<vmem>>) attributes {dimension_semantics = [], scalar_prefetch = 0 : i64, scratch_operands = 0 : i64, tpu.core_type = #tpu.core_type<tc>} {
    %c0 = arith.constant 0 : index
    %c0_0 = arith.constant 0 : index
    %0 = vector.load %arg1[%c0, %c0_0] : memref<1x256xi32, #tpu.memory_space<vmem>>, vector<1x256xi32>
    %c0_1 = arith.constant 0 : index
    %c0_2 = arith.constant 0 : index
    %1 = vector.load %arg2[%c0_1, %c0_2] : memref<1x256xi32, #tpu.memory_space<vmem>>, vector<1x256xi32>
    %c0_3 = arith.constant 0 : index
    %c0_4 = arith.constant 0 : index
    %2 = vector.load %arg3[%c0_3, %c0_4] : memref<4x49xf32, #tpu.memory_space<vmem>>, vector<4x49xf32>
    %c0_5 = arith.constant 0 : index
    %c0_6 = arith.constant 0 : index
    %c0_7 = arith.constant 0 : index
    %3 = vector.load %arg0[%c0_5, %c0_6, %c0_7] : memref<2x4x256xf32, #tpu.memory_space<vmem>>, vector<1x4x256xf32>
    %4 = vector.shape_cast %3 : vector<1x4x256xf32> to vector<4x256xf32>
    %cst = arith.constant 0.000000e+00 : f32
    %5 = vector.broadcast %cst : f32 to vector<4x256xf32>
    %c-3_i32 = arith.constant -3 : i32
    %6 = vector.broadcast %c-3_i32 : i32 to vector<1x256xi32>
    %7 = arith.addi %0, %6 : vector<1x256xi32>
    %c0_i32 = arith.constant 0 : i32
    %8 = vector.broadcast %c0_i32 : i32 to vector<1x256xi32>
    %9 = arith.cmpi sge, %7, %8 : vector<1x256xi32>
    %c-3_i32_8 = arith.constant -3 : i32
    %10 = vector.broadcast %c-3_i32_8 : i32 to vector<1x256xi32>
    %11 = arith.addi %0, %10 : vector<1x256xi32>
    %c16_i32 = arith.constant 16 : i32
    %12 = vector.broadcast %c16_i32 : i32 to vector<1x256xi32>
    %13 = arith.cmpi slt, %11, %12 : vector<1x256xi32>
    %14 = arith.andi %9, %13 : vector<1x256xi1>
    %c-3_i32_9 = arith.constant -3 : i32
    %15 = vector.broadcast %c-3_i32_9 : i32 to vector<1x256xi32>
    %16 = arith.addi %1, %15 : vector<1x256xi32>
    %c0_i32_10 = arith.constant 0 : i32
    %17 = vector.broadcast %c0_i32_10 : i32 to vector<1x256xi32>
    %18 = arith.cmpi sge, %16, %17 : vector<1x256xi32>
    %c-3_i32_11 = arith.constant -3 : i32
    %19 = vector.broadcast %c-3_i32_11 : i32 to vector<1x256xi32>
    %20 = arith.addi %1, %19 : vector<1x256xi32>
    %c16_i32_12 = arith.constant 16 : i32
    %21 = vector.broadcast %c16_i32_12 : i32 to vector<1x256xi32>
    %22 = arith.cmpi slt, %20, %21 : vector<1x256xi32>
    %23 = arith.andi %18, %22 : vector<1x256xi1>
    %24 = arith.andi %14, %23 : vector<1x256xi1>
    %c51_i32 = arith.constant 51 : i32
    %25 = tpu.dynamic_rotate %4 by %c51_i32 dim 1 : vector<4x256xf32>, i32 -> vector<4x256xf32>
    %cst_13 = arith.constant 0.000000e+00 : f32
    %26 = vector.shape_cast %24 : vector<1x256xi1> to vector<1x256xi1>
    %27 = vector.broadcast %26 : vector<1x256xi1> to vector<4x256xi1>
    %28 = vector.broadcast %cst_13 : f32 to vector<4x256xf32>
    %29 = arith.select %27, %25, %28 : vector<4x256xi1>, vector<4x256xf32>
    %30 = vector.extract_strided_slice %2 {offsets = [0, 0], sizes = [4, 1], strides = [1, 1]} : vector<4x49xf32> to vector<4x1xf32>
    %31 = vector.broadcast %30 : vector<4x1xf32> to vector<4x256xf32>
    %32 = arith.mulf %31, %29 : vector<4x256xf32>
    %33 = arith.addf %5, %32 : vector<4x256xf32>
    %c-2_i32 = arith.constant -2 : i32
    %34 = vector.broadcast %c-2_i32 : i32 to vector<1x256xi32>
    %35 = arith.addi %1, %34 : vector<1x256xi32>
    %c0_i32_14 = arith.constant 0 : i32
    %36 = vector.broadcast %c0_i32_14 : i32 to vector<1x256xi32>
    %37 = arith.cmpi sge, %35, %36 : vector<1x256xi32>
    %c-2_i32_15 = arith.constant -2 : i32
    %38 = vector.broadcast %c-2_i32_15 : i32 to vector<1x256xi32>
    %39 = arith.addi %1, %38 : vector<1x256xi32>
    %c16_i32_16 = arith.constant 16 : i32
    %40 = vector.broadcast %c16_i32_16 : i32 to vector<1x256xi32>
    %41 = arith.cmpi slt, %39, %40 : vector<1x256xi32>
    %42 = arith.andi %37, %41 : vector<1x256xi1>
    %43 = arith.andi %14, %42 : vector<1x256xi1>
    %c50_i32 = arith.constant 50 : i32
    %44 = tpu.dynamic_rotate %4 by %c50_i32 dim 1 : vector<4x256xf32>, i32 -> vector<4x256xf32>
    %cst_17 = arith.constant 0.000000e+00 : f32
    %45 = vector.shape_cast %43 : vector<1x256xi1> to vector<1x256xi1>
    %46 = vector.broadcast %45 : vector<1x256xi1> to vector<4x256xi1>
    %47 = vector.broadcast %cst_17 : f32 to vector<4x256xf32>
    %48 = arith.select %46, %44, %47 : vector<4x256xi1>, vector<4x256xf32>
    %49 = vector.extract_strided_slice %2 {offsets = [0, 1], sizes = [4, 1], strides = [1, 1]} : vector<4x49xf32> to vector<4x1xf32>
    %50 = vector.broadcast %49 : vector<4x1xf32> to vector<4x256xf32>
    %51 = arith.mulf %50, %48 : vector<4x256xf32>
    %52 = arith.addf %33, %51 : vector<4x256xf32>
    %c-1_i32 = arith.constant -1 : i32
    %53 = vector.broadcast %c-1_i32 : i32 to vector<1x256xi32>
    %54 = arith.addi %1, %53 : vector<1x256xi32>
    %c0_i32_18 = arith.constant 0 : i32
    %55 = vector.broadcast %c0_i32_18 : i32 to vector<1x256xi32>
    %56 = arith.cmpi sge, %54, %55 : vector<1x256xi32>
    %c-1_i32_19 = arith.constant -1 : i32
    %57 = vector.broadcast %c-1_i32_19 : i32 to vector<1x256xi32>
    %58 = arith.addi %1, %57 : vector<1x256xi32>
    %c16_i32_20 = arith.constant 16 : i32
    %59 = vector.broadcast %c16_i32_20 : i32 to vector<1x256xi32>
    %60 = arith.cmpi slt, %58, %59 : vector<1x256xi32>
    %61 = arith.andi %56, %60 : vector<1x256xi1>
    %62 = arith.andi %14, %61 : vector<1x256xi1>
    %c49_i32 = arith.constant 49 : i32
    %63 = tpu.dynamic_rotate %4 by %c49_i32 dim 1 : vector<4x256xf32>, i32 -> vector<4x256xf32>
    %cst_21 = arith.constant 0.000000e+00 : f32
    %64 = vector.shape_cast %62 : vector<1x256xi1> to vector<1x256xi1>
    %65 = vector.broadcast %64 : vector<1x256xi1> to vector<4x256xi1>
    %66 = vector.broadcast %cst_21 : f32 to vector<4x256xf32>
    %67 = arith.select %65, %63, %66 : vector<4x256xi1>, vector<4x256xf32>
    %68 = vector.extract_strided_slice %2 {offsets = [0, 2], sizes = [4, 1], strides = [1, 1]} : vector<4x49xf32> to vector<4x1xf32>
    %69 = vector.broadcast %68 : vector<4x1xf32> to vector<4x256xf32>
    %70 = arith.mulf %69, %67 : vector<4x256xf32>
    %71 = arith.addf %52, %70 : vector<4x256xf32>
    %c0_i32_22 = arith.constant 0 : i32
    %72 = vector.broadcast %c0_i32_22 : i32 to vector<1x256xi32>
    %73 = arith.addi %1, %72 : vector<1x256xi32>
    %c0_i32_23 = arith.constant 0 : i32
    %74 = vector.broadcast %c0_i32_23 : i32 to vector<1x256xi32>
    %75 = arith.cmpi sge, %73, %74 : vector<1x256xi32>
    %c0_i32_24 = arith.constant 0 : i32
    %76 = vector.broadcast %c0_i32_24 : i32 to vector<1x256xi32>
    %77 = arith.addi %1, %76 : vector<1x256xi32>
    %c16_i32_25 = arith.constant 16 : i32
    %78 = vector.broadcast %c16_i32_25 : i32 to vector<1x256xi32>
    %79 = arith.cmpi slt, %77, %78 : vector<1x256xi32>
    %80 = arith.andi %75, %79 : vector<1x256xi1>
    %81 = arith.andi %14, %80 : vector<1x256xi1>
    %c48_i32 = arith.constant 48 : i32
    %82 = tpu.dynamic_rotate %4 by %c48_i32 dim 1 : vector<4x256xf32>, i32 -> vector<4x256xf32>
    %cst_26 = arith.constant 0.000000e+00 : f32
    %83 = vector.shape_cast %81 : vector<1x256xi1> to vector<1x256xi1>
    %84 = vector.broadcast %83 : vector<1x256xi1> to vector<4x256xi1>
    %85 = vector.broadcast %cst_26 : f32 to vector<4x256xf32>
    %86 = arith.select %84, %82, %85 : vector<4x256xi1>, vector<4x256xf32>
    %87 = vector.extract_strided_slice %2 {offsets = [0, 3], sizes = [4, 1], strides = [1, 1]} : vector<4x49xf32> to vector<4x1xf32>
    %88 = vector.broadcast %87 : vector<4x1xf32> to vector<4x256xf32>
    %89 = arith.mulf %88, %86 : vector<4x256xf32>
    %90 = arith.addf %71, %89 : vector<4x256xf32>
    %c1_i32 = arith.constant 1 : i32
    %91 = vector.broadcast %c1_i32 : i32 to vector<1x256xi32>
    %92 = arith.addi %1, %91 : vector<1x256xi32>
    %c0_i32_27 = arith.constant 0 : i32
    %93 = vector.broadcast %c0_i32_27 : i32 to vector<1x256xi32>
    %94 = arith.cmpi sge, %92, %93 : vector<1x256xi32>
    %c1_i32_28 = arith.constant 1 : i32
    %95 = vector.broadcast %c1_i32_28 : i32 to vector<1x256xi32>
    %96 = arith.addi %1, %95 : vector<1x256xi32>
    %c16_i32_29 = arith.constant 16 : i32
    %97 = vector.broadcast %c16_i32_29 : i32 to vector<1x256xi32>
    %98 = arith.cmpi slt, %96, %97 : vector<1x256xi32>
    %99 = arith.andi %94, %98 : vector<1x256xi1>
    %100 = arith.andi %14, %99 : vector<1x256xi1>
    %c47_i32 = arith.constant 47 : i32
    %101 = tpu.dynamic_rotate %4 by %c47_i32 dim 1 : vector<4x256xf32>, i32 -> vector<4x256xf32>
    %cst_30 = arith.constant 0.000000e+00 : f32
    %102 = vector.shape_cast %100 : vector<1x256xi1> to vector<1x256xi1>
    %103 = vector.broadcast %102 : vector<1x256xi1> to vector<4x256xi1>
    %104 = vector.broadcast %cst_30 : f32 to vector<4x256xf32>
    %105 = arith.select %103, %101, %104 : vector<4x256xi1>, vector<4x256xf32>
    %106 = vector.extract_strided_slice %2 {offsets = [0, 4], sizes = [4, 1], strides = [1, 1]} : vector<4x49xf32> to vector<4x1xf32>
    %107 = vector.broadcast %106 : vector<4x1xf32> to vector<4x256xf32>
    %108 = arith.mulf %107, %105 : vector<4x256xf32>
    %109 = arith.addf %90, %108 : vector<4x256xf32>
    %c2_i32 = arith.constant 2 : i32
    %110 = vector.broadcast %c2_i32 : i32 to vector<1x256xi32>
    %111 = arith.addi %1, %110 : vector<1x256xi32>
    %c0_i32_31 = arith.constant 0 : i32
    %112 = vector.broadcast %c0_i32_31 : i32 to vector<1x256xi32>
    %113 = arith.cmpi sge, %111, %112 : vector<1x256xi32>
    %c2_i32_32 = arith.constant 2 : i32
    %114 = vector.broadcast %c2_i32_32 : i32 to vector<1x256xi32>
    %115 = arith.addi %1, %114 : vector<1x256xi32>
    %c16_i32_33 = arith.constant 16 : i32
    %116 = vector.broadcast %c16_i32_33 : i32 to vector<1x256xi32>
    %117 = arith.cmpi slt, %115, %116 : vector<1x256xi32>
    %118 = arith.andi %113, %117 : vector<1x256xi1>
    %119 = arith.andi %14, %118 : vector<1x256xi1>
    %c46_i32 = arith.constant 46 : i32
    %120 = tpu.dynamic_rotate %4 by %c46_i32 dim 1 : vector<4x256xf32>, i32 -> vector<4x256xf32>
    %cst_34 = arith.constant 0.000000e+00 : f32
    %121 = vector.shape_cast %119 : vector<1x256xi1> to vector<1x256xi1>
    %122 = vector.broadcast %121 : vector<1x256xi1> to vector<4x256xi1>
    %123 = vector.broadcast %cst_34 : f32 to vector<4x256xf32>
    %124 = arith.select %122, %120, %123 : vector<4x256xi1>, vector<4x256xf32>
    %125 = vector.extract_strided_slice %2 {offsets = [0, 5], sizes = [4, 1], strides = [1, 1]} : vector<4x49xf32> to vector<4x1xf32>
    %126 = vector.broadcast %125 : vector<4x1xf32> to vector<4x256xf32>
    %127 = arith.mulf %126, %124 : vector<4x256xf32>
    %128 = arith.addf %109, %127 : vector<4x256xf32>
    %c3_i32 = arith.constant 3 : i32
    %129 = vector.broadcast %c3_i32 : i32 to vector<1x256xi32>
    %130 = arith.addi %1, %129 : vector<1x256xi32>
    %c0_i32_35 = arith.constant 0 : i32
    %131 = vector.broadcast %c0_i32_35 : i32 to vector<1x256xi32>
    %132 = arith.cmpi sge, %130, %131 : vector<1x256xi32>
    %c3_i32_36 = arith.constant 3 : i32
    %133 = vector.broadcast %c3_i32_36 : i32 to vector<1x256xi32>
    %134 = arith.addi %1, %133 : vector<1x256xi32>
    %c16_i32_37 = arith.constant 16 : i32
    %135 = vector.broadcast %c16_i32_37 : i32 to vector<1x256xi32>
    %136 = arith.cmpi slt, %134, %135 : vector<1x256xi32>
    %137 = arith.andi %132, %136 : vector<1x256xi1>
    %138 = arith.andi %14, %137 : vector<1x256xi1>
    %c45_i32 = arith.constant 45 : i32
    %139 = tpu.dynamic_rotate %4 by %c45_i32 dim 1 : vector<4x256xf32>, i32 -> vector<4x256xf32>
    %cst_38 = arith.constant 0.000000e+00 : f32
    %140 = vector.shape_cast %138 : vector<1x256xi1> to vector<1x256xi1>
    %141 = vector.broadcast %140 : vector<1x256xi1> to vector<4x256xi1>
    %142 = vector.broadcast %cst_38 : f32 to vector<4x256xf32>
    %143 = arith.select %141, %139, %142 : vector<4x256xi1>, vector<4x256xf32>
    %144 = vector.extract_strided_slice %2 {offsets = [0, 6], sizes = [4, 1], strides = [1, 1]} : vector<4x49xf32> to vector<4x1xf32>
    %145 = vector.broadcast %144 : vector<4x1xf32> to vector<4x256xf32>
    %146 = arith.mulf %145, %143 : vector<4x256xf32>
    %147 = arith.addf %128, %146 : vector<4x256xf32>
    %c-2_i32_39 = arith.constant -2 : i32
    %148 = vector.broadcast %c-2_i32_39 : i32 to vector<1x256xi32>
    %149 = arith.addi %0, %148 : vector<1x256xi32>
    %c0_i32_40 = arith.constant 0 : i32
    %150 = vector.broadcast %c0_i32_40 : i32 to vector<1x256xi32>
    %151 = arith.cmpi sge, %149, %150 : vector<1x256xi32>
    %c-2_i32_41 = arith.constant -2 : i32
    %152 = vector.broadcast %c-2_i32_41 : i32 to vector<1x256xi32>
    %153 = arith.addi %0, %152 : vector<1x256xi32>
    %c16_i32_42 = arith.constant 16 : i32
    %154 = vector.broadcast %c16_i32_42 : i32 to vector<1x256xi32>
    %155 = arith.cmpi slt, %153, %154 : vector<1x256xi32>
    %156 = arith.andi %151, %155 : vector<1x256xi1>
    %c-3_i32_43 = arith.constant -3 : i32
    %157 = vector.broadcast %c-3_i32_43 : i32 to vector<1x256xi32>
    %158 = arith.addi %1, %157 : vector<1x256xi32>
    %c0_i32_44 = arith.constant 0 : i32
    %159 = vector.broadcast %c0_i32_44 : i32 to vector<1x256xi32>
    %160 = arith.cmpi sge, %158, %159 : vector<1x256xi32>
    %c-3_i32_45 = arith.constant -3 : i32
    %161 = vector.broadcast %c-3_i32_45 : i32 to vector<1x256xi32>
    %162 = arith.addi %1, %161 : vector<1x256xi32>
    %c16_i32_46 = arith.constant 16 : i32
    %163 = vector.broadcast %c16_i32_46 : i32 to vector<1x256xi32>
    %164 = arith.cmpi slt, %162, %163 : vector<1x256xi32>
    %165 = arith.andi %160, %164 : vector<1x256xi1>
    %166 = arith.andi %156, %165 : vector<1x256xi1>
    %c35_i32 = arith.constant 35 : i32
    %167 = tpu.dynamic_rotate %4 by %c35_i32 dim 1 : vector<4x256xf32>, i32 -> vector<4x256xf32>
    %cst_47 = arith.constant 0.000000e+00 : f32
    %168 = vector.shape_cast %166 : vector<1x256xi1> to vector<1x256xi1>
    %169 = vector.broadcast %168 : vector<1x256xi1> to vector<4x256xi1>
    %170 = vector.broadcast %cst_47 : f32 to vector<4x256xf32>
    %171 = arith.select %169, %167, %170 : vector<4x256xi1>, vector<4x256xf32>
    %172 = vector.extract_strided_slice %2 {offsets = [0, 7], sizes = [4, 1], strides = [1, 1]} : vector<4x49xf32> to vector<4x1xf32>
    %173 = vector.broadcast %172 : vector<4x1xf32> to vector<4x256xf32>
    %174 = arith.mulf %173, %171 : vector<4x256xf32>
    %175 = arith.addf %147, %174 : vector<4x256xf32>
    %c-2_i32_48 = arith.constant -2 : i32
    %176 = vector.broadcast %c-2_i32_48 : i32 to vector<1x256xi32>
    %177 = arith.addi %1, %176 : vector<1x256xi32>
    %c0_i32_49 = arith.constant 0 : i32
    %178 = vector.broadcast %c0_i32_49 : i32 to vector<1x256xi32>
    %179 = arith.cmpi sge, %177, %178 : vector<1x256xi32>
    %c-2_i32_50 = arith.constant -2 : i32
    %180 = vector.broadcast %c-2_i32_50 : i32 to vector<1x256xi32>
    %181 = arith.addi %1, %180 : vector<1x256xi32>
    %c16_i32_51 = arith.constant 16 : i32
    %182 = vector.broadcast %c16_i32_51 : i32 to vector<1x256xi32>
    %183 = arith.cmpi slt, %181, %182 : vector<1x256xi32>
    %184 = arith.andi %179, %183 : vector<1x256xi1>
    %185 = arith.andi %156, %184 : vector<1x256xi1>
    %c34_i32 = arith.constant 34 : i32
    %186 = tpu.dynamic_rotate %4 by %c34_i32 dim 1 : vector<4x256xf32>, i32 -> vector<4x256xf32>
    %cst_52 = arith.constant 0.000000e+00 : f32
    %187 = vector.shape_cast %185 : vector<1x256xi1> to vector<1x256xi1>
    %188 = vector.broadcast %187 : vector<1x256xi1> to vector<4x256xi1>
    %189 = vector.broadcast %cst_52 : f32 to vector<4x256xf32>
    %190 = arith.select %188, %186, %189 : vector<4x256xi1>, vector<4x256xf32>
    %191 = vector.extract_strided_slice %2 {offsets = [0, 8], sizes = [4, 1], strides = [1, 1]} : vector<4x49xf32> to vector<4x1xf32>
    %192 = vector.broadcast %191 : vector<4x1xf32> to vector<4x256xf32>
    %193 = arith.mulf %192, %190 : vector<4x256xf32>
    %194 = arith.addf %175, %193 : vector<4x256xf32>
    %c-1_i32_53 = arith.constant -1 : i32
    %195 = vector.broadcast %c-1_i32_53 : i32 to vector<1x256xi32>
    %196 = arith.addi %1, %195 : vector<1x256xi32>
    %c0_i32_54 = arith.constant 0 : i32
    %197 = vector.broadcast %c0_i32_54 : i32 to vector<1x256xi32>
    %198 = arith.cmpi sge, %196, %197 : vector<1x256xi32>
    %c-1_i32_55 = arith.constant -1 : i32
    %199 = vector.broadcast %c-1_i32_55 : i32 to vector<1x256xi32>
    %200 = arith.addi %1, %199 : vector<1x256xi32>
    %c16_i32_56 = arith.constant 16 : i32
    %201 = vector.broadcast %c16_i32_56 : i32 to vector<1x256xi32>
    %202 = arith.cmpi slt, %200, %201 : vector<1x256xi32>
    %203 = arith.andi %198, %202 : vector<1x256xi1>
    %204 = arith.andi %156, %203 : vector<1x256xi1>
    %c33_i32 = arith.constant 33 : i32
    %205 = tpu.dynamic_rotate %4 by %c33_i32 dim 1 : vector<4x256xf32>, i32 -> vector<4x256xf32>
    %cst_57 = arith.constant 0.000000e+00 : f32
    %206 = vector.shape_cast %204 : vector<1x256xi1> to vector<1x256xi1>
    %207 = vector.broadcast %206 : vector<1x256xi1> to vector<4x256xi1>
    %208 = vector.broadcast %cst_57 : f32 to vector<4x256xf32>
    %209 = arith.select %207, %205, %208 : vector<4x256xi1>, vector<4x256xf32>
    %210 = vector.extract_strided_slice %2 {offsets = [0, 9], sizes = [4, 1], strides = [1, 1]} : vector<4x49xf32> to vector<4x1xf32>
    %211 = vector.broadcast %210 : vector<4x1xf32> to vector<4x256xf32>
    %212 = arith.mulf %211, %209 : vector<4x256xf32>
    %213 = arith.addf %194, %212 : vector<4x256xf32>
    %c0_i32_58 = arith.constant 0 : i32
    %214 = vector.broadcast %c0_i32_58 : i32 to vector<1x256xi32>
    %215 = arith.addi %1, %214 : vector<1x256xi32>
    %c0_i32_59 = arith.constant 0 : i32
    %216 = vector.broadcast %c0_i32_59 : i32 to vector<1x256xi32>
    %217 = arith.cmpi sge, %215, %216 : vector<1x256xi32>
    %c0_i32_60 = arith.constant 0 : i32
    %218 = vector.broadcast %c0_i32_60 : i32 to vector<1x256xi32>
    %219 = arith.addi %1, %218 : vector<1x256xi32>
    %c16_i32_61 = arith.constant 16 : i32
    %220 = vector.broadcast %c16_i32_61 : i32 to vector<1x256xi32>
    %221 = arith.cmpi slt, %219, %220 : vector<1x256xi32>
    %222 = arith.andi %217, %221 : vector<1x256xi1>
    %223 = arith.andi %156, %222 : vector<1x256xi1>
    %c32_i32 = arith.constant 32 : i32
    %224 = tpu.dynamic_rotate %4 by %c32_i32 dim 1 : vector<4x256xf32>, i32 -> vector<4x256xf32>
    %cst_62 = arith.constant 0.000000e+00 : f32
    %225 = vector.shape_cast %223 : vector<1x256xi1> to vector<1x256xi1>
    %226 = vector.broadcast %225 : vector<1x256xi1> to vector<4x256xi1>
    %227 = vector.broadcast %cst_62 : f32 to vector<4x256xf32>
    %228 = arith.select %226, %224, %227 : vector<4x256xi1>, vector<4x256xf32>
    %229 = vector.extract_strided_slice %2 {offsets = [0, 10], sizes = [4, 1], strides = [1, 1]} : vector<4x49xf32> to vector<4x1xf32>
    %230 = vector.broadcast %229 : vector<4x1xf32> to vector<4x256xf32>
    %231 = arith.mulf %230, %228 : vector<4x256xf32>
    %232 = arith.addf %213, %231 : vector<4x256xf32>
    %c1_i32_63 = arith.constant 1 : i32
    %233 = vector.broadcast %c1_i32_63 : i32 to vector<1x256xi32>
    %234 = arith.addi %1, %233 : vector<1x256xi32>
    %c0_i32_64 = arith.constant 0 : i32
    %235 = vector.broadcast %c0_i32_64 : i32 to vector<1x256xi32>
    %236 = arith.cmpi sge, %234, %235 : vector<1x256xi32>
    %c1_i32_65 = arith.constant 1 : i32
    %237 = vector.broadcast %c1_i32_65 : i32 to vector<1x256xi32>
    %238 = arith.addi %1, %237 : vector<1x256xi32>
    %c16_i32_66 = arith.constant 16 : i32
    %239 = vector.broadcast %c16_i32_66 : i32 to vector<1x256xi32>
    %240 = arith.cmpi slt, %238, %239 : vector<1x256xi32>
    %241 = arith.andi %236, %240 : vector<1x256xi1>
    %242 = arith.andi %156, %241 : vector<1x256xi1>
    %c31_i32 = arith.constant 31 : i32
    %243 = tpu.dynamic_rotate %4 by %c31_i32 dim 1 : vector<4x256xf32>, i32 -> vector<4x256xf32>
    %cst_67 = arith.constant 0.000000e+00 : f32
    %244 = vector.shape_cast %242 : vector<1x256xi1> to vector<1x256xi1>
    %245 = vector.broadcast %244 : vector<1x256xi1> to vector<4x256xi1>
    %246 = vector.broadcast %cst_67 : f32 to vector<4x256xf32>
    %247 = arith.select %245, %243, %246 : vector<4x256xi1>, vector<4x256xf32>
    %248 = vector.extract_strided_slice %2 {offsets = [0, 11], sizes = [4, 1], strides = [1, 1]} : vector<4x49xf32> to vector<4x1xf32>
    %249 = vector.broadcast %248 : vector<4x1xf32> to vector<4x256xf32>
    %250 = arith.mulf %249, %247 : vector<4x256xf32>
    %251 = arith.addf %232, %250 : vector<4x256xf32>
    %c2_i32_68 = arith.constant 2 : i32
    %252 = vector.broadcast %c2_i32_68 : i32 to vector<1x256xi32>
    %253 = arith.addi %1, %252 : vector<1x256xi32>
    %c0_i32_69 = arith.constant 0 : i32
    %254 = vector.broadcast %c0_i32_69 : i32 to vector<1x256xi32>
    %255 = arith.cmpi sge, %253, %254 : vector<1x256xi32>
    %c2_i32_70 = arith.constant 2 : i32
    %256 = vector.broadcast %c2_i32_70 : i32 to vector<1x256xi32>
    %257 = arith.addi %1, %256 : vector<1x256xi32>
    %c16_i32_71 = arith.constant 16 : i32
    %258 = vector.broadcast %c16_i32_71 : i32 to vector<1x256xi32>
    %259 = arith.cmpi slt, %257, %258 : vector<1x256xi32>
    %260 = arith.andi %255, %259 : vector<1x256xi1>
    %261 = arith.andi %156, %260 : vector<1x256xi1>
    %c30_i32 = arith.constant 30 : i32
    %262 = tpu.dynamic_rotate %4 by %c30_i32 dim 1 : vector<4x256xf32>, i32 -> vector<4x256xf32>
    %cst_72 = arith.constant 0.000000e+00 : f32
    %263 = vector.shape_cast %261 : vector<1x256xi1> to vector<1x256xi1>
    %264 = vector.broadcast %263 : vector<1x256xi1> to vector<4x256xi1>
    %265 = vector.broadcast %cst_72 : f32 to vector<4x256xf32>
    %266 = arith.select %264, %262, %265 : vector<4x256xi1>, vector<4x256xf32>
    %267 = vector.extract_strided_slice %2 {offsets = [0, 12], sizes = [4, 1], strides = [1, 1]} : vector<4x49xf32> to vector<4x1xf32>
    %268 = vector.broadcast %267 : vector<4x1xf32> to vector<4x256xf32>
    %269 = arith.mulf %268, %266 : vector<4x256xf32>
    %270 = arith.addf %251, %269 : vector<4x256xf32>
    %c3_i32_73 = arith.constant 3 : i32
    %271 = vector.broadcast %c3_i32_73 : i32 to vector<1x256xi32>
    %272 = arith.addi %1, %271 : vector<1x256xi32>
    %c0_i32_74 = arith.constant 0 : i32
    %273 = vector.broadcast %c0_i32_74 : i32 to vector<1x256xi32>
    %274 = arith.cmpi sge, %272, %273 : vector<1x256xi32>
    %c3_i32_75 = arith.constant 3 : i32
    %275 = vector.broadcast %c3_i32_75 : i32 to vector<1x256xi32>
    %276 = arith.addi %1, %275 : vector<1x256xi32>
    %c16_i32_76 = arith.constant 16 : i32
    %277 = vector.broadcast %c16_i32_76 : i32 to vector<1x256xi32>
    %278 = arith.cmpi slt, %276, %277 : vector<1x256xi32>
    %279 = arith.andi %274, %278 : vector<1x256xi1>
    %280 = arith.andi %156, %279 : vector<1x256xi1>
    %c29_i32 = arith.constant 29 : i32
    %281 = tpu.dynamic_rotate %4 by %c29_i32 dim 1 : vector<4x256xf32>, i32 -> vector<4x256xf32>
    %cst_77 = arith.constant 0.000000e+00 : f32
    %282 = vector.shape_cast %280 : vector<1x256xi1> to vector<1x256xi1>
    %283 = vector.broadcast %282 : vector<1x256xi1> to vector<4x256xi1>
    %284 = vector.broadcast %cst_77 : f32 to vector<4x256xf32>
    %285 = arith.select %283, %281, %284 : vector<4x256xi1>, vector<4x256xf32>
    %286 = vector.extract_strided_slice %2 {offsets = [0, 13], sizes = [4, 1], strides = [1, 1]} : vector<4x49xf32> to vector<4x1xf32>
    %287 = vector.broadcast %286 : vector<4x1xf32> to vector<4x256xf32>
    %288 = arith.mulf %287, %285 : vector<4x256xf32>
    %289 = arith.addf %270, %288 : vector<4x256xf32>
    %c-1_i32_78 = arith.constant -1 : i32
    %290 = vector.broadcast %c-1_i32_78 : i32 to vector<1x256xi32>
    %291 = arith.addi %0, %290 : vector<1x256xi32>
    %c0_i32_79 = arith.constant 0 : i32
    %292 = vector.broadcast %c0_i32_79 : i32 to vector<1x256xi32>
    %293 = arith.cmpi sge, %291, %292 : vector<1x256xi32>
    %c-1_i32_80 = arith.constant -1 : i32
    %294 = vector.broadcast %c-1_i32_80 : i32 to vector<1x256xi32>
    %295 = arith.addi %0, %294 : vector<1x256xi32>
    %c16_i32_81 = arith.constant 16 : i32
    %296 = vector.broadcast %c16_i32_81 : i32 to vector<1x256xi32>
    %297 = arith.cmpi slt, %295, %296 : vector<1x256xi32>
    %298 = arith.andi %293, %297 : vector<1x256xi1>
    %c-3_i32_82 = arith.constant -3 : i32
    %299 = vector.broadcast %c-3_i32_82 : i32 to vector<1x256xi32>
    %300 = arith.addi %1, %299 : vector<1x256xi32>
    %c0_i32_83 = arith.constant 0 : i32
    %301 = vector.broadcast %c0_i32_83 : i32 to vector<1x256xi32>
    %302 = arith.cmpi sge, %300, %301 : vector<1x256xi32>
    %c-3_i32_84 = arith.constant -3 : i32
    %303 = vector.broadcast %c-3_i32_84 : i32 to vector<1x256xi32>
    %304 = arith.addi %1, %303 : vector<1x256xi32>
    %c16_i32_85 = arith.constant 16 : i32
    %305 = vector.broadcast %c16_i32_85 : i32 to vector<1x256xi32>
    %306 = arith.cmpi slt, %304, %305 : vector<1x256xi32>
    %307 = arith.andi %302, %306 : vector<1x256xi1>
    %308 = arith.andi %298, %307 : vector<1x256xi1>
    %c19_i32 = arith.constant 19 : i32
    %309 = tpu.dynamic_rotate %4 by %c19_i32 dim 1 : vector<4x256xf32>, i32 -> vector<4x256xf32>
    %cst_86 = arith.constant 0.000000e+00 : f32
    %310 = vector.shape_cast %308 : vector<1x256xi1> to vector<1x256xi1>
    %311 = vector.broadcast %310 : vector<1x256xi1> to vector<4x256xi1>
    %312 = vector.broadcast %cst_86 : f32 to vector<4x256xf32>
    %313 = arith.select %311, %309, %312 : vector<4x256xi1>, vector<4x256xf32>
    %314 = vector.extract_strided_slice %2 {offsets = [0, 14], sizes = [4, 1], strides = [1, 1]} : vector<4x49xf32> to vector<4x1xf32>
    %315 = vector.broadcast %314 : vector<4x1xf32> to vector<4x256xf32>
    %316 = arith.mulf %315, %313 : vector<4x256xf32>
    %317 = arith.addf %289, %316 : vector<4x256xf32>
    %c-2_i32_87 = arith.constant -2 : i32
    %318 = vector.broadcast %c-2_i32_87 : i32 to vector<1x256xi32>
    %319 = arith.addi %1, %318 : vector<1x256xi32>
    %c0_i32_88 = arith.constant 0 : i32
    %320 = vector.broadcast %c0_i32_88 : i32 to vector<1x256xi32>
    %321 = arith.cmpi sge, %319, %320 : vector<1x256xi32>
    %c-2_i32_89 = arith.constant -2 : i32
    %322 = vector.broadcast %c-2_i32_89 : i32 to vector<1x256xi32>
    %323 = arith.addi %1, %322 : vector<1x256xi32>
    %c16_i32_90 = arith.constant 16 : i32
    %324 = vector.broadcast %c16_i32_90 : i32 to vector<1x256xi32>
    %325 = arith.cmpi slt, %323, %324 : vector<1x256xi32>
    %326 = arith.andi %321, %325 : vector<1x256xi1>
    %327 = arith.andi %298, %326 : vector<1x256xi1>
    %c18_i32 = arith.constant 18 : i32
    %328 = tpu.dynamic_rotate %4 by %c18_i32 dim 1 : vector<4x256xf32>, i32 -> vector<4x256xf32>
    %cst_91 = arith.constant 0.000000e+00 : f32
    %329 = vector.shape_cast %327 : vector<1x256xi1> to vector<1x256xi1>
    %330 = vector.broadcast %329 : vector<1x256xi1> to vector<4x256xi1>
    %331 = vector.broadcast %cst_91 : f32 to vector<4x256xf32>
    %332 = arith.select %330, %328, %331 : vector<4x256xi1>, vector<4x256xf32>
    %333 = vector.extract_strided_slice %2 {offsets = [0, 15], sizes = [4, 1], strides = [1, 1]} : vector<4x49xf32> to vector<4x1xf32>
    %334 = vector.broadcast %333 : vector<4x1xf32> to vector<4x256xf32>
    %335 = arith.mulf %334, %332 : vector<4x256xf32>
    %336 = arith.addf %317, %335 : vector<4x256xf32>
    %c-1_i32_92 = arith.constant -1 : i32
    %337 = vector.broadcast %c-1_i32_92 : i32 to vector<1x256xi32>
    %338 = arith.addi %1, %337 : vector<1x256xi32>
    %c0_i32_93 = arith.constant 0 : i32
    %339 = vector.broadcast %c0_i32_93 : i32 to vector<1x256xi32>
    %340 = arith.cmpi sge, %338, %339 : vector<1x256xi32>
    %c-1_i32_94 = arith.constant -1 : i32
    %341 = vector.broadcast %c-1_i32_94 : i32 to vector<1x256xi32>
    %342 = arith.addi %1, %341 : vector<1x256xi32>
    %c16_i32_95 = arith.constant 16 : i32
    %343 = vector.broadcast %c16_i32_95 : i32 to vector<1x256xi32>
    %344 = arith.cmpi slt, %342, %343 : vector<1x256xi32>
    %345 = arith.andi %340, %344 : vector<1x256xi1>
    %346 = arith.andi %298, %345 : vector<1x256xi1>
    %c17_i32 = arith.constant 17 : i32
    %347 = tpu.dynamic_rotate %4 by %c17_i32 dim 1 : vector<4x256xf32>, i32 -> vector<4x256xf32>
    %cst_96 = arith.constant 0.000000e+00 : f32
    %348 = vector.shape_cast %346 : vector<1x256xi1> to vector<1x256xi1>
    %349 = vector.broadcast %348 : vector<1x256xi1> to vector<4x256xi1>
    %350 = vector.broadcast %cst_96 : f32 to vector<4x256xf32>
    %351 = arith.select %349, %347, %350 : vector<4x256xi1>, vector<4x256xf32>
    %352 = vector.extract_strided_slice %2 {offsets = [0, 16], sizes = [4, 1], strides = [1, 1]} : vector<4x49xf32> to vector<4x1xf32>
    %353 = vector.broadcast %352 : vector<4x1xf32> to vector<4x256xf32>
    %354 = arith.mulf %353, %351 : vector<4x256xf32>
    %355 = arith.addf %336, %354 : vector<4x256xf32>
    %c0_i32_97 = arith.constant 0 : i32
    %356 = vector.broadcast %c0_i32_97 : i32 to vector<1x256xi32>
    %357 = arith.addi %1, %356 : vector<1x256xi32>
    %c0_i32_98 = arith.constant 0 : i32
    %358 = vector.broadcast %c0_i32_98 : i32 to vector<1x256xi32>
    %359 = arith.cmpi sge, %357, %358 : vector<1x256xi32>
    %c0_i32_99 = arith.constant 0 : i32
    %360 = vector.broadcast %c0_i32_99 : i32 to vector<1x256xi32>
    %361 = arith.addi %1, %360 : vector<1x256xi32>
    %c16_i32_100 = arith.constant 16 : i32
    %362 = vector.broadcast %c16_i32_100 : i32 to vector<1x256xi32>
    %363 = arith.cmpi slt, %361, %362 : vector<1x256xi32>
    %364 = arith.andi %359, %363 : vector<1x256xi1>
    %365 = arith.andi %298, %364 : vector<1x256xi1>
    %c16_i32_101 = arith.constant 16 : i32
    %366 = tpu.dynamic_rotate %4 by %c16_i32_101 dim 1 : vector<4x256xf32>, i32 -> vector<4x256xf32>
    %cst_102 = arith.constant 0.000000e+00 : f32
    %367 = vector.shape_cast %365 : vector<1x256xi1> to vector<1x256xi1>
    %368 = vector.broadcast %367 : vector<1x256xi1> to vector<4x256xi1>
    %369 = vector.broadcast %cst_102 : f32 to vector<4x256xf32>
    %370 = arith.select %368, %366, %369 : vector<4x256xi1>, vector<4x256xf32>
    %371 = vector.extract_strided_slice %2 {offsets = [0, 17], sizes = [4, 1], strides = [1, 1]} : vector<4x49xf32> to vector<4x1xf32>
    %372 = vector.broadcast %371 : vector<4x1xf32> to vector<4x256xf32>
    %373 = arith.mulf %372, %370 : vector<4x256xf32>
    %374 = arith.addf %355, %373 : vector<4x256xf32>
    %c1_i32_103 = arith.constant 1 : i32
    %375 = vector.broadcast %c1_i32_103 : i32 to vector<1x256xi32>
    %376 = arith.addi %1, %375 : vector<1x256xi32>
    %c0_i32_104 = arith.constant 0 : i32
    %377 = vector.broadcast %c0_i32_104 : i32 to vector<1x256xi32>
    %378 = arith.cmpi sge, %376, %377 : vector<1x256xi32>
    %c1_i32_105 = arith.constant 1 : i32
    %379 = vector.broadcast %c1_i32_105 : i32 to vector<1x256xi32>
    %380 = arith.addi %1, %379 : vector<1x256xi32>
    %c16_i32_106 = arith.constant 16 : i32
    %381 = vector.broadcast %c16_i32_106 : i32 to vector<1x256xi32>
    %382 = arith.cmpi slt, %380, %381 : vector<1x256xi32>
    %383 = arith.andi %378, %382 : vector<1x256xi1>
    %384 = arith.andi %298, %383 : vector<1x256xi1>
    %c15_i32 = arith.constant 15 : i32
    %385 = tpu.dynamic_rotate %4 by %c15_i32 dim 1 : vector<4x256xf32>, i32 -> vector<4x256xf32>
    %cst_107 = arith.constant 0.000000e+00 : f32
    %386 = vector.shape_cast %384 : vector<1x256xi1> to vector<1x256xi1>
    %387 = vector.broadcast %386 : vector<1x256xi1> to vector<4x256xi1>
    %388 = vector.broadcast %cst_107 : f32 to vector<4x256xf32>
    %389 = arith.select %387, %385, %388 : vector<4x256xi1>, vector<4x256xf32>
    %390 = vector.extract_strided_slice %2 {offsets = [0, 18], sizes = [4, 1], strides = [1, 1]} : vector<4x49xf32> to vector<4x1xf32>
    %391 = vector.broadcast %390 : vector<4x1xf32> to vector<4x256xf32>
    %392 = arith.mulf %391, %389 : vector<4x256xf32>
    %393 = arith.addf %374, %392 : vector<4x256xf32>
    %c2_i32_108 = arith.constant 2 : i32
    %394 = vector.broadcast %c2_i32_108 : i32 to vector<1x256xi32>
    %395 = arith.addi %1, %394 : vector<1x256xi32>
    %c0_i32_109 = arith.constant 0 : i32
    %396 = vector.broadcast %c0_i32_109 : i32 to vector<1x256xi32>
    %397 = arith.cmpi sge, %395, %396 : vector<1x256xi32>
    %c2_i32_110 = arith.constant 2 : i32
    %398 = vector.broadcast %c2_i32_110 : i32 to vector<1x256xi32>
    %399 = arith.addi %1, %398 : vector<1x256xi32>
    %c16_i32_111 = arith.constant 16 : i32
    %400 = vector.broadcast %c16_i32_111 : i32 to vector<1x256xi32>
    %401 = arith.cmpi slt, %399, %400 : vector<1x256xi32>
    %402 = arith.andi %397, %401 : vector<1x256xi1>
    %403 = arith.andi %298, %402 : vector<1x256xi1>
    %c14_i32 = arith.constant 14 : i32
    %404 = tpu.dynamic_rotate %4 by %c14_i32 dim 1 : vector<4x256xf32>, i32 -> vector<4x256xf32>
    %cst_112 = arith.constant 0.000000e+00 : f32
    %405 = vector.shape_cast %403 : vector<1x256xi1> to vector<1x256xi1>
    %406 = vector.broadcast %405 : vector<1x256xi1> to vector<4x256xi1>
    %407 = vector.broadcast %cst_112 : f32 to vector<4x256xf32>
    %408 = arith.select %406, %404, %407 : vector<4x256xi1>, vector<4x256xf32>
    %409 = vector.extract_strided_slice %2 {offsets = [0, 19], sizes = [4, 1], strides = [1, 1]} : vector<4x49xf32> to vector<4x1xf32>
    %410 = vector.broadcast %409 : vector<4x1xf32> to vector<4x256xf32>
    %411 = arith.mulf %410, %408 : vector<4x256xf32>
    %412 = arith.addf %393, %411 : vector<4x256xf32>
    %c3_i32_113 = arith.constant 3 : i32
    %413 = vector.broadcast %c3_i32_113 : i32 to vector<1x256xi32>
    %414 = arith.addi %1, %413 : vector<1x256xi32>
    %c0_i32_114 = arith.constant 0 : i32
    %415 = vector.broadcast %c0_i32_114 : i32 to vector<1x256xi32>
    %416 = arith.cmpi sge, %414, %415 : vector<1x256xi32>
    %c3_i32_115 = arith.constant 3 : i32
    %417 = vector.broadcast %c3_i32_115 : i32 to vector<1x256xi32>
    %418 = arith.addi %1, %417 : vector<1x256xi32>
    %c16_i32_116 = arith.constant 16 : i32
    %419 = vector.broadcast %c16_i32_116 : i32 to vector<1x256xi32>
    %420 = arith.cmpi slt, %418, %419 : vector<1x256xi32>
    %421 = arith.andi %416, %420 : vector<1x256xi1>
    %422 = arith.andi %298, %421 : vector<1x256xi1>
    %c13_i32 = arith.constant 13 : i32
    %423 = tpu.dynamic_rotate %4 by %c13_i32 dim 1 : vector<4x256xf32>, i32 -> vector<4x256xf32>
    %cst_117 = arith.constant 0.000000e+00 : f32
    %424 = vector.shape_cast %422 : vector<1x256xi1> to vector<1x256xi1>
    %425 = vector.broadcast %424 : vector<1x256xi1> to vector<4x256xi1>
    %426 = vector.broadcast %cst_117 : f32 to vector<4x256xf32>
    %427 = arith.select %425, %423, %426 : vector<4x256xi1>, vector<4x256xf32>
    %428 = vector.extract_strided_slice %2 {offsets = [0, 20], sizes = [4, 1], strides = [1, 1]} : vector<4x49xf32> to vector<4x1xf32>
    %429 = vector.broadcast %428 : vector<4x1xf32> to vector<4x256xf32>
    %430 = arith.mulf %429, %427 : vector<4x256xf32>
    %431 = arith.addf %412, %430 : vector<4x256xf32>
    %c0_i32_118 = arith.constant 0 : i32
    %432 = vector.broadcast %c0_i32_118 : i32 to vector<1x256xi32>
    %433 = arith.addi %0, %432 : vector<1x256xi32>
    %c0_i32_119 = arith.constant 0 : i32
    %434 = vector.broadcast %c0_i32_119 : i32 to vector<1x256xi32>
    %435 = arith.cmpi sge, %433, %434 : vector<1x256xi32>
    %c0_i32_120 = arith.constant 0 : i32
    %436 = vector.broadcast %c0_i32_120 : i32 to vector<1x256xi32>
    %437 = arith.addi %0, %436 : vector<1x256xi32>
    %c16_i32_121 = arith.constant 16 : i32
    %438 = vector.broadcast %c16_i32_121 : i32 to vector<1x256xi32>
    %439 = arith.cmpi slt, %437, %438 : vector<1x256xi32>
    %440 = arith.andi %435, %439 : vector<1x256xi1>
    %c-3_i32_122 = arith.constant -3 : i32
    %441 = vector.broadcast %c-3_i32_122 : i32 to vector<1x256xi32>
    %442 = arith.addi %1, %441 : vector<1x256xi32>
    %c0_i32_123 = arith.constant 0 : i32
    %443 = vector.broadcast %c0_i32_123 : i32 to vector<1x256xi32>
    %444 = arith.cmpi sge, %442, %443 : vector<1x256xi32>
    %c-3_i32_124 = arith.constant -3 : i32
    %445 = vector.broadcast %c-3_i32_124 : i32 to vector<1x256xi32>
    %446 = arith.addi %1, %445 : vector<1x256xi32>
    %c16_i32_125 = arith.constant 16 : i32
    %447 = vector.broadcast %c16_i32_125 : i32 to vector<1x256xi32>
    %448 = arith.cmpi slt, %446, %447 : vector<1x256xi32>
    %449 = arith.andi %444, %448 : vector<1x256xi1>
    %450 = arith.andi %440, %449 : vector<1x256xi1>
    %c3_i32_126 = arith.constant 3 : i32
    %451 = tpu.dynamic_rotate %4 by %c3_i32_126 dim 1 : vector<4x256xf32>, i32 -> vector<4x256xf32>
    %cst_127 = arith.constant 0.000000e+00 : f32
    %452 = vector.shape_cast %450 : vector<1x256xi1> to vector<1x256xi1>
    %453 = vector.broadcast %452 : vector<1x256xi1> to vector<4x256xi1>
    %454 = vector.broadcast %cst_127 : f32 to vector<4x256xf32>
    %455 = arith.select %453, %451, %454 : vector<4x256xi1>, vector<4x256xf32>
    %456 = vector.extract_strided_slice %2 {offsets = [0, 21], sizes = [4, 1], strides = [1, 1]} : vector<4x49xf32> to vector<4x1xf32>
    %457 = vector.broadcast %456 : vector<4x1xf32> to vector<4x256xf32>
    %458 = arith.mulf %457, %455 : vector<4x256xf32>
    %459 = arith.addf %431, %458 : vector<4x256xf32>
    %c-2_i32_128 = arith.constant -2 : i32
    %460 = vector.broadcast %c-2_i32_128 : i32 to vector<1x256xi32>
    %461 = arith.addi %1, %460 : vector<1x256xi32>
    %c0_i32_129 = arith.constant 0 : i32
    %462 = vector.broadcast %c0_i32_129 : i32 to vector<1x256xi32>
    %463 = arith.cmpi sge, %461, %462 : vector<1x256xi32>
    %c-2_i32_130 = arith.constant -2 : i32
    %464 = vector.broadcast %c-2_i32_130 : i32 to vector<1x256xi32>
    %465 = arith.addi %1, %464 : vector<1x256xi32>
    %c16_i32_131 = arith.constant 16 : i32
    %466 = vector.broadcast %c16_i32_131 : i32 to vector<1x256xi32>
    %467 = arith.cmpi slt, %465, %466 : vector<1x256xi32>
    %468 = arith.andi %463, %467 : vector<1x256xi1>
    %469 = arith.andi %440, %468 : vector<1x256xi1>
    %c2_i32_132 = arith.constant 2 : i32
    %470 = tpu.dynamic_rotate %4 by %c2_i32_132 dim 1 : vector<4x256xf32>, i32 -> vector<4x256xf32>
    %cst_133 = arith.constant 0.000000e+00 : f32
    %471 = vector.shape_cast %469 : vector<1x256xi1> to vector<1x256xi1>
    %472 = vector.broadcast %471 : vector<1x256xi1> to vector<4x256xi1>
    %473 = vector.broadcast %cst_133 : f32 to vector<4x256xf32>
    %474 = arith.select %472, %470, %473 : vector<4x256xi1>, vector<4x256xf32>
    %475 = vector.extract_strided_slice %2 {offsets = [0, 22], sizes = [4, 1], strides = [1, 1]} : vector<4x49xf32> to vector<4x1xf32>
    %476 = vector.broadcast %475 : vector<4x1xf32> to vector<4x256xf32>
    %477 = arith.mulf %476, %474 : vector<4x256xf32>
    %478 = arith.addf %459, %477 : vector<4x256xf32>
    %c-1_i32_134 = arith.constant -1 : i32
    %479 = vector.broadcast %c-1_i32_134 : i32 to vector<1x256xi32>
    %480 = arith.addi %1, %479 : vector<1x256xi32>
    %c0_i32_135 = arith.constant 0 : i32
    %481 = vector.broadcast %c0_i32_135 : i32 to vector<1x256xi32>
    %482 = arith.cmpi sge, %480, %481 : vector<1x256xi32>
    %c-1_i32_136 = arith.constant -1 : i32
    %483 = vector.broadcast %c-1_i32_136 : i32 to vector<1x256xi32>
    %484 = arith.addi %1, %483 : vector<1x256xi32>
    %c16_i32_137 = arith.constant 16 : i32
    %485 = vector.broadcast %c16_i32_137 : i32 to vector<1x256xi32>
    %486 = arith.cmpi slt, %484, %485 : vector<1x256xi32>
    %487 = arith.andi %482, %486 : vector<1x256xi1>
    %488 = arith.andi %440, %487 : vector<1x256xi1>
    %c1_i32_138 = arith.constant 1 : i32
    %489 = tpu.dynamic_rotate %4 by %c1_i32_138 dim 1 : vector<4x256xf32>, i32 -> vector<4x256xf32>
    %cst_139 = arith.constant 0.000000e+00 : f32
    %490 = vector.shape_cast %488 : vector<1x256xi1> to vector<1x256xi1>
    %491 = vector.broadcast %490 : vector<1x256xi1> to vector<4x256xi1>
    %492 = vector.broadcast %cst_139 : f32 to vector<4x256xf32>
    %493 = arith.select %491, %489, %492 : vector<4x256xi1>, vector<4x256xf32>
    %494 = vector.extract_strided_slice %2 {offsets = [0, 23], sizes = [4, 1], strides = [1, 1]} : vector<4x49xf32> to vector<4x1xf32>
    %495 = vector.broadcast %494 : vector<4x1xf32> to vector<4x256xf32>
    %496 = arith.mulf %495, %493 : vector<4x256xf32>
    %497 = arith.addf %478, %496 : vector<4x256xf32>
    %c0_i32_140 = arith.constant 0 : i32
    %498 = vector.broadcast %c0_i32_140 : i32 to vector<1x256xi32>
    %499 = arith.addi %1, %498 : vector<1x256xi32>
    %c0_i32_141 = arith.constant 0 : i32
    %500 = vector.broadcast %c0_i32_141 : i32 to vector<1x256xi32>
    %501 = arith.cmpi sge, %499, %500 : vector<1x256xi32>
    %c0_i32_142 = arith.constant 0 : i32
    %502 = vector.broadcast %c0_i32_142 : i32 to vector<1x256xi32>
    %503 = arith.addi %1, %502 : vector<1x256xi32>
    %c16_i32_143 = arith.constant 16 : i32
    %504 = vector.broadcast %c16_i32_143 : i32 to vector<1x256xi32>
    %505 = arith.cmpi slt, %503, %504 : vector<1x256xi32>
    %506 = arith.andi %501, %505 : vector<1x256xi1>
    %507 = arith.andi %440, %506 : vector<1x256xi1>
    %cst_144 = arith.constant 0.000000e+00 : f32
    %508 = vector.shape_cast %507 : vector<1x256xi1> to vector<1x256xi1>
    %509 = vector.broadcast %508 : vector<1x256xi1> to vector<4x256xi1>
    %510 = vector.broadcast %cst_144 : f32 to vector<4x256xf32>
    %511 = arith.select %509, %4, %510 : vector<4x256xi1>, vector<4x256xf32>
    %512 = vector.extract_strided_slice %2 {offsets = [0, 24], sizes = [4, 1], strides = [1, 1]} : vector<4x49xf32> to vector<4x1xf32>
    %513 = vector.broadcast %512 : vector<4x1xf32> to vector<4x256xf32>
    %514 = arith.mulf %513, %511 : vector<4x256xf32>
    %515 = arith.addf %497, %514 : vector<4x256xf32>
    %c1_i32_145 = arith.constant 1 : i32
    %516 = vector.broadcast %c1_i32_145 : i32 to vector<1x256xi32>
    %517 = arith.addi %1, %516 : vector<1x256xi32>
    %c0_i32_146 = arith.constant 0 : i32
    %518 = vector.broadcast %c0_i32_146 : i32 to vector<1x256xi32>
    %519 = arith.cmpi sge, %517, %518 : vector<1x256xi32>
    %c1_i32_147 = arith.constant 1 : i32
    %520 = vector.broadcast %c1_i32_147 : i32 to vector<1x256xi32>
    %521 = arith.addi %1, %520 : vector<1x256xi32>
    %c16_i32_148 = arith.constant 16 : i32
    %522 = vector.broadcast %c16_i32_148 : i32 to vector<1x256xi32>
    %523 = arith.cmpi slt, %521, %522 : vector<1x256xi32>
    %524 = arith.andi %519, %523 : vector<1x256xi1>
    %525 = arith.andi %440, %524 : vector<1x256xi1>
    %c255_i32 = arith.constant 255 : i32
    %526 = tpu.dynamic_rotate %4 by %c255_i32 dim 1 : vector<4x256xf32>, i32 -> vector<4x256xf32>
    %cst_149 = arith.constant 0.000000e+00 : f32
    %527 = vector.shape_cast %525 : vector<1x256xi1> to vector<1x256xi1>
    %528 = vector.broadcast %527 : vector<1x256xi1> to vector<4x256xi1>
    %529 = vector.broadcast %cst_149 : f32 to vector<4x256xf32>
    %530 = arith.select %528, %526, %529 : vector<4x256xi1>, vector<4x256xf32>
    %531 = vector.extract_strided_slice %2 {offsets = [0, 25], sizes = [4, 1], strides = [1, 1]} : vector<4x49xf32> to vector<4x1xf32>
    %532 = vector.broadcast %531 : vector<4x1xf32> to vector<4x256xf32>
    %533 = arith.mulf %532, %530 : vector<4x256xf32>
    %534 = arith.addf %515, %533 : vector<4x256xf32>
    %c2_i32_150 = arith.constant 2 : i32
    %535 = vector.broadcast %c2_i32_150 : i32 to vector<1x256xi32>
    %536 = arith.addi %1, %535 : vector<1x256xi32>
    %c0_i32_151 = arith.constant 0 : i32
    %537 = vector.broadcast %c0_i32_151 : i32 to vector<1x256xi32>
    %538 = arith.cmpi sge, %536, %537 : vector<1x256xi32>
    %c2_i32_152 = arith.constant 2 : i32
    %539 = vector.broadcast %c2_i32_152 : i32 to vector<1x256xi32>
    %540 = arith.addi %1, %539 : vector<1x256xi32>
    %c16_i32_153 = arith.constant 16 : i32
    %541 = vector.broadcast %c16_i32_153 : i32 to vector<1x256xi32>
    %542 = arith.cmpi slt, %540, %541 : vector<1x256xi32>
    %543 = arith.andi %538, %542 : vector<1x256xi1>
    %544 = arith.andi %440, %543 : vector<1x256xi1>
    %c254_i32 = arith.constant 254 : i32
    %545 = tpu.dynamic_rotate %4 by %c254_i32 dim 1 : vector<4x256xf32>, i32 -> vector<4x256xf32>
    %cst_154 = arith.constant 0.000000e+00 : f32
    %546 = vector.shape_cast %544 : vector<1x256xi1> to vector<1x256xi1>
    %547 = vector.broadcast %546 : vector<1x256xi1> to vector<4x256xi1>
    %548 = vector.broadcast %cst_154 : f32 to vector<4x256xf32>
    %549 = arith.select %547, %545, %548 : vector<4x256xi1>, vector<4x256xf32>
    %550 = vector.extract_strided_slice %2 {offsets = [0, 26], sizes = [4, 1], strides = [1, 1]} : vector<4x49xf32> to vector<4x1xf32>
    %551 = vector.broadcast %550 : vector<4x1xf32> to vector<4x256xf32>
    %552 = arith.mulf %551, %549 : vector<4x256xf32>
    %553 = arith.addf %534, %552 : vector<4x256xf32>
    %c3_i32_155 = arith.constant 3 : i32
    %554 = vector.broadcast %c3_i32_155 : i32 to vector<1x256xi32>
    %555 = arith.addi %1, %554 : vector<1x256xi32>
    %c0_i32_156 = arith.constant 0 : i32
    %556 = vector.broadcast %c0_i32_156 : i32 to vector<1x256xi32>
    %557 = arith.cmpi sge, %555, %556 : vector<1x256xi32>
    %c3_i32_157 = arith.constant 3 : i32
    %558 = vector.broadcast %c3_i32_157 : i32 to vector<1x256xi32>
    %559 = arith.addi %1, %558 : vector<1x256xi32>
    %c16_i32_158 = arith.constant 16 : i32
    %560 = vector.broadcast %c16_i32_158 : i32 to vector<1x256xi32>
    %561 = arith.cmpi slt, %559, %560 : vector<1x256xi32>
    %562 = arith.andi %557, %561 : vector<1x256xi1>
    %563 = arith.andi %440, %562 : vector<1x256xi1>
    %c253_i32 = arith.constant 253 : i32
    %564 = tpu.dynamic_rotate %4 by %c253_i32 dim 1 : vector<4x256xf32>, i32 -> vector<4x256xf32>
    %cst_159 = arith.constant 0.000000e+00 : f32
    %565 = vector.shape_cast %563 : vector<1x256xi1> to vector<1x256xi1>
    %566 = vector.broadcast %565 : vector<1x256xi1> to vector<4x256xi1>
    %567 = vector.broadcast %cst_159 : f32 to vector<4x256xf32>
    %568 = arith.select %566, %564, %567 : vector<4x256xi1>, vector<4x256xf32>
    %569 = vector.extract_strided_slice %2 {offsets = [0, 27], sizes = [4, 1], strides = [1, 1]} : vector<4x49xf32> to vector<4x1xf32>
    %570 = vector.broadcast %569 : vector<4x1xf32> to vector<4x256xf32>
    %571 = arith.mulf %570, %568 : vector<4x256xf32>
    %572 = arith.addf %553, %571 : vector<4x256xf32>
    %c1_i32_160 = arith.constant 1 : i32
    %573 = vector.broadcast %c1_i32_160 : i32 to vector<1x256xi32>
    %574 = arith.addi %0, %573 : vector<1x256xi32>
    %c0_i32_161 = arith.constant 0 : i32
    %575 = vector.broadcast %c0_i32_161 : i32 to vector<1x256xi32>
    %576 = arith.cmpi sge, %574, %575 : vector<1x256xi32>
    %c1_i32_162 = arith.constant 1 : i32
    %577 = vector.broadcast %c1_i32_162 : i32 to vector<1x256xi32>
    %578 = arith.addi %0, %577 : vector<1x256xi32>
    %c16_i32_163 = arith.constant 16 : i32
    %579 = vector.broadcast %c16_i32_163 : i32 to vector<1x256xi32>
    %580 = arith.cmpi slt, %578, %579 : vector<1x256xi32>
    %581 = arith.andi %576, %580 : vector<1x256xi1>
    %c-3_i32_164 = arith.constant -3 : i32
    %582 = vector.broadcast %c-3_i32_164 : i32 to vector<1x256xi32>
    %583 = arith.addi %1, %582 : vector<1x256xi32>
    %c0_i32_165 = arith.constant 0 : i32
    %584 = vector.broadcast %c0_i32_165 : i32 to vector<1x256xi32>
    %585 = arith.cmpi sge, %583, %584 : vector<1x256xi32>
    %c-3_i32_166 = arith.constant -3 : i32
    %586 = vector.broadcast %c-3_i32_166 : i32 to vector<1x256xi32>
    %587 = arith.addi %1, %586 : vector<1x256xi32>
    %c16_i32_167 = arith.constant 16 : i32
    %588 = vector.broadcast %c16_i32_167 : i32 to vector<1x256xi32>
    %589 = arith.cmpi slt, %587, %588 : vector<1x256xi32>
    %590 = arith.andi %585, %589 : vector<1x256xi1>
    %591 = arith.andi %581, %590 : vector<1x256xi1>
    %c243_i32 = arith.constant 243 : i32
    %592 = tpu.dynamic_rotate %4 by %c243_i32 dim 1 : vector<4x256xf32>, i32 -> vector<4x256xf32>
    %cst_168 = arith.constant 0.000000e+00 : f32
    %593 = vector.shape_cast %591 : vector<1x256xi1> to vector<1x256xi1>
    %594 = vector.broadcast %593 : vector<1x256xi1> to vector<4x256xi1>
    %595 = vector.broadcast %cst_168 : f32 to vector<4x256xf32>
    %596 = arith.select %594, %592, %595 : vector<4x256xi1>, vector<4x256xf32>
    %597 = vector.extract_strided_slice %2 {offsets = [0, 28], sizes = [4, 1], strides = [1, 1]} : vector<4x49xf32> to vector<4x1xf32>
    %598 = vector.broadcast %597 : vector<4x1xf32> to vector<4x256xf32>
    %599 = arith.mulf %598, %596 : vector<4x256xf32>
    %600 = arith.addf %572, %599 : vector<4x256xf32>
    %c-2_i32_169 = arith.constant -2 : i32
    %601 = vector.broadcast %c-2_i32_169 : i32 to vector<1x256xi32>
    %602 = arith.addi %1, %601 : vector<1x256xi32>
    %c0_i32_170 = arith.constant 0 : i32
    %603 = vector.broadcast %c0_i32_170 : i32 to vector<1x256xi32>
    %604 = arith.cmpi sge, %602, %603 : vector<1x256xi32>
    %c-2_i32_171 = arith.constant -2 : i32
    %605 = vector.broadcast %c-2_i32_171 : i32 to vector<1x256xi32>
    %606 = arith.addi %1, %605 : vector<1x256xi32>
    %c16_i32_172 = arith.constant 16 : i32
    %607 = vector.broadcast %c16_i32_172 : i32 to vector<1x256xi32>
    %608 = arith.cmpi slt, %606, %607 : vector<1x256xi32>
    %609 = arith.andi %604, %608 : vector<1x256xi1>
    %610 = arith.andi %581, %609 : vector<1x256xi1>
    %c242_i32 = arith.constant 242 : i32
    %611 = tpu.dynamic_rotate %4 by %c242_i32 dim 1 : vector<4x256xf32>, i32 -> vector<4x256xf32>
    %cst_173 = arith.constant 0.000000e+00 : f32
    %612 = vector.shape_cast %610 : vector<1x256xi1> to vector<1x256xi1>
    %613 = vector.broadcast %612 : vector<1x256xi1> to vector<4x256xi1>
    %614 = vector.broadcast %cst_173 : f32 to vector<4x256xf32>
    %615 = arith.select %613, %611, %614 : vector<4x256xi1>, vector<4x256xf32>
    %616 = vector.extract_strided_slice %2 {offsets = [0, 29], sizes = [4, 1], strides = [1, 1]} : vector<4x49xf32> to vector<4x1xf32>
    %617 = vector.broadcast %616 : vector<4x1xf32> to vector<4x256xf32>
    %618 = arith.mulf %617, %615 : vector<4x256xf32>
    %619 = arith.addf %600, %618 : vector<4x256xf32>
    %c-1_i32_174 = arith.constant -1 : i32
    %620 = vector.broadcast %c-1_i32_174 : i32 to vector<1x256xi32>
    %621 = arith.addi %1, %620 : vector<1x256xi32>
    %c0_i32_175 = arith.constant 0 : i32
    %622 = vector.broadcast %c0_i32_175 : i32 to vector<1x256xi32>
    %623 = arith.cmpi sge, %621, %622 : vector<1x256xi32>
    %c-1_i32_176 = arith.constant -1 : i32
    %624 = vector.broadcast %c-1_i32_176 : i32 to vector<1x256xi32>
    %625 = arith.addi %1, %624 : vector<1x256xi32>
    %c16_i32_177 = arith.constant 16 : i32
    %626 = vector.broadcast %c16_i32_177 : i32 to vector<1x256xi32>
    %627 = arith.cmpi slt, %625, %626 : vector<1x256xi32>
    %628 = arith.andi %623, %627 : vector<1x256xi1>
    %629 = arith.andi %581, %628 : vector<1x256xi1>
    %c241_i32 = arith.constant 241 : i32
    %630 = tpu.dynamic_rotate %4 by %c241_i32 dim 1 : vector<4x256xf32>, i32 -> vector<4x256xf32>
    %cst_178 = arith.constant 0.000000e+00 : f32
    %631 = vector.shape_cast %629 : vector<1x256xi1> to vector<1x256xi1>
    %632 = vector.broadcast %631 : vector<1x256xi1> to vector<4x256xi1>
    %633 = vector.broadcast %cst_178 : f32 to vector<4x256xf32>
    %634 = arith.select %632, %630, %633 : vector<4x256xi1>, vector<4x256xf32>
    %635 = vector.extract_strided_slice %2 {offsets = [0, 30], sizes = [4, 1], strides = [1, 1]} : vector<4x49xf32> to vector<4x1xf32>
    %636 = vector.broadcast %635 : vector<4x1xf32> to vector<4x256xf32>
    %637 = arith.mulf %636, %634 : vector<4x256xf32>
    %638 = arith.addf %619, %637 : vector<4x256xf32>
    %c0_i32_179 = arith.constant 0 : i32
    %639 = vector.broadcast %c0_i32_179 : i32 to vector<1x256xi32>
    %640 = arith.addi %1, %639 : vector<1x256xi32>
    %c0_i32_180 = arith.constant 0 : i32
    %641 = vector.broadcast %c0_i32_180 : i32 to vector<1x256xi32>
    %642 = arith.cmpi sge, %640, %641 : vector<1x256xi32>
    %c0_i32_181 = arith.constant 0 : i32
    %643 = vector.broadcast %c0_i32_181 : i32 to vector<1x256xi32>
    %644 = arith.addi %1, %643 : vector<1x256xi32>
    %c16_i32_182 = arith.constant 16 : i32
    %645 = vector.broadcast %c16_i32_182 : i32 to vector<1x256xi32>
    %646 = arith.cmpi slt, %644, %645 : vector<1x256xi32>
    %647 = arith.andi %642, %646 : vector<1x256xi1>
    %648 = arith.andi %581, %647 : vector<1x256xi1>
    %c240_i32 = arith.constant 240 : i32
    %649 = tpu.dynamic_rotate %4 by %c240_i32 dim 1 : vector<4x256xf32>, i32 -> vector<4x256xf32>
    %cst_183 = arith.constant 0.000000e+00 : f32
    %650 = vector.shape_cast %648 : vector<1x256xi1> to vector<1x256xi1>
    %651 = vector.broadcast %650 : vector<1x256xi1> to vector<4x256xi1>
    %652 = vector.broadcast %cst_183 : f32 to vector<4x256xf32>
    %653 = arith.select %651, %649, %652 : vector<4x256xi1>, vector<4x256xf32>
    %654 = vector.extract_strided_slice %2 {offsets = [0, 31], sizes = [4, 1], strides = [1, 1]} : vector<4x49xf32> to vector<4x1xf32>
    %655 = vector.broadcast %654 : vector<4x1xf32> to vector<4x256xf32>
    %656 = arith.mulf %655, %653 : vector<4x256xf32>
    %657 = arith.addf %638, %656 : vector<4x256xf32>
    %c1_i32_184 = arith.constant 1 : i32
    %658 = vector.broadcast %c1_i32_184 : i32 to vector<1x256xi32>
    %659 = arith.addi %1, %658 : vector<1x256xi32>
    %c0_i32_185 = arith.constant 0 : i32
    %660 = vector.broadcast %c0_i32_185 : i32 to vector<1x256xi32>
    %661 = arith.cmpi sge, %659, %660 : vector<1x256xi32>
    %c1_i32_186 = arith.constant 1 : i32
    %662 = vector.broadcast %c1_i32_186 : i32 to vector<1x256xi32>
    %663 = arith.addi %1, %662 : vector<1x256xi32>
    %c16_i32_187 = arith.constant 16 : i32
    %664 = vector.broadcast %c16_i32_187 : i32 to vector<1x256xi32>
    %665 = arith.cmpi slt, %663, %664 : vector<1x256xi32>
    %666 = arith.andi %661, %665 : vector<1x256xi1>
    %667 = arith.andi %581, %666 : vector<1x256xi1>
    %c239_i32 = arith.constant 239 : i32
    %668 = tpu.dynamic_rotate %4 by %c239_i32 dim 1 : vector<4x256xf32>, i32 -> vector<4x256xf32>
    %cst_188 = arith.constant 0.000000e+00 : f32
    %669 = vector.shape_cast %667 : vector<1x256xi1> to vector<1x256xi1>
    %670 = vector.broadcast %669 : vector<1x256xi1> to vector<4x256xi1>
    %671 = vector.broadcast %cst_188 : f32 to vector<4x256xf32>
    %672 = arith.select %670, %668, %671 : vector<4x256xi1>, vector<4x256xf32>
    %673 = vector.extract_strided_slice %2 {offsets = [0, 32], sizes = [4, 1], strides = [1, 1]} : vector<4x49xf32> to vector<4x1xf32>
    %674 = vector.broadcast %673 : vector<4x1xf32> to vector<4x256xf32>
    %675 = arith.mulf %674, %672 : vector<4x256xf32>
    %676 = arith.addf %657, %675 : vector<4x256xf32>
    %c2_i32_189 = arith.constant 2 : i32
    %677 = vector.broadcast %c2_i32_189 : i32 to vector<1x256xi32>
    %678 = arith.addi %1, %677 : vector<1x256xi32>
    %c0_i32_190 = arith.constant 0 : i32
    %679 = vector.broadcast %c0_i32_190 : i32 to vector<1x256xi32>
    %680 = arith.cmpi sge, %678, %679 : vector<1x256xi32>
    %c2_i32_191 = arith.constant 2 : i32
    %681 = vector.broadcast %c2_i32_191 : i32 to vector<1x256xi32>
    %682 = arith.addi %1, %681 : vector<1x256xi32>
    %c16_i32_192 = arith.constant 16 : i32
    %683 = vector.broadcast %c16_i32_192 : i32 to vector<1x256xi32>
    %684 = arith.cmpi slt, %682, %683 : vector<1x256xi32>
    %685 = arith.andi %680, %684 : vector<1x256xi1>
    %686 = arith.andi %581, %685 : vector<1x256xi1>
    %c238_i32 = arith.constant 238 : i32
    %687 = tpu.dynamic_rotate %4 by %c238_i32 dim 1 : vector<4x256xf32>, i32 -> vector<4x256xf32>
    %cst_193 = arith.constant 0.000000e+00 : f32
    %688 = vector.shape_cast %686 : vector<1x256xi1> to vector<1x256xi1>
    %689 = vector.broadcast %688 : vector<1x256xi1> to vector<4x256xi1>
    %690 = vector.broadcast %cst_193 : f32 to vector<4x256xf32>
    %691 = arith.select %689, %687, %690 : vector<4x256xi1>, vector<4x256xf32>
    %692 = vector.extract_strided_slice %2 {offsets = [0, 33], sizes = [4, 1], strides = [1, 1]} : vector<4x49xf32> to vector<4x1xf32>
    %693 = vector.broadcast %692 : vector<4x1xf32> to vector<4x256xf32>
    %694 = arith.mulf %693, %691 : vector<4x256xf32>
    %695 = arith.addf %676, %694 : vector<4x256xf32>
    %c3_i32_194 = arith.constant 3 : i32
    %696 = vector.broadcast %c3_i32_194 : i32 to vector<1x256xi32>
    %697 = arith.addi %1, %696 : vector<1x256xi32>
    %c0_i32_195 = arith.constant 0 : i32
    %698 = vector.broadcast %c0_i32_195 : i32 to vector<1x256xi32>
    %699 = arith.cmpi sge, %697, %698 : vector<1x256xi32>
    %c3_i32_196 = arith.constant 3 : i32
    %700 = vector.broadcast %c3_i32_196 : i32 to vector<1x256xi32>
    %701 = arith.addi %1, %700 : vector<1x256xi32>
    %c16_i32_197 = arith.constant 16 : i32
    %702 = vector.broadcast %c16_i32_197 : i32 to vector<1x256xi32>
    %703 = arith.cmpi slt, %701, %702 : vector<1x256xi32>
    %704 = arith.andi %699, %703 : vector<1x256xi1>
    %705 = arith.andi %581, %704 : vector<1x256xi1>
    %c237_i32 = arith.constant 237 : i32
    %706 = tpu.dynamic_rotate %4 by %c237_i32 dim 1 : vector<4x256xf32>, i32 -> vector<4x256xf32>
    %cst_198 = arith.constant 0.000000e+00 : f32
    %707 = vector.shape_cast %705 : vector<1x256xi1> to vector<1x256xi1>
    %708 = vector.broadcast %707 : vector<1x256xi1> to vector<4x256xi1>
    %709 = vector.broadcast %cst_198 : f32 to vector<4x256xf32>
    %710 = arith.select %708, %706, %709 : vector<4x256xi1>, vector<4x256xf32>
    %711 = vector.extract_strided_slice %2 {offsets = [0, 34], sizes = [4, 1], strides = [1, 1]} : vector<4x49xf32> to vector<4x1xf32>
    %712 = vector.broadcast %711 : vector<4x1xf32> to vector<4x256xf32>
    %713 = arith.mulf %712, %710 : vector<4x256xf32>
    %714 = arith.addf %695, %713 : vector<4x256xf32>
    %c2_i32_199 = arith.constant 2 : i32
    %715 = vector.broadcast %c2_i32_199 : i32 to vector<1x256xi32>
    %716 = arith.addi %0, %715 : vector<1x256xi32>
    %c0_i32_200 = arith.constant 0 : i32
    %717 = vector.broadcast %c0_i32_200 : i32 to vector<1x256xi32>
    %718 = arith.cmpi sge, %716, %717 : vector<1x256xi32>
    %c2_i32_201 = arith.constant 2 : i32
    %719 = vector.broadcast %c2_i32_201 : i32 to vector<1x256xi32>
    %720 = arith.addi %0, %719 : vector<1x256xi32>
    %c16_i32_202 = arith.constant 16 : i32
    %721 = vector.broadcast %c16_i32_202 : i32 to vector<1x256xi32>
    %722 = arith.cmpi slt, %720, %721 : vector<1x256xi32>
    %723 = arith.andi %718, %722 : vector<1x256xi1>
    %c-3_i32_203 = arith.constant -3 : i32
    %724 = vector.broadcast %c-3_i32_203 : i32 to vector<1x256xi32>
    %725 = arith.addi %1, %724 : vector<1x256xi32>
    %c0_i32_204 = arith.constant 0 : i32
    %726 = vector.broadcast %c0_i32_204 : i32 to vector<1x256xi32>
    %727 = arith.cmpi sge, %725, %726 : vector<1x256xi32>
    %c-3_i32_205 = arith.constant -3 : i32
    %728 = vector.broadcast %c-3_i32_205 : i32 to vector<1x256xi32>
    %729 = arith.addi %1, %728 : vector<1x256xi32>
    %c16_i32_206 = arith.constant 16 : i32
    %730 = vector.broadcast %c16_i32_206 : i32 to vector<1x256xi32>
    %731 = arith.cmpi slt, %729, %730 : vector<1x256xi32>
    %732 = arith.andi %727, %731 : vector<1x256xi1>
    %733 = arith.andi %723, %732 : vector<1x256xi1>
    %c227_i32 = arith.constant 227 : i32
    %734 = tpu.dynamic_rotate %4 by %c227_i32 dim 1 : vector<4x256xf32>, i32 -> vector<4x256xf32>
    %cst_207 = arith.constant 0.000000e+00 : f32
    %735 = vector.shape_cast %733 : vector<1x256xi1> to vector<1x256xi1>
    %736 = vector.broadcast %735 : vector<1x256xi1> to vector<4x256xi1>
    %737 = vector.broadcast %cst_207 : f32 to vector<4x256xf32>
    %738 = arith.select %736, %734, %737 : vector<4x256xi1>, vector<4x256xf32>
    %739 = vector.extract_strided_slice %2 {offsets = [0, 35], sizes = [4, 1], strides = [1, 1]} : vector<4x49xf32> to vector<4x1xf32>
    %740 = vector.broadcast %739 : vector<4x1xf32> to vector<4x256xf32>
    %741 = arith.mulf %740, %738 : vector<4x256xf32>
    %742 = arith.addf %714, %741 : vector<4x256xf32>
    %c-2_i32_208 = arith.constant -2 : i32
    %743 = vector.broadcast %c-2_i32_208 : i32 to vector<1x256xi32>
    %744 = arith.addi %1, %743 : vector<1x256xi32>
    %c0_i32_209 = arith.constant 0 : i32
    %745 = vector.broadcast %c0_i32_209 : i32 to vector<1x256xi32>
    %746 = arith.cmpi sge, %744, %745 : vector<1x256xi32>
    %c-2_i32_210 = arith.constant -2 : i32
    %747 = vector.broadcast %c-2_i32_210 : i32 to vector<1x256xi32>
    %748 = arith.addi %1, %747 : vector<1x256xi32>
    %c16_i32_211 = arith.constant 16 : i32
    %749 = vector.broadcast %c16_i32_211 : i32 to vector<1x256xi32>
    %750 = arith.cmpi slt, %748, %749 : vector<1x256xi32>
    %751 = arith.andi %746, %750 : vector<1x256xi1>
    %752 = arith.andi %723, %751 : vector<1x256xi1>
    %c226_i32 = arith.constant 226 : i32
    %753 = tpu.dynamic_rotate %4 by %c226_i32 dim 1 : vector<4x256xf32>, i32 -> vector<4x256xf32>
    %cst_212 = arith.constant 0.000000e+00 : f32
    %754 = vector.shape_cast %752 : vector<1x256xi1> to vector<1x256xi1>
    %755 = vector.broadcast %754 : vector<1x256xi1> to vector<4x256xi1>
    %756 = vector.broadcast %cst_212 : f32 to vector<4x256xf32>
    %757 = arith.select %755, %753, %756 : vector<4x256xi1>, vector<4x256xf32>
    %758 = vector.extract_strided_slice %2 {offsets = [0, 36], sizes = [4, 1], strides = [1, 1]} : vector<4x49xf32> to vector<4x1xf32>
    %759 = vector.broadcast %758 : vector<4x1xf32> to vector<4x256xf32>
    %760 = arith.mulf %759, %757 : vector<4x256xf32>
    %761 = arith.addf %742, %760 : vector<4x256xf32>
    %c-1_i32_213 = arith.constant -1 : i32
    %762 = vector.broadcast %c-1_i32_213 : i32 to vector<1x256xi32>
    %763 = arith.addi %1, %762 : vector<1x256xi32>
    %c0_i32_214 = arith.constant 0 : i32
    %764 = vector.broadcast %c0_i32_214 : i32 to vector<1x256xi32>
    %765 = arith.cmpi sge, %763, %764 : vector<1x256xi32>
    %c-1_i32_215 = arith.constant -1 : i32
    %766 = vector.broadcast %c-1_i32_215 : i32 to vector<1x256xi32>
    %767 = arith.addi %1, %766 : vector<1x256xi32>
    %c16_i32_216 = arith.constant 16 : i32
    %768 = vector.broadcast %c16_i32_216 : i32 to vector<1x256xi32>
    %769 = arith.cmpi slt, %767, %768 : vector<1x256xi32>
    %770 = arith.andi %765, %769 : vector<1x256xi1>
    %771 = arith.andi %723, %770 : vector<1x256xi1>
    %c225_i32 = arith.constant 225 : i32
    %772 = tpu.dynamic_rotate %4 by %c225_i32 dim 1 : vector<4x256xf32>, i32 -> vector<4x256xf32>
    %cst_217 = arith.constant 0.000000e+00 : f32
    %773 = vector.shape_cast %771 : vector<1x256xi1> to vector<1x256xi1>
    %774 = vector.broadcast %773 : vector<1x256xi1> to vector<4x256xi1>
    %775 = vector.broadcast %cst_217 : f32 to vector<4x256xf32>
    %776 = arith.select %774, %772, %775 : vector<4x256xi1>, vector<4x256xf32>
    %777 = vector.extract_strided_slice %2 {offsets = [0, 37], sizes = [4, 1], strides = [1, 1]} : vector<4x49xf32> to vector<4x1xf32>
    %778 = vector.broadcast %777 : vector<4x1xf32> to vector<4x256xf32>
    %779 = arith.mulf %778, %776 : vector<4x256xf32>
    %780 = arith.addf %761, %779 : vector<4x256xf32>
    %c0_i32_218 = arith.constant 0 : i32
    %781 = vector.broadcast %c0_i32_218 : i32 to vector<1x256xi32>
    %782 = arith.addi %1, %781 : vector<1x256xi32>
    %c0_i32_219 = arith.constant 0 : i32
    %783 = vector.broadcast %c0_i32_219 : i32 to vector<1x256xi32>
    %784 = arith.cmpi sge, %782, %783 : vector<1x256xi32>
    %c0_i32_220 = arith.constant 0 : i32
    %785 = vector.broadcast %c0_i32_220 : i32 to vector<1x256xi32>
    %786 = arith.addi %1, %785 : vector<1x256xi32>
    %c16_i32_221 = arith.constant 16 : i32
    %787 = vector.broadcast %c16_i32_221 : i32 to vector<1x256xi32>
    %788 = arith.cmpi slt, %786, %787 : vector<1x256xi32>
    %789 = arith.andi %784, %788 : vector<1x256xi1>
    %790 = arith.andi %723, %789 : vector<1x256xi1>
    %c224_i32 = arith.constant 224 : i32
    %791 = tpu.dynamic_rotate %4 by %c224_i32 dim 1 : vector<4x256xf32>, i32 -> vector<4x256xf32>
    %cst_222 = arith.constant 0.000000e+00 : f32
    %792 = vector.shape_cast %790 : vector<1x256xi1> to vector<1x256xi1>
    %793 = vector.broadcast %792 : vector<1x256xi1> to vector<4x256xi1>
    %794 = vector.broadcast %cst_222 : f32 to vector<4x256xf32>
    %795 = arith.select %793, %791, %794 : vector<4x256xi1>, vector<4x256xf32>
    %796 = vector.extract_strided_slice %2 {offsets = [0, 38], sizes = [4, 1], strides = [1, 1]} : vector<4x49xf32> to vector<4x1xf32>
    %797 = vector.broadcast %796 : vector<4x1xf32> to vector<4x256xf32>
    %798 = arith.mulf %797, %795 : vector<4x256xf32>
    %799 = arith.addf %780, %798 : vector<4x256xf32>
    %c1_i32_223 = arith.constant 1 : i32
    %800 = vector.broadcast %c1_i32_223 : i32 to vector<1x256xi32>
    %801 = arith.addi %1, %800 : vector<1x256xi32>
    %c0_i32_224 = arith.constant 0 : i32
    %802 = vector.broadcast %c0_i32_224 : i32 to vector<1x256xi32>
    %803 = arith.cmpi sge, %801, %802 : vector<1x256xi32>
    %c1_i32_225 = arith.constant 1 : i32
    %804 = vector.broadcast %c1_i32_225 : i32 to vector<1x256xi32>
    %805 = arith.addi %1, %804 : vector<1x256xi32>
    %c16_i32_226 = arith.constant 16 : i32
    %806 = vector.broadcast %c16_i32_226 : i32 to vector<1x256xi32>
    %807 = arith.cmpi slt, %805, %806 : vector<1x256xi32>
    %808 = arith.andi %803, %807 : vector<1x256xi1>
    %809 = arith.andi %723, %808 : vector<1x256xi1>
    %c223_i32 = arith.constant 223 : i32
    %810 = tpu.dynamic_rotate %4 by %c223_i32 dim 1 : vector<4x256xf32>, i32 -> vector<4x256xf32>
    %cst_227 = arith.constant 0.000000e+00 : f32
    %811 = vector.shape_cast %809 : vector<1x256xi1> to vector<1x256xi1>
    %812 = vector.broadcast %811 : vector<1x256xi1> to vector<4x256xi1>
    %813 = vector.broadcast %cst_227 : f32 to vector<4x256xf32>
    %814 = arith.select %812, %810, %813 : vector<4x256xi1>, vector<4x256xf32>
    %815 = vector.extract_strided_slice %2 {offsets = [0, 39], sizes = [4, 1], strides = [1, 1]} : vector<4x49xf32> to vector<4x1xf32>
    %816 = vector.broadcast %815 : vector<4x1xf32> to vector<4x256xf32>
    %817 = arith.mulf %816, %814 : vector<4x256xf32>
    %818 = arith.addf %799, %817 : vector<4x256xf32>
    %c2_i32_228 = arith.constant 2 : i32
    %819 = vector.broadcast %c2_i32_228 : i32 to vector<1x256xi32>
    %820 = arith.addi %1, %819 : vector<1x256xi32>
    %c0_i32_229 = arith.constant 0 : i32
    %821 = vector.broadcast %c0_i32_229 : i32 to vector<1x256xi32>
    %822 = arith.cmpi sge, %820, %821 : vector<1x256xi32>
    %c2_i32_230 = arith.constant 2 : i32
    %823 = vector.broadcast %c2_i32_230 : i32 to vector<1x256xi32>
    %824 = arith.addi %1, %823 : vector<1x256xi32>
    %c16_i32_231 = arith.constant 16 : i32
    %825 = vector.broadcast %c16_i32_231 : i32 to vector<1x256xi32>
    %826 = arith.cmpi slt, %824, %825 : vector<1x256xi32>
    %827 = arith.andi %822, %826 : vector<1x256xi1>
    %828 = arith.andi %723, %827 : vector<1x256xi1>
    %c222_i32 = arith.constant 222 : i32
    %829 = tpu.dynamic_rotate %4 by %c222_i32 dim 1 : vector<4x256xf32>, i32 -> vector<4x256xf32>
    %cst_232 = arith.constant 0.000000e+00 : f32
    %830 = vector.shape_cast %828 : vector<1x256xi1> to vector<1x256xi1>
    %831 = vector.broadcast %830 : vector<1x256xi1> to vector<4x256xi1>
    %832 = vector.broadcast %cst_232 : f32 to vector<4x256xf32>
    %833 = arith.select %831, %829, %832 : vector<4x256xi1>, vector<4x256xf32>
    %834 = vector.extract_strided_slice %2 {offsets = [0, 40], sizes = [4, 1], strides = [1, 1]} : vector<4x49xf32> to vector<4x1xf32>
    %835 = vector.broadcast %834 : vector<4x1xf32> to vector<4x256xf32>
    %836 = arith.mulf %835, %833 : vector<4x256xf32>
    %837 = arith.addf %818, %836 : vector<4x256xf32>
    %c3_i32_233 = arith.constant 3 : i32
    %838 = vector.broadcast %c3_i32_233 : i32 to vector<1x256xi32>
    %839 = arith.addi %1, %838 : vector<1x256xi32>
    %c0_i32_234 = arith.constant 0 : i32
    %840 = vector.broadcast %c0_i32_234 : i32 to vector<1x256xi32>
    %841 = arith.cmpi sge, %839, %840 : vector<1x256xi32>
    %c3_i32_235 = arith.constant 3 : i32
    %842 = vector.broadcast %c3_i32_235 : i32 to vector<1x256xi32>
    %843 = arith.addi %1, %842 : vector<1x256xi32>
    %c16_i32_236 = arith.constant 16 : i32
    %844 = vector.broadcast %c16_i32_236 : i32 to vector<1x256xi32>
    %845 = arith.cmpi slt, %843, %844 : vector<1x256xi32>
    %846 = arith.andi %841, %845 : vector<1x256xi1>
    %847 = arith.andi %723, %846 : vector<1x256xi1>
    %c221_i32 = arith.constant 221 : i32
    %848 = tpu.dynamic_rotate %4 by %c221_i32 dim 1 : vector<4x256xf32>, i32 -> vector<4x256xf32>
    %cst_237 = arith.constant 0.000000e+00 : f32
    %849 = vector.shape_cast %847 : vector<1x256xi1> to vector<1x256xi1>
    %850 = vector.broadcast %849 : vector<1x256xi1> to vector<4x256xi1>
    %851 = vector.broadcast %cst_237 : f32 to vector<4x256xf32>
    %852 = arith.select %850, %848, %851 : vector<4x256xi1>, vector<4x256xf32>
    %853 = vector.extract_strided_slice %2 {offsets = [0, 41], sizes = [4, 1], strides = [1, 1]} : vector<4x49xf32> to vector<4x1xf32>
    %854 = vector.broadcast %853 : vector<4x1xf32> to vector<4x256xf32>
    %855 = arith.mulf %854, %852 : vector<4x256xf32>
    %856 = arith.addf %837, %855 : vector<4x256xf32>
    %c3_i32_238 = arith.constant 3 : i32
    %857 = vector.broadcast %c3_i32_238 : i32 to vector<1x256xi32>
    %858 = arith.addi %0, %857 : vector<1x256xi32>
    %c0_i32_239 = arith.constant 0 : i32
    %859 = vector.broadcast %c0_i32_239 : i32 to vector<1x256xi32>
    %860 = arith.cmpi sge, %858, %859 : vector<1x256xi32>
    %c3_i32_240 = arith.constant 3 : i32
    %861 = vector.broadcast %c3_i32_240 : i32 to vector<1x256xi32>
    %862 = arith.addi %0, %861 : vector<1x256xi32>
    %c16_i32_241 = arith.constant 16 : i32
    %863 = vector.broadcast %c16_i32_241 : i32 to vector<1x256xi32>
    %864 = arith.cmpi slt, %862, %863 : vector<1x256xi32>
    %865 = arith.andi %860, %864 : vector<1x256xi1>
    %c-3_i32_242 = arith.constant -3 : i32
    %866 = vector.broadcast %c-3_i32_242 : i32 to vector<1x256xi32>
    %867 = arith.addi %1, %866 : vector<1x256xi32>
    %c0_i32_243 = arith.constant 0 : i32
    %868 = vector.broadcast %c0_i32_243 : i32 to vector<1x256xi32>
    %869 = arith.cmpi sge, %867, %868 : vector<1x256xi32>
    %c-3_i32_244 = arith.constant -3 : i32
    %870 = vector.broadcast %c-3_i32_244 : i32 to vector<1x256xi32>
    %871 = arith.addi %1, %870 : vector<1x256xi32>
    %c16_i32_245 = arith.constant 16 : i32
    %872 = vector.broadcast %c16_i32_245 : i32 to vector<1x256xi32>
    %873 = arith.cmpi slt, %871, %872 : vector<1x256xi32>
    %874 = arith.andi %869, %873 : vector<1x256xi1>
    %875 = arith.andi %865, %874 : vector<1x256xi1>
    %c211_i32 = arith.constant 211 : i32
    %876 = tpu.dynamic_rotate %4 by %c211_i32 dim 1 : vector<4x256xf32>, i32 -> vector<4x256xf32>
    %cst_246 = arith.constant 0.000000e+00 : f32
    %877 = vector.shape_cast %875 : vector<1x256xi1> to vector<1x256xi1>
    %878 = vector.broadcast %877 : vector<1x256xi1> to vector<4x256xi1>
    %879 = vector.broadcast %cst_246 : f32 to vector<4x256xf32>
    %880 = arith.select %878, %876, %879 : vector<4x256xi1>, vector<4x256xf32>
    %881 = vector.extract_strided_slice %2 {offsets = [0, 42], sizes = [4, 1], strides = [1, 1]} : vector<4x49xf32> to vector<4x1xf32>
    %882 = vector.broadcast %881 : vector<4x1xf32> to vector<4x256xf32>
    %883 = arith.mulf %882, %880 : vector<4x256xf32>
    %884 = arith.addf %856, %883 : vector<4x256xf32>
    %c-2_i32_247 = arith.constant -2 : i32
    %885 = vector.broadcast %c-2_i32_247 : i32 to vector<1x256xi32>
    %886 = arith.addi %1, %885 : vector<1x256xi32>
    %c0_i32_248 = arith.constant 0 : i32
    %887 = vector.broadcast %c0_i32_248 : i32 to vector<1x256xi32>
    %888 = arith.cmpi sge, %886, %887 : vector<1x256xi32>
    %c-2_i32_249 = arith.constant -2 : i32
    %889 = vector.broadcast %c-2_i32_249 : i32 to vector<1x256xi32>
    %890 = arith.addi %1, %889 : vector<1x256xi32>
    %c16_i32_250 = arith.constant 16 : i32
    %891 = vector.broadcast %c16_i32_250 : i32 to vector<1x256xi32>
    %892 = arith.cmpi slt, %890, %891 : vector<1x256xi32>
    %893 = arith.andi %888, %892 : vector<1x256xi1>
    %894 = arith.andi %865, %893 : vector<1x256xi1>
    %c210_i32 = arith.constant 210 : i32
    %895 = tpu.dynamic_rotate %4 by %c210_i32 dim 1 : vector<4x256xf32>, i32 -> vector<4x256xf32>
    %cst_251 = arith.constant 0.000000e+00 : f32
    %896 = vector.shape_cast %894 : vector<1x256xi1> to vector<1x256xi1>
    %897 = vector.broadcast %896 : vector<1x256xi1> to vector<4x256xi1>
    %898 = vector.broadcast %cst_251 : f32 to vector<4x256xf32>
    %899 = arith.select %897, %895, %898 : vector<4x256xi1>, vector<4x256xf32>
    %900 = vector.extract_strided_slice %2 {offsets = [0, 43], sizes = [4, 1], strides = [1, 1]} : vector<4x49xf32> to vector<4x1xf32>
    %901 = vector.broadcast %900 : vector<4x1xf32> to vector<4x256xf32>
    %902 = arith.mulf %901, %899 : vector<4x256xf32>
    %903 = arith.addf %884, %902 : vector<4x256xf32>
    %c-1_i32_252 = arith.constant -1 : i32
    %904 = vector.broadcast %c-1_i32_252 : i32 to vector<1x256xi32>
    %905 = arith.addi %1, %904 : vector<1x256xi32>
    %c0_i32_253 = arith.constant 0 : i32
    %906 = vector.broadcast %c0_i32_253 : i32 to vector<1x256xi32>
    %907 = arith.cmpi sge, %905, %906 : vector<1x256xi32>
    %c-1_i32_254 = arith.constant -1 : i32
    %908 = vector.broadcast %c-1_i32_254 : i32 to vector<1x256xi32>
    %909 = arith.addi %1, %908 : vector<1x256xi32>
    %c16_i32_255 = arith.constant 16 : i32
    %910 = vector.broadcast %c16_i32_255 : i32 to vector<1x256xi32>
    %911 = arith.cmpi slt, %909, %910 : vector<1x256xi32>
    %912 = arith.andi %907, %911 : vector<1x256xi1>
    %913 = arith.andi %865, %912 : vector<1x256xi1>
    %c209_i32 = arith.constant 209 : i32
    %914 = tpu.dynamic_rotate %4 by %c209_i32 dim 1 : vector<4x256xf32>, i32 -> vector<4x256xf32>
    %cst_256 = arith.constant 0.000000e+00 : f32
    %915 = vector.shape_cast %913 : vector<1x256xi1> to vector<1x256xi1>
    %916 = vector.broadcast %915 : vector<1x256xi1> to vector<4x256xi1>
    %917 = vector.broadcast %cst_256 : f32 to vector<4x256xf32>
    %918 = arith.select %916, %914, %917 : vector<4x256xi1>, vector<4x256xf32>
    %919 = vector.extract_strided_slice %2 {offsets = [0, 44], sizes = [4, 1], strides = [1, 1]} : vector<4x49xf32> to vector<4x1xf32>
    %920 = vector.broadcast %919 : vector<4x1xf32> to vector<4x256xf32>
    %921 = arith.mulf %920, %918 : vector<4x256xf32>
    %922 = arith.addf %903, %921 : vector<4x256xf32>
    %c0_i32_257 = arith.constant 0 : i32
    %923 = vector.broadcast %c0_i32_257 : i32 to vector<1x256xi32>
    %924 = arith.addi %1, %923 : vector<1x256xi32>
    %c0_i32_258 = arith.constant 0 : i32
    %925 = vector.broadcast %c0_i32_258 : i32 to vector<1x256xi32>
    %926 = arith.cmpi sge, %924, %925 : vector<1x256xi32>
    %c0_i32_259 = arith.constant 0 : i32
    %927 = vector.broadcast %c0_i32_259 : i32 to vector<1x256xi32>
    %928 = arith.addi %1, %927 : vector<1x256xi32>
    %c16_i32_260 = arith.constant 16 : i32
    %929 = vector.broadcast %c16_i32_260 : i32 to vector<1x256xi32>
    %930 = arith.cmpi slt, %928, %929 : vector<1x256xi32>
    %931 = arith.andi %926, %930 : vector<1x256xi1>
    %932 = arith.andi %865, %931 : vector<1x256xi1>
    %c208_i32 = arith.constant 208 : i32
    %933 = tpu.dynamic_rotate %4 by %c208_i32 dim 1 : vector<4x256xf32>, i32 -> vector<4x256xf32>
    %cst_261 = arith.constant 0.000000e+00 : f32
    %934 = vector.shape_cast %932 : vector<1x256xi1> to vector<1x256xi1>
    %935 = vector.broadcast %934 : vector<1x256xi1> to vector<4x256xi1>
    %936 = vector.broadcast %cst_261 : f32 to vector<4x256xf32>
    %937 = arith.select %935, %933, %936 : vector<4x256xi1>, vector<4x256xf32>
    %938 = vector.extract_strided_slice %2 {offsets = [0, 45], sizes = [4, 1], strides = [1, 1]} : vector<4x49xf32> to vector<4x1xf32>
    %939 = vector.broadcast %938 : vector<4x1xf32> to vector<4x256xf32>
    %940 = arith.mulf %939, %937 : vector<4x256xf32>
    %941 = arith.addf %922, %940 : vector<4x256xf32>
    %c1_i32_262 = arith.constant 1 : i32
    %942 = vector.broadcast %c1_i32_262 : i32 to vector<1x256xi32>
    %943 = arith.addi %1, %942 : vector<1x256xi32>
    %c0_i32_263 = arith.constant 0 : i32
    %944 = vector.broadcast %c0_i32_263 : i32 to vector<1x256xi32>
    %945 = arith.cmpi sge, %943, %944 : vector<1x256xi32>
    %c1_i32_264 = arith.constant 1 : i32
    %946 = vector.broadcast %c1_i32_264 : i32 to vector<1x256xi32>
    %947 = arith.addi %1, %946 : vector<1x256xi32>
    %c16_i32_265 = arith.constant 16 : i32
    %948 = vector.broadcast %c16_i32_265 : i32 to vector<1x256xi32>
    %949 = arith.cmpi slt, %947, %948 : vector<1x256xi32>
    %950 = arith.andi %945, %949 : vector<1x256xi1>
    %951 = arith.andi %865, %950 : vector<1x256xi1>
    %c207_i32 = arith.constant 207 : i32
    %952 = tpu.dynamic_rotate %4 by %c207_i32 dim 1 : vector<4x256xf32>, i32 -> vector<4x256xf32>
    %cst_266 = arith.constant 0.000000e+00 : f32
    %953 = vector.shape_cast %951 : vector<1x256xi1> to vector<1x256xi1>
    %954 = vector.broadcast %953 : vector<1x256xi1> to vector<4x256xi1>
    %955 = vector.broadcast %cst_266 : f32 to vector<4x256xf32>
    %956 = arith.select %954, %952, %955 : vector<4x256xi1>, vector<4x256xf32>
    %957 = vector.extract_strided_slice %2 {offsets = [0, 46], sizes = [4, 1], strides = [1, 1]} : vector<4x49xf32> to vector<4x1xf32>
    %958 = vector.broadcast %957 : vector<4x1xf32> to vector<4x256xf32>
    %959 = arith.mulf %958, %956 : vector<4x256xf32>
    %960 = arith.addf %941, %959 : vector<4x256xf32>
    %c2_i32_267 = arith.constant 2 : i32
    %961 = vector.broadcast %c2_i32_267 : i32 to vector<1x256xi32>
    %962 = arith.addi %1, %961 : vector<1x256xi32>
    %c0_i32_268 = arith.constant 0 : i32
    %963 = vector.broadcast %c0_i32_268 : i32 to vector<1x256xi32>
    %964 = arith.cmpi sge, %962, %963 : vector<1x256xi32>
    %c2_i32_269 = arith.constant 2 : i32
    %965 = vector.broadcast %c2_i32_269 : i32 to vector<1x256xi32>
    %966 = arith.addi %1, %965 : vector<1x256xi32>
    %c16_i32_270 = arith.constant 16 : i32
    %967 = vector.broadcast %c16_i32_270 : i32 to vector<1x256xi32>
    %968 = arith.cmpi slt, %966, %967 : vector<1x256xi32>
    %969 = arith.andi %964, %968 : vector<1x256xi1>
    %970 = arith.andi %865, %969 : vector<1x256xi1>
    %c206_i32 = arith.constant 206 : i32
    %971 = tpu.dynamic_rotate %4 by %c206_i32 dim 1 : vector<4x256xf32>, i32 -> vector<4x256xf32>
    %cst_271 = arith.constant 0.000000e+00 : f32
    %972 = vector.shape_cast %970 : vector<1x256xi1> to vector<1x256xi1>
    %973 = vector.broadcast %972 : vector<1x256xi1> to vector<4x256xi1>
    %974 = vector.broadcast %cst_271 : f32 to vector<4x256xf32>
    %975 = arith.select %973, %971, %974 : vector<4x256xi1>, vector<4x256xf32>
    %976 = vector.extract_strided_slice %2 {offsets = [0, 47], sizes = [4, 1], strides = [1, 1]} : vector<4x49xf32> to vector<4x1xf32>
    %977 = vector.broadcast %976 : vector<4x1xf32> to vector<4x256xf32>
    %978 = arith.mulf %977, %975 : vector<4x256xf32>
    %979 = arith.addf %960, %978 : vector<4x256xf32>
    %c3_i32_272 = arith.constant 3 : i32
    %980 = vector.broadcast %c3_i32_272 : i32 to vector<1x256xi32>
    %981 = arith.addi %1, %980 : vector<1x256xi32>
    %c0_i32_273 = arith.constant 0 : i32
    %982 = vector.broadcast %c0_i32_273 : i32 to vector<1x256xi32>
    %983 = arith.cmpi sge, %981, %982 : vector<1x256xi32>
    %c3_i32_274 = arith.constant 3 : i32
    %984 = vector.broadcast %c3_i32_274 : i32 to vector<1x256xi32>
    %985 = arith.addi %1, %984 : vector<1x256xi32>
    %c16_i32_275 = arith.constant 16 : i32
    %986 = vector.broadcast %c16_i32_275 : i32 to vector<1x256xi32>
    %987 = arith.cmpi slt, %985, %986 : vector<1x256xi32>
    %988 = arith.andi %983, %987 : vector<1x256xi1>
    %989 = arith.andi %865, %988 : vector<1x256xi1>
    %c205_i32 = arith.constant 205 : i32
    %990 = tpu.dynamic_rotate %4 by %c205_i32 dim 1 : vector<4x256xf32>, i32 -> vector<4x256xf32>
    %cst_276 = arith.constant 0.000000e+00 : f32
    %991 = vector.shape_cast %989 : vector<1x256xi1> to vector<1x256xi1>
    %992 = vector.broadcast %991 : vector<1x256xi1> to vector<4x256xi1>
    %993 = vector.broadcast %cst_276 : f32 to vector<4x256xf32>
    %994 = arith.select %992, %990, %993 : vector<4x256xi1>, vector<4x256xf32>
    %995 = vector.extract_strided_slice %2 {offsets = [0, 48], sizes = [4, 1], strides = [1, 1]} : vector<4x49xf32> to vector<4x1xf32>
    %996 = vector.broadcast %995 : vector<4x1xf32> to vector<4x256xf32>
    %997 = arith.mulf %996, %994 : vector<4x256xf32>
    %998 = arith.addf %979, %997 : vector<4x256xf32>
    %cst_277 = arith.constant dense<0.000000e+00> : vector<4xf32>
    %999 = vector.multi_reduction <add>, %998, %cst_277 [1] : vector<4x256xf32> to vector<4xf32>
    %1000 = vector.shape_cast %999 : vector<4xf32> to vector<4x1xf32>
    %1001 = arith.mulf %998, %998 : vector<4x256xf32>
    %cst_278 = arith.constant dense<0.000000e+00> : vector<4xf32>
    %1002 = vector.multi_reduction <add>, %1001, %cst_278 [1] : vector<4x256xf32> to vector<4xf32>
    %1003 = vector.shape_cast %1002 : vector<4xf32> to vector<4x1xf32>
    %c1 = arith.constant 1 : index
    %c0_279 = arith.constant 0 : index
    %c0_280 = arith.constant 0 : index
    %1004 = vector.load %arg0[%c1, %c0_279, %c0_280] : memref<2x4x256xf32, #tpu.memory_space<vmem>>, vector<1x4x256xf32>
    %1005 = vector.shape_cast %1004 : vector<1x4x256xf32> to vector<4x256xf32>
    %cst_281 = arith.constant 0.000000e+00 : f32
    %1006 = vector.broadcast %cst_281 : f32 to vector<4x256xf32>
    %c-3_i32_282 = arith.constant -3 : i32
    %1007 = vector.broadcast %c-3_i32_282 : i32 to vector<1x256xi32>
    %1008 = arith.addi %0, %1007 : vector<1x256xi32>
    %c0_i32_283 = arith.constant 0 : i32
    %1009 = vector.broadcast %c0_i32_283 : i32 to vector<1x256xi32>
    %1010 = arith.cmpi sge, %1008, %1009 : vector<1x256xi32>
    %c-3_i32_284 = arith.constant -3 : i32
    %1011 = vector.broadcast %c-3_i32_284 : i32 to vector<1x256xi32>
    %1012 = arith.addi %0, %1011 : vector<1x256xi32>
    %c16_i32_285 = arith.constant 16 : i32
    %1013 = vector.broadcast %c16_i32_285 : i32 to vector<1x256xi32>
    %1014 = arith.cmpi slt, %1012, %1013 : vector<1x256xi32>
    %1015 = arith.andi %1010, %1014 : vector<1x256xi1>
    %c-3_i32_286 = arith.constant -3 : i32
    %1016 = vector.broadcast %c-3_i32_286 : i32 to vector<1x256xi32>
    %1017 = arith.addi %1, %1016 : vector<1x256xi32>
    %c0_i32_287 = arith.constant 0 : i32
    %1018 = vector.broadcast %c0_i32_287 : i32 to vector<1x256xi32>
    %1019 = arith.cmpi sge, %1017, %1018 : vector<1x256xi32>
    %c-3_i32_288 = arith.constant -3 : i32
    %1020 = vector.broadcast %c-3_i32_288 : i32 to vector<1x256xi32>
    %1021 = arith.addi %1, %1020 : vector<1x256xi32>
    %c16_i32_289 = arith.constant 16 : i32
    %1022 = vector.broadcast %c16_i32_289 : i32 to vector<1x256xi32>
    %1023 = arith.cmpi slt, %1021, %1022 : vector<1x256xi32>
    %1024 = arith.andi %1019, %1023 : vector<1x256xi1>
    %1025 = arith.andi %1015, %1024 : vector<1x256xi1>
    %c51_i32_290 = arith.constant 51 : i32
    %1026 = tpu.dynamic_rotate %1005 by %c51_i32_290 dim 1 : vector<4x256xf32>, i32 -> vector<4x256xf32>
    %cst_291 = arith.constant 0.000000e+00 : f32
    %1027 = vector.shape_cast %1025 : vector<1x256xi1> to vector<1x256xi1>
    %1028 = vector.broadcast %1027 : vector<1x256xi1> to vector<4x256xi1>
    %1029 = vector.broadcast %cst_291 : f32 to vector<4x256xf32>
    %1030 = arith.select %1028, %1026, %1029 : vector<4x256xi1>, vector<4x256xf32>
    %1031 = vector.extract_strided_slice %2 {offsets = [0, 0], sizes = [4, 1], strides = [1, 1]} : vector<4x49xf32> to vector<4x1xf32>
    %1032 = vector.broadcast %1031 : vector<4x1xf32> to vector<4x256xf32>
    %1033 = arith.mulf %1032, %1030 : vector<4x256xf32>
    %1034 = arith.addf %1006, %1033 : vector<4x256xf32>
    %c-2_i32_292 = arith.constant -2 : i32
    %1035 = vector.broadcast %c-2_i32_292 : i32 to vector<1x256xi32>
    %1036 = arith.addi %1, %1035 : vector<1x256xi32>
    %c0_i32_293 = arith.constant 0 : i32
    %1037 = vector.broadcast %c0_i32_293 : i32 to vector<1x256xi32>
    %1038 = arith.cmpi sge, %1036, %1037 : vector<1x256xi32>
    %c-2_i32_294 = arith.constant -2 : i32
    %1039 = vector.broadcast %c-2_i32_294 : i32 to vector<1x256xi32>
    %1040 = arith.addi %1, %1039 : vector<1x256xi32>
    %c16_i32_295 = arith.constant 16 : i32
    %1041 = vector.broadcast %c16_i32_295 : i32 to vector<1x256xi32>
    %1042 = arith.cmpi slt, %1040, %1041 : vector<1x256xi32>
    %1043 = arith.andi %1038, %1042 : vector<1x256xi1>
    %1044 = arith.andi %1015, %1043 : vector<1x256xi1>
    %c50_i32_296 = arith.constant 50 : i32
    %1045 = tpu.dynamic_rotate %1005 by %c50_i32_296 dim 1 : vector<4x256xf32>, i32 -> vector<4x256xf32>
    %cst_297 = arith.constant 0.000000e+00 : f32
    %1046 = vector.shape_cast %1044 : vector<1x256xi1> to vector<1x256xi1>
    %1047 = vector.broadcast %1046 : vector<1x256xi1> to vector<4x256xi1>
    %1048 = vector.broadcast %cst_297 : f32 to vector<4x256xf32>
    %1049 = arith.select %1047, %1045, %1048 : vector<4x256xi1>, vector<4x256xf32>
    %1050 = vector.extract_strided_slice %2 {offsets = [0, 1], sizes = [4, 1], strides = [1, 1]} : vector<4x49xf32> to vector<4x1xf32>
    %1051 = vector.broadcast %1050 : vector<4x1xf32> to vector<4x256xf32>
    %1052 = arith.mulf %1051, %1049 : vector<4x256xf32>
    %1053 = arith.addf %1034, %1052 : vector<4x256xf32>
    %c-1_i32_298 = arith.constant -1 : i32
    %1054 = vector.broadcast %c-1_i32_298 : i32 to vector<1x256xi32>
    %1055 = arith.addi %1, %1054 : vector<1x256xi32>
    %c0_i32_299 = arith.constant 0 : i32
    %1056 = vector.broadcast %c0_i32_299 : i32 to vector<1x256xi32>
    %1057 = arith.cmpi sge, %1055, %1056 : vector<1x256xi32>
    %c-1_i32_300 = arith.constant -1 : i32
    %1058 = vector.broadcast %c-1_i32_300 : i32 to vector<1x256xi32>
    %1059 = arith.addi %1, %1058 : vector<1x256xi32>
    %c16_i32_301 = arith.constant 16 : i32
    %1060 = vector.broadcast %c16_i32_301 : i32 to vector<1x256xi32>
    %1061 = arith.cmpi slt, %1059, %1060 : vector<1x256xi32>
    %1062 = arith.andi %1057, %1061 : vector<1x256xi1>
    %1063 = arith.andi %1015, %1062 : vector<1x256xi1>
    %c49_i32_302 = arith.constant 49 : i32
    %1064 = tpu.dynamic_rotate %1005 by %c49_i32_302 dim 1 : vector<4x256xf32>, i32 -> vector<4x256xf32>
    %cst_303 = arith.constant 0.000000e+00 : f32
    %1065 = vector.shape_cast %1063 : vector<1x256xi1> to vector<1x256xi1>
    %1066 = vector.broadcast %1065 : vector<1x256xi1> to vector<4x256xi1>
    %1067 = vector.broadcast %cst_303 : f32 to vector<4x256xf32>
    %1068 = arith.select %1066, %1064, %1067 : vector<4x256xi1>, vector<4x256xf32>
    %1069 = vector.extract_strided_slice %2 {offsets = [0, 2], sizes = [4, 1], strides = [1, 1]} : vector<4x49xf32> to vector<4x1xf32>
    %1070 = vector.broadcast %1069 : vector<4x1xf32> to vector<4x256xf32>
    %1071 = arith.mulf %1070, %1068 : vector<4x256xf32>
    %1072 = arith.addf %1053, %1071 : vector<4x256xf32>
    %c0_i32_304 = arith.constant 0 : i32
    %1073 = vector.broadcast %c0_i32_304 : i32 to vector<1x256xi32>
    %1074 = arith.addi %1, %1073 : vector<1x256xi32>
    %c0_i32_305 = arith.constant 0 : i32
    %1075 = vector.broadcast %c0_i32_305 : i32 to vector<1x256xi32>
    %1076 = arith.cmpi sge, %1074, %1075 : vector<1x256xi32>
    %c0_i32_306 = arith.constant 0 : i32
    %1077 = vector.broadcast %c0_i32_306 : i32 to vector<1x256xi32>
    %1078 = arith.addi %1, %1077 : vector<1x256xi32>
    %c16_i32_307 = arith.constant 16 : i32
    %1079 = vector.broadcast %c16_i32_307 : i32 to vector<1x256xi32>
    %1080 = arith.cmpi slt, %1078, %1079 : vector<1x256xi32>
    %1081 = arith.andi %1076, %1080 : vector<1x256xi1>
    %1082 = arith.andi %1015, %1081 : vector<1x256xi1>
    %c48_i32_308 = arith.constant 48 : i32
    %1083 = tpu.dynamic_rotate %1005 by %c48_i32_308 dim 1 : vector<4x256xf32>, i32 -> vector<4x256xf32>
    %cst_309 = arith.constant 0.000000e+00 : f32
    %1084 = vector.shape_cast %1082 : vector<1x256xi1> to vector<1x256xi1>
    %1085 = vector.broadcast %1084 : vector<1x256xi1> to vector<4x256xi1>
    %1086 = vector.broadcast %cst_309 : f32 to vector<4x256xf32>
    %1087 = arith.select %1085, %1083, %1086 : vector<4x256xi1>, vector<4x256xf32>
    %1088 = vector.extract_strided_slice %2 {offsets = [0, 3], sizes = [4, 1], strides = [1, 1]} : vector<4x49xf32> to vector<4x1xf32>
    %1089 = vector.broadcast %1088 : vector<4x1xf32> to vector<4x256xf32>
    %1090 = arith.mulf %1089, %1087 : vector<4x256xf32>
    %1091 = arith.addf %1072, %1090 : vector<4x256xf32>
    %c1_i32_310 = arith.constant 1 : i32
    %1092 = vector.broadcast %c1_i32_310 : i32 to vector<1x256xi32>
    %1093 = arith.addi %1, %1092 : vector<1x256xi32>
    %c0_i32_311 = arith.constant 0 : i32
    %1094 = vector.broadcast %c0_i32_311 : i32 to vector<1x256xi32>
    %1095 = arith.cmpi sge, %1093, %1094 : vector<1x256xi32>
    %c1_i32_312 = arith.constant 1 : i32
    %1096 = vector.broadcast %c1_i32_312 : i32 to vector<1x256xi32>
    %1097 = arith.addi %1, %1096 : vector<1x256xi32>
    %c16_i32_313 = arith.constant 16 : i32
    %1098 = vector.broadcast %c16_i32_313 : i32 to vector<1x256xi32>
    %1099 = arith.cmpi slt, %1097, %1098 : vector<1x256xi32>
    %1100 = arith.andi %1095, %1099 : vector<1x256xi1>
    %1101 = arith.andi %1015, %1100 : vector<1x256xi1>
    %c47_i32_314 = arith.constant 47 : i32
    %1102 = tpu.dynamic_rotate %1005 by %c47_i32_314 dim 1 : vector<4x256xf32>, i32 -> vector<4x256xf32>
    %cst_315 = arith.constant 0.000000e+00 : f32
    %1103 = vector.shape_cast %1101 : vector<1x256xi1> to vector<1x256xi1>
    %1104 = vector.broadcast %1103 : vector<1x256xi1> to vector<4x256xi1>
    %1105 = vector.broadcast %cst_315 : f32 to vector<4x256xf32>
    %1106 = arith.select %1104, %1102, %1105 : vector<4x256xi1>, vector<4x256xf32>
    %1107 = vector.extract_strided_slice %2 {offsets = [0, 4], sizes = [4, 1], strides = [1, 1]} : vector<4x49xf32> to vector<4x1xf32>
    %1108 = vector.broadcast %1107 : vector<4x1xf32> to vector<4x256xf32>
    %1109 = arith.mulf %1108, %1106 : vector<4x256xf32>
    %1110 = arith.addf %1091, %1109 : vector<4x256xf32>
    %c2_i32_316 = arith.constant 2 : i32
    %1111 = vector.broadcast %c2_i32_316 : i32 to vector<1x256xi32>
    %1112 = arith.addi %1, %1111 : vector<1x256xi32>
    %c0_i32_317 = arith.constant 0 : i32
    %1113 = vector.broadcast %c0_i32_317 : i32 to vector<1x256xi32>
    %1114 = arith.cmpi sge, %1112, %1113 : vector<1x256xi32>
    %c2_i32_318 = arith.constant 2 : i32
    %1115 = vector.broadcast %c2_i32_318 : i32 to vector<1x256xi32>
    %1116 = arith.addi %1, %1115 : vector<1x256xi32>
    %c16_i32_319 = arith.constant 16 : i32
    %1117 = vector.broadcast %c16_i32_319 : i32 to vector<1x256xi32>
    %1118 = arith.cmpi slt, %1116, %1117 : vector<1x256xi32>
    %1119 = arith.andi %1114, %1118 : vector<1x256xi1>
    %1120 = arith.andi %1015, %1119 : vector<1x256xi1>
    %c46_i32_320 = arith.constant 46 : i32
    %1121 = tpu.dynamic_rotate %1005 by %c46_i32_320 dim 1 : vector<4x256xf32>, i32 -> vector<4x256xf32>
    %cst_321 = arith.constant 0.000000e+00 : f32
    %1122 = vector.shape_cast %1120 : vector<1x256xi1> to vector<1x256xi1>
    %1123 = vector.broadcast %1122 : vector<1x256xi1> to vector<4x256xi1>
    %1124 = vector.broadcast %cst_321 : f32 to vector<4x256xf32>
    %1125 = arith.select %1123, %1121, %1124 : vector<4x256xi1>, vector<4x256xf32>
    %1126 = vector.extract_strided_slice %2 {offsets = [0, 5], sizes = [4, 1], strides = [1, 1]} : vector<4x49xf32> to vector<4x1xf32>
    %1127 = vector.broadcast %1126 : vector<4x1xf32> to vector<4x256xf32>
    %1128 = arith.mulf %1127, %1125 : vector<4x256xf32>
    %1129 = arith.addf %1110, %1128 : vector<4x256xf32>
    %c3_i32_322 = arith.constant 3 : i32
    %1130 = vector.broadcast %c3_i32_322 : i32 to vector<1x256xi32>
    %1131 = arith.addi %1, %1130 : vector<1x256xi32>
    %c0_i32_323 = arith.constant 0 : i32
    %1132 = vector.broadcast %c0_i32_323 : i32 to vector<1x256xi32>
    %1133 = arith.cmpi sge, %1131, %1132 : vector<1x256xi32>
    %c3_i32_324 = arith.constant 3 : i32
    %1134 = vector.broadcast %c3_i32_324 : i32 to vector<1x256xi32>
    %1135 = arith.addi %1, %1134 : vector<1x256xi32>
    %c16_i32_325 = arith.constant 16 : i32
    %1136 = vector.broadcast %c16_i32_325 : i32 to vector<1x256xi32>
    %1137 = arith.cmpi slt, %1135, %1136 : vector<1x256xi32>
    %1138 = arith.andi %1133, %1137 : vector<1x256xi1>
    %1139 = arith.andi %1015, %1138 : vector<1x256xi1>
    %c45_i32_326 = arith.constant 45 : i32
    %1140 = tpu.dynamic_rotate %1005 by %c45_i32_326 dim 1 : vector<4x256xf32>, i32 -> vector<4x256xf32>
    %cst_327 = arith.constant 0.000000e+00 : f32
    %1141 = vector.shape_cast %1139 : vector<1x256xi1> to vector<1x256xi1>
    %1142 = vector.broadcast %1141 : vector<1x256xi1> to vector<4x256xi1>
    %1143 = vector.broadcast %cst_327 : f32 to vector<4x256xf32>
    %1144 = arith.select %1142, %1140, %1143 : vector<4x256xi1>, vector<4x256xf32>
    %1145 = vector.extract_strided_slice %2 {offsets = [0, 6], sizes = [4, 1], strides = [1, 1]} : vector<4x49xf32> to vector<4x1xf32>
    %1146 = vector.broadcast %1145 : vector<4x1xf32> to vector<4x256xf32>
    %1147 = arith.mulf %1146, %1144 : vector<4x256xf32>
    %1148 = arith.addf %1129, %1147 : vector<4x256xf32>
    %c-2_i32_328 = arith.constant -2 : i32
    %1149 = vector.broadcast %c-2_i32_328 : i32 to vector<1x256xi32>
    %1150 = arith.addi %0, %1149 : vector<1x256xi32>
    %c0_i32_329 = arith.constant 0 : i32
    %1151 = vector.broadcast %c0_i32_329 : i32 to vector<1x256xi32>
    %1152 = arith.cmpi sge, %1150, %1151 : vector<1x256xi32>
    %c-2_i32_330 = arith.constant -2 : i32
    %1153 = vector.broadcast %c-2_i32_330 : i32 to vector<1x256xi32>
    %1154 = arith.addi %0, %1153 : vector<1x256xi32>
    %c16_i32_331 = arith.constant 16 : i32
    %1155 = vector.broadcast %c16_i32_331 : i32 to vector<1x256xi32>
    %1156 = arith.cmpi slt, %1154, %1155 : vector<1x256xi32>
    %1157 = arith.andi %1152, %1156 : vector<1x256xi1>
    %c-3_i32_332 = arith.constant -3 : i32
    %1158 = vector.broadcast %c-3_i32_332 : i32 to vector<1x256xi32>
    %1159 = arith.addi %1, %1158 : vector<1x256xi32>
    %c0_i32_333 = arith.constant 0 : i32
    %1160 = vector.broadcast %c0_i32_333 : i32 to vector<1x256xi32>
    %1161 = arith.cmpi sge, %1159, %1160 : vector<1x256xi32>
    %c-3_i32_334 = arith.constant -3 : i32
    %1162 = vector.broadcast %c-3_i32_334 : i32 to vector<1x256xi32>
    %1163 = arith.addi %1, %1162 : vector<1x256xi32>
    %c16_i32_335 = arith.constant 16 : i32
    %1164 = vector.broadcast %c16_i32_335 : i32 to vector<1x256xi32>
    %1165 = arith.cmpi slt, %1163, %1164 : vector<1x256xi32>
    %1166 = arith.andi %1161, %1165 : vector<1x256xi1>
    %1167 = arith.andi %1157, %1166 : vector<1x256xi1>
    %c35_i32_336 = arith.constant 35 : i32
    %1168 = tpu.dynamic_rotate %1005 by %c35_i32_336 dim 1 : vector<4x256xf32>, i32 -> vector<4x256xf32>
    %cst_337 = arith.constant 0.000000e+00 : f32
    %1169 = vector.shape_cast %1167 : vector<1x256xi1> to vector<1x256xi1>
    %1170 = vector.broadcast %1169 : vector<1x256xi1> to vector<4x256xi1>
    %1171 = vector.broadcast %cst_337 : f32 to vector<4x256xf32>
    %1172 = arith.select %1170, %1168, %1171 : vector<4x256xi1>, vector<4x256xf32>
    %1173 = vector.extract_strided_slice %2 {offsets = [0, 7], sizes = [4, 1], strides = [1, 1]} : vector<4x49xf32> to vector<4x1xf32>
    %1174 = vector.broadcast %1173 : vector<4x1xf32> to vector<4x256xf32>
    %1175 = arith.mulf %1174, %1172 : vector<4x256xf32>
    %1176 = arith.addf %1148, %1175 : vector<4x256xf32>
    %c-2_i32_338 = arith.constant -2 : i32
    %1177 = vector.broadcast %c-2_i32_338 : i32 to vector<1x256xi32>
    %1178 = arith.addi %1, %1177 : vector<1x256xi32>
    %c0_i32_339 = arith.constant 0 : i32
    %1179 = vector.broadcast %c0_i32_339 : i32 to vector<1x256xi32>
    %1180 = arith.cmpi sge, %1178, %1179 : vector<1x256xi32>
    %c-2_i32_340 = arith.constant -2 : i32
    %1181 = vector.broadcast %c-2_i32_340 : i32 to vector<1x256xi32>
    %1182 = arith.addi %1, %1181 : vector<1x256xi32>
    %c16_i32_341 = arith.constant 16 : i32
    %1183 = vector.broadcast %c16_i32_341 : i32 to vector<1x256xi32>
    %1184 = arith.cmpi slt, %1182, %1183 : vector<1x256xi32>
    %1185 = arith.andi %1180, %1184 : vector<1x256xi1>
    %1186 = arith.andi %1157, %1185 : vector<1x256xi1>
    %c34_i32_342 = arith.constant 34 : i32
    %1187 = tpu.dynamic_rotate %1005 by %c34_i32_342 dim 1 : vector<4x256xf32>, i32 -> vector<4x256xf32>
    %cst_343 = arith.constant 0.000000e+00 : f32
    %1188 = vector.shape_cast %1186 : vector<1x256xi1> to vector<1x256xi1>
    %1189 = vector.broadcast %1188 : vector<1x256xi1> to vector<4x256xi1>
    %1190 = vector.broadcast %cst_343 : f32 to vector<4x256xf32>
    %1191 = arith.select %1189, %1187, %1190 : vector<4x256xi1>, vector<4x256xf32>
    %1192 = vector.extract_strided_slice %2 {offsets = [0, 8], sizes = [4, 1], strides = [1, 1]} : vector<4x49xf32> to vector<4x1xf32>
    %1193 = vector.broadcast %1192 : vector<4x1xf32> to vector<4x256xf32>
    %1194 = arith.mulf %1193, %1191 : vector<4x256xf32>
    %1195 = arith.addf %1176, %1194 : vector<4x256xf32>
    %c-1_i32_344 = arith.constant -1 : i32
    %1196 = vector.broadcast %c-1_i32_344 : i32 to vector<1x256xi32>
    %1197 = arith.addi %1, %1196 : vector<1x256xi32>
    %c0_i32_345 = arith.constant 0 : i32
    %1198 = vector.broadcast %c0_i32_345 : i32 to vector<1x256xi32>
    %1199 = arith.cmpi sge, %1197, %1198 : vector<1x256xi32>
    %c-1_i32_346 = arith.constant -1 : i32
    %1200 = vector.broadcast %c-1_i32_346 : i32 to vector<1x256xi32>
    %1201 = arith.addi %1, %1200 : vector<1x256xi32>
    %c16_i32_347 = arith.constant 16 : i32
    %1202 = vector.broadcast %c16_i32_347 : i32 to vector<1x256xi32>
    %1203 = arith.cmpi slt, %1201, %1202 : vector<1x256xi32>
    %1204 = arith.andi %1199, %1203 : vector<1x256xi1>
    %1205 = arith.andi %1157, %1204 : vector<1x256xi1>
    %c33_i32_348 = arith.constant 33 : i32
    %1206 = tpu.dynamic_rotate %1005 by %c33_i32_348 dim 1 : vector<4x256xf32>, i32 -> vector<4x256xf32>
    %cst_349 = arith.constant 0.000000e+00 : f32
    %1207 = vector.shape_cast %1205 : vector<1x256xi1> to vector<1x256xi1>
    %1208 = vector.broadcast %1207 : vector<1x256xi1> to vector<4x256xi1>
    %1209 = vector.broadcast %cst_349 : f32 to vector<4x256xf32>
    %1210 = arith.select %1208, %1206, %1209 : vector<4x256xi1>, vector<4x256xf32>
    %1211 = vector.extract_strided_slice %2 {offsets = [0, 9], sizes = [4, 1], strides = [1, 1]} : vector<4x49xf32> to vector<4x1xf32>
    %1212 = vector.broadcast %1211 : vector<4x1xf32> to vector<4x256xf32>
    %1213 = arith.mulf %1212, %1210 : vector<4x256xf32>
    %1214 = arith.addf %1195, %1213 : vector<4x256xf32>
    %c0_i32_350 = arith.constant 0 : i32
    %1215 = vector.broadcast %c0_i32_350 : i32 to vector<1x256xi32>
    %1216 = arith.addi %1, %1215 : vector<1x256xi32>
    %c0_i32_351 = arith.constant 0 : i32
    %1217 = vector.broadcast %c0_i32_351 : i32 to vector<1x256xi32>
    %1218 = arith.cmpi sge, %1216, %1217 : vector<1x256xi32>
    %c0_i32_352 = arith.constant 0 : i32
    %1219 = vector.broadcast %c0_i32_352 : i32 to vector<1x256xi32>
    %1220 = arith.addi %1, %1219 : vector<1x256xi32>
    %c16_i32_353 = arith.constant 16 : i32
    %1221 = vector.broadcast %c16_i32_353 : i32 to vector<1x256xi32>
    %1222 = arith.cmpi slt, %1220, %1221 : vector<1x256xi32>
    %1223 = arith.andi %1218, %1222 : vector<1x256xi1>
    %1224 = arith.andi %1157, %1223 : vector<1x256xi1>
    %c32_i32_354 = arith.constant 32 : i32
    %1225 = tpu.dynamic_rotate %1005 by %c32_i32_354 dim 1 : vector<4x256xf32>, i32 -> vector<4x256xf32>
    %cst_355 = arith.constant 0.000000e+00 : f32
    %1226 = vector.shape_cast %1224 : vector<1x256xi1> to vector<1x256xi1>
    %1227 = vector.broadcast %1226 : vector<1x256xi1> to vector<4x256xi1>
    %1228 = vector.broadcast %cst_355 : f32 to vector<4x256xf32>
    %1229 = arith.select %1227, %1225, %1228 : vector<4x256xi1>, vector<4x256xf32>
    %1230 = vector.extract_strided_slice %2 {offsets = [0, 10], sizes = [4, 1], strides = [1, 1]} : vector<4x49xf32> to vector<4x1xf32>
    %1231 = vector.broadcast %1230 : vector<4x1xf32> to vector<4x256xf32>
    %1232 = arith.mulf %1231, %1229 : vector<4x256xf32>
    %1233 = arith.addf %1214, %1232 : vector<4x256xf32>
    %c1_i32_356 = arith.constant 1 : i32
    %1234 = vector.broadcast %c1_i32_356 : i32 to vector<1x256xi32>
    %1235 = arith.addi %1, %1234 : vector<1x256xi32>
    %c0_i32_357 = arith.constant 0 : i32
    %1236 = vector.broadcast %c0_i32_357 : i32 to vector<1x256xi32>
    %1237 = arith.cmpi sge, %1235, %1236 : vector<1x256xi32>
    %c1_i32_358 = arith.constant 1 : i32
    %1238 = vector.broadcast %c1_i32_358 : i32 to vector<1x256xi32>
    %1239 = arith.addi %1, %1238 : vector<1x256xi32>
    %c16_i32_359 = arith.constant 16 : i32
    %1240 = vector.broadcast %c16_i32_359 : i32 to vector<1x256xi32>
    %1241 = arith.cmpi slt, %1239, %1240 : vector<1x256xi32>
    %1242 = arith.andi %1237, %1241 : vector<1x256xi1>
    %1243 = arith.andi %1157, %1242 : vector<1x256xi1>
    %c31_i32_360 = arith.constant 31 : i32
    %1244 = tpu.dynamic_rotate %1005 by %c31_i32_360 dim 1 : vector<4x256xf32>, i32 -> vector<4x256xf32>
    %cst_361 = arith.constant 0.000000e+00 : f32
    %1245 = vector.shape_cast %1243 : vector<1x256xi1> to vector<1x256xi1>
    %1246 = vector.broadcast %1245 : vector<1x256xi1> to vector<4x256xi1>
    %1247 = vector.broadcast %cst_361 : f32 to vector<4x256xf32>
    %1248 = arith.select %1246, %1244, %1247 : vector<4x256xi1>, vector<4x256xf32>
    %1249 = vector.extract_strided_slice %2 {offsets = [0, 11], sizes = [4, 1], strides = [1, 1]} : vector<4x49xf32> to vector<4x1xf32>
    %1250 = vector.broadcast %1249 : vector<4x1xf32> to vector<4x256xf32>
    %1251 = arith.mulf %1250, %1248 : vector<4x256xf32>
    %1252 = arith.addf %1233, %1251 : vector<4x256xf32>
    %c2_i32_362 = arith.constant 2 : i32
    %1253 = vector.broadcast %c2_i32_362 : i32 to vector<1x256xi32>
    %1254 = arith.addi %1, %1253 : vector<1x256xi32>
    %c0_i32_363 = arith.constant 0 : i32
    %1255 = vector.broadcast %c0_i32_363 : i32 to vector<1x256xi32>
    %1256 = arith.cmpi sge, %1254, %1255 : vector<1x256xi32>
    %c2_i32_364 = arith.constant 2 : i32
    %1257 = vector.broadcast %c2_i32_364 : i32 to vector<1x256xi32>
    %1258 = arith.addi %1, %1257 : vector<1x256xi32>
    %c16_i32_365 = arith.constant 16 : i32
    %1259 = vector.broadcast %c16_i32_365 : i32 to vector<1x256xi32>
    %1260 = arith.cmpi slt, %1258, %1259 : vector<1x256xi32>
    %1261 = arith.andi %1256, %1260 : vector<1x256xi1>
    %1262 = arith.andi %1157, %1261 : vector<1x256xi1>
    %c30_i32_366 = arith.constant 30 : i32
    %1263 = tpu.dynamic_rotate %1005 by %c30_i32_366 dim 1 : vector<4x256xf32>, i32 -> vector<4x256xf32>
    %cst_367 = arith.constant 0.000000e+00 : f32
    %1264 = vector.shape_cast %1262 : vector<1x256xi1> to vector<1x256xi1>
    %1265 = vector.broadcast %1264 : vector<1x256xi1> to vector<4x256xi1>
    %1266 = vector.broadcast %cst_367 : f32 to vector<4x256xf32>
    %1267 = arith.select %1265, %1263, %1266 : vector<4x256xi1>, vector<4x256xf32>
    %1268 = vector.extract_strided_slice %2 {offsets = [0, 12], sizes = [4, 1], strides = [1, 1]} : vector<4x49xf32> to vector<4x1xf32>
    %1269 = vector.broadcast %1268 : vector<4x1xf32> to vector<4x256xf32>
    %1270 = arith.mulf %1269, %1267 : vector<4x256xf32>
    %1271 = arith.addf %1252, %1270 : vector<4x256xf32>
    %c3_i32_368 = arith.constant 3 : i32
    %1272 = vector.broadcast %c3_i32_368 : i32 to vector<1x256xi32>
    %1273 = arith.addi %1, %1272 : vector<1x256xi32>
    %c0_i32_369 = arith.constant 0 : i32
    %1274 = vector.broadcast %c0_i32_369 : i32 to vector<1x256xi32>
    %1275 = arith.cmpi sge, %1273, %1274 : vector<1x256xi32>
    %c3_i32_370 = arith.constant 3 : i32
    %1276 = vector.broadcast %c3_i32_370 : i32 to vector<1x256xi32>
    %1277 = arith.addi %1, %1276 : vector<1x256xi32>
    %c16_i32_371 = arith.constant 16 : i32
    %1278 = vector.broadcast %c16_i32_371 : i32 to vector<1x256xi32>
    %1279 = arith.cmpi slt, %1277, %1278 : vector<1x256xi32>
    %1280 = arith.andi %1275, %1279 : vector<1x256xi1>
    %1281 = arith.andi %1157, %1280 : vector<1x256xi1>
    %c29_i32_372 = arith.constant 29 : i32
    %1282 = tpu.dynamic_rotate %1005 by %c29_i32_372 dim 1 : vector<4x256xf32>, i32 -> vector<4x256xf32>
    %cst_373 = arith.constant 0.000000e+00 : f32
    %1283 = vector.shape_cast %1281 : vector<1x256xi1> to vector<1x256xi1>
    %1284 = vector.broadcast %1283 : vector<1x256xi1> to vector<4x256xi1>
    %1285 = vector.broadcast %cst_373 : f32 to vector<4x256xf32>
    %1286 = arith.select %1284, %1282, %1285 : vector<4x256xi1>, vector<4x256xf32>
    %1287 = vector.extract_strided_slice %2 {offsets = [0, 13], sizes = [4, 1], strides = [1, 1]} : vector<4x49xf32> to vector<4x1xf32>
    %1288 = vector.broadcast %1287 : vector<4x1xf32> to vector<4x256xf32>
    %1289 = arith.mulf %1288, %1286 : vector<4x256xf32>
    %1290 = arith.addf %1271, %1289 : vector<4x256xf32>
    %c-1_i32_374 = arith.constant -1 : i32
    %1291 = vector.broadcast %c-1_i32_374 : i32 to vector<1x256xi32>
    %1292 = arith.addi %0, %1291 : vector<1x256xi32>
    %c0_i32_375 = arith.constant 0 : i32
    %1293 = vector.broadcast %c0_i32_375 : i32 to vector<1x256xi32>
    %1294 = arith.cmpi sge, %1292, %1293 : vector<1x256xi32>
    %c-1_i32_376 = arith.constant -1 : i32
    %1295 = vector.broadcast %c-1_i32_376 : i32 to vector<1x256xi32>
    %1296 = arith.addi %0, %1295 : vector<1x256xi32>
    %c16_i32_377 = arith.constant 16 : i32
    %1297 = vector.broadcast %c16_i32_377 : i32 to vector<1x256xi32>
    %1298 = arith.cmpi slt, %1296, %1297 : vector<1x256xi32>
    %1299 = arith.andi %1294, %1298 : vector<1x256xi1>
    %c-3_i32_378 = arith.constant -3 : i32
    %1300 = vector.broadcast %c-3_i32_378 : i32 to vector<1x256xi32>
    %1301 = arith.addi %1, %1300 : vector<1x256xi32>
    %c0_i32_379 = arith.constant 0 : i32
    %1302 = vector.broadcast %c0_i32_379 : i32 to vector<1x256xi32>
    %1303 = arith.cmpi sge, %1301, %1302 : vector<1x256xi32>
    %c-3_i32_380 = arith.constant -3 : i32
    %1304 = vector.broadcast %c-3_i32_380 : i32 to vector<1x256xi32>
    %1305 = arith.addi %1, %1304 : vector<1x256xi32>
    %c16_i32_381 = arith.constant 16 : i32
    %1306 = vector.broadcast %c16_i32_381 : i32 to vector<1x256xi32>
    %1307 = arith.cmpi slt, %1305, %1306 : vector<1x256xi32>
    %1308 = arith.andi %1303, %1307 : vector<1x256xi1>
    %1309 = arith.andi %1299, %1308 : vector<1x256xi1>
    %c19_i32_382 = arith.constant 19 : i32
    %1310 = tpu.dynamic_rotate %1005 by %c19_i32_382 dim 1 : vector<4x256xf32>, i32 -> vector<4x256xf32>
    %cst_383 = arith.constant 0.000000e+00 : f32
    %1311 = vector.shape_cast %1309 : vector<1x256xi1> to vector<1x256xi1>
    %1312 = vector.broadcast %1311 : vector<1x256xi1> to vector<4x256xi1>
    %1313 = vector.broadcast %cst_383 : f32 to vector<4x256xf32>
    %1314 = arith.select %1312, %1310, %1313 : vector<4x256xi1>, vector<4x256xf32>
    %1315 = vector.extract_strided_slice %2 {offsets = [0, 14], sizes = [4, 1], strides = [1, 1]} : vector<4x49xf32> to vector<4x1xf32>
    %1316 = vector.broadcast %1315 : vector<4x1xf32> to vector<4x256xf32>
    %1317 = arith.mulf %1316, %1314 : vector<4x256xf32>
    %1318 = arith.addf %1290, %1317 : vector<4x256xf32>
    %c-2_i32_384 = arith.constant -2 : i32
    %1319 = vector.broadcast %c-2_i32_384 : i32 to vector<1x256xi32>
    %1320 = arith.addi %1, %1319 : vector<1x256xi32>
    %c0_i32_385 = arith.constant 0 : i32
    %1321 = vector.broadcast %c0_i32_385 : i32 to vector<1x256xi32>
    %1322 = arith.cmpi sge, %1320, %1321 : vector<1x256xi32>
    %c-2_i32_386 = arith.constant -2 : i32
    %1323 = vector.broadcast %c-2_i32_386 : i32 to vector<1x256xi32>
    %1324 = arith.addi %1, %1323 : vector<1x256xi32>
    %c16_i32_387 = arith.constant 16 : i32
    %1325 = vector.broadcast %c16_i32_387 : i32 to vector<1x256xi32>
    %1326 = arith.cmpi slt, %1324, %1325 : vector<1x256xi32>
    %1327 = arith.andi %1322, %1326 : vector<1x256xi1>
    %1328 = arith.andi %1299, %1327 : vector<1x256xi1>
    %c18_i32_388 = arith.constant 18 : i32
    %1329 = tpu.dynamic_rotate %1005 by %c18_i32_388 dim 1 : vector<4x256xf32>, i32 -> vector<4x256xf32>
    %cst_389 = arith.constant 0.000000e+00 : f32
    %1330 = vector.shape_cast %1328 : vector<1x256xi1> to vector<1x256xi1>
    %1331 = vector.broadcast %1330 : vector<1x256xi1> to vector<4x256xi1>
    %1332 = vector.broadcast %cst_389 : f32 to vector<4x256xf32>
    %1333 = arith.select %1331, %1329, %1332 : vector<4x256xi1>, vector<4x256xf32>
    %1334 = vector.extract_strided_slice %2 {offsets = [0, 15], sizes = [4, 1], strides = [1, 1]} : vector<4x49xf32> to vector<4x1xf32>
    %1335 = vector.broadcast %1334 : vector<4x1xf32> to vector<4x256xf32>
    %1336 = arith.mulf %1335, %1333 : vector<4x256xf32>
    %1337 = arith.addf %1318, %1336 : vector<4x256xf32>
    %c-1_i32_390 = arith.constant -1 : i32
    %1338 = vector.broadcast %c-1_i32_390 : i32 to vector<1x256xi32>
    %1339 = arith.addi %1, %1338 : vector<1x256xi32>
    %c0_i32_391 = arith.constant 0 : i32
    %1340 = vector.broadcast %c0_i32_391 : i32 to vector<1x256xi32>
    %1341 = arith.cmpi sge, %1339, %1340 : vector<1x256xi32>
    %c-1_i32_392 = arith.constant -1 : i32
    %1342 = vector.broadcast %c-1_i32_392 : i32 to vector<1x256xi32>
    %1343 = arith.addi %1, %1342 : vector<1x256xi32>
    %c16_i32_393 = arith.constant 16 : i32
    %1344 = vector.broadcast %c16_i32_393 : i32 to vector<1x256xi32>
    %1345 = arith.cmpi slt, %1343, %1344 : vector<1x256xi32>
    %1346 = arith.andi %1341, %1345 : vector<1x256xi1>
    %1347 = arith.andi %1299, %1346 : vector<1x256xi1>
    %c17_i32_394 = arith.constant 17 : i32
    %1348 = tpu.dynamic_rotate %1005 by %c17_i32_394 dim 1 : vector<4x256xf32>, i32 -> vector<4x256xf32>
    %cst_395 = arith.constant 0.000000e+00 : f32
    %1349 = vector.shape_cast %1347 : vector<1x256xi1> to vector<1x256xi1>
    %1350 = vector.broadcast %1349 : vector<1x256xi1> to vector<4x256xi1>
    %1351 = vector.broadcast %cst_395 : f32 to vector<4x256xf32>
    %1352 = arith.select %1350, %1348, %1351 : vector<4x256xi1>, vector<4x256xf32>
    %1353 = vector.extract_strided_slice %2 {offsets = [0, 16], sizes = [4, 1], strides = [1, 1]} : vector<4x49xf32> to vector<4x1xf32>
    %1354 = vector.broadcast %1353 : vector<4x1xf32> to vector<4x256xf32>
    %1355 = arith.mulf %1354, %1352 : vector<4x256xf32>
    %1356 = arith.addf %1337, %1355 : vector<4x256xf32>
    %c0_i32_396 = arith.constant 0 : i32
    %1357 = vector.broadcast %c0_i32_396 : i32 to vector<1x256xi32>
    %1358 = arith.addi %1, %1357 : vector<1x256xi32>
    %c0_i32_397 = arith.constant 0 : i32
    %1359 = vector.broadcast %c0_i32_397 : i32 to vector<1x256xi32>
    %1360 = arith.cmpi sge, %1358, %1359 : vector<1x256xi32>
    %c0_i32_398 = arith.constant 0 : i32
    %1361 = vector.broadcast %c0_i32_398 : i32 to vector<1x256xi32>
    %1362 = arith.addi %1, %1361 : vector<1x256xi32>
    %c16_i32_399 = arith.constant 16 : i32
    %1363 = vector.broadcast %c16_i32_399 : i32 to vector<1x256xi32>
    %1364 = arith.cmpi slt, %1362, %1363 : vector<1x256xi32>
    %1365 = arith.andi %1360, %1364 : vector<1x256xi1>
    %1366 = arith.andi %1299, %1365 : vector<1x256xi1>
    %c16_i32_400 = arith.constant 16 : i32
    %1367 = tpu.dynamic_rotate %1005 by %c16_i32_400 dim 1 : vector<4x256xf32>, i32 -> vector<4x256xf32>
    %cst_401 = arith.constant 0.000000e+00 : f32
    %1368 = vector.shape_cast %1366 : vector<1x256xi1> to vector<1x256xi1>
    %1369 = vector.broadcast %1368 : vector<1x256xi1> to vector<4x256xi1>
    %1370 = vector.broadcast %cst_401 : f32 to vector<4x256xf32>
    %1371 = arith.select %1369, %1367, %1370 : vector<4x256xi1>, vector<4x256xf32>
    %1372 = vector.extract_strided_slice %2 {offsets = [0, 17], sizes = [4, 1], strides = [1, 1]} : vector<4x49xf32> to vector<4x1xf32>
    %1373 = vector.broadcast %1372 : vector<4x1xf32> to vector<4x256xf32>
    %1374 = arith.mulf %1373, %1371 : vector<4x256xf32>
    %1375 = arith.addf %1356, %1374 : vector<4x256xf32>
    %c1_i32_402 = arith.constant 1 : i32
    %1376 = vector.broadcast %c1_i32_402 : i32 to vector<1x256xi32>
    %1377 = arith.addi %1, %1376 : vector<1x256xi32>
    %c0_i32_403 = arith.constant 0 : i32
    %1378 = vector.broadcast %c0_i32_403 : i32 to vector<1x256xi32>
    %1379 = arith.cmpi sge, %1377, %1378 : vector<1x256xi32>
    %c1_i32_404 = arith.constant 1 : i32
    %1380 = vector.broadcast %c1_i32_404 : i32 to vector<1x256xi32>
    %1381 = arith.addi %1, %1380 : vector<1x256xi32>
    %c16_i32_405 = arith.constant 16 : i32
    %1382 = vector.broadcast %c16_i32_405 : i32 to vector<1x256xi32>
    %1383 = arith.cmpi slt, %1381, %1382 : vector<1x256xi32>
    %1384 = arith.andi %1379, %1383 : vector<1x256xi1>
    %1385 = arith.andi %1299, %1384 : vector<1x256xi1>
    %c15_i32_406 = arith.constant 15 : i32
    %1386 = tpu.dynamic_rotate %1005 by %c15_i32_406 dim 1 : vector<4x256xf32>, i32 -> vector<4x256xf32>
    %cst_407 = arith.constant 0.000000e+00 : f32
    %1387 = vector.shape_cast %1385 : vector<1x256xi1> to vector<1x256xi1>
    %1388 = vector.broadcast %1387 : vector<1x256xi1> to vector<4x256xi1>
    %1389 = vector.broadcast %cst_407 : f32 to vector<4x256xf32>
    %1390 = arith.select %1388, %1386, %1389 : vector<4x256xi1>, vector<4x256xf32>
    %1391 = vector.extract_strided_slice %2 {offsets = [0, 18], sizes = [4, 1], strides = [1, 1]} : vector<4x49xf32> to vector<4x1xf32>
    %1392 = vector.broadcast %1391 : vector<4x1xf32> to vector<4x256xf32>
    %1393 = arith.mulf %1392, %1390 : vector<4x256xf32>
    %1394 = arith.addf %1375, %1393 : vector<4x256xf32>
    %c2_i32_408 = arith.constant 2 : i32
    %1395 = vector.broadcast %c2_i32_408 : i32 to vector<1x256xi32>
    %1396 = arith.addi %1, %1395 : vector<1x256xi32>
    %c0_i32_409 = arith.constant 0 : i32
    %1397 = vector.broadcast %c0_i32_409 : i32 to vector<1x256xi32>
    %1398 = arith.cmpi sge, %1396, %1397 : vector<1x256xi32>
    %c2_i32_410 = arith.constant 2 : i32
    %1399 = vector.broadcast %c2_i32_410 : i32 to vector<1x256xi32>
    %1400 = arith.addi %1, %1399 : vector<1x256xi32>
    %c16_i32_411 = arith.constant 16 : i32
    %1401 = vector.broadcast %c16_i32_411 : i32 to vector<1x256xi32>
    %1402 = arith.cmpi slt, %1400, %1401 : vector<1x256xi32>
    %1403 = arith.andi %1398, %1402 : vector<1x256xi1>
    %1404 = arith.andi %1299, %1403 : vector<1x256xi1>
    %c14_i32_412 = arith.constant 14 : i32
    %1405 = tpu.dynamic_rotate %1005 by %c14_i32_412 dim 1 : vector<4x256xf32>, i32 -> vector<4x256xf32>
    %cst_413 = arith.constant 0.000000e+00 : f32
    %1406 = vector.shape_cast %1404 : vector<1x256xi1> to vector<1x256xi1>
    %1407 = vector.broadcast %1406 : vector<1x256xi1> to vector<4x256xi1>
    %1408 = vector.broadcast %cst_413 : f32 to vector<4x256xf32>
    %1409 = arith.select %1407, %1405, %1408 : vector<4x256xi1>, vector<4x256xf32>
    %1410 = vector.extract_strided_slice %2 {offsets = [0, 19], sizes = [4, 1], strides = [1, 1]} : vector<4x49xf32> to vector<4x1xf32>
    %1411 = vector.broadcast %1410 : vector<4x1xf32> to vector<4x256xf32>
    %1412 = arith.mulf %1411, %1409 : vector<4x256xf32>
    %1413 = arith.addf %1394, %1412 : vector<4x256xf32>
    %c3_i32_414 = arith.constant 3 : i32
    %1414 = vector.broadcast %c3_i32_414 : i32 to vector<1x256xi32>
    %1415 = arith.addi %1, %1414 : vector<1x256xi32>
    %c0_i32_415 = arith.constant 0 : i32
    %1416 = vector.broadcast %c0_i32_415 : i32 to vector<1x256xi32>
    %1417 = arith.cmpi sge, %1415, %1416 : vector<1x256xi32>
    %c3_i32_416 = arith.constant 3 : i32
    %1418 = vector.broadcast %c3_i32_416 : i32 to vector<1x256xi32>
    %1419 = arith.addi %1, %1418 : vector<1x256xi32>
    %c16_i32_417 = arith.constant 16 : i32
    %1420 = vector.broadcast %c16_i32_417 : i32 to vector<1x256xi32>
    %1421 = arith.cmpi slt, %1419, %1420 : vector<1x256xi32>
    %1422 = arith.andi %1417, %1421 : vector<1x256xi1>
    %1423 = arith.andi %1299, %1422 : vector<1x256xi1>
    %c13_i32_418 = arith.constant 13 : i32
    %1424 = tpu.dynamic_rotate %1005 by %c13_i32_418 dim 1 : vector<4x256xf32>, i32 -> vector<4x256xf32>
    %cst_419 = arith.constant 0.000000e+00 : f32
    %1425 = vector.shape_cast %1423 : vector<1x256xi1> to vector<1x256xi1>
    %1426 = vector.broadcast %1425 : vector<1x256xi1> to vector<4x256xi1>
    %1427 = vector.broadcast %cst_419 : f32 to vector<4x256xf32>
    %1428 = arith.select %1426, %1424, %1427 : vector<4x256xi1>, vector<4x256xf32>
    %1429 = vector.extract_strided_slice %2 {offsets = [0, 20], sizes = [4, 1], strides = [1, 1]} : vector<4x49xf32> to vector<4x1xf32>
    %1430 = vector.broadcast %1429 : vector<4x1xf32> to vector<4x256xf32>
    %1431 = arith.mulf %1430, %1428 : vector<4x256xf32>
    %1432 = arith.addf %1413, %1431 : vector<4x256xf32>
    %c0_i32_420 = arith.constant 0 : i32
    %1433 = vector.broadcast %c0_i32_420 : i32 to vector<1x256xi32>
    %1434 = arith.addi %0, %1433 : vector<1x256xi32>
    %c0_i32_421 = arith.constant 0 : i32
    %1435 = vector.broadcast %c0_i32_421 : i32 to vector<1x256xi32>
    %1436 = arith.cmpi sge, %1434, %1435 : vector<1x256xi32>
    %c0_i32_422 = arith.constant 0 : i32
    %1437 = vector.broadcast %c0_i32_422 : i32 to vector<1x256xi32>
    %1438 = arith.addi %0, %1437 : vector<1x256xi32>
    %c16_i32_423 = arith.constant 16 : i32
    %1439 = vector.broadcast %c16_i32_423 : i32 to vector<1x256xi32>
    %1440 = arith.cmpi slt, %1438, %1439 : vector<1x256xi32>
    %1441 = arith.andi %1436, %1440 : vector<1x256xi1>
    %c-3_i32_424 = arith.constant -3 : i32
    %1442 = vector.broadcast %c-3_i32_424 : i32 to vector<1x256xi32>
    %1443 = arith.addi %1, %1442 : vector<1x256xi32>
    %c0_i32_425 = arith.constant 0 : i32
    %1444 = vector.broadcast %c0_i32_425 : i32 to vector<1x256xi32>
    %1445 = arith.cmpi sge, %1443, %1444 : vector<1x256xi32>
    %c-3_i32_426 = arith.constant -3 : i32
    %1446 = vector.broadcast %c-3_i32_426 : i32 to vector<1x256xi32>
    %1447 = arith.addi %1, %1446 : vector<1x256xi32>
    %c16_i32_427 = arith.constant 16 : i32
    %1448 = vector.broadcast %c16_i32_427 : i32 to vector<1x256xi32>
    %1449 = arith.cmpi slt, %1447, %1448 : vector<1x256xi32>
    %1450 = arith.andi %1445, %1449 : vector<1x256xi1>
    %1451 = arith.andi %1441, %1450 : vector<1x256xi1>
    %c3_i32_428 = arith.constant 3 : i32
    %1452 = tpu.dynamic_rotate %1005 by %c3_i32_428 dim 1 : vector<4x256xf32>, i32 -> vector<4x256xf32>
    %cst_429 = arith.constant 0.000000e+00 : f32
    %1453 = vector.shape_cast %1451 : vector<1x256xi1> to vector<1x256xi1>
    %1454 = vector.broadcast %1453 : vector<1x256xi1> to vector<4x256xi1>
    %1455 = vector.broadcast %cst_429 : f32 to vector<4x256xf32>
    %1456 = arith.select %1454, %1452, %1455 : vector<4x256xi1>, vector<4x256xf32>
    %1457 = vector.extract_strided_slice %2 {offsets = [0, 21], sizes = [4, 1], strides = [1, 1]} : vector<4x49xf32> to vector<4x1xf32>
    %1458 = vector.broadcast %1457 : vector<4x1xf32> to vector<4x256xf32>
    %1459 = arith.mulf %1458, %1456 : vector<4x256xf32>
    %1460 = arith.addf %1432, %1459 : vector<4x256xf32>
    %c-2_i32_430 = arith.constant -2 : i32
    %1461 = vector.broadcast %c-2_i32_430 : i32 to vector<1x256xi32>
    %1462 = arith.addi %1, %1461 : vector<1x256xi32>
    %c0_i32_431 = arith.constant 0 : i32
    %1463 = vector.broadcast %c0_i32_431 : i32 to vector<1x256xi32>
    %1464 = arith.cmpi sge, %1462, %1463 : vector<1x256xi32>
    %c-2_i32_432 = arith.constant -2 : i32
    %1465 = vector.broadcast %c-2_i32_432 : i32 to vector<1x256xi32>
    %1466 = arith.addi %1, %1465 : vector<1x256xi32>
    %c16_i32_433 = arith.constant 16 : i32
    %1467 = vector.broadcast %c16_i32_433 : i32 to vector<1x256xi32>
    %1468 = arith.cmpi slt, %1466, %1467 : vector<1x256xi32>
    %1469 = arith.andi %1464, %1468 : vector<1x256xi1>
    %1470 = arith.andi %1441, %1469 : vector<1x256xi1>
    %c2_i32_434 = arith.constant 2 : i32
    %1471 = tpu.dynamic_rotate %1005 by %c2_i32_434 dim 1 : vector<4x256xf32>, i32 -> vector<4x256xf32>
    %cst_435 = arith.constant 0.000000e+00 : f32
    %1472 = vector.shape_cast %1470 : vector<1x256xi1> to vector<1x256xi1>
    %1473 = vector.broadcast %1472 : vector<1x256xi1> to vector<4x256xi1>
    %1474 = vector.broadcast %cst_435 : f32 to vector<4x256xf32>
    %1475 = arith.select %1473, %1471, %1474 : vector<4x256xi1>, vector<4x256xf32>
    %1476 = vector.extract_strided_slice %2 {offsets = [0, 22], sizes = [4, 1], strides = [1, 1]} : vector<4x49xf32> to vector<4x1xf32>
    %1477 = vector.broadcast %1476 : vector<4x1xf32> to vector<4x256xf32>
    %1478 = arith.mulf %1477, %1475 : vector<4x256xf32>
    %1479 = arith.addf %1460, %1478 : vector<4x256xf32>
    %c-1_i32_436 = arith.constant -1 : i32
    %1480 = vector.broadcast %c-1_i32_436 : i32 to vector<1x256xi32>
    %1481 = arith.addi %1, %1480 : vector<1x256xi32>
    %c0_i32_437 = arith.constant 0 : i32
    %1482 = vector.broadcast %c0_i32_437 : i32 to vector<1x256xi32>
    %1483 = arith.cmpi sge, %1481, %1482 : vector<1x256xi32>
    %c-1_i32_438 = arith.constant -1 : i32
    %1484 = vector.broadcast %c-1_i32_438 : i32 to vector<1x256xi32>
    %1485 = arith.addi %1, %1484 : vector<1x256xi32>
    %c16_i32_439 = arith.constant 16 : i32
    %1486 = vector.broadcast %c16_i32_439 : i32 to vector<1x256xi32>
    %1487 = arith.cmpi slt, %1485, %1486 : vector<1x256xi32>
    %1488 = arith.andi %1483, %1487 : vector<1x256xi1>
    %1489 = arith.andi %1441, %1488 : vector<1x256xi1>
    %c1_i32_440 = arith.constant 1 : i32
    %1490 = tpu.dynamic_rotate %1005 by %c1_i32_440 dim 1 : vector<4x256xf32>, i32 -> vector<4x256xf32>
    %cst_441 = arith.constant 0.000000e+00 : f32
    %1491 = vector.shape_cast %1489 : vector<1x256xi1> to vector<1x256xi1>
    %1492 = vector.broadcast %1491 : vector<1x256xi1> to vector<4x256xi1>
    %1493 = vector.broadcast %cst_441 : f32 to vector<4x256xf32>
    %1494 = arith.select %1492, %1490, %1493 : vector<4x256xi1>, vector<4x256xf32>
    %1495 = vector.extract_strided_slice %2 {offsets = [0, 23], sizes = [4, 1], strides = [1, 1]} : vector<4x49xf32> to vector<4x1xf32>
    %1496 = vector.broadcast %1495 : vector<4x1xf32> to vector<4x256xf32>
    %1497 = arith.mulf %1496, %1494 : vector<4x256xf32>
    %1498 = arith.addf %1479, %1497 : vector<4x256xf32>
    %c0_i32_442 = arith.constant 0 : i32
    %1499 = vector.broadcast %c0_i32_442 : i32 to vector<1x256xi32>
    %1500 = arith.addi %1, %1499 : vector<1x256xi32>
    %c0_i32_443 = arith.constant 0 : i32
    %1501 = vector.broadcast %c0_i32_443 : i32 to vector<1x256xi32>
    %1502 = arith.cmpi sge, %1500, %1501 : vector<1x256xi32>
    %c0_i32_444 = arith.constant 0 : i32
    %1503 = vector.broadcast %c0_i32_444 : i32 to vector<1x256xi32>
    %1504 = arith.addi %1, %1503 : vector<1x256xi32>
    %c16_i32_445 = arith.constant 16 : i32
    %1505 = vector.broadcast %c16_i32_445 : i32 to vector<1x256xi32>
    %1506 = arith.cmpi slt, %1504, %1505 : vector<1x256xi32>
    %1507 = arith.andi %1502, %1506 : vector<1x256xi1>
    %1508 = arith.andi %1441, %1507 : vector<1x256xi1>
    %cst_446 = arith.constant 0.000000e+00 : f32
    %1509 = vector.shape_cast %1508 : vector<1x256xi1> to vector<1x256xi1>
    %1510 = vector.broadcast %1509 : vector<1x256xi1> to vector<4x256xi1>
    %1511 = vector.broadcast %cst_446 : f32 to vector<4x256xf32>
    %1512 = arith.select %1510, %1005, %1511 : vector<4x256xi1>, vector<4x256xf32>
    %1513 = vector.extract_strided_slice %2 {offsets = [0, 24], sizes = [4, 1], strides = [1, 1]} : vector<4x49xf32> to vector<4x1xf32>
    %1514 = vector.broadcast %1513 : vector<4x1xf32> to vector<4x256xf32>
    %1515 = arith.mulf %1514, %1512 : vector<4x256xf32>
    %1516 = arith.addf %1498, %1515 : vector<4x256xf32>
    %c1_i32_447 = arith.constant 1 : i32
    %1517 = vector.broadcast %c1_i32_447 : i32 to vector<1x256xi32>
    %1518 = arith.addi %1, %1517 : vector<1x256xi32>
    %c0_i32_448 = arith.constant 0 : i32
    %1519 = vector.broadcast %c0_i32_448 : i32 to vector<1x256xi32>
    %1520 = arith.cmpi sge, %1518, %1519 : vector<1x256xi32>
    %c1_i32_449 = arith.constant 1 : i32
    %1521 = vector.broadcast %c1_i32_449 : i32 to vector<1x256xi32>
    %1522 = arith.addi %1, %1521 : vector<1x256xi32>
    %c16_i32_450 = arith.constant 16 : i32
    %1523 = vector.broadcast %c16_i32_450 : i32 to vector<1x256xi32>
    %1524 = arith.cmpi slt, %1522, %1523 : vector<1x256xi32>
    %1525 = arith.andi %1520, %1524 : vector<1x256xi1>
    %1526 = arith.andi %1441, %1525 : vector<1x256xi1>
    %c255_i32_451 = arith.constant 255 : i32
    %1527 = tpu.dynamic_rotate %1005 by %c255_i32_451 dim 1 : vector<4x256xf32>, i32 -> vector<4x256xf32>
    %cst_452 = arith.constant 0.000000e+00 : f32
    %1528 = vector.shape_cast %1526 : vector<1x256xi1> to vector<1x256xi1>
    %1529 = vector.broadcast %1528 : vector<1x256xi1> to vector<4x256xi1>
    %1530 = vector.broadcast %cst_452 : f32 to vector<4x256xf32>
    %1531 = arith.select %1529, %1527, %1530 : vector<4x256xi1>, vector<4x256xf32>
    %1532 = vector.extract_strided_slice %2 {offsets = [0, 25], sizes = [4, 1], strides = [1, 1]} : vector<4x49xf32> to vector<4x1xf32>
    %1533 = vector.broadcast %1532 : vector<4x1xf32> to vector<4x256xf32>
    %1534 = arith.mulf %1533, %1531 : vector<4x256xf32>
    %1535 = arith.addf %1516, %1534 : vector<4x256xf32>
    %c2_i32_453 = arith.constant 2 : i32
    %1536 = vector.broadcast %c2_i32_453 : i32 to vector<1x256xi32>
    %1537 = arith.addi %1, %1536 : vector<1x256xi32>
    %c0_i32_454 = arith.constant 0 : i32
    %1538 = vector.broadcast %c0_i32_454 : i32 to vector<1x256xi32>
    %1539 = arith.cmpi sge, %1537, %1538 : vector<1x256xi32>
    %c2_i32_455 = arith.constant 2 : i32
    %1540 = vector.broadcast %c2_i32_455 : i32 to vector<1x256xi32>
    %1541 = arith.addi %1, %1540 : vector<1x256xi32>
    %c16_i32_456 = arith.constant 16 : i32
    %1542 = vector.broadcast %c16_i32_456 : i32 to vector<1x256xi32>
    %1543 = arith.cmpi slt, %1541, %1542 : vector<1x256xi32>
    %1544 = arith.andi %1539, %1543 : vector<1x256xi1>
    %1545 = arith.andi %1441, %1544 : vector<1x256xi1>
    %c254_i32_457 = arith.constant 254 : i32
    %1546 = tpu.dynamic_rotate %1005 by %c254_i32_457 dim 1 : vector<4x256xf32>, i32 -> vector<4x256xf32>
    %cst_458 = arith.constant 0.000000e+00 : f32
    %1547 = vector.shape_cast %1545 : vector<1x256xi1> to vector<1x256xi1>
    %1548 = vector.broadcast %1547 : vector<1x256xi1> to vector<4x256xi1>
    %1549 = vector.broadcast %cst_458 : f32 to vector<4x256xf32>
    %1550 = arith.select %1548, %1546, %1549 : vector<4x256xi1>, vector<4x256xf32>
    %1551 = vector.extract_strided_slice %2 {offsets = [0, 26], sizes = [4, 1], strides = [1, 1]} : vector<4x49xf32> to vector<4x1xf32>
    %1552 = vector.broadcast %1551 : vector<4x1xf32> to vector<4x256xf32>
    %1553 = arith.mulf %1552, %1550 : vector<4x256xf32>
    %1554 = arith.addf %1535, %1553 : vector<4x256xf32>
    %c3_i32_459 = arith.constant 3 : i32
    %1555 = vector.broadcast %c3_i32_459 : i32 to vector<1x256xi32>
    %1556 = arith.addi %1, %1555 : vector<1x256xi32>
    %c0_i32_460 = arith.constant 0 : i32
    %1557 = vector.broadcast %c0_i32_460 : i32 to vector<1x256xi32>
    %1558 = arith.cmpi sge, %1556, %1557 : vector<1x256xi32>
    %c3_i32_461 = arith.constant 3 : i32
    %1559 = vector.broadcast %c3_i32_461 : i32 to vector<1x256xi32>
    %1560 = arith.addi %1, %1559 : vector<1x256xi32>
    %c16_i32_462 = arith.constant 16 : i32
    %1561 = vector.broadcast %c16_i32_462 : i32 to vector<1x256xi32>
    %1562 = arith.cmpi slt, %1560, %1561 : vector<1x256xi32>
    %1563 = arith.andi %1558, %1562 : vector<1x256xi1>
    %1564 = arith.andi %1441, %1563 : vector<1x256xi1>
    %c253_i32_463 = arith.constant 253 : i32
    %1565 = tpu.dynamic_rotate %1005 by %c253_i32_463 dim 1 : vector<4x256xf32>, i32 -> vector<4x256xf32>
    %cst_464 = arith.constant 0.000000e+00 : f32
    %1566 = vector.shape_cast %1564 : vector<1x256xi1> to vector<1x256xi1>
    %1567 = vector.broadcast %1566 : vector<1x256xi1> to vector<4x256xi1>
    %1568 = vector.broadcast %cst_464 : f32 to vector<4x256xf32>
    %1569 = arith.select %1567, %1565, %1568 : vector<4x256xi1>, vector<4x256xf32>
    %1570 = vector.extract_strided_slice %2 {offsets = [0, 27], sizes = [4, 1], strides = [1, 1]} : vector<4x49xf32> to vector<4x1xf32>
    %1571 = vector.broadcast %1570 : vector<4x1xf32> to vector<4x256xf32>
    %1572 = arith.mulf %1571, %1569 : vector<4x256xf32>
    %1573 = arith.addf %1554, %1572 : vector<4x256xf32>
    %c1_i32_465 = arith.constant 1 : i32
    %1574 = vector.broadcast %c1_i32_465 : i32 to vector<1x256xi32>
    %1575 = arith.addi %0, %1574 : vector<1x256xi32>
    %c0_i32_466 = arith.constant 0 : i32
    %1576 = vector.broadcast %c0_i32_466 : i32 to vector<1x256xi32>
    %1577 = arith.cmpi sge, %1575, %1576 : vector<1x256xi32>
    %c1_i32_467 = arith.constant 1 : i32
    %1578 = vector.broadcast %c1_i32_467 : i32 to vector<1x256xi32>
    %1579 = arith.addi %0, %1578 : vector<1x256xi32>
    %c16_i32_468 = arith.constant 16 : i32
    %1580 = vector.broadcast %c16_i32_468 : i32 to vector<1x256xi32>
    %1581 = arith.cmpi slt, %1579, %1580 : vector<1x256xi32>
    %1582 = arith.andi %1577, %1581 : vector<1x256xi1>
    %c-3_i32_469 = arith.constant -3 : i32
    %1583 = vector.broadcast %c-3_i32_469 : i32 to vector<1x256xi32>
    %1584 = arith.addi %1, %1583 : vector<1x256xi32>
    %c0_i32_470 = arith.constant 0 : i32
    %1585 = vector.broadcast %c0_i32_470 : i32 to vector<1x256xi32>
    %1586 = arith.cmpi sge, %1584, %1585 : vector<1x256xi32>
    %c-3_i32_471 = arith.constant -3 : i32
    %1587 = vector.broadcast %c-3_i32_471 : i32 to vector<1x256xi32>
    %1588 = arith.addi %1, %1587 : vector<1x256xi32>
    %c16_i32_472 = arith.constant 16 : i32
    %1589 = vector.broadcast %c16_i32_472 : i32 to vector<1x256xi32>
    %1590 = arith.cmpi slt, %1588, %1589 : vector<1x256xi32>
    %1591 = arith.andi %1586, %1590 : vector<1x256xi1>
    %1592 = arith.andi %1582, %1591 : vector<1x256xi1>
    %c243_i32_473 = arith.constant 243 : i32
    %1593 = tpu.dynamic_rotate %1005 by %c243_i32_473 dim 1 : vector<4x256xf32>, i32 -> vector<4x256xf32>
    %cst_474 = arith.constant 0.000000e+00 : f32
    %1594 = vector.shape_cast %1592 : vector<1x256xi1> to vector<1x256xi1>
    %1595 = vector.broadcast %1594 : vector<1x256xi1> to vector<4x256xi1>
    %1596 = vector.broadcast %cst_474 : f32 to vector<4x256xf32>
    %1597 = arith.select %1595, %1593, %1596 : vector<4x256xi1>, vector<4x256xf32>
    %1598 = vector.extract_strided_slice %2 {offsets = [0, 28], sizes = [4, 1], strides = [1, 1]} : vector<4x49xf32> to vector<4x1xf32>
    %1599 = vector.broadcast %1598 : vector<4x1xf32> to vector<4x256xf32>
    %1600 = arith.mulf %1599, %1597 : vector<4x256xf32>
    %1601 = arith.addf %1573, %1600 : vector<4x256xf32>
    %c-2_i32_475 = arith.constant -2 : i32
    %1602 = vector.broadcast %c-2_i32_475 : i32 to vector<1x256xi32>
    %1603 = arith.addi %1, %1602 : vector<1x256xi32>
    %c0_i32_476 = arith.constant 0 : i32
    %1604 = vector.broadcast %c0_i32_476 : i32 to vector<1x256xi32>
    %1605 = arith.cmpi sge, %1603, %1604 : vector<1x256xi32>
    %c-2_i32_477 = arith.constant -2 : i32
    %1606 = vector.broadcast %c-2_i32_477 : i32 to vector<1x256xi32>
    %1607 = arith.addi %1, %1606 : vector<1x256xi32>
    %c16_i32_478 = arith.constant 16 : i32
    %1608 = vector.broadcast %c16_i32_478 : i32 to vector<1x256xi32>
    %1609 = arith.cmpi slt, %1607, %1608 : vector<1x256xi32>
    %1610 = arith.andi %1605, %1609 : vector<1x256xi1>
    %1611 = arith.andi %1582, %1610 : vector<1x256xi1>
    %c242_i32_479 = arith.constant 242 : i32
    %1612 = tpu.dynamic_rotate %1005 by %c242_i32_479 dim 1 : vector<4x256xf32>, i32 -> vector<4x256xf32>
    %cst_480 = arith.constant 0.000000e+00 : f32
    %1613 = vector.shape_cast %1611 : vector<1x256xi1> to vector<1x256xi1>
    %1614 = vector.broadcast %1613 : vector<1x256xi1> to vector<4x256xi1>
    %1615 = vector.broadcast %cst_480 : f32 to vector<4x256xf32>
    %1616 = arith.select %1614, %1612, %1615 : vector<4x256xi1>, vector<4x256xf32>
    %1617 = vector.extract_strided_slice %2 {offsets = [0, 29], sizes = [4, 1], strides = [1, 1]} : vector<4x49xf32> to vector<4x1xf32>
    %1618 = vector.broadcast %1617 : vector<4x1xf32> to vector<4x256xf32>
    %1619 = arith.mulf %1618, %1616 : vector<4x256xf32>
    %1620 = arith.addf %1601, %1619 : vector<4x256xf32>
    %c-1_i32_481 = arith.constant -1 : i32
    %1621 = vector.broadcast %c-1_i32_481 : i32 to vector<1x256xi32>
    %1622 = arith.addi %1, %1621 : vector<1x256xi32>
    %c0_i32_482 = arith.constant 0 : i32
    %1623 = vector.broadcast %c0_i32_482 : i32 to vector<1x256xi32>
    %1624 = arith.cmpi sge, %1622, %1623 : vector<1x256xi32>
    %c-1_i32_483 = arith.constant -1 : i32
    %1625 = vector.broadcast %c-1_i32_483 : i32 to vector<1x256xi32>
    %1626 = arith.addi %1, %1625 : vector<1x256xi32>
    %c16_i32_484 = arith.constant 16 : i32
    %1627 = vector.broadcast %c16_i32_484 : i32 to vector<1x256xi32>
    %1628 = arith.cmpi slt, %1626, %1627 : vector<1x256xi32>
    %1629 = arith.andi %1624, %1628 : vector<1x256xi1>
    %1630 = arith.andi %1582, %1629 : vector<1x256xi1>
    %c241_i32_485 = arith.constant 241 : i32
    %1631 = tpu.dynamic_rotate %1005 by %c241_i32_485 dim 1 : vector<4x256xf32>, i32 -> vector<4x256xf32>
    %cst_486 = arith.constant 0.000000e+00 : f32
    %1632 = vector.shape_cast %1630 : vector<1x256xi1> to vector<1x256xi1>
    %1633 = vector.broadcast %1632 : vector<1x256xi1> to vector<4x256xi1>
    %1634 = vector.broadcast %cst_486 : f32 to vector<4x256xf32>
    %1635 = arith.select %1633, %1631, %1634 : vector<4x256xi1>, vector<4x256xf32>
    %1636 = vector.extract_strided_slice %2 {offsets = [0, 30], sizes = [4, 1], strides = [1, 1]} : vector<4x49xf32> to vector<4x1xf32>
    %1637 = vector.broadcast %1636 : vector<4x1xf32> to vector<4x256xf32>
    %1638 = arith.mulf %1637, %1635 : vector<4x256xf32>
    %1639 = arith.addf %1620, %1638 : vector<4x256xf32>
    %c0_i32_487 = arith.constant 0 : i32
    %1640 = vector.broadcast %c0_i32_487 : i32 to vector<1x256xi32>
    %1641 = arith.addi %1, %1640 : vector<1x256xi32>
    %c0_i32_488 = arith.constant 0 : i32
    %1642 = vector.broadcast %c0_i32_488 : i32 to vector<1x256xi32>
    %1643 = arith.cmpi sge, %1641, %1642 : vector<1x256xi32>
    %c0_i32_489 = arith.constant 0 : i32
    %1644 = vector.broadcast %c0_i32_489 : i32 to vector<1x256xi32>
    %1645 = arith.addi %1, %1644 : vector<1x256xi32>
    %c16_i32_490 = arith.constant 16 : i32
    %1646 = vector.broadcast %c16_i32_490 : i32 to vector<1x256xi32>
    %1647 = arith.cmpi slt, %1645, %1646 : vector<1x256xi32>
    %1648 = arith.andi %1643, %1647 : vector<1x256xi1>
    %1649 = arith.andi %1582, %1648 : vector<1x256xi1>
    %c240_i32_491 = arith.constant 240 : i32
    %1650 = tpu.dynamic_rotate %1005 by %c240_i32_491 dim 1 : vector<4x256xf32>, i32 -> vector<4x256xf32>
    %cst_492 = arith.constant 0.000000e+00 : f32
    %1651 = vector.shape_cast %1649 : vector<1x256xi1> to vector<1x256xi1>
    %1652 = vector.broadcast %1651 : vector<1x256xi1> to vector<4x256xi1>
    %1653 = vector.broadcast %cst_492 : f32 to vector<4x256xf32>
    %1654 = arith.select %1652, %1650, %1653 : vector<4x256xi1>, vector<4x256xf32>
    %1655 = vector.extract_strided_slice %2 {offsets = [0, 31], sizes = [4, 1], strides = [1, 1]} : vector<4x49xf32> to vector<4x1xf32>
    %1656 = vector.broadcast %1655 : vector<4x1xf32> to vector<4x256xf32>
    %1657 = arith.mulf %1656, %1654 : vector<4x256xf32>
    %1658 = arith.addf %1639, %1657 : vector<4x256xf32>
    %c1_i32_493 = arith.constant 1 : i32
    %1659 = vector.broadcast %c1_i32_493 : i32 to vector<1x256xi32>
    %1660 = arith.addi %1, %1659 : vector<1x256xi32>
    %c0_i32_494 = arith.constant 0 : i32
    %1661 = vector.broadcast %c0_i32_494 : i32 to vector<1x256xi32>
    %1662 = arith.cmpi sge, %1660, %1661 : vector<1x256xi32>
    %c1_i32_495 = arith.constant 1 : i32
    %1663 = vector.broadcast %c1_i32_495 : i32 to vector<1x256xi32>
    %1664 = arith.addi %1, %1663 : vector<1x256xi32>
    %c16_i32_496 = arith.constant 16 : i32
    %1665 = vector.broadcast %c16_i32_496 : i32 to vector<1x256xi32>
    %1666 = arith.cmpi slt, %1664, %1665 : vector<1x256xi32>
    %1667 = arith.andi %1662, %1666 : vector<1x256xi1>
    %1668 = arith.andi %1582, %1667 : vector<1x256xi1>
    %c239_i32_497 = arith.constant 239 : i32
    %1669 = tpu.dynamic_rotate %1005 by %c239_i32_497 dim 1 : vector<4x256xf32>, i32 -> vector<4x256xf32>
    %cst_498 = arith.constant 0.000000e+00 : f32
    %1670 = vector.shape_cast %1668 : vector<1x256xi1> to vector<1x256xi1>
    %1671 = vector.broadcast %1670 : vector<1x256xi1> to vector<4x256xi1>
    %1672 = vector.broadcast %cst_498 : f32 to vector<4x256xf32>
    %1673 = arith.select %1671, %1669, %1672 : vector<4x256xi1>, vector<4x256xf32>
    %1674 = vector.extract_strided_slice %2 {offsets = [0, 32], sizes = [4, 1], strides = [1, 1]} : vector<4x49xf32> to vector<4x1xf32>
    %1675 = vector.broadcast %1674 : vector<4x1xf32> to vector<4x256xf32>
    %1676 = arith.mulf %1675, %1673 : vector<4x256xf32>
    %1677 = arith.addf %1658, %1676 : vector<4x256xf32>
    %c2_i32_499 = arith.constant 2 : i32
    %1678 = vector.broadcast %c2_i32_499 : i32 to vector<1x256xi32>
    %1679 = arith.addi %1, %1678 : vector<1x256xi32>
    %c0_i32_500 = arith.constant 0 : i32
    %1680 = vector.broadcast %c0_i32_500 : i32 to vector<1x256xi32>
    %1681 = arith.cmpi sge, %1679, %1680 : vector<1x256xi32>
    %c2_i32_501 = arith.constant 2 : i32
    %1682 = vector.broadcast %c2_i32_501 : i32 to vector<1x256xi32>
    %1683 = arith.addi %1, %1682 : vector<1x256xi32>
    %c16_i32_502 = arith.constant 16 : i32
    %1684 = vector.broadcast %c16_i32_502 : i32 to vector<1x256xi32>
    %1685 = arith.cmpi slt, %1683, %1684 : vector<1x256xi32>
    %1686 = arith.andi %1681, %1685 : vector<1x256xi1>
    %1687 = arith.andi %1582, %1686 : vector<1x256xi1>
    %c238_i32_503 = arith.constant 238 : i32
    %1688 = tpu.dynamic_rotate %1005 by %c238_i32_503 dim 1 : vector<4x256xf32>, i32 -> vector<4x256xf32>
    %cst_504 = arith.constant 0.000000e+00 : f32
    %1689 = vector.shape_cast %1687 : vector<1x256xi1> to vector<1x256xi1>
    %1690 = vector.broadcast %1689 : vector<1x256xi1> to vector<4x256xi1>
    %1691 = vector.broadcast %cst_504 : f32 to vector<4x256xf32>
    %1692 = arith.select %1690, %1688, %1691 : vector<4x256xi1>, vector<4x256xf32>
    %1693 = vector.extract_strided_slice %2 {offsets = [0, 33], sizes = [4, 1], strides = [1, 1]} : vector<4x49xf32> to vector<4x1xf32>
    %1694 = vector.broadcast %1693 : vector<4x1xf32> to vector<4x256xf32>
    %1695 = arith.mulf %1694, %1692 : vector<4x256xf32>
    %1696 = arith.addf %1677, %1695 : vector<4x256xf32>
    %c3_i32_505 = arith.constant 3 : i32
    %1697 = vector.broadcast %c3_i32_505 : i32 to vector<1x256xi32>
    %1698 = arith.addi %1, %1697 : vector<1x256xi32>
    %c0_i32_506 = arith.constant 0 : i32
    %1699 = vector.broadcast %c0_i32_506 : i32 to vector<1x256xi32>
    %1700 = arith.cmpi sge, %1698, %1699 : vector<1x256xi32>
    %c3_i32_507 = arith.constant 3 : i32
    %1701 = vector.broadcast %c3_i32_507 : i32 to vector<1x256xi32>
    %1702 = arith.addi %1, %1701 : vector<1x256xi32>
    %c16_i32_508 = arith.constant 16 : i32
    %1703 = vector.broadcast %c16_i32_508 : i32 to vector<1x256xi32>
    %1704 = arith.cmpi slt, %1702, %1703 : vector<1x256xi32>
    %1705 = arith.andi %1700, %1704 : vector<1x256xi1>
    %1706 = arith.andi %1582, %1705 : vector<1x256xi1>
    %c237_i32_509 = arith.constant 237 : i32
    %1707 = tpu.dynamic_rotate %1005 by %c237_i32_509 dim 1 : vector<4x256xf32>, i32 -> vector<4x256xf32>
    %cst_510 = arith.constant 0.000000e+00 : f32
    %1708 = vector.shape_cast %1706 : vector<1x256xi1> to vector<1x256xi1>
    %1709 = vector.broadcast %1708 : vector<1x256xi1> to vector<4x256xi1>
    %1710 = vector.broadcast %cst_510 : f32 to vector<4x256xf32>
    %1711 = arith.select %1709, %1707, %1710 : vector<4x256xi1>, vector<4x256xf32>
    %1712 = vector.extract_strided_slice %2 {offsets = [0, 34], sizes = [4, 1], strides = [1, 1]} : vector<4x49xf32> to vector<4x1xf32>
    %1713 = vector.broadcast %1712 : vector<4x1xf32> to vector<4x256xf32>
    %1714 = arith.mulf %1713, %1711 : vector<4x256xf32>
    %1715 = arith.addf %1696, %1714 : vector<4x256xf32>
    %c2_i32_511 = arith.constant 2 : i32
    %1716 = vector.broadcast %c2_i32_511 : i32 to vector<1x256xi32>
    %1717 = arith.addi %0, %1716 : vector<1x256xi32>
    %c0_i32_512 = arith.constant 0 : i32
    %1718 = vector.broadcast %c0_i32_512 : i32 to vector<1x256xi32>
    %1719 = arith.cmpi sge, %1717, %1718 : vector<1x256xi32>
    %c2_i32_513 = arith.constant 2 : i32
    %1720 = vector.broadcast %c2_i32_513 : i32 to vector<1x256xi32>
    %1721 = arith.addi %0, %1720 : vector<1x256xi32>
    %c16_i32_514 = arith.constant 16 : i32
    %1722 = vector.broadcast %c16_i32_514 : i32 to vector<1x256xi32>
    %1723 = arith.cmpi slt, %1721, %1722 : vector<1x256xi32>
    %1724 = arith.andi %1719, %1723 : vector<1x256xi1>
    %c-3_i32_515 = arith.constant -3 : i32
    %1725 = vector.broadcast %c-3_i32_515 : i32 to vector<1x256xi32>
    %1726 = arith.addi %1, %1725 : vector<1x256xi32>
    %c0_i32_516 = arith.constant 0 : i32
    %1727 = vector.broadcast %c0_i32_516 : i32 to vector<1x256xi32>
    %1728 = arith.cmpi sge, %1726, %1727 : vector<1x256xi32>
    %c-3_i32_517 = arith.constant -3 : i32
    %1729 = vector.broadcast %c-3_i32_517 : i32 to vector<1x256xi32>
    %1730 = arith.addi %1, %1729 : vector<1x256xi32>
    %c16_i32_518 = arith.constant 16 : i32
    %1731 = vector.broadcast %c16_i32_518 : i32 to vector<1x256xi32>
    %1732 = arith.cmpi slt, %1730, %1731 : vector<1x256xi32>
    %1733 = arith.andi %1728, %1732 : vector<1x256xi1>
    %1734 = arith.andi %1724, %1733 : vector<1x256xi1>
    %c227_i32_519 = arith.constant 227 : i32
    %1735 = tpu.dynamic_rotate %1005 by %c227_i32_519 dim 1 : vector<4x256xf32>, i32 -> vector<4x256xf32>
    %cst_520 = arith.constant 0.000000e+00 : f32
    %1736 = vector.shape_cast %1734 : vector<1x256xi1> to vector<1x256xi1>
    %1737 = vector.broadcast %1736 : vector<1x256xi1> to vector<4x256xi1>
    %1738 = vector.broadcast %cst_520 : f32 to vector<4x256xf32>
    %1739 = arith.select %1737, %1735, %1738 : vector<4x256xi1>, vector<4x256xf32>
    %1740 = vector.extract_strided_slice %2 {offsets = [0, 35], sizes = [4, 1], strides = [1, 1]} : vector<4x49xf32> to vector<4x1xf32>
    %1741 = vector.broadcast %1740 : vector<4x1xf32> to vector<4x256xf32>
    %1742 = arith.mulf %1741, %1739 : vector<4x256xf32>
    %1743 = arith.addf %1715, %1742 : vector<4x256xf32>
    %c-2_i32_521 = arith.constant -2 : i32
    %1744 = vector.broadcast %c-2_i32_521 : i32 to vector<1x256xi32>
    %1745 = arith.addi %1, %1744 : vector<1x256xi32>
    %c0_i32_522 = arith.constant 0 : i32
    %1746 = vector.broadcast %c0_i32_522 : i32 to vector<1x256xi32>
    %1747 = arith.cmpi sge, %1745, %1746 : vector<1x256xi32>
    %c-2_i32_523 = arith.constant -2 : i32
    %1748 = vector.broadcast %c-2_i32_523 : i32 to vector<1x256xi32>
    %1749 = arith.addi %1, %1748 : vector<1x256xi32>
    %c16_i32_524 = arith.constant 16 : i32
    %1750 = vector.broadcast %c16_i32_524 : i32 to vector<1x256xi32>
    %1751 = arith.cmpi slt, %1749, %1750 : vector<1x256xi32>
    %1752 = arith.andi %1747, %1751 : vector<1x256xi1>
    %1753 = arith.andi %1724, %1752 : vector<1x256xi1>
    %c226_i32_525 = arith.constant 226 : i32
    %1754 = tpu.dynamic_rotate %1005 by %c226_i32_525 dim 1 : vector<4x256xf32>, i32 -> vector<4x256xf32>
    %cst_526 = arith.constant 0.000000e+00 : f32
    %1755 = vector.shape_cast %1753 : vector<1x256xi1> to vector<1x256xi1>
    %1756 = vector.broadcast %1755 : vector<1x256xi1> to vector<4x256xi1>
    %1757 = vector.broadcast %cst_526 : f32 to vector<4x256xf32>
    %1758 = arith.select %1756, %1754, %1757 : vector<4x256xi1>, vector<4x256xf32>
    %1759 = vector.extract_strided_slice %2 {offsets = [0, 36], sizes = [4, 1], strides = [1, 1]} : vector<4x49xf32> to vector<4x1xf32>
    %1760 = vector.broadcast %1759 : vector<4x1xf32> to vector<4x256xf32>
    %1761 = arith.mulf %1760, %1758 : vector<4x256xf32>
    %1762 = arith.addf %1743, %1761 : vector<4x256xf32>
    %c-1_i32_527 = arith.constant -1 : i32
    %1763 = vector.broadcast %c-1_i32_527 : i32 to vector<1x256xi32>
    %1764 = arith.addi %1, %1763 : vector<1x256xi32>
    %c0_i32_528 = arith.constant 0 : i32
    %1765 = vector.broadcast %c0_i32_528 : i32 to vector<1x256xi32>
    %1766 = arith.cmpi sge, %1764, %1765 : vector<1x256xi32>
    %c-1_i32_529 = arith.constant -1 : i32
    %1767 = vector.broadcast %c-1_i32_529 : i32 to vector<1x256xi32>
    %1768 = arith.addi %1, %1767 : vector<1x256xi32>
    %c16_i32_530 = arith.constant 16 : i32
    %1769 = vector.broadcast %c16_i32_530 : i32 to vector<1x256xi32>
    %1770 = arith.cmpi slt, %1768, %1769 : vector<1x256xi32>
    %1771 = arith.andi %1766, %1770 : vector<1x256xi1>
    %1772 = arith.andi %1724, %1771 : vector<1x256xi1>
    %c225_i32_531 = arith.constant 225 : i32
    %1773 = tpu.dynamic_rotate %1005 by %c225_i32_531 dim 1 : vector<4x256xf32>, i32 -> vector<4x256xf32>
    %cst_532 = arith.constant 0.000000e+00 : f32
    %1774 = vector.shape_cast %1772 : vector<1x256xi1> to vector<1x256xi1>
    %1775 = vector.broadcast %1774 : vector<1x256xi1> to vector<4x256xi1>
    %1776 = vector.broadcast %cst_532 : f32 to vector<4x256xf32>
    %1777 = arith.select %1775, %1773, %1776 : vector<4x256xi1>, vector<4x256xf32>
    %1778 = vector.extract_strided_slice %2 {offsets = [0, 37], sizes = [4, 1], strides = [1, 1]} : vector<4x49xf32> to vector<4x1xf32>
    %1779 = vector.broadcast %1778 : vector<4x1xf32> to vector<4x256xf32>
    %1780 = arith.mulf %1779, %1777 : vector<4x256xf32>
    %1781 = arith.addf %1762, %1780 : vector<4x256xf32>
    %c0_i32_533 = arith.constant 0 : i32
    %1782 = vector.broadcast %c0_i32_533 : i32 to vector<1x256xi32>
    %1783 = arith.addi %1, %1782 : vector<1x256xi32>
    %c0_i32_534 = arith.constant 0 : i32
    %1784 = vector.broadcast %c0_i32_534 : i32 to vector<1x256xi32>
    %1785 = arith.cmpi sge, %1783, %1784 : vector<1x256xi32>
    %c0_i32_535 = arith.constant 0 : i32
    %1786 = vector.broadcast %c0_i32_535 : i32 to vector<1x256xi32>
    %1787 = arith.addi %1, %1786 : vector<1x256xi32>
    %c16_i32_536 = arith.constant 16 : i32
    %1788 = vector.broadcast %c16_i32_536 : i32 to vector<1x256xi32>
    %1789 = arith.cmpi slt, %1787, %1788 : vector<1x256xi32>
    %1790 = arith.andi %1785, %1789 : vector<1x256xi1>
    %1791 = arith.andi %1724, %1790 : vector<1x256xi1>
    %c224_i32_537 = arith.constant 224 : i32
    %1792 = tpu.dynamic_rotate %1005 by %c224_i32_537 dim 1 : vector<4x256xf32>, i32 -> vector<4x256xf32>
    %cst_538 = arith.constant 0.000000e+00 : f32
    %1793 = vector.shape_cast %1791 : vector<1x256xi1> to vector<1x256xi1>
    %1794 = vector.broadcast %1793 : vector<1x256xi1> to vector<4x256xi1>
    %1795 = vector.broadcast %cst_538 : f32 to vector<4x256xf32>
    %1796 = arith.select %1794, %1792, %1795 : vector<4x256xi1>, vector<4x256xf32>
    %1797 = vector.extract_strided_slice %2 {offsets = [0, 38], sizes = [4, 1], strides = [1, 1]} : vector<4x49xf32> to vector<4x1xf32>
    %1798 = vector.broadcast %1797 : vector<4x1xf32> to vector<4x256xf32>
    %1799 = arith.mulf %1798, %1796 : vector<4x256xf32>
    %1800 = arith.addf %1781, %1799 : vector<4x256xf32>
    %c1_i32_539 = arith.constant 1 : i32
    %1801 = vector.broadcast %c1_i32_539 : i32 to vector<1x256xi32>
    %1802 = arith.addi %1, %1801 : vector<1x256xi32>
    %c0_i32_540 = arith.constant 0 : i32
    %1803 = vector.broadcast %c0_i32_540 : i32 to vector<1x256xi32>
    %1804 = arith.cmpi sge, %1802, %1803 : vector<1x256xi32>
    %c1_i32_541 = arith.constant 1 : i32
    %1805 = vector.broadcast %c1_i32_541 : i32 to vector<1x256xi32>
    %1806 = arith.addi %1, %1805 : vector<1x256xi32>
    %c16_i32_542 = arith.constant 16 : i32
    %1807 = vector.broadcast %c16_i32_542 : i32 to vector<1x256xi32>
    %1808 = arith.cmpi slt, %1806, %1807 : vector<1x256xi32>
    %1809 = arith.andi %1804, %1808 : vector<1x256xi1>
    %1810 = arith.andi %1724, %1809 : vector<1x256xi1>
    %c223_i32_543 = arith.constant 223 : i32
    %1811 = tpu.dynamic_rotate %1005 by %c223_i32_543 dim 1 : vector<4x256xf32>, i32 -> vector<4x256xf32>
    %cst_544 = arith.constant 0.000000e+00 : f32
    %1812 = vector.shape_cast %1810 : vector<1x256xi1> to vector<1x256xi1>
    %1813 = vector.broadcast %1812 : vector<1x256xi1> to vector<4x256xi1>
    %1814 = vector.broadcast %cst_544 : f32 to vector<4x256xf32>
    %1815 = arith.select %1813, %1811, %1814 : vector<4x256xi1>, vector<4x256xf32>
    %1816 = vector.extract_strided_slice %2 {offsets = [0, 39], sizes = [4, 1], strides = [1, 1]} : vector<4x49xf32> to vector<4x1xf32>
    %1817 = vector.broadcast %1816 : vector<4x1xf32> to vector<4x256xf32>
    %1818 = arith.mulf %1817, %1815 : vector<4x256xf32>
    %1819 = arith.addf %1800, %1818 : vector<4x256xf32>
    %c2_i32_545 = arith.constant 2 : i32
    %1820 = vector.broadcast %c2_i32_545 : i32 to vector<1x256xi32>
    %1821 = arith.addi %1, %1820 : vector<1x256xi32>
    %c0_i32_546 = arith.constant 0 : i32
    %1822 = vector.broadcast %c0_i32_546 : i32 to vector<1x256xi32>
    %1823 = arith.cmpi sge, %1821, %1822 : vector<1x256xi32>
    %c2_i32_547 = arith.constant 2 : i32
    %1824 = vector.broadcast %c2_i32_547 : i32 to vector<1x256xi32>
    %1825 = arith.addi %1, %1824 : vector<1x256xi32>
    %c16_i32_548 = arith.constant 16 : i32
    %1826 = vector.broadcast %c16_i32_548 : i32 to vector<1x256xi32>
    %1827 = arith.cmpi slt, %1825, %1826 : vector<1x256xi32>
    %1828 = arith.andi %1823, %1827 : vector<1x256xi1>
    %1829 = arith.andi %1724, %1828 : vector<1x256xi1>
    %c222_i32_549 = arith.constant 222 : i32
    %1830 = tpu.dynamic_rotate %1005 by %c222_i32_549 dim 1 : vector<4x256xf32>, i32 -> vector<4x256xf32>
    %cst_550 = arith.constant 0.000000e+00 : f32
    %1831 = vector.shape_cast %1829 : vector<1x256xi1> to vector<1x256xi1>
    %1832 = vector.broadcast %1831 : vector<1x256xi1> to vector<4x256xi1>
    %1833 = vector.broadcast %cst_550 : f32 to vector<4x256xf32>
    %1834 = arith.select %1832, %1830, %1833 : vector<4x256xi1>, vector<4x256xf32>
    %1835 = vector.extract_strided_slice %2 {offsets = [0, 40], sizes = [4, 1], strides = [1, 1]} : vector<4x49xf32> to vector<4x1xf32>
    %1836 = vector.broadcast %1835 : vector<4x1xf32> to vector<4x256xf32>
    %1837 = arith.mulf %1836, %1834 : vector<4x256xf32>
    %1838 = arith.addf %1819, %1837 : vector<4x256xf32>
    %c3_i32_551 = arith.constant 3 : i32
    %1839 = vector.broadcast %c3_i32_551 : i32 to vector<1x256xi32>
    %1840 = arith.addi %1, %1839 : vector<1x256xi32>
    %c0_i32_552 = arith.constant 0 : i32
    %1841 = vector.broadcast %c0_i32_552 : i32 to vector<1x256xi32>
    %1842 = arith.cmpi sge, %1840, %1841 : vector<1x256xi32>
    %c3_i32_553 = arith.constant 3 : i32
    %1843 = vector.broadcast %c3_i32_553 : i32 to vector<1x256xi32>
    %1844 = arith.addi %1, %1843 : vector<1x256xi32>
    %c16_i32_554 = arith.constant 16 : i32
    %1845 = vector.broadcast %c16_i32_554 : i32 to vector<1x256xi32>
    %1846 = arith.cmpi slt, %1844, %1845 : vector<1x256xi32>
    %1847 = arith.andi %1842, %1846 : vector<1x256xi1>
    %1848 = arith.andi %1724, %1847 : vector<1x256xi1>
    %c221_i32_555 = arith.constant 221 : i32
    %1849 = tpu.dynamic_rotate %1005 by %c221_i32_555 dim 1 : vector<4x256xf32>, i32 -> vector<4x256xf32>
    %cst_556 = arith.constant 0.000000e+00 : f32
    %1850 = vector.shape_cast %1848 : vector<1x256xi1> to vector<1x256xi1>
    %1851 = vector.broadcast %1850 : vector<1x256xi1> to vector<4x256xi1>
    %1852 = vector.broadcast %cst_556 : f32 to vector<4x256xf32>
    %1853 = arith.select %1851, %1849, %1852 : vector<4x256xi1>, vector<4x256xf32>
    %1854 = vector.extract_strided_slice %2 {offsets = [0, 41], sizes = [4, 1], strides = [1, 1]} : vector<4x49xf32> to vector<4x1xf32>
    %1855 = vector.broadcast %1854 : vector<4x1xf32> to vector<4x256xf32>
    %1856 = arith.mulf %1855, %1853 : vector<4x256xf32>
    %1857 = arith.addf %1838, %1856 : vector<4x256xf32>
    %c3_i32_557 = arith.constant 3 : i32
    %1858 = vector.broadcast %c3_i32_557 : i32 to vector<1x256xi32>
    %1859 = arith.addi %0, %1858 : vector<1x256xi32>
    %c0_i32_558 = arith.constant 0 : i32
    %1860 = vector.broadcast %c0_i32_558 : i32 to vector<1x256xi32>
    %1861 = arith.cmpi sge, %1859, %1860 : vector<1x256xi32>
    %c3_i32_559 = arith.constant 3 : i32
    %1862 = vector.broadcast %c3_i32_559 : i32 to vector<1x256xi32>
    %1863 = arith.addi %0, %1862 : vector<1x256xi32>
    %c16_i32_560 = arith.constant 16 : i32
    %1864 = vector.broadcast %c16_i32_560 : i32 to vector<1x256xi32>
    %1865 = arith.cmpi slt, %1863, %1864 : vector<1x256xi32>
    %1866 = arith.andi %1861, %1865 : vector<1x256xi1>
    %c-3_i32_561 = arith.constant -3 : i32
    %1867 = vector.broadcast %c-3_i32_561 : i32 to vector<1x256xi32>
    %1868 = arith.addi %1, %1867 : vector<1x256xi32>
    %c0_i32_562 = arith.constant 0 : i32
    %1869 = vector.broadcast %c0_i32_562 : i32 to vector<1x256xi32>
    %1870 = arith.cmpi sge, %1868, %1869 : vector<1x256xi32>
    %c-3_i32_563 = arith.constant -3 : i32
    %1871 = vector.broadcast %c-3_i32_563 : i32 to vector<1x256xi32>
    %1872 = arith.addi %1, %1871 : vector<1x256xi32>
    %c16_i32_564 = arith.constant 16 : i32
    %1873 = vector.broadcast %c16_i32_564 : i32 to vector<1x256xi32>
    %1874 = arith.cmpi slt, %1872, %1873 : vector<1x256xi32>
    %1875 = arith.andi %1870, %1874 : vector<1x256xi1>
    %1876 = arith.andi %1866, %1875 : vector<1x256xi1>
    %c211_i32_565 = arith.constant 211 : i32
    %1877 = tpu.dynamic_rotate %1005 by %c211_i32_565 dim 1 : vector<4x256xf32>, i32 -> vector<4x256xf32>
    %cst_566 = arith.constant 0.000000e+00 : f32
    %1878 = vector.shape_cast %1876 : vector<1x256xi1> to vector<1x256xi1>
    %1879 = vector.broadcast %1878 : vector<1x256xi1> to vector<4x256xi1>
    %1880 = vector.broadcast %cst_566 : f32 to vector<4x256xf32>
    %1881 = arith.select %1879, %1877, %1880 : vector<4x256xi1>, vector<4x256xf32>
    %1882 = vector.extract_strided_slice %2 {offsets = [0, 42], sizes = [4, 1], strides = [1, 1]} : vector<4x49xf32> to vector<4x1xf32>
    %1883 = vector.broadcast %1882 : vector<4x1xf32> to vector<4x256xf32>
    %1884 = arith.mulf %1883, %1881 : vector<4x256xf32>
    %1885 = arith.addf %1857, %1884 : vector<4x256xf32>
    %c-2_i32_567 = arith.constant -2 : i32
    %1886 = vector.broadcast %c-2_i32_567 : i32 to vector<1x256xi32>
    %1887 = arith.addi %1, %1886 : vector<1x256xi32>
    %c0_i32_568 = arith.constant 0 : i32
    %1888 = vector.broadcast %c0_i32_568 : i32 to vector<1x256xi32>
    %1889 = arith.cmpi sge, %1887, %1888 : vector<1x256xi32>
    %c-2_i32_569 = arith.constant -2 : i32
    %1890 = vector.broadcast %c-2_i32_569 : i32 to vector<1x256xi32>
    %1891 = arith.addi %1, %1890 : vector<1x256xi32>
    %c16_i32_570 = arith.constant 16 : i32
    %1892 = vector.broadcast %c16_i32_570 : i32 to vector<1x256xi32>
    %1893 = arith.cmpi slt, %1891, %1892 : vector<1x256xi32>
    %1894 = arith.andi %1889, %1893 : vector<1x256xi1>
    %1895 = arith.andi %1866, %1894 : vector<1x256xi1>
    %c210_i32_571 = arith.constant 210 : i32
    %1896 = tpu.dynamic_rotate %1005 by %c210_i32_571 dim 1 : vector<4x256xf32>, i32 -> vector<4x256xf32>
    %cst_572 = arith.constant 0.000000e+00 : f32
    %1897 = vector.shape_cast %1895 : vector<1x256xi1> to vector<1x256xi1>
    %1898 = vector.broadcast %1897 : vector<1x256xi1> to vector<4x256xi1>
    %1899 = vector.broadcast %cst_572 : f32 to vector<4x256xf32>
    %1900 = arith.select %1898, %1896, %1899 : vector<4x256xi1>, vector<4x256xf32>
    %1901 = vector.extract_strided_slice %2 {offsets = [0, 43], sizes = [4, 1], strides = [1, 1]} : vector<4x49xf32> to vector<4x1xf32>
    %1902 = vector.broadcast %1901 : vector<4x1xf32> to vector<4x256xf32>
    %1903 = arith.mulf %1902, %1900 : vector<4x256xf32>
    %1904 = arith.addf %1885, %1903 : vector<4x256xf32>
    %c-1_i32_573 = arith.constant -1 : i32
    %1905 = vector.broadcast %c-1_i32_573 : i32 to vector<1x256xi32>
    %1906 = arith.addi %1, %1905 : vector<1x256xi32>
    %c0_i32_574 = arith.constant 0 : i32
    %1907 = vector.broadcast %c0_i32_574 : i32 to vector<1x256xi32>
    %1908 = arith.cmpi sge, %1906, %1907 : vector<1x256xi32>
    %c-1_i32_575 = arith.constant -1 : i32
    %1909 = vector.broadcast %c-1_i32_575 : i32 to vector<1x256xi32>
    %1910 = arith.addi %1, %1909 : vector<1x256xi32>
    %c16_i32_576 = arith.constant 16 : i32
    %1911 = vector.broadcast %c16_i32_576 : i32 to vector<1x256xi32>
    %1912 = arith.cmpi slt, %1910, %1911 : vector<1x256xi32>
    %1913 = arith.andi %1908, %1912 : vector<1x256xi1>
    %1914 = arith.andi %1866, %1913 : vector<1x256xi1>
    %c209_i32_577 = arith.constant 209 : i32
    %1915 = tpu.dynamic_rotate %1005 by %c209_i32_577 dim 1 : vector<4x256xf32>, i32 -> vector<4x256xf32>
    %cst_578 = arith.constant 0.000000e+00 : f32
    %1916 = vector.shape_cast %1914 : vector<1x256xi1> to vector<1x256xi1>
    %1917 = vector.broadcast %1916 : vector<1x256xi1> to vector<4x256xi1>
    %1918 = vector.broadcast %cst_578 : f32 to vector<4x256xf32>
    %1919 = arith.select %1917, %1915, %1918 : vector<4x256xi1>, vector<4x256xf32>
    %1920 = vector.extract_strided_slice %2 {offsets = [0, 44], sizes = [4, 1], strides = [1, 1]} : vector<4x49xf32> to vector<4x1xf32>
    %1921 = vector.broadcast %1920 : vector<4x1xf32> to vector<4x256xf32>
    %1922 = arith.mulf %1921, %1919 : vector<4x256xf32>
    %1923 = arith.addf %1904, %1922 : vector<4x256xf32>
    %c0_i32_579 = arith.constant 0 : i32
    %1924 = vector.broadcast %c0_i32_579 : i32 to vector<1x256xi32>
    %1925 = arith.addi %1, %1924 : vector<1x256xi32>
    %c0_i32_580 = arith.constant 0 : i32
    %1926 = vector.broadcast %c0_i32_580 : i32 to vector<1x256xi32>
    %1927 = arith.cmpi sge, %1925, %1926 : vector<1x256xi32>
    %c0_i32_581 = arith.constant 0 : i32
    %1928 = vector.broadcast %c0_i32_581 : i32 to vector<1x256xi32>
    %1929 = arith.addi %1, %1928 : vector<1x256xi32>
    %c16_i32_582 = arith.constant 16 : i32
    %1930 = vector.broadcast %c16_i32_582 : i32 to vector<1x256xi32>
    %1931 = arith.cmpi slt, %1929, %1930 : vector<1x256xi32>
    %1932 = arith.andi %1927, %1931 : vector<1x256xi1>
    %1933 = arith.andi %1866, %1932 : vector<1x256xi1>
    %c208_i32_583 = arith.constant 208 : i32
    %1934 = tpu.dynamic_rotate %1005 by %c208_i32_583 dim 1 : vector<4x256xf32>, i32 -> vector<4x256xf32>
    %cst_584 = arith.constant 0.000000e+00 : f32
    %1935 = vector.shape_cast %1933 : vector<1x256xi1> to vector<1x256xi1>
    %1936 = vector.broadcast %1935 : vector<1x256xi1> to vector<4x256xi1>
    %1937 = vector.broadcast %cst_584 : f32 to vector<4x256xf32>
    %1938 = arith.select %1936, %1934, %1937 : vector<4x256xi1>, vector<4x256xf32>
    %1939 = vector.extract_strided_slice %2 {offsets = [0, 45], sizes = [4, 1], strides = [1, 1]} : vector<4x49xf32> to vector<4x1xf32>
    %1940 = vector.broadcast %1939 : vector<4x1xf32> to vector<4x256xf32>
    %1941 = arith.mulf %1940, %1938 : vector<4x256xf32>
    %1942 = arith.addf %1923, %1941 : vector<4x256xf32>
    %c1_i32_585 = arith.constant 1 : i32
    %1943 = vector.broadcast %c1_i32_585 : i32 to vector<1x256xi32>
    %1944 = arith.addi %1, %1943 : vector<1x256xi32>
    %c0_i32_586 = arith.constant 0 : i32
    %1945 = vector.broadcast %c0_i32_586 : i32 to vector<1x256xi32>
    %1946 = arith.cmpi sge, %1944, %1945 : vector<1x256xi32>
    %c1_i32_587 = arith.constant 1 : i32
    %1947 = vector.broadcast %c1_i32_587 : i32 to vector<1x256xi32>
    %1948 = arith.addi %1, %1947 : vector<1x256xi32>
    %c16_i32_588 = arith.constant 16 : i32
    %1949 = vector.broadcast %c16_i32_588 : i32 to vector<1x256xi32>
    %1950 = arith.cmpi slt, %1948, %1949 : vector<1x256xi32>
    %1951 = arith.andi %1946, %1950 : vector<1x256xi1>
    %1952 = arith.andi %1866, %1951 : vector<1x256xi1>
    %c207_i32_589 = arith.constant 207 : i32
    %1953 = tpu.dynamic_rotate %1005 by %c207_i32_589 dim 1 : vector<4x256xf32>, i32 -> vector<4x256xf32>
    %cst_590 = arith.constant 0.000000e+00 : f32
    %1954 = vector.shape_cast %1952 : vector<1x256xi1> to vector<1x256xi1>
    %1955 = vector.broadcast %1954 : vector<1x256xi1> to vector<4x256xi1>
    %1956 = vector.broadcast %cst_590 : f32 to vector<4x256xf32>
    %1957 = arith.select %1955, %1953, %1956 : vector<4x256xi1>, vector<4x256xf32>
    %1958 = vector.extract_strided_slice %2 {offsets = [0, 46], sizes = [4, 1], strides = [1, 1]} : vector<4x49xf32> to vector<4x1xf32>
    %1959 = vector.broadcast %1958 : vector<4x1xf32> to vector<4x256xf32>
    %1960 = arith.mulf %1959, %1957 : vector<4x256xf32>
    %1961 = arith.addf %1942, %1960 : vector<4x256xf32>
    %c2_i32_591 = arith.constant 2 : i32
    %1962 = vector.broadcast %c2_i32_591 : i32 to vector<1x256xi32>
    %1963 = arith.addi %1, %1962 : vector<1x256xi32>
    %c0_i32_592 = arith.constant 0 : i32
    %1964 = vector.broadcast %c0_i32_592 : i32 to vector<1x256xi32>
    %1965 = arith.cmpi sge, %1963, %1964 : vector<1x256xi32>
    %c2_i32_593 = arith.constant 2 : i32
    %1966 = vector.broadcast %c2_i32_593 : i32 to vector<1x256xi32>
    %1967 = arith.addi %1, %1966 : vector<1x256xi32>
    %c16_i32_594 = arith.constant 16 : i32
    %1968 = vector.broadcast %c16_i32_594 : i32 to vector<1x256xi32>
    %1969 = arith.cmpi slt, %1967, %1968 : vector<1x256xi32>
    %1970 = arith.andi %1965, %1969 : vector<1x256xi1>
    %1971 = arith.andi %1866, %1970 : vector<1x256xi1>
    %c206_i32_595 = arith.constant 206 : i32
    %1972 = tpu.dynamic_rotate %1005 by %c206_i32_595 dim 1 : vector<4x256xf32>, i32 -> vector<4x256xf32>
    %cst_596 = arith.constant 0.000000e+00 : f32
    %1973 = vector.shape_cast %1971 : vector<1x256xi1> to vector<1x256xi1>
    %1974 = vector.broadcast %1973 : vector<1x256xi1> to vector<4x256xi1>
    %1975 = vector.broadcast %cst_596 : f32 to vector<4x256xf32>
    %1976 = arith.select %1974, %1972, %1975 : vector<4x256xi1>, vector<4x256xf32>
    %1977 = vector.extract_strided_slice %2 {offsets = [0, 47], sizes = [4, 1], strides = [1, 1]} : vector<4x49xf32> to vector<4x1xf32>
    %1978 = vector.broadcast %1977 : vector<4x1xf32> to vector<4x256xf32>
    %1979 = arith.mulf %1978, %1976 : vector<4x256xf32>
    %1980 = arith.addf %1961, %1979 : vector<4x256xf32>
    %c3_i32_597 = arith.constant 3 : i32
    %1981 = vector.broadcast %c3_i32_597 : i32 to vector<1x256xi32>
    %1982 = arith.addi %1, %1981 : vector<1x256xi32>
    %c0_i32_598 = arith.constant 0 : i32
    %1983 = vector.broadcast %c0_i32_598 : i32 to vector<1x256xi32>
    %1984 = arith.cmpi sge, %1982, %1983 : vector<1x256xi32>
    %c3_i32_599 = arith.constant 3 : i32
    %1985 = vector.broadcast %c3_i32_599 : i32 to vector<1x256xi32>
    %1986 = arith.addi %1, %1985 : vector<1x256xi32>
    %c16_i32_600 = arith.constant 16 : i32
    %1987 = vector.broadcast %c16_i32_600 : i32 to vector<1x256xi32>
    %1988 = arith.cmpi slt, %1986, %1987 : vector<1x256xi32>
    %1989 = arith.andi %1984, %1988 : vector<1x256xi1>
    %1990 = arith.andi %1866, %1989 : vector<1x256xi1>
    %c205_i32_601 = arith.constant 205 : i32
    %1991 = tpu.dynamic_rotate %1005 by %c205_i32_601 dim 1 : vector<4x256xf32>, i32 -> vector<4x256xf32>
    %cst_602 = arith.constant 0.000000e+00 : f32
    %1992 = vector.shape_cast %1990 : vector<1x256xi1> to vector<1x256xi1>
    %1993 = vector.broadcast %1992 : vector<1x256xi1> to vector<4x256xi1>
    %1994 = vector.broadcast %cst_602 : f32 to vector<4x256xf32>
    %1995 = arith.select %1993, %1991, %1994 : vector<4x256xi1>, vector<4x256xf32>
    %1996 = vector.extract_strided_slice %2 {offsets = [0, 48], sizes = [4, 1], strides = [1, 1]} : vector<4x49xf32> to vector<4x1xf32>
    %1997 = vector.broadcast %1996 : vector<4x1xf32> to vector<4x256xf32>
    %1998 = arith.mulf %1997, %1995 : vector<4x256xf32>
    %1999 = arith.addf %1980, %1998 : vector<4x256xf32>
    %cst_603 = arith.constant dense<0.000000e+00> : vector<4xf32>
    %2000 = vector.multi_reduction <add>, %1999, %cst_603 [1] : vector<4x256xf32> to vector<4xf32>
    %2001 = vector.shape_cast %2000 : vector<4xf32> to vector<4x1xf32>
    %2002 = arith.mulf %1999, %1999 : vector<4x256xf32>
    %cst_604 = arith.constant dense<0.000000e+00> : vector<4xf32>
    %2003 = vector.multi_reduction <add>, %2002, %cst_604 [1] : vector<4x256xf32> to vector<4xf32>
    %2004 = vector.shape_cast %2003 : vector<4xf32> to vector<4x1xf32>
    %2005 = arith.addf %1000, %2001 : vector<4x1xf32>
    %2006 = arith.addf %1003, %2004 : vector<4x1xf32>
    %c0_605 = arith.constant 0 : index
    %c0_606 = arith.constant 0 : index
    %2007 = vector.load %arg7[%c0_605, %c0_606] : memref<4x1xf32, #tpu.memory_space<vmem>>, vector<4x1xf32>
    %c0_607 = arith.constant 0 : index
    %c0_608 = arith.constant 0 : index
    %2008 = vector.load %arg8[%c0_607, %c0_608] : memref<4x1xf32, #tpu.memory_space<vmem>>, vector<4x1xf32>
    %cst_609 = arith.constant 0.001953125 : f32
    %2009 = vector.broadcast %cst_609 : f32 to vector<4x1xf32>
    %2010 = arith.mulf %2005, %2009 : vector<4x1xf32>
    %cst_610 = arith.constant 0.001953125 : f32
    %2011 = vector.broadcast %cst_610 : f32 to vector<4x1xf32>
    %2012 = arith.mulf %2006, %2011 : vector<4x1xf32>
    %2013 = arith.mulf %2010, %2010 : vector<4x1xf32>
    %2014 = arith.subf %2012, %2013 : vector<4x1xf32>
    %cst_611 = arith.constant 0.000000e+00 : f32
    %2015 = vector.broadcast %cst_611 : f32 to vector<4x1xf32>
    %2016 = arith.maximumf %2014, %2015 : vector<4x1xf32>
    %cst_612 = arith.constant 9.99999974E-6 : f32
    %2017 = vector.broadcast %cst_612 : f32 to vector<4x1xf32>
    %2018 = arith.addf %2016, %2017 : vector<4x1xf32>
    %2019 = math.rsqrt %2018 : vector<4x1xf32>
    %2020 = arith.mulf %2007, %2019 : vector<4x1xf32>
    %2021 = arith.mulf %2010, %2020 : vector<4x1xf32>
    %2022 = arith.subf %2008, %2021 : vector<4x1xf32>
    %c0_613 = arith.constant 0 : index
    %c0_614 = arith.constant 0 : index
    %2023 = vector.load %arg4[%c0_613, %c0_614] : memref<4x4xf32, #tpu.memory_space<vmem>>, vector<4x4xf32>
    %2024 = vector.broadcast %2020 : vector<4x1xf32> to vector<4x256xf32>
    %2025 = arith.mulf %998, %2024 : vector<4x256xf32>
    %2026 = vector.broadcast %2022 : vector<4x1xf32> to vector<4x256xf32>
    %2027 = arith.addf %2025, %2026 : vector<4x256xf32>
    %cst_615 = arith.constant 5.000000e-01 : f32
    %2028 = vector.broadcast %cst_615 : f32 to vector<4x256xf32>
    %2029 = arith.mulf %2028, %2027 : vector<4x256xf32>
    %cst_616 = arith.constant 0.707106769 : f32
    %2030 = vector.broadcast %cst_616 : f32 to vector<4x256xf32>
    %2031 = arith.mulf %2027, %2030 : vector<4x256xf32>
    %2032 = math.erf %2031 : vector<4x256xf32>
    %cst_617 = arith.constant 1.000000e+00 : f32
    %2033 = vector.broadcast %cst_617 : f32 to vector<4x256xf32>
    %2034 = arith.addf %2033, %2032 : vector<4x256xf32>
    %2035 = arith.mulf %2029, %2034 : vector<4x256xf32>
    %2036 = vector.extract_strided_slice %2023 {offsets = [0, 0], sizes = [4, 1], strides = [1, 1]} : vector<4x4xf32> to vector<4x1xf32>
    %2037 = vector.extract_strided_slice %2035 {offsets = [0, 0], sizes = [1, 256], strides = [1, 1]} : vector<4x256xf32> to vector<1x256xf32>
    %2038 = vector.broadcast %2036 : vector<4x1xf32> to vector<4x256xf32>
    %2039 = vector.broadcast %2037 : vector<1x256xf32> to vector<4x256xf32>
    %2040 = arith.mulf %2038, %2039 : vector<4x256xf32>
    %2041 = vector.extract_strided_slice %2023 {offsets = [0, 1], sizes = [4, 1], strides = [1, 1]} : vector<4x4xf32> to vector<4x1xf32>
    %2042 = vector.extract_strided_slice %2035 {offsets = [1, 0], sizes = [1, 256], strides = [1, 1]} : vector<4x256xf32> to vector<1x256xf32>
    %2043 = vector.broadcast %2041 : vector<4x1xf32> to vector<4x256xf32>
    %2044 = vector.broadcast %2042 : vector<1x256xf32> to vector<4x256xf32>
    %2045 = arith.mulf %2043, %2044 : vector<4x256xf32>
    %2046 = arith.addf %2040, %2045 : vector<4x256xf32>
    %2047 = vector.extract_strided_slice %2023 {offsets = [0, 2], sizes = [4, 1], strides = [1, 1]} : vector<4x4xf32> to vector<4x1xf32>
    %2048 = vector.extract_strided_slice %2035 {offsets = [2, 0], sizes = [1, 256], strides = [1, 1]} : vector<4x256xf32> to vector<1x256xf32>
    %2049 = vector.broadcast %2047 : vector<4x1xf32> to vector<4x256xf32>
    %2050 = vector.broadcast %2048 : vector<1x256xf32> to vector<4x256xf32>
    %2051 = arith.mulf %2049, %2050 : vector<4x256xf32>
    %2052 = arith.addf %2046, %2051 : vector<4x256xf32>
    %2053 = vector.extract_strided_slice %2023 {offsets = [0, 3], sizes = [4, 1], strides = [1, 1]} : vector<4x4xf32> to vector<4x1xf32>
    %2054 = vector.extract_strided_slice %2035 {offsets = [3, 0], sizes = [1, 256], strides = [1, 1]} : vector<4x256xf32> to vector<1x256xf32>
    %2055 = vector.broadcast %2053 : vector<4x1xf32> to vector<4x256xf32>
    %2056 = vector.broadcast %2054 : vector<1x256xf32> to vector<4x256xf32>
    %2057 = arith.mulf %2055, %2056 : vector<4x256xf32>
    %2058 = arith.addf %2052, %2057 : vector<4x256xf32>
    %cst_618 = arith.constant dense<0.000000e+00> : vector<4xf32>
    %2059 = vector.multi_reduction <add>, %2058, %cst_618 [1] : vector<4x256xf32> to vector<4xf32>
    %2060 = vector.shape_cast %2059 : vector<4xf32> to vector<4x1xf32>
    %2061 = arith.mulf %2058, %2058 : vector<4x256xf32>
    %cst_619 = arith.constant dense<0.000000e+00> : vector<4xf32>
    %2062 = vector.multi_reduction <add>, %2061, %cst_619 [1] : vector<4x256xf32> to vector<4xf32>
    %2063 = vector.shape_cast %2062 : vector<4xf32> to vector<4x1xf32>
    %2064 = vector.broadcast %2020 : vector<4x1xf32> to vector<4x256xf32>
    %2065 = arith.mulf %1999, %2064 : vector<4x256xf32>
    %2066 = vector.broadcast %2022 : vector<4x1xf32> to vector<4x256xf32>
    %2067 = arith.addf %2065, %2066 : vector<4x256xf32>
    %cst_620 = arith.constant 5.000000e-01 : f32
    %2068 = vector.broadcast %cst_620 : f32 to vector<4x256xf32>
    %2069 = arith.mulf %2068, %2067 : vector<4x256xf32>
    %cst_621 = arith.constant 0.707106769 : f32
    %2070 = vector.broadcast %cst_621 : f32 to vector<4x256xf32>
    %2071 = arith.mulf %2067, %2070 : vector<4x256xf32>
    %2072 = math.erf %2071 : vector<4x256xf32>
    %cst_622 = arith.constant 1.000000e+00 : f32
    %2073 = vector.broadcast %cst_622 : f32 to vector<4x256xf32>
    %2074 = arith.addf %2073, %2072 : vector<4x256xf32>
    %2075 = arith.mulf %2069, %2074 : vector<4x256xf32>
    %2076 = vector.extract_strided_slice %2023 {offsets = [0, 0], sizes = [4, 1], strides = [1, 1]} : vector<4x4xf32> to vector<4x1xf32>
    %2077 = vector.extract_strided_slice %2075 {offsets = [0, 0], sizes = [1, 256], strides = [1, 1]} : vector<4x256xf32> to vector<1x256xf32>
    %2078 = vector.broadcast %2076 : vector<4x1xf32> to vector<4x256xf32>
    %2079 = vector.broadcast %2077 : vector<1x256xf32> to vector<4x256xf32>
    %2080 = arith.mulf %2078, %2079 : vector<4x256xf32>
    %2081 = vector.extract_strided_slice %2023 {offsets = [0, 1], sizes = [4, 1], strides = [1, 1]} : vector<4x4xf32> to vector<4x1xf32>
    %2082 = vector.extract_strided_slice %2075 {offsets = [1, 0], sizes = [1, 256], strides = [1, 1]} : vector<4x256xf32> to vector<1x256xf32>
    %2083 = vector.broadcast %2081 : vector<4x1xf32> to vector<4x256xf32>
    %2084 = vector.broadcast %2082 : vector<1x256xf32> to vector<4x256xf32>
    %2085 = arith.mulf %2083, %2084 : vector<4x256xf32>
    %2086 = arith.addf %2080, %2085 : vector<4x256xf32>
    %2087 = vector.extract_strided_slice %2023 {offsets = [0, 2], sizes = [4, 1], strides = [1, 1]} : vector<4x4xf32> to vector<4x1xf32>
    %2088 = vector.extract_strided_slice %2075 {offsets = [2, 0], sizes = [1, 256], strides = [1, 1]} : vector<4x256xf32> to vector<1x256xf32>
    %2089 = vector.broadcast %2087 : vector<4x1xf32> to vector<4x256xf32>
    %2090 = vector.broadcast %2088 : vector<1x256xf32> to vector<4x256xf32>
    %2091 = arith.mulf %2089, %2090 : vector<4x256xf32>
    %2092 = arith.addf %2086, %2091 : vector<4x256xf32>
    %2093 = vector.extract_strided_slice %2023 {offsets = [0, 3], sizes = [4, 1], strides = [1, 1]} : vector<4x4xf32> to vector<4x1xf32>
    %2094 = vector.extract_strided_slice %2075 {offsets = [3, 0], sizes = [1, 256], strides = [1, 1]} : vector<4x256xf32> to vector<1x256xf32>
    %2095 = vector.broadcast %2093 : vector<4x1xf32> to vector<4x256xf32>
    %2096 = vector.broadcast %2094 : vector<1x256xf32> to vector<4x256xf32>
    %2097 = arith.mulf %2095, %2096 : vector<4x256xf32>
    %2098 = arith.addf %2092, %2097 : vector<4x256xf32>
    %cst_623 = arith.constant dense<0.000000e+00> : vector<4xf32>
    %2099 = vector.multi_reduction <add>, %2098, %cst_623 [1] : vector<4x256xf32> to vector<4xf32>
    %2100 = vector.shape_cast %2099 : vector<4xf32> to vector<4x1xf32>
    %2101 = arith.mulf %2098, %2098 : vector<4x256xf32>
    %cst_624 = arith.constant dense<0.000000e+00> : vector<4xf32>
    %2102 = vector.multi_reduction <add>, %2101, %cst_624 [1] : vector<4x256xf32> to vector<4xf32>
    %2103 = vector.shape_cast %2102 : vector<4xf32> to vector<4x1xf32>
    %2104 = arith.addf %2060, %2100 : vector<4x1xf32>
    %2105 = arith.addf %2063, %2103 : vector<4x1xf32>
    %c0_625 = arith.constant 0 : index
    %c0_626 = arith.constant 0 : index
    %2106 = vector.load %arg9[%c0_625, %c0_626] : memref<4x1xf32, #tpu.memory_space<vmem>>, vector<4x1xf32>
    %c0_627 = arith.constant 0 : index
    %c0_628 = arith.constant 0 : index
    %2107 = vector.load %arg10[%c0_627, %c0_628] : memref<4x1xf32, #tpu.memory_space<vmem>>, vector<4x1xf32>
    %cst_629 = arith.constant 0.001953125 : f32
    %2108 = vector.broadcast %cst_629 : f32 to vector<4x1xf32>
    %2109 = arith.mulf %2104, %2108 : vector<4x1xf32>
    %cst_630 = arith.constant 0.001953125 : f32
    %2110 = vector.broadcast %cst_630 : f32 to vector<4x1xf32>
    %2111 = arith.mulf %2105, %2110 : vector<4x1xf32>
    %2112 = arith.mulf %2109, %2109 : vector<4x1xf32>
    %2113 = arith.subf %2111, %2112 : vector<4x1xf32>
    %cst_631 = arith.constant 0.000000e+00 : f32
    %2114 = vector.broadcast %cst_631 : f32 to vector<4x1xf32>
    %2115 = arith.maximumf %2113, %2114 : vector<4x1xf32>
    %cst_632 = arith.constant 9.99999974E-6 : f32
    %2116 = vector.broadcast %cst_632 : f32 to vector<4x1xf32>
    %2117 = arith.addf %2115, %2116 : vector<4x1xf32>
    %2118 = math.rsqrt %2117 : vector<4x1xf32>
    %2119 = arith.mulf %2106, %2118 : vector<4x1xf32>
    %2120 = arith.mulf %2109, %2119 : vector<4x1xf32>
    %2121 = arith.subf %2107, %2120 : vector<4x1xf32>
    %c0_633 = arith.constant 0 : index
    %c0_634 = arith.constant 0 : index
    %2122 = vector.load %arg5[%c0_633, %c0_634] : memref<8x4xf32, #tpu.memory_space<vmem>>, vector<8x4xf32>
    %2123 = vector.broadcast %2119 : vector<4x1xf32> to vector<4x256xf32>
    %2124 = arith.mulf %2058, %2123 : vector<4x256xf32>
    %2125 = vector.broadcast %2121 : vector<4x1xf32> to vector<4x256xf32>
    %2126 = arith.addf %2124, %2125 : vector<4x256xf32>
    %cst_635 = arith.constant 5.000000e-01 : f32
    %2127 = vector.broadcast %cst_635 : f32 to vector<4x256xf32>
    %2128 = arith.mulf %2127, %2126 : vector<4x256xf32>
    %cst_636 = arith.constant 0.707106769 : f32
    %2129 = vector.broadcast %cst_636 : f32 to vector<4x256xf32>
    %2130 = arith.mulf %2126, %2129 : vector<4x256xf32>
    %2131 = math.erf %2130 : vector<4x256xf32>
    %cst_637 = arith.constant 1.000000e+00 : f32
    %2132 = vector.broadcast %cst_637 : f32 to vector<4x256xf32>
    %2133 = arith.addf %2132, %2131 : vector<4x256xf32>
    %2134 = arith.mulf %2128, %2133 : vector<4x256xf32>
    %2135 = vector.extract_strided_slice %2122 {offsets = [0, 0], sizes = [8, 1], strides = [1, 1]} : vector<8x4xf32> to vector<8x1xf32>
    %2136 = vector.extract_strided_slice %2134 {offsets = [0, 0], sizes = [1, 256], strides = [1, 1]} : vector<4x256xf32> to vector<1x256xf32>
    %2137 = vector.broadcast %2135 : vector<8x1xf32> to vector<8x256xf32>
    %2138 = vector.broadcast %2136 : vector<1x256xf32> to vector<8x256xf32>
    %2139 = arith.mulf %2137, %2138 : vector<8x256xf32>
    %2140 = vector.extract_strided_slice %2122 {offsets = [0, 1], sizes = [8, 1], strides = [1, 1]} : vector<8x4xf32> to vector<8x1xf32>
    %2141 = vector.extract_strided_slice %2134 {offsets = [1, 0], sizes = [1, 256], strides = [1, 1]} : vector<4x256xf32> to vector<1x256xf32>
    %2142 = vector.broadcast %2140 : vector<8x1xf32> to vector<8x256xf32>
    %2143 = vector.broadcast %2141 : vector<1x256xf32> to vector<8x256xf32>
    %2144 = arith.mulf %2142, %2143 : vector<8x256xf32>
    %2145 = arith.addf %2139, %2144 : vector<8x256xf32>
    %2146 = vector.extract_strided_slice %2122 {offsets = [0, 2], sizes = [8, 1], strides = [1, 1]} : vector<8x4xf32> to vector<8x1xf32>
    %2147 = vector.extract_strided_slice %2134 {offsets = [2, 0], sizes = [1, 256], strides = [1, 1]} : vector<4x256xf32> to vector<1x256xf32>
    %2148 = vector.broadcast %2146 : vector<8x1xf32> to vector<8x256xf32>
    %2149 = vector.broadcast %2147 : vector<1x256xf32> to vector<8x256xf32>
    %2150 = arith.mulf %2148, %2149 : vector<8x256xf32>
    %2151 = arith.addf %2145, %2150 : vector<8x256xf32>
    %2152 = vector.extract_strided_slice %2122 {offsets = [0, 3], sizes = [8, 1], strides = [1, 1]} : vector<8x4xf32> to vector<8x1xf32>
    %2153 = vector.extract_strided_slice %2134 {offsets = [3, 0], sizes = [1, 256], strides = [1, 1]} : vector<4x256xf32> to vector<1x256xf32>
    %2154 = vector.broadcast %2152 : vector<8x1xf32> to vector<8x256xf32>
    %2155 = vector.broadcast %2153 : vector<1x256xf32> to vector<8x256xf32>
    %2156 = arith.mulf %2154, %2155 : vector<8x256xf32>
    %2157 = arith.addf %2151, %2156 : vector<8x256xf32>
    %cst_638 = arith.constant dense<0.000000e+00> : vector<8xf32>
    %2158 = vector.multi_reduction <add>, %2157, %cst_638 [1] : vector<8x256xf32> to vector<8xf32>
    %2159 = vector.shape_cast %2158 : vector<8xf32> to vector<8x1xf32>
    %2160 = arith.mulf %2157, %2157 : vector<8x256xf32>
    %cst_639 = arith.constant dense<0.000000e+00> : vector<8xf32>
    %2161 = vector.multi_reduction <add>, %2160, %cst_639 [1] : vector<8x256xf32> to vector<8xf32>
    %2162 = vector.shape_cast %2161 : vector<8xf32> to vector<8x1xf32>
    %2163 = vector.broadcast %2119 : vector<4x1xf32> to vector<4x256xf32>
    %2164 = arith.mulf %2098, %2163 : vector<4x256xf32>
    %2165 = vector.broadcast %2121 : vector<4x1xf32> to vector<4x256xf32>
    %2166 = arith.addf %2164, %2165 : vector<4x256xf32>
    %cst_640 = arith.constant 5.000000e-01 : f32
    %2167 = vector.broadcast %cst_640 : f32 to vector<4x256xf32>
    %2168 = arith.mulf %2167, %2166 : vector<4x256xf32>
    %cst_641 = arith.constant 0.707106769 : f32
    %2169 = vector.broadcast %cst_641 : f32 to vector<4x256xf32>
    %2170 = arith.mulf %2166, %2169 : vector<4x256xf32>
    %2171 = math.erf %2170 : vector<4x256xf32>
    %cst_642 = arith.constant 1.000000e+00 : f32
    %2172 = vector.broadcast %cst_642 : f32 to vector<4x256xf32>
    %2173 = arith.addf %2172, %2171 : vector<4x256xf32>
    %2174 = arith.mulf %2168, %2173 : vector<4x256xf32>
    %2175 = vector.extract_strided_slice %2122 {offsets = [0, 0], sizes = [8, 1], strides = [1, 1]} : vector<8x4xf32> to vector<8x1xf32>
    %2176 = vector.extract_strided_slice %2174 {offsets = [0, 0], sizes = [1, 256], strides = [1, 1]} : vector<4x256xf32> to vector<1x256xf32>
    %2177 = vector.broadcast %2175 : vector<8x1xf32> to vector<8x256xf32>
    %2178 = vector.broadcast %2176 : vector<1x256xf32> to vector<8x256xf32>
    %2179 = arith.mulf %2177, %2178 : vector<8x256xf32>
    %2180 = vector.extract_strided_slice %2122 {offsets = [0, 1], sizes = [8, 1], strides = [1, 1]} : vector<8x4xf32> to vector<8x1xf32>
    %2181 = vector.extract_strided_slice %2174 {offsets = [1, 0], sizes = [1, 256], strides = [1, 1]} : vector<4x256xf32> to vector<1x256xf32>
    %2182 = vector.broadcast %2180 : vector<8x1xf32> to vector<8x256xf32>
    %2183 = vector.broadcast %2181 : vector<1x256xf32> to vector<8x256xf32>
    %2184 = arith.mulf %2182, %2183 : vector<8x256xf32>
    %2185 = arith.addf %2179, %2184 : vector<8x256xf32>
    %2186 = vector.extract_strided_slice %2122 {offsets = [0, 2], sizes = [8, 1], strides = [1, 1]} : vector<8x4xf32> to vector<8x1xf32>
    %2187 = vector.extract_strided_slice %2174 {offsets = [2, 0], sizes = [1, 256], strides = [1, 1]} : vector<4x256xf32> to vector<1x256xf32>
    %2188 = vector.broadcast %2186 : vector<8x1xf32> to vector<8x256xf32>
    %2189 = vector.broadcast %2187 : vector<1x256xf32> to vector<8x256xf32>
    %2190 = arith.mulf %2188, %2189 : vector<8x256xf32>
    %2191 = arith.addf %2185, %2190 : vector<8x256xf32>
    %2192 = vector.extract_strided_slice %2122 {offsets = [0, 3], sizes = [8, 1], strides = [1, 1]} : vector<8x4xf32> to vector<8x1xf32>
    %2193 = vector.extract_strided_slice %2174 {offsets = [3, 0], sizes = [1, 256], strides = [1, 1]} : vector<4x256xf32> to vector<1x256xf32>
    %2194 = vector.broadcast %2192 : vector<8x1xf32> to vector<8x256xf32>
    %2195 = vector.broadcast %2193 : vector<1x256xf32> to vector<8x256xf32>
    %2196 = arith.mulf %2194, %2195 : vector<8x256xf32>
    %2197 = arith.addf %2191, %2196 : vector<8x256xf32>
    %cst_643 = arith.constant dense<0.000000e+00> : vector<8xf32>
    %2198 = vector.multi_reduction <add>, %2197, %cst_643 [1] : vector<8x256xf32> to vector<8xf32>
    %2199 = vector.shape_cast %2198 : vector<8xf32> to vector<8x1xf32>
    %2200 = arith.mulf %2197, %2197 : vector<8x256xf32>
    %cst_644 = arith.constant dense<0.000000e+00> : vector<8xf32>
    %2201 = vector.multi_reduction <add>, %2200, %cst_644 [1] : vector<8x256xf32> to vector<8xf32>
    %2202 = vector.shape_cast %2201 : vector<8xf32> to vector<8x1xf32>
    %2203 = arith.addf %2159, %2199 : vector<8x1xf32>
    %2204 = arith.addf %2162, %2202 : vector<8x1xf32>
    %c0_645 = arith.constant 0 : index
    %c0_646 = arith.constant 0 : index
    %2205 = vector.load %arg11[%c0_645, %c0_646] : memref<8x1xf32, #tpu.memory_space<vmem>>, vector<8x1xf32>
    %c0_647 = arith.constant 0 : index
    %c0_648 = arith.constant 0 : index
    %2206 = vector.load %arg12[%c0_647, %c0_648] : memref<8x1xf32, #tpu.memory_space<vmem>>, vector<8x1xf32>
    %cst_649 = arith.constant 0.001953125 : f32
    %2207 = vector.broadcast %cst_649 : f32 to vector<8x1xf32>
    %2208 = arith.mulf %2203, %2207 : vector<8x1xf32>
    %cst_650 = arith.constant 0.001953125 : f32
    %2209 = vector.broadcast %cst_650 : f32 to vector<8x1xf32>
    %2210 = arith.mulf %2204, %2209 : vector<8x1xf32>
    %2211 = arith.mulf %2208, %2208 : vector<8x1xf32>
    %2212 = arith.subf %2210, %2211 : vector<8x1xf32>
    %cst_651 = arith.constant 0.000000e+00 : f32
    %2213 = vector.broadcast %cst_651 : f32 to vector<8x1xf32>
    %2214 = arith.maximumf %2212, %2213 : vector<8x1xf32>
    %cst_652 = arith.constant 1.000000e-03 : f32
    %2215 = vector.broadcast %cst_652 : f32 to vector<8x1xf32>
    %2216 = arith.addf %2214, %2215 : vector<8x1xf32>
    %2217 = math.rsqrt %2216 : vector<8x1xf32>
    %2218 = arith.mulf %2205, %2217 : vector<8x1xf32>
    %2219 = arith.mulf %2208, %2218 : vector<8x1xf32>
    %2220 = arith.subf %2206, %2219 : vector<8x1xf32>
    %c0_653 = arith.constant 0 : index
    %c0_654 = arith.constant 0 : index
    %2221 = vector.load %arg6[%c0_653, %c0_654] : memref<8x8xf32, #tpu.memory_space<vmem>>, vector<8x8xf32>
    %2222 = vector.broadcast %2218 : vector<8x1xf32> to vector<8x256xf32>
    %2223 = arith.mulf %2157, %2222 : vector<8x256xf32>
    %2224 = vector.broadcast %2220 : vector<8x1xf32> to vector<8x256xf32>
    %2225 = arith.addf %2223, %2224 : vector<8x256xf32>
    %cst_655 = arith.constant 5.000000e-01 : f32
    %2226 = vector.broadcast %cst_655 : f32 to vector<8x256xf32>
    %2227 = arith.mulf %2226, %2225 : vector<8x256xf32>
    %cst_656 = arith.constant 0.707106769 : f32
    %2228 = vector.broadcast %cst_656 : f32 to vector<8x256xf32>
    %2229 = arith.mulf %2225, %2228 : vector<8x256xf32>
    %2230 = math.erf %2229 : vector<8x256xf32>
    %cst_657 = arith.constant 1.000000e+00 : f32
    %2231 = vector.broadcast %cst_657 : f32 to vector<8x256xf32>
    %2232 = arith.addf %2231, %2230 : vector<8x256xf32>
    %2233 = arith.mulf %2227, %2232 : vector<8x256xf32>
    %2234 = vector.extract_strided_slice %2221 {offsets = [0, 0], sizes = [8, 1], strides = [1, 1]} : vector<8x8xf32> to vector<8x1xf32>
    %2235 = vector.extract_strided_slice %2233 {offsets = [0, 0], sizes = [1, 256], strides = [1, 1]} : vector<8x256xf32> to vector<1x256xf32>
    %2236 = vector.broadcast %2234 : vector<8x1xf32> to vector<8x256xf32>
    %2237 = vector.broadcast %2235 : vector<1x256xf32> to vector<8x256xf32>
    %2238 = arith.mulf %2236, %2237 : vector<8x256xf32>
    %2239 = vector.extract_strided_slice %2221 {offsets = [0, 1], sizes = [8, 1], strides = [1, 1]} : vector<8x8xf32> to vector<8x1xf32>
    %2240 = vector.extract_strided_slice %2233 {offsets = [1, 0], sizes = [1, 256], strides = [1, 1]} : vector<8x256xf32> to vector<1x256xf32>
    %2241 = vector.broadcast %2239 : vector<8x1xf32> to vector<8x256xf32>
    %2242 = vector.broadcast %2240 : vector<1x256xf32> to vector<8x256xf32>
    %2243 = arith.mulf %2241, %2242 : vector<8x256xf32>
    %2244 = arith.addf %2238, %2243 : vector<8x256xf32>
    %2245 = vector.extract_strided_slice %2221 {offsets = [0, 2], sizes = [8, 1], strides = [1, 1]} : vector<8x8xf32> to vector<8x1xf32>
    %2246 = vector.extract_strided_slice %2233 {offsets = [2, 0], sizes = [1, 256], strides = [1, 1]} : vector<8x256xf32> to vector<1x256xf32>
    %2247 = vector.broadcast %2245 : vector<8x1xf32> to vector<8x256xf32>
    %2248 = vector.broadcast %2246 : vector<1x256xf32> to vector<8x256xf32>
    %2249 = arith.mulf %2247, %2248 : vector<8x256xf32>
    %2250 = arith.addf %2244, %2249 : vector<8x256xf32>
    %2251 = vector.extract_strided_slice %2221 {offsets = [0, 3], sizes = [8, 1], strides = [1, 1]} : vector<8x8xf32> to vector<8x1xf32>
    %2252 = vector.extract_strided_slice %2233 {offsets = [3, 0], sizes = [1, 256], strides = [1, 1]} : vector<8x256xf32> to vector<1x256xf32>
    %2253 = vector.broadcast %2251 : vector<8x1xf32> to vector<8x256xf32>
    %2254 = vector.broadcast %2252 : vector<1x256xf32> to vector<8x256xf32>
    %2255 = arith.mulf %2253, %2254 : vector<8x256xf32>
    %2256 = arith.addf %2250, %2255 : vector<8x256xf32>
    %2257 = vector.extract_strided_slice %2221 {offsets = [0, 4], sizes = [8, 1], strides = [1, 1]} : vector<8x8xf32> to vector<8x1xf32>
    %2258 = vector.extract_strided_slice %2233 {offsets = [4, 0], sizes = [1, 256], strides = [1, 1]} : vector<8x256xf32> to vector<1x256xf32>
    %2259 = vector.broadcast %2257 : vector<8x1xf32> to vector<8x256xf32>
    %2260 = vector.broadcast %2258 : vector<1x256xf32> to vector<8x256xf32>
    %2261 = arith.mulf %2259, %2260 : vector<8x256xf32>
    %2262 = arith.addf %2256, %2261 : vector<8x256xf32>
    %2263 = vector.extract_strided_slice %2221 {offsets = [0, 5], sizes = [8, 1], strides = [1, 1]} : vector<8x8xf32> to vector<8x1xf32>
    %2264 = vector.extract_strided_slice %2233 {offsets = [5, 0], sizes = [1, 256], strides = [1, 1]} : vector<8x256xf32> to vector<1x256xf32>
    %2265 = vector.broadcast %2263 : vector<8x1xf32> to vector<8x256xf32>
    %2266 = vector.broadcast %2264 : vector<1x256xf32> to vector<8x256xf32>
    %2267 = arith.mulf %2265, %2266 : vector<8x256xf32>
    %2268 = arith.addf %2262, %2267 : vector<8x256xf32>
    %2269 = vector.extract_strided_slice %2221 {offsets = [0, 6], sizes = [8, 1], strides = [1, 1]} : vector<8x8xf32> to vector<8x1xf32>
    %2270 = vector.extract_strided_slice %2233 {offsets = [6, 0], sizes = [1, 256], strides = [1, 1]} : vector<8x256xf32> to vector<1x256xf32>
    %2271 = vector.broadcast %2269 : vector<8x1xf32> to vector<8x256xf32>
    %2272 = vector.broadcast %2270 : vector<1x256xf32> to vector<8x256xf32>
    %2273 = arith.mulf %2271, %2272 : vector<8x256xf32>
    %2274 = arith.addf %2268, %2273 : vector<8x256xf32>
    %2275 = vector.extract_strided_slice %2221 {offsets = [0, 7], sizes = [8, 1], strides = [1, 1]} : vector<8x8xf32> to vector<8x1xf32>
    %2276 = vector.extract_strided_slice %2233 {offsets = [7, 0], sizes = [1, 256], strides = [1, 1]} : vector<8x256xf32> to vector<1x256xf32>
    %2277 = vector.broadcast %2275 : vector<8x1xf32> to vector<8x256xf32>
    %2278 = vector.broadcast %2276 : vector<1x256xf32> to vector<8x256xf32>
    %2279 = arith.mulf %2277, %2278 : vector<8x256xf32>
    %2280 = arith.addf %2274, %2279 : vector<8x256xf32>
    %cst_658 = arith.constant dense<0.000000e+00> : vector<8xf32>
    %2281 = vector.multi_reduction <add>, %2280, %cst_658 [1] : vector<8x256xf32> to vector<8xf32>
    %2282 = vector.shape_cast %2281 : vector<8xf32> to vector<8x1xf32>
    %2283 = arith.mulf %2280, %2280 : vector<8x256xf32>
    %cst_659 = arith.constant dense<0.000000e+00> : vector<8xf32>
    %2284 = vector.multi_reduction <add>, %2283, %cst_659 [1] : vector<8x256xf32> to vector<8xf32>
    %2285 = vector.shape_cast %2284 : vector<8xf32> to vector<8x1xf32>
    %2286 = vector.broadcast %2218 : vector<8x1xf32> to vector<8x256xf32>
    %2287 = arith.mulf %2197, %2286 : vector<8x256xf32>
    %2288 = vector.broadcast %2220 : vector<8x1xf32> to vector<8x256xf32>
    %2289 = arith.addf %2287, %2288 : vector<8x256xf32>
    %cst_660 = arith.constant 5.000000e-01 : f32
    %2290 = vector.broadcast %cst_660 : f32 to vector<8x256xf32>
    %2291 = arith.mulf %2290, %2289 : vector<8x256xf32>
    %cst_661 = arith.constant 0.707106769 : f32
    %2292 = vector.broadcast %cst_661 : f32 to vector<8x256xf32>
    %2293 = arith.mulf %2289, %2292 : vector<8x256xf32>
    %2294 = math.erf %2293 : vector<8x256xf32>
    %cst_662 = arith.constant 1.000000e+00 : f32
    %2295 = vector.broadcast %cst_662 : f32 to vector<8x256xf32>
    %2296 = arith.addf %2295, %2294 : vector<8x256xf32>
    %2297 = arith.mulf %2291, %2296 : vector<8x256xf32>
    %2298 = vector.extract_strided_slice %2221 {offsets = [0, 0], sizes = [8, 1], strides = [1, 1]} : vector<8x8xf32> to vector<8x1xf32>
    %2299 = vector.extract_strided_slice %2297 {offsets = [0, 0], sizes = [1, 256], strides = [1, 1]} : vector<8x256xf32> to vector<1x256xf32>
    %2300 = vector.broadcast %2298 : vector<8x1xf32> to vector<8x256xf32>
    %2301 = vector.broadcast %2299 : vector<1x256xf32> to vector<8x256xf32>
    %2302 = arith.mulf %2300, %2301 : vector<8x256xf32>
    %2303 = vector.extract_strided_slice %2221 {offsets = [0, 1], sizes = [8, 1], strides = [1, 1]} : vector<8x8xf32> to vector<8x1xf32>
    %2304 = vector.extract_strided_slice %2297 {offsets = [1, 0], sizes = [1, 256], strides = [1, 1]} : vector<8x256xf32> to vector<1x256xf32>
    %2305 = vector.broadcast %2303 : vector<8x1xf32> to vector<8x256xf32>
    %2306 = vector.broadcast %2304 : vector<1x256xf32> to vector<8x256xf32>
    %2307 = arith.mulf %2305, %2306 : vector<8x256xf32>
    %2308 = arith.addf %2302, %2307 : vector<8x256xf32>
    %2309 = vector.extract_strided_slice %2221 {offsets = [0, 2], sizes = [8, 1], strides = [1, 1]} : vector<8x8xf32> to vector<8x1xf32>
    %2310 = vector.extract_strided_slice %2297 {offsets = [2, 0], sizes = [1, 256], strides = [1, 1]} : vector<8x256xf32> to vector<1x256xf32>
    %2311 = vector.broadcast %2309 : vector<8x1xf32> to vector<8x256xf32>
    %2312 = vector.broadcast %2310 : vector<1x256xf32> to vector<8x256xf32>
    %2313 = arith.mulf %2311, %2312 : vector<8x256xf32>
    %2314 = arith.addf %2308, %2313 : vector<8x256xf32>
    %2315 = vector.extract_strided_slice %2221 {offsets = [0, 3], sizes = [8, 1], strides = [1, 1]} : vector<8x8xf32> to vector<8x1xf32>
    %2316 = vector.extract_strided_slice %2297 {offsets = [3, 0], sizes = [1, 256], strides = [1, 1]} : vector<8x256xf32> to vector<1x256xf32>
    %2317 = vector.broadcast %2315 : vector<8x1xf32> to vector<8x256xf32>
    %2318 = vector.broadcast %2316 : vector<1x256xf32> to vector<8x256xf32>
    %2319 = arith.mulf %2317, %2318 : vector<8x256xf32>
    %2320 = arith.addf %2314, %2319 : vector<8x256xf32>
    %2321 = vector.extract_strided_slice %2221 {offsets = [0, 4], sizes = [8, 1], strides = [1, 1]} : vector<8x8xf32> to vector<8x1xf32>
    %2322 = vector.extract_strided_slice %2297 {offsets = [4, 0], sizes = [1, 256], strides = [1, 1]} : vector<8x256xf32> to vector<1x256xf32>
    %2323 = vector.broadcast %2321 : vector<8x1xf32> to vector<8x256xf32>
    %2324 = vector.broadcast %2322 : vector<1x256xf32> to vector<8x256xf32>
    %2325 = arith.mulf %2323, %2324 : vector<8x256xf32>
    %2326 = arith.addf %2320, %2325 : vector<8x256xf32>
    %2327 = vector.extract_strided_slice %2221 {offsets = [0, 5], sizes = [8, 1], strides = [1, 1]} : vector<8x8xf32> to vector<8x1xf32>
    %2328 = vector.extract_strided_slice %2297 {offsets = [5, 0], sizes = [1, 256], strides = [1, 1]} : vector<8x256xf32> to vector<1x256xf32>
    %2329 = vector.broadcast %2327 : vector<8x1xf32> to vector<8x256xf32>
    %2330 = vector.broadcast %2328 : vector<1x256xf32> to vector<8x256xf32>
    %2331 = arith.mulf %2329, %2330 : vector<8x256xf32>
    %2332 = arith.addf %2326, %2331 : vector<8x256xf32>
    %2333 = vector.extract_strided_slice %2221 {offsets = [0, 6], sizes = [8, 1], strides = [1, 1]} : vector<8x8xf32> to vector<8x1xf32>
    %2334 = vector.extract_strided_slice %2297 {offsets = [6, 0], sizes = [1, 256], strides = [1, 1]} : vector<8x256xf32> to vector<1x256xf32>
    %2335 = vector.broadcast %2333 : vector<8x1xf32> to vector<8x256xf32>
    %2336 = vector.broadcast %2334 : vector<1x256xf32> to vector<8x256xf32>
    %2337 = arith.mulf %2335, %2336 : vector<8x256xf32>
    %2338 = arith.addf %2332, %2337 : vector<8x256xf32>
    %2339 = vector.extract_strided_slice %2221 {offsets = [0, 7], sizes = [8, 1], strides = [1, 1]} : vector<8x8xf32> to vector<8x1xf32>
    %2340 = vector.extract_strided_slice %2297 {offsets = [7, 0], sizes = [1, 256], strides = [1, 1]} : vector<8x256xf32> to vector<1x256xf32>
    %2341 = vector.broadcast %2339 : vector<8x1xf32> to vector<8x256xf32>
    %2342 = vector.broadcast %2340 : vector<1x256xf32> to vector<8x256xf32>
    %2343 = arith.mulf %2341, %2342 : vector<8x256xf32>
    %2344 = arith.addf %2338, %2343 : vector<8x256xf32>
    %cst_663 = arith.constant dense<0.000000e+00> : vector<8xf32>
    %2345 = vector.multi_reduction <add>, %2344, %cst_663 [1] : vector<8x256xf32> to vector<8xf32>
    %2346 = vector.shape_cast %2345 : vector<8xf32> to vector<8x1xf32>
    %2347 = arith.mulf %2344, %2344 : vector<8x256xf32>
    %cst_664 = arith.constant dense<0.000000e+00> : vector<8xf32>
    %2348 = vector.multi_reduction <add>, %2347, %cst_664 [1] : vector<8x256xf32> to vector<8xf32>
    %2349 = vector.shape_cast %2348 : vector<8xf32> to vector<8x1xf32>
    %2350 = arith.addf %2282, %2346 : vector<8x1xf32>
    %2351 = arith.addf %2285, %2349 : vector<8x1xf32>
    %c0_665 = arith.constant 0 : index
    %c0_666 = arith.constant 0 : index
    %2352 = vector.load %arg13[%c0_665, %c0_666] : memref<8x1xf32, #tpu.memory_space<vmem>>, vector<8x1xf32>
    %c0_667 = arith.constant 0 : index
    %c0_668 = arith.constant 0 : index
    %2353 = vector.load %arg14[%c0_667, %c0_668] : memref<8x1xf32, #tpu.memory_space<vmem>>, vector<8x1xf32>
    %cst_669 = arith.constant 0.001953125 : f32
    %2354 = vector.broadcast %cst_669 : f32 to vector<8x1xf32>
    %2355 = arith.mulf %2350, %2354 : vector<8x1xf32>
    %cst_670 = arith.constant 0.001953125 : f32
    %2356 = vector.broadcast %cst_670 : f32 to vector<8x1xf32>
    %2357 = arith.mulf %2351, %2356 : vector<8x1xf32>
    %2358 = arith.mulf %2355, %2355 : vector<8x1xf32>
    %2359 = arith.subf %2357, %2358 : vector<8x1xf32>
    %cst_671 = arith.constant 0.000000e+00 : f32
    %2360 = vector.broadcast %cst_671 : f32 to vector<8x1xf32>
    %2361 = arith.maximumf %2359, %2360 : vector<8x1xf32>
    %cst_672 = arith.constant 1.000000e-03 : f32
    %2362 = vector.broadcast %cst_672 : f32 to vector<8x1xf32>
    %2363 = arith.addf %2361, %2362 : vector<8x1xf32>
    %2364 = math.rsqrt %2363 : vector<8x1xf32>
    %2365 = arith.mulf %2352, %2364 : vector<8x1xf32>
    %2366 = arith.mulf %2355, %2365 : vector<8x1xf32>
    %2367 = arith.subf %2353, %2366 : vector<8x1xf32>
    %2368 = vector.broadcast %2365 : vector<8x1xf32> to vector<8x256xf32>
    %2369 = arith.mulf %2280, %2368 : vector<8x256xf32>
    %2370 = vector.broadcast %2367 : vector<8x1xf32> to vector<8x256xf32>
    %2371 = arith.addf %2369, %2370 : vector<8x256xf32>
    %cst_673 = arith.constant 5.000000e-01 : f32
    %2372 = vector.broadcast %cst_673 : f32 to vector<8x256xf32>
    %2373 = arith.mulf %2372, %2371 : vector<8x256xf32>
    %cst_674 = arith.constant 0.707106769 : f32
    %2374 = vector.broadcast %cst_674 : f32 to vector<8x256xf32>
    %2375 = arith.mulf %2371, %2374 : vector<8x256xf32>
    %2376 = math.erf %2375 : vector<8x256xf32>
    %cst_675 = arith.constant 1.000000e+00 : f32
    %2377 = vector.broadcast %cst_675 : f32 to vector<8x256xf32>
    %2378 = arith.addf %2377, %2376 : vector<8x256xf32>
    %2379 = arith.mulf %2373, %2378 : vector<8x256xf32>
    %c0_676 = arith.constant 0 : index
    %c0_677 = arith.constant 0 : index
    %c0_678 = arith.constant 0 : index
    %2380 = vector.load %arg15[%c0_676, %c0_677, %c0_678] : memref<2x8x256xf32, #tpu.memory_space<vmem>>, vector<1x8x256xf32>
    %2381 = vector.shape_cast %2380 : vector<1x8x256xf32> to vector<8x256xf32>
    %2382 = vector.shape_cast %2379 : vector<8x256xf32> to vector<1x8x256xf32>
    tpu.vector_store %arg15[%c0_676, %c0_677, %c0_678], %2382 {strides = array<i32>} : memref<2x8x256xf32, #tpu.memory_space<vmem>>, vector<1x8x256xf32>,
    %2383 = vector.broadcast %2365 : vector<8x1xf32> to vector<8x256xf32>
    %2384 = arith.mulf %2344, %2383 : vector<8x256xf32>
    %2385 = vector.broadcast %2367 : vector<8x1xf32> to vector<8x256xf32>
    %2386 = arith.addf %2384, %2385 : vector<8x256xf32>
    %cst_679 = arith.constant 5.000000e-01 : f32
    %2387 = vector.broadcast %cst_679 : f32 to vector<8x256xf32>
    %2388 = arith.mulf %2387, %2386 : vector<8x256xf32>
    %cst_680 = arith.constant 0.707106769 : f32
    %2389 = vector.broadcast %cst_680 : f32 to vector<8x256xf32>
    %2390 = arith.mulf %2386, %2389 : vector<8x256xf32>
    %2391 = math.erf %2390 : vector<8x256xf32>
    %cst_681 = arith.constant 1.000000e+00 : f32
    %2392 = vector.broadcast %cst_681 : f32 to vector<8x256xf32>
    %2393 = arith.addf %2392, %2391 : vector<8x256xf32>
    %2394 = arith.mulf %2388, %2393 : vector<8x256xf32>
    %c1_682 = arith.constant 1 : index
    %c0_683 = arith.constant 0 : index
    %c0_684 = arith.constant 0 : index
    %2395 = vector.load %arg15[%c1_682, %c0_683, %c0_684] : memref<2x8x256xf32, #tpu.memory_space<vmem>>, vector<1x8x256xf32>
    %2396 = vector.shape_cast %2395 : vector<1x8x256xf32> to vector<8x256xf32>
    %2397 = vector.shape_cast %2394 : vector<8x256xf32> to vector<1x8x256xf32>
    tpu.vector_store %arg15[%c1_682, %c0_683, %c0_684], %2397 {strides = array<i32>} : memref<2x8x256xf32, #tpu.memory_space<vmem>>, vector<1x8x256xf32>,
    return
  }
}

</mosaic_0001>

<bundles_post_ra>
// kernel: block_dwconv_forward.1
= control target key start
LH: loop header
LB: loop body
LE: loop exit
PB: predicated region body
PF: predicated region fallthrough
CT: control target
= control target key end

     0   :  { %v7688_v0 = vmov 0   ;;  %v7686_v3 = vmov 1   ;;  %s3747_s22 = smov 51   ;;  %v7684_v6 = vmov 2   ;;  %s3749_s23 = smov 50   ;;  %v7682_v9 = vmov 3   ;;  %s7618_s3 = inlined_call_operand.vmem [shape: f32[4,49], index: 3, kind: input, shape index: {}]   ;;  %s7619_s0 = inlined_call_operand.vmem [shape: f32[2,4,256], index: 0, kind: input, shape index: {}]   ;;  %s7620_s1 = inlined_call_operand.vmem [shape: s32[1,256], index: 1, kind: input, shape index: {}]   ;;  %s7621_s2 = inlined_call_operand.vmem [shape: s32[1,256], index: 2, kind: input, shape index: {}]   ;;  %s7622_s4 = inlined_call_operand.vmem [shape: f32[4,4], index: 4, kind: input, shape index: {}]   ;;  %s7623_s7 = inlined_call_operand.vmem [shape: f32[4,1], index: 7, kind: input, shape index: {}]   ;;  %s7624_s8 = inlined_call_operand.vmem [shape: f32[4,1], index: 8, kind: input, shape index: {}]   ;;  %s7625_s5 = inlined_call_operand.vmem [shape: f32[8,4], index: 5, kind: input, shape index: {}]   ;;  %s7626_s9 = inlined_call_operand.vmem [shape: f32[4,1], index: 9, kind: input, shape index: {}]   ;;  %s7627_s10 = inlined_call_operand.vmem [shape: f32[4,1], index: 10, kind: input, shape index: {}]   ;;  %s7628_s6 = inlined_call_operand.vmem [shape: f32[8,8], index: 6, kind: input, shape index: {}]   ;;  %s7629_s11 = inlined_call_operand.vmem [shape: f32[8,1], index: 11, kind: input, shape index: {}]   ;;  %s7630_s12 = inlined_call_operand.vmem [shape: f32[8,1], index: 12, kind: input, shape index: {}]   ;;  %s7631_s13 = inlined_call_operand.vmem [shape: f32[8,1], index: 13, kind: input, shape index: {}]   ;;  %s7632_s14 = inlined_call_operand.vmem [shape: f32[8,1], index: 14, kind: input, shape index: {}]   ;;  %s7633_s15 = inlined_call_operand.vmem [shape: f32[2,8,256], index: 15, kind: output, shape index: {}]  }
   0x1   :  { %3631 = vset.pattern.permute.xlu1 %v7688_v0  ;;  %v3926_v1 = vld [vmem:[%s7618_s3] sm:$0xf]  ;;  %3632 = vset.pattern.permute.xlu2 %v7686_v3  ;;  %s3751_s24 = smov 49   ;;  %s3752_s25 = smov 48   ;;  %v7678_v14 = vmov 4   ;;  %v7677_v17 = vmov 5  }
   0x2   :  { %v3931_v2 = vld [vmem:[%s7619_s0] sm:$0xff]  ;;  %87 = vperm.xlu1 %3631, %v3926_v1   ;;  %119 = vperm.xlu2 %3632, %v3926_v1   ;;  %s3754_s26 = smov 47   ;;  %s3756_s27 = smov 46   ;;  %v7676_v20 = vmov 6   ;;  %v7681_v23 = vmov 7   ;;  %v3761_v26 = vmov 8  }
   0x3   :  { %64 = vst [vmem:[#allocation1] ss:$2 sm:$0xff] %v3931_v2  ;;  %s3758_s28 = smov 45   ;;  %s3760_s29 = smov 35   ;;  %v3763_v29 = vmov 9   ;;  %v3765_v34 = vmov 10  }
   0x4   :  { %s3762_s30 = smov 34   ;;  %s3764_s16 = smov 33   ;;  %v3768_v37 = vmov 11   ;;  %v3770_v40 = vmov 12   ;;  %v3772_v43 = vmov 13   ;;  %v3774_v46 = vmov 14  }
   0x5   :  { %s3766_s17 = smov 32   ;;  %s3767_s18 = smov 31   ;;  %v3776_v50 = vmov 15   ;;  %v3778_v54 = vmov 16   ;;  %v3780_v60 = vmov 17  }
   0x6   :  { %s7662_s19 = smov 30   ;;  %s7634_s20 = smov 29  }
   0x7   :  { %s7636_s21 = smov 19  }
   0xa   :  { %v65_v4 = vld.sshfl [vmem:[#allocation1] sm:$0xff pattern:$0x75316420]  ;;  %v66_v5 = vld.sshfl [vmem:[#allocation1 + $0x8] sm:$0xff pattern:$0x75316420]  ;;  %3633 = vset.pattern.permute.xlu2 %v7684_v6 }
   0xb   :  { %69 = vrot.lane.b32.xlu0 %v65_v4, %s3747_s22  ;;  %99 = vst [vmem:[#allocation1] ss:$2 sm:$0xff] %v3931_v2  ;;  %151 = vperm.xlu2 %3633, %v3926_v1   ;;  %v3818_v6 = vmov 36  }
  0x12   :  { %v100_v7 = vld.sshfl [vmem:[#allocation1] sm:$0xff pattern:$0x75316420]  ;;  %v101_v8 = vld.sshfl [vmem:[#allocation1 + $0x8] sm:$0xff pattern:$0x75316420] }
  0x13   :  { %71 = vrot.lane.b32.xlu0 %v66_v5, %s3747_s22  ;;  %104 = vrot.lane.b32.xlu1 %v100_v7, %s3749_s23  ;;  %131 = vst [vmem:[#allocation1] ss:$2 sm:$0xff] %v3931_v2  ;;  %v3783_v7 = vmov 18  }
  0x14   :  { %106 = vrot.lane.b32.xlu2 %v101_v8, %s3749_s23 }
  0x15   :  { %3634 = vset.pattern.permute.xlu2 %v7682_v9 }
  0x1a   :  { %v133_v10 = vld.sshfl [vmem:[#allocation1 + $0x8] sm:$0xff pattern:$0x75316420]  ;;  %v132_v11 = vld.sshfl [vmem:[#allocation1] sm:$0xff pattern:$0x75316420] }
  0x1b   :  { %138 = vrot.lane.b32.xlu1 %v133_v10, %s3751_s24  ;;  %136 = vrot.lane.b32.xlu0 %v132_v11, %s3751_s24  ;;  %162 = vst [vmem:[#allocation1] ss:$2 sm:$0xff] %v3931_v2  ;;  %v3784_v10 = vmov 24  }
  0x1c   :  { %182 = vperm.xlu2 %3634, %v3926_v1   ;;  %3655 = vset.pattern.permute.xlu0 %v3784_v10  ;;  %v3800_v10 = vmov 27  }
  0x22   :  { %v164_v12 = vld.sshfl [vmem:[#allocation1 + $0x8] sm:$0xff pattern:$0x75316420]  ;;  %v163_v13 = vld.sshfl [vmem:[#allocation1] sm:$0xff pattern:$0x75316420] }
  0x23   :  { %169 = vrot.lane.b32.xlu1 %v164_v12, %s3752_s25  ;;  %167 = vrot.lane.b32.xlu0 %v163_v13, %s3752_s25  ;;  %194 = vst [vmem:[#allocation1] ss:$2 sm:$0xff] %v3931_v2 }
  0x24   :  { %3635 = vset.pattern.permute.xlu2 %v7678_v14 }
  0x25   :  { %214 = vperm.xlu2 %3635, %v3926_v1  }
  0x2a   :  { %v196_v15 = vld.sshfl [vmem:[#allocation1 + $0x8] sm:$0xff pattern:$0x75316420]  ;;  %v195_v16 = vld.sshfl [vmem:[#allocation1] sm:$0xff pattern:$0x75316420] }
  0x2b   :  { %201 = vrot.lane.b32.xlu1 %v196_v15, %s3754_s26  ;;  %199 = vrot.lane.b32.xlu0 %v195_v16, %s3754_s26  ;;  %226 = vst [vmem:[#allocation1] ss:$2 sm:$0xff] %v3931_v2  ;;  %v3786_v16 = vmov 19  }
  0x2d   :  { %3636 = vset.pattern.permute.xlu2 %v7677_v17 }
  0x2e   :  { %246 = vperm.xlu2 %3636, %v3926_v1  }
  0x32   :  { %v228_v18 = vld.sshfl [vmem:[#allocation1 + $0x8] sm:$0xff pattern:$0x75316420]  ;;  %v227_v19 = vld.sshfl [vmem:[#allocation1] sm:$0xff pattern:$0x75316420] }
  0x33   :  { %233 = vrot.lane.b32.xlu1 %v228_v18, %s3756_s27  ;;  %231 = vrot.lane.b32.xlu0 %v227_v19, %s3756_s27  ;;  %258 = vst [vmem:[#allocation1] ss:$2 sm:$0xff] %v3931_v2 }
  0x36   :  { %3637 = vset.pattern.permute.xlu2 %v7676_v20 }
  0x37   :  { %278 = vperm.xlu2 %3637, %v3926_v1  }
  0x3a   :  { %v260_v21 = vld.sshfl [vmem:[#allocation1 + $0x8] sm:$0xff pattern:$0x75316420]  ;;  %v259_v22 = vld.sshfl [vmem:[#allocation1] sm:$0xff pattern:$0x75316420] }
  0x3b   :  { %265 = vrot.lane.b32.xlu1 %v260_v21, %s3758_s28  ;;  %263 = vrot.lane.b32.xlu0 %v259_v22, %s3758_s28  ;;  %290 = vst [vmem:[#allocation1] ss:$2 sm:$0xff] %v3931_v2 }
  0x3f   :  { %3638 = vset.pattern.permute.xlu2 %v7681_v23 }
  0x40   :  { %310 = vperm.xlu2 %3638, %v3926_v1  }
  0x42   :  { %v292_v24 = vld.sshfl [vmem:[#allocation1 + $0x8] sm:$0xff pattern:$0x75316420]  ;;  %v291_v25 = vld.sshfl [vmem:[#allocation1] sm:$0xff pattern:$0x75316420] }
  0x43   :  { %297 = vrot.lane.b32.xlu1 %v292_v24, %s3760_s29  ;;  %295 = vrot.lane.b32.xlu0 %v291_v25, %s3760_s29  ;;  %318 = vst [vmem:[#allocation1] ss:$2 sm:$0xff] %v3931_v2  ;;  %v3788_v25 = vmov 20  }
  0x48   :  { %3639 = vset.pattern.permute.xlu2 %v3761_v26 }
  0x49   :  { %338 = vperm.xlu2 %3639, %v3926_v1  }
  0x4a   :  { %v320_v27 = vld.sshfl [vmem:[#allocation1 + $0x8] sm:$0xff pattern:$0x75316420]  ;;  %v319_v28 = vld.sshfl [vmem:[#allocation1] sm:$0xff pattern:$0x75316420] }
  0x4b   :  { %325 = vrot.lane.b32.xlu1 %v320_v27, %s3762_s30  ;;  %323 = vrot.lane.b32.xlu0 %v319_v28, %s3762_s30  ;;  %346 = vst [vmem:[#allocation1] ss:$2 sm:$0xff] %v3931_v2 }
  0x51   :  { %3640 = vset.pattern.permute.xlu2 %v3763_v29 }
  0x52   :  { %v348_v30 = vld.sshfl [vmem:[#allocation1 + $0x8] sm:$0xff pattern:$0x75316420]  ;;  %v347_v31 = vld.sshfl [vmem:[#allocation1] sm:$0xff pattern:$0x75316420]  ;;  %366 = vperm.xlu2 %3640, %v3926_v1  }
  0x53   :  { %353 = vrot.lane.b32.xlu1 %v348_v30, %s3764_s16  ;;  %351 = vrot.lane.b32.xlu0 %v347_v31, %s3764_s16  ;;  %374 = vst [vmem:[#allocation1] ss:$2 sm:$0xff] %v3931_v2  ;;  %v3790_v30 = vmov 21  }
  0x5a   :  { %v376_v32 = vld.sshfl [vmem:[#allocation1 + $0x8] sm:$0xff pattern:$0x75316420]  ;;  %v375_v33 = vld.sshfl [vmem:[#allocation1] sm:$0xff pattern:$0x75316420]  ;;  %3641 = vset.pattern.permute.xlu2 %v3765_v34 }
  0x5b   :  { %381 = vrot.lane.b32.xlu1 %v376_v32, %s3766_s17  ;;  %379 = vrot.lane.b32.xlu0 %v375_v33, %s3766_s17  ;;  %402 = vst [vmem:[#allocation1] ss:$2 sm:$0xff] %v3931_v2 }
  0x5c   :  { %394 = vperm.xlu2 %3641, %v3926_v1   ;;  %v4004_v49 = vpop.permute.xlu2 %119 }
  0x62   :  { %v404_v35 = vld.sshfl [vmem:[#allocation1 + $0x8] sm:$0xff pattern:$0x75316420]  ;;  %v403_v36 = vld.sshfl [vmem:[#allocation1] sm:$0xff pattern:$0x75316420] }
  0x63   :  { %409 = vrot.lane.b32.xlu1 %v404_v35, %s3767_s18  ;;  %407 = vrot.lane.b32.xlu0 %v403_v36, %s3767_s18  ;;  %430 = vst [vmem:[#allocation1] ss:$2 sm:$0xff] %v3931_v2  ;;  %v3792_v35 = vmov 22  }
  0x64   :  { %3642 = vset.pattern.permute.xlu2 %v3768_v37 }
  0x65   :  { %422 = vperm.xlu2 %3642, %v3926_v1   ;;  %v4010_v53 = vpop.permute.xlu2 %151 }
  0x6a   :  { %v432_v38 = vld.sshfl [vmem:[#allocation1 + $0x8] sm:$0xff pattern:$0x75316420]  ;;  %v431_v39 = vld.sshfl [vmem:[#allocation1] sm:$0xff pattern:$0x75316420] }
  0x6b   :  { %437 = vrot.lane.b32.xlu1 %v432_v38, %s7662_s19  ;;  %435 = vrot.lane.b32.xlu0 %v431_v39, %s7662_s19  ;;  %458 = vst [vmem:[#allocation1] ss:$2 sm:$0xff] %v3931_v2  ;;  %s7666_s19 = smov 113  }
  0x6d   :  { %3643 = vset.pattern.permute.xlu2 %v3770_v40 }
  0x6e   :  { %450 = vperm.xlu2 %3643, %v3926_v1   ;;  %v4016_v57 = vpop.permute.xlu2 %106 }
  0x72   :  { %v460_v41 = vld.sshfl [vmem:[#allocation1 + $0x8] sm:$0xff pattern:$0x75316420]  ;;  %v459_v42 = vld.sshfl [vmem:[#allocation1] sm:$0xff pattern:$0x75316420] }
  0x73   :  { %465 = vrot.lane.b32.xlu1 %v460_v41, %s7634_s20  ;;  %463 = vrot.lane.b32.xlu0 %v459_v42, %s7634_s20  ;;  %490 = vst [vmem:[#allocation1] ss:$2 sm:$0xff] %v3931_v2  ;;  %s7638_s20 = smov 18   ;;  %v3793_v41 = vmov 23  }
  0x74   :  { %v4024_v62 = vpop.permute.xlu1 %87 }
  0x76   :  { %3644 = vset.pattern.permute.xlu2 %v3772_v43  ;;  %v4026_v63 = vpop.permute.xlu2 %182 }
  0x77   :  { %478 = vperm.xlu2 %3644, %v3926_v1  }
  0x7a   :  { %v492_v44 = vld.sshfl [vmem:[#allocation1 + $0x8] sm:$0xff pattern:$0x75316420]  ;;  %v491_v45 = vld.sshfl [vmem:[#allocation1] sm:$0xff pattern:$0x75316420] }
  0x7b   :  { %497 = vrot.lane.b32.xlu1 %v492_v44, %s7636_s21  ;;  %495 = vrot.lane.b32.xlu0 %v491_v45, %s7636_s21  ;;  %518 = vst [vmem:[#allocation1] ss:$2 sm:$0xff] %v3931_v2  ;;  %s7640_s21 = smov 17  }
  0x7d   :  { %v4018_v61 = vpop.permute.xlu0 %69 }
  0x7f   :  { %3645 = vset.pattern.permute.xlu2 %v3774_v46  ;;  %v4039_v15 = vpop.permute.xlu2 %214  ;;  %v3795_v46 = vmov 25  }
  0x80   :  { %510 = vperm.xlu2 %3645, %v3926_v1  }
  0x82   :  { %v520_v47 = vld.sshfl [vmem:[#allocation1 + $0x8] sm:$0xff pattern:$0x75316420]  ;;  %v519_v48 = vld.sshfl [vmem:[#allocation1] sm:$0xff pattern:$0x75316420] }
  0x83   :  { %525 = vrot.lane.b32.xlu1 %v520_v47, %s7638_s20  ;;  %523 = vrot.lane.b32.xlu0 %v519_v48, %s7638_s20  ;;  %546 = vst [vmem:[#allocation1] ss:$2 sm:$0xff] %v3931_v2  ;;  %s7642_s20 = smov 16  }
  0x85   :  { %v4031_v8 = vpop.permute.xlu0 %71  ;;  %v4034_v13 = vpop.permute.xlu1 %104 }
  0x88   :  { %3646 = vset.pattern.permute.xlu2 %v3776_v50  ;;  %v4049_v24 = vpop.permute.xlu2 %246 }
  0x89   :  { %538 = vperm.xlu2 %3646, %v3926_v1  }
  0x8a   :  { %v548_v51 = vld.sshfl [vmem:[#allocation1 + $0x8] sm:$0xff pattern:$0x75316420]  ;;  %v547_v52 = vld.sshfl [vmem:[#allocation1] sm:$0xff pattern:$0x75316420] }
  0x8b   :  { %553 = vrot.lane.b32.xlu1 %v548_v51, %s7640_s21  ;;  %551 = vrot.lane.b32.xlu0 %v547_v52, %s7640_s21  ;;  %574 = vst [vmem:[#allocation1] ss:$2 sm:$0xff] %v3931_v2  ;;  %s7644_s21 = smov 15  }
  0x8d   :  { %v4042_v18 = vpop.permute.xlu0 %136  ;;  %v4047_v22 = vpop.permute.xlu1 %138 }
  0x91   :  { %3647 = vset.pattern.permute.xlu2 %v3778_v54  ;;  %v4059_v31 = vpop.permute.xlu2 %278 }
  0x92   :  { %v576_v55 = vld.sshfl [vmem:[#allocation1 + $0x8] sm:$0xff pattern:$0x75316420]  ;;  %v575_v56 = vld.sshfl [vmem:[#allocation1] sm:$0xff pattern:$0x75316420]  ;;  %566 = vperm.xlu2 %3647, %v3926_v1  }
  0x93   :  { %581 = vrot.lane.b32.xlu1 %v576_v55, %s7642_s20  ;;  %579 = vrot.lane.b32.xlu0 %v575_v56, %s7642_s20  ;;  %602 = vst [vmem:[#allocation1] ss:$2 sm:$0xff] %v3931_v2  ;;  %s7646_s20 = smov 14  }
  0x95   :  { %v4052_v26 = vpop.permute.xlu0 %167  ;;  %v4057_v29 = vpop.permute.xlu1 %169 }
  0x9a   :  { %v604_v58 = vld.sshfl [vmem:[#allocation1 + $0x8] sm:$0xff pattern:$0x75316420]  ;;  %v603_v59 = vld.sshfl [vmem:[#allocation1] sm:$0xff pattern:$0x75316420]  ;;  %3648 = vset.pattern.permute.xlu2 %v3780_v60  ;;  %v4070_v37 = vpop.permute.xlu2 %310 }
  0x9b   :  { %609 = vrot.lane.b32.xlu1 %v604_v58, %s7644_s21  ;;  %607 = vrot.lane.b32.xlu0 %v603_v59, %s7644_s21  ;;  %630 = vst [vmem:[#allocation1] ss:$2 sm:$0xff] %v3931_v2  ;;  %s7648_s21 = smov 13   ;;  %v3797_v58 = vmov 26  }
  0x9c   :  { %594 = vperm.xlu2 %3648, %v3926_v1  }
  0x9d   :  { %v4062_v34 = vpop.permute.xlu0 %199  ;;  %v4067_v36 = vpop.permute.xlu1 %201 }
  0xa2   :  { %v632_v4 = vld.sshfl [vmem:[#allocation1 + $0x8] sm:$0xff pattern:$0x75316420]  ;;  %v631_v5 = vld.sshfl [vmem:[#allocation1] sm:$0xff pattern:$0x75316420] }
  0xa3   :  { %637 = vrot.lane.b32.xlu1 %v632_v4, %s7646_s20  ;;  %635 = vrot.lane.b32.xlu0 %v631_v5, %s7646_s20  ;;  %658 = vst [vmem:[#allocation1] ss:$2 sm:$0xff] %v3931_v2  ;;  %s7650_s20 = smov 3   ;;  %v4085_v45 = vpop.permute.xlu2 %338 }
  0xa4   :  { %3649 = vset.pattern.permute.xlu2 %v3783_v7  ;;  %7958 = vst [vmem:[#allocation4_spill] sm:$0xff] %v4085_v45 }
  0xa5   :  { %622 = vperm.xlu2 %3649, %v3926_v1   ;;  %v4078_v40 = vpop.permute.xlu0 %231  ;;  %v4081_v44 = vpop.permute.xlu1 %233 }
  0xaa   :  { %v660_v11 = vld.sshfl [vmem:[#allocation1 + $0x8] sm:$0xff pattern:$0x75316420]  ;;  %v659_v12 = vld.sshfl [vmem:[#allocation1] sm:$0xff pattern:$0x75316420] }
  0xab   :  { %665 = vrot.lane.b32.xlu1 %v660_v11, %s7648_s21  ;;  %663 = vrot.lane.b32.xlu0 %v659_v12, %s7648_s21  ;;  %689 = vst [vmem:[#allocation1] ss:$2 sm:$0xff] %v3931_v2  ;;  %s7654_s21 = smov 2  }
  0xac   :  { %v4096_v52 = vpop.permute.xlu2 %366 }
  0xad   :  { %3650 = vset.pattern.permute.xlu2 %v3786_v16  ;;  %v4087_v47 = vpop.permute.xlu0 %263  ;;  %v4094_v51 = vpop.permute.xlu1 %265  ;;  %7959 = vst [vmem:[#allocation5_spill] sm:$0xff] %v4096_v52 }
  0xae   :  { %650 = vperm.xlu2 %3650, %v3926_v1  }
  0xb2   :  { %v691_v19 = vld.sshfl [vmem:[#allocation1 + $0x8] sm:$0xff pattern:$0x75316420]  ;;  %v690_v21 = vld.sshfl [vmem:[#allocation1] sm:$0xff pattern:$0x75316420] }
  0xb3   :  { %696 = vrot.lane.b32.xlu1 %v691_v19, %s7650_s20  ;;  %694 = vrot.lane.b32.xlu0 %v690_v21, %s7650_s20  ;;  %717 = vst [vmem:[#allocation1] ss:$2 sm:$0xff] %v3931_v2  ;;  %s7652_s20 = smov 1  }
  0xb5   :  { %v4098_v54 = vpop.permute.xlu0 %295  ;;  %v4104_v59 = vpop.permute.xlu1 %297 }
  0xb6   :  { %3651 = vset.pattern.permute.xlu2 %v3788_v25  ;;  %7960 = vst [vmem:[#allocation6_spill] sm:$0xff] %v4098_v54  ;;  %v4106_v60 = vpop.permute.xlu2 %394  ;;  %v3802_v25 = vmov 28  }
  0xb7   :  { %678 = vperm.xlu2 %3651, %v3926_v1   ;;  %7961 = vst [vmem:[#allocation7_spill] sm:$0xff] %v4104_v59 }
  0xb8   :  { %7962 = vst [vmem:[#allocation8_spill] sm:$0xff] %v4106_v60 }
  0xba   :  { %v719_v27 = vld.sshfl [vmem:[#allocation1 + $0x8] sm:$0xff pattern:$0x75316420]  ;;  %v718_v28 = vld.sshfl [vmem:[#allocation1] sm:$0xff pattern:$0x75316420] }
  0xbb   :  { %724 = vrot.lane.b32.xlu1 %v719_v27, %s7654_s21  ;;  %722 = vrot.lane.b32.xlu0 %v718_v28, %s7654_s21  ;;  %745 = vst [vmem:[#allocation1] ss:$2 sm:$0xff] %v3931_v2  ;;  %s7658_s21 = smov 126  }
  0xbd   :  { %v4109_v7 = vpop.permute.xlu0 %323  ;;  %v4114_v11 = vpop.permute.xlu1 %325 }
  0xbe   :  { %7963 = vst [vmem:[#allocation9_spill] sm:$0xff] %v4109_v7 }
  0xbf   :  { %3652 = vset.pattern.permute.xlu2 %v3790_v30  ;;  %7964 = vst [vmem:[#allocation10_spill] sm:$0xff] %v4114_v11  ;;  %v4116_v12 = vpop.permute.xlu2 %422 }
  0xc0   :  { %709 = vperm.xlu2 %3652, %v3926_v1   ;;  %7965 = vst [vmem:[#allocation11_spill] sm:$0xff] %v4116_v12 }
  0xc2   :  { %v747_v32 = vld.sshfl [vmem:[#allocation1 + $0x8] sm:$0xff pattern:$0x75316420]  ;;  %v746_v33 = vld.sshfl [vmem:[#allocation1] sm:$0xff pattern:$0x75316420] }
  0xc3   :  { %752 = vrot.lane.b32.xlu1 %v747_v32, %s7652_s20  ;;  %750 = vrot.lane.b32.xlu0 %v746_v33, %s7652_s20  ;;  %778 = vst [vmem:[#allocation1] ss:$2 sm:$0xff] %v3931_v2  ;;  %s7656_s20 = smov 127   ;;  %v3804_v33 = vmov 29  }
  0xc5   :  { %v4121_v21 = vpop.permute.xlu0 %351  ;;  %v4125_v30 = vpop.permute.xlu1 %353 }
  0xc6   :  { %7966 = vst [vmem:[#allocation12_spill] sm:$0xff] %v4121_v21 }
  0xc7   :  { %7967 = vst [vmem:[#allocation13_spill] sm:$0xff] %v4125_v30 }
  0xc8   :  { %3653 = vset.pattern.permute.xlu2 %v3792_v35  ;;  %v4129_v32 = vpop.permute.xlu2 %450 }
  0xc9   :  { %737 = vperm.xlu2 %3653, %v3926_v1   ;;  %7968 = vst [vmem:[#allocation14_spill] sm:$0xff] %v4129_v32 }
  0xca   :  { %v4072_v38 = vld.sshfl [vmem:[#allocation1] sm:$0xff pattern:$0x75316420]  ;;  %v4074_v39 = vld.sshfl [vmem:[#allocation1 + $0x8] sm:$0xff pattern:$0x75316420] }
  0xcb   :  { %7956 = vst [vmem:[#allocation2_spill] sm:$0xff] %v4072_v38  ;;  %786 = vperm.xlu0 %3655, %v3926_v1  }
  0xcc   :  { %7957 = vst [vmem:[#allocation3_spill] sm:$0xff] %v4074_v39 }
  0xcd   :  { %794 = vst [vmem:[#allocation1] ss:$2 sm:$0xff] %v3931_v2  ;;  %v4131_v35 = vpop.permute.xlu0 %379 }
  0xce   :  { %7969 = vst [vmem:[#allocation15_spill] sm:$0xff] %v4131_v35 }
  0xd1   :  { %3654 = vset.pattern.permute.xlu2 %v3793_v41 }
  0xd2   :  { %765 = vperm.xlu2 %3654, %v3926_v1  }
  0xd3   :  { %3656 = vset.pattern.permute.xlu0 %v3795_v46  ;;  %v4139_v46 = vpop.permute.xlu2 %478 }
  0xd4   :  { %v796_v42 = vld.sshfl [vmem:[#allocation1 + $0x8] sm:$0xff pattern:$0x75316420]  ;;  %v795_v43 = vld.sshfl [vmem:[#allocation1] sm:$0xff pattern:$0x75316420] }
  0xd5   :  { %801 = vrot.lane.b32.xlu0 %v796_v42, %s7656_s20  ;;  %822 = vst [vmem:[#allocation1] ss:$2 sm:$0xff] %v3931_v2 }
  0xd6   :  { %7971 = vst [vmem:[#allocation17_spill] sm:$0xff] %v4139_v46 }
  0xda   :  { %799 = vrot.lane.b32.xlu2 %v795_v43, %s7656_s20  ;;  %s7660_s20 = smov 125   ;;  %v4137_v43 = vpop.permute.xlu1 %381 }
  0xdb   :  { %3680 = vset.pattern.permute.xlu2 %v7688_v0  ;;  %7970 = vst [vmem:[#allocation16_spill] sm:$0xff] %v4137_v43 }
  0xdc   :  { %v823_v48 = vld.sshfl [vmem:[#allocation1] sm:$0xff pattern:$0x75316420]  ;;  %v824_v50 = vld.sshfl [vmem:[#allocation1 + $0x8] sm:$0xff pattern:$0x75316420] }
  0xdd   :  { %814 = vperm.xlu0 %3656, %v3926_v1   ;;  %827 = vrot.lane.b32.xlu1 %v823_v48, %s7658_s21  ;;  %850 = vst [vmem:[#allocation1] ss:$2 sm:$0xff] %v3931_v2  ;;  %v3806_v48 = vmov 30  }
  0xe2   :  { %829 = vrot.lane.b32.xlu2 %v824_v50, %s7658_s21  ;;  %s7672_s21 = smov 115   ;;  %v4142_v50 = vpop.permute.xlu0 %407 }
  0xe3   :  { %7972 = vst [vmem:[#allocation18_spill] sm:$0xff] %v4142_v50 }
  0xe4   :  { %v851_v55 = vld.sshfl [vmem:[#allocation1] sm:$0xff pattern:$0x75316420]  ;;  %v852_v56 = vld.sshfl [vmem:[#allocation1 + $0x8] sm:$0xff pattern:$0x75316420] }
  0xe5   :  { %3657 = vset.pattern.permute.xlu0 %v3797_v58  ;;  %855 = vrot.lane.b32.xlu1 %v851_v55, %s7660_s20  ;;  %882 = vst [vmem:[#allocation1] ss:$2 sm:$0xff] %v3931_v2  ;;  %v4147_v58 = vpop.permute.xlu1 %409 }
  0xe6   :  { %842 = vperm.xlu0 %3657, %v3926_v1   ;;  %7973 = vst [vmem:[#allocation19_spill] sm:$0xff] %v4147_v58 }
  0xea   :  { %857 = vrot.lane.b32.xlu2 %v852_v56, %s7660_s20  ;;  %s7664_s20 = smov 114  }
  0xec   :  { %v883_v4 = vld.sshfl [vmem:[#allocation1] sm:$0xff pattern:$0x75316420]  ;;  %v884_v5 = vld.sshfl [vmem:[#allocation1 + $0x8] sm:$0xff pattern:$0x75316420] }
  0xed   :  { %887 = vrot.lane.b32.xlu1 %v883_v4, %s7672_s21  ;;  %910 = vst [vmem:[#allocation1] ss:$2 sm:$0xff] %v3931_v2  ;;  %v4149_v4 = vpop.permute.xlu2 %510 }
  0xee   :  { %3658 = vset.pattern.permute.xlu0 %v3800_v10  ;;  %7974 = vst [vmem:[#allocation20_spill] sm:$0xff] %v4149_v4 }
  0xef   :  { %870 = vperm.xlu0 %3658, %v3926_v1  }
  0xf2   :  { %889 = vrot.lane.b32.xlu2 %v884_v5, %s7672_s21  ;;  %v3808_v5 = vmov 31   ;;  %s7679_s21 = smov 99  }
  0xf4   :  { %v911_v16 = vld.sshfl [vmem:[#allocation1] sm:$0xff pattern:$0x75316420]  ;;  %v912_v19 = vld.sshfl [vmem:[#allocation1 + $0x8] sm:$0xff pattern:$0x75316420] }
  0xf5   :  { %915 = vrot.lane.b32.xlu1 %v911_v16, %s7664_s20  ;;  %938 = vst [vmem:[#allocation1] ss:$2 sm:$0xff] %v3931_v2 }
  0xf7   :  { %3659 = vset.pattern.permute.xlu0 %v3802_v25  ;;  %v4157_v25 = vpop.permute.xlu1 %437 }
  0xf8   :  { %902 = vperm.xlu0 %3659, %v3926_v1   ;;  %7976 = vst [vmem:[#allocation22_spill] sm:$0xff] %v4157_v25 }
  0xfa   :  { %917 = vrot.lane.b32.xlu2 %v912_v19, %s7664_s20  ;;  %s7668_s20 = smov 112   ;;  %v4153_v19 = vpop.permute.xlu0 %435 }
  0xfb   :  { %7975 = vst [vmem:[#allocation21_spill] sm:$0xff] %v4153_v19 }
  0xfc   :  { %v939_v27 = vld.sshfl [vmem:[#allocation1] sm:$0xff pattern:$0x75316420]  ;;  %v940_v28 = vld.sshfl [vmem:[#allocation1 + $0x8] sm:$0xff pattern:$0x75316420] }
  0xfd   :  { %943 = vrot.lane.b32.xlu1 %v939_v27, %s7666_s19  ;;  %966 = vst [vmem:[#allocation1] ss:$2 sm:$0xff] %v3931_v2  ;;  %v3810_v27 = vmov 32  }
 0x100   :  { %3660 = vset.pattern.permute.xlu0 %v3804_v33 }
 0x101   :  { %930 = vperm.xlu0 %3660, %v3926_v1  }
 0x102   :  { %945 = vrot.lane.b32.xlu2 %v940_v28, %s7666_s19  ;;  %s7670_s19 = smov 111   ;;  %v4159_v28 = vpop.permute.xlu2 %538 }
 0x103   :  { %7977 = vst [vmem:[#allocation23_spill] sm:$0xff] %v4159_v28 }
 0x104   :  { %v967_v41 = vld.sshfl [vmem:[#allocation1] sm:$0xff pattern:$0x75316420]  ;;  %v968_v42 = vld.sshfl [vmem:[#allocation1 + $0x8] sm:$0xff pattern:$0x75316420] }
 0x105   :  { %971 = vrot.lane.b32.xlu1 %v967_v41, %s7668_s20  ;;  %994 = vst [vmem:[#allocation1] ss:$2 sm:$0xff] %v3931_v2 }
 0x109   :  { %3661 = vset.pattern.permute.xlu0 %v3806_v48  ;;  %v3812_v48 = vmov 33  }
 0x10a   :  { %958 = vperm.xlu0 %3661, %v3926_v1   ;;  %973 = vrot.lane.b32.xlu2 %v968_v42, %s7668_s20  ;;  %s3809_s20 = smov 110   ;;  %v4165_v42 = vpop.permute.xlu0 %463 }
 0x10b   :  { %7978 = vst [vmem:[#allocation24_spill] sm:$0xff] %v4165_v42 }
 0x10c   :  { %v995_v55 = vld.sshfl [vmem:[#allocation1] sm:$0xff pattern:$0x75316420]  ;;  %v996_v56 = vld.sshfl [vmem:[#allocation1 + $0x8] sm:$0xff pattern:$0x75316420] }
 0x10d   :  { %999 = vrot.lane.b32.xlu1 %v995_v55, %s7670_s19  ;;  %1022 = vst [vmem:[#allocation1] ss:$2 sm:$0xff] %v3931_v2 }
 0x112   :  { %3662 = vset.pattern.permute.xlu0 %v3808_v5  ;;  %1001 = vrot.lane.b32.xlu2 %v996_v56, %s7670_s19  ;;  %s7674_s19 = smov 109   ;;  %v4168_v5 = vpop.permute.xlu1 %465 }
 0x113   :  { %986 = vperm.xlu0 %3662, %v3926_v1   ;;  %7979 = vst [vmem:[#allocation25_spill] sm:$0xff] %v4168_v5 }
 0x114   :  { %v1023_v10 = vld.sshfl [vmem:[#allocation1] sm:$0xff pattern:$0x75316420]  ;;  %v1024_v16 = vld.sshfl [vmem:[#allocation1 + $0x8] sm:$0xff pattern:$0x75316420] }
 0x115   :  { %1027 = vrot.lane.b32.xlu1 %v1023_v10, %s3809_s20  ;;  %1050 = vst [vmem:[#allocation1] ss:$2 sm:$0xff] %v3931_v2  ;;  %v4173_v10 = vpop.permute.xlu2 %566 }
 0x116   :  { %7980 = vst [vmem:[#allocation26_spill] sm:$0xff] %v4173_v10 }
 0x11a   :  { %1029 = vrot.lane.b32.xlu2 %v1024_v16, %s3809_s20  ;;  %v4175_v16 = vpop.permute.xlu0 %495 }
 0x11b   :  { %3663 = vset.pattern.permute.xlu0 %v3810_v27  ;;  %7981 = vst [vmem:[#allocation27_spill] sm:$0xff] %v4175_v16 }
 0x11c   :  { %1014 = vperm.xlu0 %3663, %v3926_v1   ;;  %v1051_v33 = vld.sshfl [vmem:[#allocation1] sm:$0xff pattern:$0x75316420]  ;;  %v1052_v41 = vld.sshfl [vmem:[#allocation1 + $0x8] sm:$0xff pattern:$0x75316420] }
 0x11d   :  { %1055 = vrot.lane.b32.xlu1 %v1051_v33, %s7674_s19  ;;  %1082 = vst [vmem:[#allocation1] ss:$2 sm:$0xff] %v3931_v2 }
 0x122   :  { %1057 = vrot.lane.b32.xlu2 %v1052_v41, %s7674_s19  ;;  %s7724_s19 = smov 98   ;;  %v4181_v41 = vpop.permute.xlu1 %497  ;;  %v4185_v20 = vpop.permute.xlu0 %523 }
 0x123   :  { %7982 = vst [vmem:[#allocation28_spill] sm:$0xff] %v4181_v41 }
 0x124   :  { %3664 = vset.pattern.permute.xlu0 %v3812_v48  ;;  %v1083_v55 = vld.sshfl [vmem:[#allocation1] sm:$0xff pattern:$0x75316420]  ;;  %v1084_v56 = vld.sshfl [vmem:[#allocation1 + $0x8] sm:$0xff pattern:$0x75316420] }
 0x125   :  { %1042 = vperm.xlu0 %3664, %v3926_v1   ;;  %1087 = vrot.lane.b32.xlu1 %v1083_v55, %s7679_s21  ;;  %1110 = vst [vmem:[#allocation1] ss:$2 sm:$0xff] %v3931_v2  ;;  %v3814_v48 = vmov 34   ;;  %v4183_v55 = vpop.permute.xlu2 %594 }
 0x126   :  { %7983 = vst [vmem:[#allocation29_spill] sm:$0xff] %v4183_v55 }
 0x127   :  { %7984 = vst [vmem:[#allocation30_spill] sm:$0xff] %v4185_v20 }
 0x12a   :  { %1089 = vrot.lane.b32.xlu2 %v1084_v56, %s7679_s21  ;;  %s7722_s21 = smov 97   ;;  %v3817_v56 = vmov 35  }
 0x12c   :  { %v1111_v27 = vld.sshfl [vmem:[#allocation1] sm:$0xff pattern:$0x75316420]  ;;  %v1112_v33 = vld.sshfl [vmem:[#allocation1 + $0x8] sm:$0xff pattern:$0x75316420] }
 0x12d   :  { %3665 = vset.pattern.permute.xlu0 %v3814_v48  ;;  %1115 = vrot.lane.b32.xlu1 %v1111_v27, %s7724_s19  ;;  %1138 = vst [vmem:[#allocation1] ss:$2 sm:$0xff] %v3931_v2  ;;  %v4191_v27 = vpop.permute.xlu1 %525  ;;  %v4193_v48 = vpop.permute.xlu2 %622 }
 0x12e   :  { %1070 = vperm.xlu0 %3665, %v3926_v1   ;;  %7985 = vst [vmem:[#allocation31_spill] sm:$0xff] %v4191_v27 }
 0x12f   :  { %7986 = vst [vmem:[#allocation32_spill] sm:$0xff] %v4193_v48 }
 0x132   :  { %1117 = vrot.lane.b32.xlu2 %v1112_v33, %s7724_s19  ;;  %v4200_v33 = vpop.permute.xlu0 %551  ;;  %s8095_s19 = smov 16  }
 0x133   :  { %7987 = vst [vmem:[#allocation33_spill] sm:$0xff] %v4200_v33 }
 0x134   :  { %v1139_v17 = vld.sshfl [vmem:[#allocation1] sm:$0xff pattern:$0x75316420]  ;;  %v1140_v14 = vld.sshfl [vmem:[#allocation1 + $0x8] sm:$0xff pattern:$0x75316420] }
 0x135   :  { %1166 = vst [vmem:[#allocation1] ss:$2 sm:$0xff] %v3931_v2  ;;  %1143 = vrot.lane.b32.xlu1 %v1139_v17, %s7722_s21  ;;  %v4204_v17 = vpop.permute.xlu1 %553 }
 0x136   :  { %3666 = vset.pattern.permute.xlu0 %v3817_v56  ;;  %7988 = vst [vmem:[#allocation34_spill] sm:$0xff] %v4204_v17  ;;  %v4206_v56 = vpop.permute.xlu2 %650 }
 0x137   :  { %1102 = vperm.xlu0 %3666, %v3926_v1   ;;  %7989 = vst [vmem:[#allocation35_spill] sm:$0xff] %v4206_v56 }
 0x13a   :  { %1145 = vrot.lane.b32.xlu2 %v1140_v14, %s7722_s21  ;;  %v4213_v39 = vpop.permute.xlu0 %579  ;;  %s8106_s21 = smov 15  }
 0x13b   :  { %7990 = vst [vmem:[#allocation36_spill] sm:$0xff] %v4213_v39 }
 0x13c   :  { %v4195_v23 = vld.sshfl [vmem:[#allocation1] sm:$0xff pattern:$0x75316420]  ;;  %v4197_v9 = vld.sshfl [vmem:[#allocation1 + $0x8] sm:$0xff pattern:$0x75316420] }
 0x13d   :  { %1194 = vst [vmem:[#allocation1] ss:$2 sm:$0xff] %v3931_v2  ;;  %v4219_v48 = vpop.permute.xlu1 %581 }
 0x13e   :  { %7991 = vst [vmem:[#allocation37_spill] sm:$0xff] %v4219_v48 }
 0x13f   :  { %3667 = vset.pattern.permute.xlu0 %v3818_v6  ;;  %v4222_v6 = vpop.permute.xlu2 %678 }
 0x140   :  { %1130 = vperm.xlu0 %3667, %v3926_v1   ;;  %7992 = vst [vmem:[#allocation38_spill] sm:$0xff] %v4222_v6 }
 0x142   :  { %v4224_v55 = vpop.permute.xlu0 %607 }
 0x143   :  { %7993 = vst [vmem:[#allocation39_spill] sm:$0xff] %v4224_v55 }
 0x144   :  { %v4208_v3 = vld.sshfl [vmem:[#allocation1] sm:$0xff pattern:$0x75316420]  ;;  %v4210_v0 = vld.sshfl [vmem:[#allocation1 + $0x8] sm:$0xff pattern:$0x75316420] }
 0x145   :  { %1222 = vst [vmem:[#allocation1] ss:$2 sm:$0xff] %v3931_v2  ;;  %v4231_v28 = vpop.permute.xlu1 %609 }
 0x146   :  { %7994 = vst [vmem:[#allocation40_spill] sm:$0xff] %v4231_v28 }
 0x147   :  { %v4233_v39 = vpop.permute.xlu2 %709 }
 0x148   :  { %7995 = vst [vmem:[#allocation41_spill] sm:$0xff] %v4233_v39 }
 0x14a   :  { %v4235_v33 = vpop.permute.xlu0 %635 }
 0x14b   :  { %7996 = vst [vmem:[#allocation42_spill] sm:$0xff] %v4235_v33 }
 0x14c   :  { %v4215_v14 = vld.sshfl [vmem:[#allocation1] sm:$0xff pattern:$0x75316420]  ;;  %v4217_v38 = vld.sshfl [vmem:[#allocation1 + $0x8] sm:$0xff pattern:$0x75316420] }
 0x14d   :  { %1250 = vst [vmem:[#allocation1] ss:$2 sm:$0xff] %v3931_v2  ;;  %v4242_v6 = vpop.permute.xlu1 %637 }
 0x14e   :  { %7999 = vst [vmem:[#allocation45_spill] sm:$0xff] %v4242_v6 }
 0x14f   :  { %v4244_v55 = vpop.permute.xlu2 %737 }
 0x150   :  { %8000 = vst [vmem:[#allocation46_spill] sm:$0xff] %v4244_v55 }
 0x152   :  { %v4250_v4 = vpop.permute.xlu0 %663 }
 0x153   :  { %8003 = vst [vmem:[#allocation49_spill] sm:$0xff] %v4250_v4 }
 0x154   :  { %v4226_v56 = vld.sshfl [vmem:[#allocation1] sm:$0xff pattern:$0x75316420]  ;;  %v4228_v10 = vld.sshfl [vmem:[#allocation1 + $0x8] sm:$0xff pattern:$0x75316420] }
 0x155   :  { %1282 = vst [vmem:[#allocation1] ss:$2 sm:$0xff] %v3931_v2  ;;  %v4253_v39 = vpop.permute.xlu1 %665 }
 0x156   :  { %8004 = vst [vmem:[#allocation50_spill] sm:$0xff] %v4253_v39 }
 0x157   :  { %v4255_v33 = vpop.permute.xlu2 %765 }
 0x158   :  { %8005 = vst [vmem:[#allocation51_spill] sm:$0xff] %v4255_v33 }
 0x15a   :  { %v4262_v6 = vpop.permute.xlu0 %694 }
 0x15b   :  { %8008 = vst [vmem:[#allocation54_spill] sm:$0xff] %v4262_v6 }
 0x15c   :  { %v4237_v17 = vld.sshfl [vmem:[#allocation1] sm:$0xff pattern:$0x75316420]  ;;  %v4239_v48 = vld.sshfl [vmem:[#allocation1 + $0x8] sm:$0xff pattern:$0x75316420] }
 0x15d   :  { %7997 = vst [vmem:[#allocation43_spill] sm:$0xff] %v4237_v17  ;;  %v4270_v4 = vpop.permute.xlu1 %696 }
 0x15e   :  { %7998 = vst [vmem:[#allocation44_spill] sm:$0xff] %v4239_v48 }
 0x15f   :  { %1310 = vst [vmem:[#allocation1] ss:$2 sm:$0xff] %v3931_v2  ;;  %v4268_v16 = vpop.permute.xlu2 %799 }
 0x160   :  { %8011 = vst [vmem:[#allocation57_spill] sm:$0xff] %v4268_v16 }
 0x161   :  { %8012 = vst [vmem:[#allocation58_spill] sm:$0xff] %v4270_v4 }
 0x162   :  { %v4273_v39 = vpop.permute.xlu0 %722 }
 0x163   :  { %8013 = vst [vmem:[#allocation59_spill] sm:$0xff] %v4273_v39 }
 0x165   :  { %v4282_v6 = vpop.permute.xlu1 %724 }
 0x166   :  { %v4246_v20 = vld.sshfl [vmem:[#allocation1] sm:$0xff pattern:$0x75316420]  ;;  %v4248_v27 = vld.sshfl [vmem:[#allocation1 + $0x8] sm:$0xff pattern:$0x75316420] }
 0x167   :  { %8001 = vst [vmem:[#allocation47_spill] sm:$0xff] %v4246_v20  ;;  %v4280_v5 = vpop.permute.xlu2 %829 }
 0x168   :  { %8002 = vst [vmem:[#allocation48_spill] sm:$0xff] %v4248_v27 }
 0x169   :  { %1338 = vst [vmem:[#allocation1] ss:$2 sm:$0xff] %v3931_v2 }
 0x16a   :  { %8016 = vst [vmem:[#allocation62_spill] sm:$0xff] %v4280_v5  ;;  %v4284_v32 = vpop.permute.xlu0 %750 }
 0x16b   :  { %8017 = vst [vmem:[#allocation63_spill] sm:$0xff] %v4282_v6 }
 0x16c   :  { %8018 = vst [vmem:[#allocation64_spill] sm:$0xff] %v4284_v32 }
 0x16d   :  { %v4293_v39 = vpop.permute.xlu1 %752 }
 0x16e   :  { %8022 = vst [vmem:[#allocation68_spill] sm:$0xff] %v4293_v39  ;;  %v3819_v39 = vmov 37  }
 0x16f   :  { %v4291_v4 = vpop.permute.xlu2 %857  ;;  %3668 = vset.pattern.permute.xlu0 %v3819_v39 }
 0x170   :  { %v4257_v28 = vld.sshfl [vmem:[#allocation1] sm:$0xff pattern:$0x75316420]  ;;  %v4259_v46 = vld.sshfl [vmem:[#allocation1 + $0x8] sm:$0xff pattern:$0x75316420] }
 0x171   :  { %8006 = vst [vmem:[#allocation52_spill] sm:$0xff] %v4257_v28 }
 0x172   :  { %8007 = vst [vmem:[#allocation53_spill] sm:$0xff] %v4259_v46  ;;  %v4304_v32 = vpop.permute.xlu0 %786 }
 0x173   :  { %1366 = vst [vmem:[#allocation1] ss:$2 sm:$0xff] %v3931_v2 }
 0x174   :  { %8021 = vst [vmem:[#allocation67_spill] sm:$0xff] %v4291_v4 }
 0x175   :  { %8025 = vst [vmem:[#allocation71_spill] sm:$0xff] %v4304_v32 }
 0x17a   :  { %v4264_v55 = vld.sshfl [vmem:[#allocation1] sm:$0xff pattern:$0x75316420]  ;;  %v4266_v41 = vld.sshfl [vmem:[#allocation1 + $0x8] sm:$0xff pattern:$0x75316420] }
 0x17b   :  { %8009 = vst [vmem:[#allocation55_spill] sm:$0xff] %v4264_v55  ;;  %v8073_v55 = vmov 0  }
 0x17c   :  { %8010 = vst [vmem:[#allocation56_spill] sm:$0xff] %v4266_v41 }
 0x17d   :  { %1394 = vst [vmem:[#allocation1] ss:$2 sm:$0xff] %v3931_v2 }
 0x184   :  { %v4275_v33 = vld.sshfl [vmem:[#allocation1] sm:$0xff pattern:$0x75316420]  ;;  %v4277_v42 = vld.sshfl [vmem:[#allocation1 + $0x8] sm:$0xff pattern:$0x75316420] }
 0x185   :  { %8014 = vst [vmem:[#allocation60_spill] sm:$0xff] %v4275_v33 }
 0x186   :  { %8015 = vst [vmem:[#allocation61_spill] sm:$0xff] %v4277_v42  ;;  %v4298_v42 = vld [vmem:[%s7619_s0 + $0x8] sm:$0xff]  ;;  %s3820_s0 = smov 96  }
 0x187   :  { %1422 = vst [vmem:[#allocation1] ss:$2 sm:$0xff] %v3931_v2 }
 0x18e   :  { %v4286_v41 = vld.sshfl [vmem:[#allocation1] sm:$0xff pattern:$0x75316420]  ;;  %v4288_v16 = vld.sshfl [vmem:[#allocation1 + $0x8] sm:$0xff pattern:$0x75316420] }
 0x18f   :  { %8019 = vst [vmem:[#allocation65_spill] sm:$0xff] %v4286_v41 }
 0x190   :  { %8020 = vst [vmem:[#allocation66_spill] sm:$0xff] %v4288_v16  ;;  %v4307_v16 = vpop.permute.xlu1 %827 }
 0x191   :  { %1450 = vst [vmem:[#allocation1] ss:$2 sm:$0xff] %v3931_v2  ;;  %v4309_v2 = vpop.permute.xlu2 %889 }
 0x192   :  { %8026 = vst [vmem:[#allocation72_spill] sm:$0xff] %v4307_v16 }
 0x193   :  { %8027 = vst [vmem:[#allocation73_spill] sm:$0xff] %v4309_v2 }
 0x198   :  { %v4300_v5 = vld.sshfl [vmem:[#allocation1] sm:$0xff pattern:$0x75316420]  ;;  %v4302_v6 = vld.sshfl [vmem:[#allocation1 + $0x8] sm:$0xff pattern:$0x75316420] }
 0x199   :  { %8023 = vst [vmem:[#allocation69_spill] sm:$0xff] %v4300_v5  ;;  %v4314_v5 = vpop.permute.xlu0 %801  ;;  %v4318_v46 = vpop.permute.xlu2 %917 }
 0x19a   :  { %8024 = vst [vmem:[#allocation70_spill] sm:$0xff] %v4302_v6  ;;  %v4316_v6 = vpop.permute.xlu1 %855 }
 0x19b   :  { %1493 = vst [vmem:[#allocation1] ss:$2 sm:$0xff] %v4298_v42 }
 0x19c   :  { %8028 = vst [vmem:[#allocation74_spill] sm:$0xff] %v4314_v5  ;;  %v8070_v5 = vmov 0 }
 0x19d   :  { %8029 = vst [vmem:[#allocation75_spill] sm:$0xff] %v4316_v6 }
 0x19e   :  { %8030 = vst [vmem:[#allocation76_spill] sm:$0xff] %v4318_v46 }
 0x1a1   :  { %v4323_v39 = vpop.permute.xlu0 %814  ;;  %v4330_v6 = vpop.permute.xlu2 %945 }
 0x1a2   :  { %v1494_v4 = vld.sshfl [vmem:[#allocation1] sm:$0xff pattern:$0x75316420]  ;;  %v1495_v41 = vld.sshfl [vmem:[#allocation1 + $0x8] sm:$0xff pattern:$0x75316420] }
 0x1a3   :  { %1510 = vst [vmem:[#allocation1] ss:$2 sm:$0xff] %v4298_v42  ;;  %1498 = vrot.lane.b32.xlu1 %v1494_v4, %s3747_s22  ;;  %1500 = vrot.lane.b32.xlu2 %v1495_v41, %s3747_s22  ;;  %v4326_v41 = vpop.permute.xlu1 %887  ;;  %s3822_s22 = smov 95  }
 0x1a4   :  { %8031 = vst [vmem:[#allocation77_spill] sm:$0xff] %v4323_v39  ;;  %v8066_v39 = vmov 0 }
 0x1a5   :  { %8032 = vst [vmem:[#allocation78_spill] sm:$0xff] %v4326_v41 }
 0x1a6   :  { %8033 = vst [vmem:[#allocation79_spill] sm:$0xff] %v4330_v6 }
 0x1a9   :  { %v4332_v46 = vpop.permute.xlu0 %842 }
 0x1aa   :  { %v1511_v32 = vld.sshfl [vmem:[#allocation1] sm:$0xff pattern:$0x75316420]  ;;  %v1512_v33 = vld.sshfl [vmem:[#allocation1 + $0x8] sm:$0xff pattern:$0x75316420] }
 0x1ab   :  { %1527 = vst [vmem:[#allocation1] ss:$2 sm:$0xff] %v4298_v42  ;;  %1515 = vrot.lane.b32.xlu1 %v1511_v32, %s3749_s23  ;;  %1517 = vrot.lane.b32.xlu2 %v1512_v33, %s3749_s23  ;;  %v4339_v33 = vpop.permute.xlu1 %915  ;;  %s8115_s23 = smov 14  }
 0x1ac   :  { %8034 = vst [vmem:[#allocation80_spill] sm:$0xff] %v4332_v46 }
 0x1ad   :  { %8035 = vst [vmem:[#allocation81_spill] sm:$0xff] %v4339_v33 }
 0x1b1   :  { %v4344_v41 = vpop.permute.xlu0 %870 }
 0x1b2   :  { %v1528_v2 = vld.sshfl [vmem:[#allocation1] sm:$0xff pattern:$0x75316420]  ;;  %v1529_v4 = vld.sshfl [vmem:[#allocation1 + $0x8] sm:$0xff pattern:$0x75316420] }
 0x1b3   :  { %1544 = vst [vmem:[#allocation1] ss:$2 sm:$0xff] %v4298_v42  ;;  %1534 = vrot.lane.b32.xlu1 %v1529_v4, %s3751_s24  ;;  %1532 = vrot.lane.b32.xlu0 %v1528_v2, %s3751_s24  ;;  %v4341_v4 = vpop.permute.xlu2 %973  ;;  %s8130_s24 = smov 13  }
 0x1b4   :  { %8036 = vst [vmem:[#allocation82_spill] sm:$0xff] %v4341_v4 }
 0x1b5   :  { %8037 = vst [vmem:[#allocation83_spill] sm:$0xff] %v4344_v41 }
 0x1ba   :  { %v1545_v16 = vld.sshfl [vmem:[#allocation1] sm:$0xff pattern:$0x75316420]  ;;  %v1546_v32 = vld.sshfl [vmem:[#allocation1 + $0x8] sm:$0xff pattern:$0x75316420] }
 0x1bb   :  { %1561 = vst [vmem:[#allocation1] ss:$2 sm:$0xff] %v4298_v42  ;;  %1171 = vrot.lane.b32.xlu1 %v4195_v23, %s3820_s0  ;;  %1551 = vrot.lane.b32.xlu0 %v1546_v32, %s3752_s25  ;;  %v4350_v23 = vpop.permute.xlu1 %943 }
 0x1bc   :  { %1549 = vrot.lane.b32.xlu2 %v1545_v16, %s3752_s25  ;;  %8038 = vst [vmem:[#allocation84_spill] sm:$0xff] %v4350_v23  ;;  %v4352_v16 = vpop.permute.xlu2 %1001  ;;  %v3821_v23 = vmov 38   ;;  %s8057_s25 = smov 30  }
 0x1bd   :  { %8039 = vst [vmem:[#allocation85_spill] sm:$0xff] %v4352_v16 }
 0x1c2   :  { %v1562_v2 = vld.sshfl [vmem:[#allocation1] sm:$0xff pattern:$0x75316420]  ;;  %v1563_v6 = vld.sshfl [vmem:[#allocation1 + $0x8] sm:$0xff pattern:$0x75316420] }
 0x1c3   :  { %1578 = vst [vmem:[#allocation1] ss:$2 sm:$0xff] %v4298_v42  ;;  %1158 = vperm.xlu0 %3668, %v3926_v1   ;;  %1566 = vrot.lane.b32.xlu1 %v1562_v2, %s3754_s26  ;;  %v4358_v1 = vpop.permute.xlu0 %902  ;;  %v4360_v2 = vpop.permute.xlu1 %971 }
 0x1c4   :  { %1173 = vrot.lane.b32.xlu2 %v4197_v9, %s3820_s0  ;;  %8040 = vst [vmem:[#allocation86_spill] sm:$0xff] %v4358_v1  ;;  %v4362_v41 = vpop.permute.xlu2 %1029 }
 0x1c5   :  { %8041 = vst [vmem:[#allocation87_spill] sm:$0xff] %v4360_v2 }
 0x1c6   :  { %8042 = vst [vmem:[#allocation88_spill] sm:$0xff] %v4362_v41 }
 0x1ca   :  { %v1579_v32 = vld.sshfl [vmem:[#allocation1] sm:$0xff pattern:$0x75316420]  ;;  %v1580_v33 = vld.sshfl [vmem:[#allocation1 + $0x8] sm:$0xff pattern:$0x75316420] }
 0x1cb   :  { %1595 = vst [vmem:[#allocation1] ss:$2 sm:$0xff] %v4298_v42  ;;  %1585 = vrot.lane.b32.xlu1 %v1580_v33, %s3756_s27  ;;  %1583 = vrot.lane.b32.xlu0 %v1579_v32, %s3756_s27  ;;  %v4367_v33 = vpop.permute.xlu0 %930  ;;  %v4370_v16 = vpop.permute.xlu1 %999  ;;  %s8155_s27 = smov 2  }
 0x1cc   :  { %1568 = vrot.lane.b32.xlu2 %v1563_v6, %s3754_s26  ;;  %3669 = vset.pattern.permute.xlu0 %v3821_v23  ;;  %8043 = vst [vmem:[#allocation89_spill] sm:$0xff] %v4367_v33  ;;  %v4373_v2 = vpop.permute.xlu2 %1057  ;;  %s8140_s26 = smov 3  }
 0x1cd   :  { %8044 = vst [vmem:[#allocation90_spill] sm:$0xff] %v4370_v16 }
 0x1ce   :  { %8045 = vst [vmem:[#allocation91_spill] sm:$0xff] %v4373_v2 }
 0x1d2   :  { %v1596_v4 = vld.sshfl [vmem:[#allocation1] sm:$0xff pattern:$0x75316420]  ;;  %v1597_v9 = vld.sshfl [vmem:[#allocation1 + $0x8] sm:$0xff pattern:$0x75316420] }
 0x1d3   :  { %1612 = vst [vmem:[#allocation1] ss:$2 sm:$0xff] %v4298_v42  ;;  %1602 = vrot.lane.b32.xlu0 %v1597_v9, %s3758_s28  ;;  %v4376_v23 = vpop.permute.xlu0 %958 }
 0x1d4   :  { %1600 = vrot.lane.b32.xlu2 %v1596_v4, %s3758_s28  ;;  %8046 = vst [vmem:[#allocation92_spill] sm:$0xff] %v4376_v23  ;;  %v4381_v4 = vpop.permute.xlu1 %1027  ;;  %v4383_v33 = vpop.permute.xlu2 %1089  ;;  %s8060_s28 = smov 29  }
 0x1d5   :  { %8047 = vst [vmem:[#allocation93_spill] sm:$0xff] %v4381_v4 }
 0x1d6   :  { %8048 = vst [vmem:[#allocation94_spill] sm:$0xff] %v4383_v33 }
 0x1da   :  { %v1613_v32 = vld.sshfl [vmem:[#allocation1] sm:$0xff pattern:$0x75316420]  ;;  %v1614_v6 = vld.sshfl [vmem:[#allocation1 + $0x8] sm:$0xff pattern:$0x75316420] }
 0x1db   :  { %1629 = vst [vmem:[#allocation1] ss:$2 sm:$0xff] %v4298_v42  ;;  %1617 = vrot.lane.b32.xlu1 %v1613_v32, %s3760_s29  ;;  %v4386_v2 = vpop.permute.xlu0 %986 }
 0x1dc   :  { %1619 = vrot.lane.b32.xlu2 %v1614_v6, %s3760_s29  ;;  %8049 = vst [vmem:[#allocation95_spill] sm:$0xff] %v4386_v2  ;;  %v4392_v6 = vpop.permute.xlu1 %1055  ;;  %v4400_v2 = vld [vmem:[%s7618_s3] sm:$0xf]  ;;  %s8166_s29 = smov 1  }
 0x1dd   :  { %8050 = vst [vmem:[#allocation96_spill] sm:$0xff] %v4392_v6 }
 0x1e2   :  { %v1630_v41 = vld.sshfl [vmem:[#allocation1] sm:$0xff pattern:$0x75316420]  ;;  %v1631_v9 = vld.sshfl [vmem:[#allocation1 + $0x8] sm:$0xff pattern:$0x75316420] }
 0x1e3   :  { %1646 = vst [vmem:[#allocation1] ss:$2 sm:$0xff] %v4298_v42  ;;  %1636 = vrot.lane.b32.xlu1 %v1631_v9, %s3762_s30  ;;  %1634 = vrot.lane.b32.xlu0 %v1630_v41, %s3762_s30  ;;  %v4394_v41 = vpop.permute.xlu2 %1117  ;;  %s3829_s30 = smov 82  }
 0x1e4   :  { %8051 = vst [vmem:[#allocation97_spill] sm:$0xff] %v4394_v41 }
 0x1ea   :  { %v1647_v16 = vld.sshfl [vmem:[#allocation1] sm:$0xff pattern:$0x75316420]  ;;  %v1648_v32 = vld.sshfl [vmem:[#allocation1 + $0x8] sm:$0xff pattern:$0x75316420] }
 0x1eb   :  { %1663 = vst [vmem:[#allocation1] ss:$2 sm:$0xff] %v4298_v42  ;;  %1199 = vrot.lane.b32.xlu1 %v4208_v3, %s3822_s22  ;;  %1653 = vrot.lane.b32.xlu0 %v1648_v32, %s3764_s16  ;;  %v4406_v3 = vpop.permute.xlu0 %1014  ;;  %v4410_v32 = vpop.permute.xlu1 %1087 }
 0x1ec   :  { %1651 = vrot.lane.b32.xlu2 %v1647_v16, %s3764_s16  ;;  %8052 = vst [vmem:[#allocation98_spill] sm:$0xff] %v4406_v3  ;;  %v4408_v16 = vpop.permute.xlu2 %1145  ;;  %v3823_v3 = vmov 39   ;;  %s3824_s16 = smov 94  }
 0x1ed   :  { %8053 = vst [vmem:[#allocation99_spill] sm:$0xff] %v4408_v16 }
 0x1ee   :  { %8054 = vst [vmem:[#allocation100_spill] sm:$0xff] %v4410_v32 }
 0x1f2   :  { %v1664_v9 = vld.sshfl [vmem:[#allocation1] sm:$0xff pattern:$0x75316420]  ;;  %v1665_v33 = vld.sshfl [vmem:[#allocation1 + $0x8] sm:$0xff pattern:$0x75316420] }
 0x1f3   :  { %1680 = vst [vmem:[#allocation1] ss:$2 sm:$0xff] %v4298_v42  ;;  %1186 = vperm.xlu0 %3669, %v4400_v2   ;;  %1668 = vrot.lane.b32.xlu1 %v1664_v9, %s3766_s17  ;;  %v4416_v9 = vpop.permute.xlu0 %1042  ;;  %v4421_v16 = vpop.permute.xlu1 %1115 }
 0x1f4   :  { %1201 = vrot.lane.b32.xlu2 %v4210_v0, %s3822_s22  ;;  %8055 = vst [vmem:[#allocation101_spill] sm:$0xff] %v4416_v9 }
 0x1f5   :  { %8056 = vst [vmem:[#allocation102_spill] sm:$0xff] %v4421_v16 }
 0x1fa   :  { %v1681_v41 = vld.sshfl [vmem:[#allocation1] sm:$0xff pattern:$0x75316420]  ;;  %v1682_v6 = vld.sshfl [vmem:[#allocation1 + $0x8] sm:$0xff pattern:$0x75316420] }
 0x1fb   :  { %1697 = vst [vmem:[#allocation1] ss:$2 sm:$0xff] %v4298_v42  ;;  %1687 = vrot.lane.b32.xlu1 %v1682_v6, %s3767_s18  ;;  %1685 = vrot.lane.b32.xlu0 %v1681_v41, %s3767_s18  ;;  %v4430_v6 = vpop.permute.xlu0 %1070  ;;  %s8083_s18 = smov 17  }
 0x1fc   :  { %1670 = vrot.lane.b32.xlu2 %v1665_v33, %s3766_s17  ;;  %3670 = vset.pattern.permute.xlu0 %v3823_v3  ;;  %v4428_v33 = vld [vmem:[%s7620_s1] sm:$0x3]  ;;  %8059 = vst [vmem:[#allocation104_spill] sm:$0xff] %v4430_v6  ;;  %v4434_v3 = vpop.permute.xlu1 %1143  ;;  %s8072_s17 = smov 18  }
 0x1fd   :  { %v4418_v23 = vpop.permute.xlu2 %1500  ;;  %8058 = vst [vmem:[#allocation103_spill] sm:$0xff] %v4428_v33  ;;  %v54_v16 = vadd.s32 4294967293, %v4428_v33 }
 0x1fe   :  { %8061 = vst [vmem:[#allocation105_spill] sm:$0xff] %v4434_v3 }
 0x1ff   :  { %vm55_vm0 = vcmp.ge.s32.totalorder %v54_v16, 0  ;;  %vm56_vm1 = vcmp.lt.s32.totalorder %v54_v16, 16 }
 0x200   :  { %vm4453_vm6 = vmand %vm55_vm0, %vm56_vm1 }
 0x202   :  { %v1698_v4 = vld.sshfl [vmem:[#allocation1] sm:$0xff pattern:$0x75316420]  ;;  %v1699_v0 = vld.sshfl [vmem:[#allocation1 + $0x8] sm:$0xff pattern:$0x75316420] }
 0x203   :  { %1714 = vst [vmem:[#allocation1] ss:$2 sm:$0xff] %v4298_v42  ;;  %1704 = vrot.lane.b32.xlu0 %v1699_v0, %s8057_s25  ;;  %v4439_v0 = vld [vmem:[%s7621_s2] sm:$0x3]  ;;  %v4448_v3 = vpop.permute.xlu0 %1102  ;;  %s8063_s2 = smov 19  }
 0x204   :  { %1702 = vrot.lane.b32.xlu2 %v1698_v4, %s8057_s25  ;;  %v58_v6 = vadd.s32 4294967293, %v4439_v0  ;;  %v94_v9 = vadd.s32 4294967294, %v4439_v0  ;;  %8062 = vst [vmem:[#allocation106_spill] sm:$0xff] %v4448_v3  ;;  %v8068_v3 = vmov 0  ;;  %vm158_vm14 = vcmp.ge.s32.totalorder %v4439_v0, 0  ;;  %s3826_s25 = smov 93  }
 0x205   :  { %v4441_v4 = vpop.permute.xlu2 %1517  ;;  %vm159_vm15 = vcmp.lt.s32.totalorder %v4439_v0, 16  ;;  %v189_v27 = vadd.s32 1, %v4439_v0 }
 0x206   :  { %vm59_vm2 = vcmp.ge.s32.totalorder %v58_v6, 0  ;;  %vm60_vm3 = vcmp.lt.s32.totalorder %v58_v6, 16  ;;  %vm95_vm4 = vcmp.ge.s32.totalorder %v94_v9, 0  ;;  %vm96_vm5 = vcmp.lt.s32.totalorder %v94_v9, 16  ;;  %vm4496_vm1 = vmand %vm158_vm14, %vm159_vm15 }
 0x207   :  { %vm4457_vm7 = vmand %vm59_vm2, %vm60_vm3  ;;  %vm190_vm14 = vcmp.ge.s32.totalorder %v189_v27, 0  ;;  %vm191_vm15 = vcmp.lt.s32.totalorder %v189_v27, 16 }
 0x208   :  { %v8067_v39 = vsel %vm4457_vm7, 4294967295, %v8066_v39  ;;  %vm4463_vm8 = vmand %vm95_vm4, %vm96_vm5 }
 0x209   :  { %v8069_v3 = vsel %vm4463_vm8, 4294967295, %v8068_v3  ;;  %vm62_vm11 = vmand %vm4453_vm6, %vm4457_vm7 }
 0x20a   :  { %v1715_v41 = vld.sshfl [vmem:[#allocation1] sm:$0xff pattern:$0x75316420]  ;;  %v1716_v32 = vld.sshfl [vmem:[#allocation1 + $0x8] sm:$0xff pattern:$0x75316420]  ;;  %vm98_vm12 = vmand %vm4453_vm6, %vm4463_vm8 }
 0x20b   :  { %1731 = vst [vmem:[#allocation1] ss:$2 sm:$0xff] %v4298_v42  ;;  %1719 = vrot.lane.b32.xlu1 %v1715_v41, %s8060_s28  ;;  %v78_v12 = vsel %vm62_vm11, 1, %v8073_v55  ;;  %v4489_v19 = vpop.permute.xlu0 %1130  ;;  %v111_v50 = vsel %vm98_vm12, 1, %v8073_v55  ;;  %vm161_vm3 = vmand %vm4453_vm6, %vm4496_vm1 }
 0x20c   :  { %1721 = vrot.lane.b32.xlu2 %v1716_v32, %s8060_s28  ;;  %v126_v32 = vadd.s32 4294967295, %v4439_v0  ;;  %8074 = vst [vmem:[#allocation107_spill] sm:$0xff] %v4489_v19  ;;  %v113_v19 = vperm.slane %v111_v50, 1  ;;  %s3827_s28 = smov 83  }
 0x20e   :  { %vm127_vm9 = vcmp.ge.s32.totalorder %v126_v32, 0  ;;  %vm128_vm10 = vcmp.lt.s32.totalorder %v126_v32, 16  ;;  %vm4534_vm12 = vcmp.eq.s32.totalorder %v113_v19, 1 }
 0x20f   :  { %vm4475_vm13 = vmand %vm127_vm9, %vm128_vm10 }
 0x210   :  { %v8071_v5 = vsel %vm4475_vm13, 4294967295, %v8070_v5  ;;  %vm130_vm0 = vmand %vm4453_vm6, %vm4475_vm13 }
 0x211   :  { %v143_v28 = vsel %vm130_vm0, 1, %v8073_v55 }
 0x212   :  { %v1732_v41 = vld.sshfl [vmem:[#allocation1] sm:$0xff pattern:$0x75316420]  ;;  %v1733_v1 = vld.sshfl [vmem:[#allocation1 + $0x8] sm:$0xff pattern:$0x75316420] }
 0x213   :  { %1748 = vst [vmem:[#allocation1] ss:$2 sm:$0xff] %v4298_v42  ;;  %1738 = vrot.lane.b32.xlu1 %v1733_v1, %s8063_s2  ;;  %1736 = vrot.lane.b32.xlu0 %v1732_v41, %s8063_s2  ;;  %v73_v1 = vlaneseq  ;;  %s3830_s2 = smov 81  }
 0x215   :  { %v1499_v16 = vpop.permute.xlu1 %1498  ;;  %v4483_v32 = vand.u32 127, %v73_v1  ;;  %v80_v1 = vperm.slane %v78_v12, 1 }
 0x216   :  { %v4461_v6 = vpop.permute.xlu2 %1549 }
 0x217   :  { %vm7785_vm2 = vcmp.lt.s32.totalorder %v4483_v32, 51  ;;  %vm4513_vm5 = vcmp.eq.s32.totalorder %v80_v1, 1  ;;  %vm7783_vm9 = vcmp.lt.s32.totalorder %v4483_v32, 49  ;;  %vm7784_vm10 = vcmp.lt.s32.totalorder %v4483_v32, 50 }
 0x218   :  { %v144_v1 = vperm.slane %v143_v28, 0  ;;  %v1503_v19 = vsel %vm7785_vm2, %v4418_v23, %v1499_v16 }
 0x21a   :  { %v1749_v9 = vld.sshfl [vmem:[#allocation1] sm:$0xff pattern:$0x75316420]  ;;  %v1750_v41 = vld.sshfl [vmem:[#allocation1 + $0x8] sm:$0xff pattern:$0x75316420] }
 0x21b   :  { %1765 = vst [vmem:[#allocation1] ss:$2 sm:$0xff] %v4298_v42  ;;  %1227 = vrot.lane.b32.xlu1 %v4215_v14, %s3824_s16  ;;  %1755 = vrot.lane.b32.xlu0 %v1750_v41, %s8072_s17  ;;  %v79_v14 = vperm.slane %v78_v12, 0  ;;  %v8075_v41 = vmov 0  ;;  %vm4559_vm0 = vcmp.eq.s32.totalorder %v144_v1, 1 }
 0x21c   :  { %1753 = vrot.lane.b32.xlu2 %v1749_v9, %s8072_s17  ;;  %v8076_v41 = vsel %vm4496_vm1, 4294967295, %v8075_v41  ;;  %v112_v9 = vperm.slane %v111_v50, 0  ;;  %vm8101_vm1 = vcmp.lt.s32.totalorder %v4483_v32, 48  ;;  %s3832_s17 = smov 80  }
 0x21d   :  { %v1516_v25 = vpop.permute.xlu1 %1515  ;;  %8077 = vst [vmem:[#allocation108_spill] sm:$0xff] %v8076_v41  ;;  %vm4509_vm4 = vcmp.eq.s32.totalorder %v79_v14, 1  ;;  %vm8102_vm8 = vmmov %vm8101_vm1 }
 0x21e   :  { %v4501_v58 = vpop.permute.xlu2 %1173  ;;  %v1519_v50 = vsel %vm7784_vm10, %v1516_v25, %v4441_v4  ;;  %v1520_v14 = vsel %vm7784_vm10, %v4441_v4, %v1516_v25  ;;  %vm4530_vm11 = vcmp.eq.s32.totalorder %v112_v9, 1  ;;  %v174_v25 = vsel %vm161_vm3, 1, %v8073_v55  ;;  %vm4580_vm10 = vmand %vm190_vm14, %vm191_vm15 }
 0x21f   :  { %8078 = vst [vmem:[#allocation109_spill] sm:$0xff] %v4501_v58  ;;  %v145_v58 = vperm.slane %v143_v28, 1  ;;  %v221_v9 = vadd.s32 2, %v4439_v0  ;;  %v1521_v20 = vsel %vm4530_vm11, %v1520_v14, 0.0  ;;  %v1522_v52 = vsel %vm4534_vm12, %v1519_v50, 0.0  ;;  %vm193_vm13 = vmand %vm4453_vm6, %vm4580_vm10 }
 0x220   :  { %v176_v7 = vperm.slane %v174_v25, 1  ;;  %v1524_v54 = vmul.f32 %v1522_v52, %v4004_v49 }
 0x221   :  { %vm4563_vm3 = vcmp.eq.s32.totalorder %v145_v58, 1  ;;  %v1523_v58 = vmul.f32 %v1521_v20, %v4004_v49  ;;  %vm222_vm14 = vcmp.ge.s32.totalorder %v221_v9, 0  ;;  %vm223_vm15 = vcmp.lt.s32.totalorder %v221_v9, 16 }
 0x222   :  { %v1766_v60 = vld.sshfl [vmem:[#allocation1] sm:$0xff pattern:$0x75316420]  ;;  %v1767_v48 = vld.sshfl [vmem:[#allocation1 + $0x8] sm:$0xff pattern:$0x75316420] }
 0x223   :  { %1782 = vst [vmem:[#allocation1] ss:$2 sm:$0xff] %v4298_v42  ;;  %1214 = vperm.xlu0 %3670, %v4400_v2   ;;  %1770 = vrot.lane.b32.xlu1 %v1766_v60, %s8083_s18 }
 0x224   :  { %1229 = vrot.lane.b32.xlu2 %v4217_v38, %s3824_s16  ;;  %v1502_v38 = vsel %vm7785_vm2, %v1499_v16, %v4418_v23  ;;  %v8090_v23 = vmov 0  ;;  %v175_v16 = vperm.slane %v174_v25, 0  ;;  %v8092_v25 = vmov 0 }
 0x225   :  { %v1535_v60 = vpop.permute.xlu1 %1534  ;;  %v1533_v30 = vpop.permute.xlu0 %1532  ;;  %v8091_v23 = vsel %vm4563_vm3, 4294967295, %v8090_v23  ;;  %v8093_v25 = vsel %vm4580_vm10, 4294967295, %v8092_v25 }
 0x226   :  { %v1536_v28 = vsel %vm7783_vm9, %v1533_v30, %v1535_v60  ;;  %v1537_v4 = vsel %vm7783_vm9, %v1535_v60, %v1533_v30  ;;  %v1504_v30 = vsel %vm4509_vm4, %v1503_v19, 0.0  ;;  %v1505_v60 = vsel %vm4513_vm5, %v1502_v38, 0.0  ;;  %v1569_v17 = vpop.permute.xlu2 %1568  ;;  %8094 = vst [vmem:[#allocation110_spill] sm:$0xff] %v8093_v25 }
 0x227   :  { %v1538_v14 = vsel %vm4559_vm0, %v1537_v4, 0.0  ;;  %v1539_v50 = vsel %vm4563_vm3, %v1536_v28, 0.0  ;;  %v1506_v38 = vmul.f32 %v1504_v30, %v4024_v62  ;;  %v1507_v20 = vmul.f32 %v1505_v60, %v4024_v62  ;;  %vm4617_vm3 = vmand %vm222_vm14, %vm223_vm15 }
 0x228   :  { %v1540_v52 = vmul.f32 %v1538_v14, %v4010_v53  ;;  %v1541_v19 = vmul.f32 %v1539_v50, %v4010_v53  ;;  %vm4594_vm2 = vcmp.eq.s32.totalorder %v175_v16, 1  ;;  %vm4598_vm9 = vcmp.eq.s32.totalorder %v176_v7, 1 }
 0x229   :  { %v1525_v30 = vadd.f32 %v1523_v58, %v1506_v38  ;;  %v253_v7 = vadd.s32 3, %v4439_v0  ;;  %v8103_v50 = vmov 0  ;;  %v3825_v25 = vmov 40  }
 0x22a   :  { %v1783_v1 = vld.sshfl [vmem:[#allocation1] sm:$0xff pattern:$0x75316420]  ;;  %v1784_v59 = vld.sshfl [vmem:[#allocation1 + $0x8] sm:$0xff pattern:$0x75316420] }
 0x22b   :  { %1799 = vst [vmem:[#allocation1] ss:$2 sm:$0xff] %v4298_v42  ;;  %1789 = vrot.lane.b32.xlu1 %v1784_v59, %s8095_s19  ;;  %1787 = vrot.lane.b32.xlu0 %v1783_v1, %s8095_s19  ;;  %v8104_v50 = vsel %vm4617_vm3, 4294967295, %v8103_v50  ;;  %vm7800_vm14 = vcmp.lt.s32.totalorder %v4483_v32, 47  ;;  %s8387_s19 = smov 115  }
 0x22c   :  { %1772 = vrot.lane.b32.xlu2 %v1767_v48, %s8083_s18  ;;  %v1526_v48 = vadd.f32 %v1524_v54, %v1507_v20  ;;  %8105 = vst [vmem:[#allocation112_spill] sm:$0xff] %v8104_v50  ;;  %v1542_v54 = vadd.f32 %v1540_v52, %v1525_v30  ;;  %3671 = vset.pattern.permute.xlu0 %v3825_v25  ;;  %s3834_s18 = smov 79  }
 0x22d   :  { %v4592_v27 = vpop.permute.xlu1 %1171  ;;  %v1552_v4 = vpop.permute.xlu0 %1551 }
 0x22e   :  { %8096 = vst [vmem:[#allocation111_spill] sm:$0xff] %v4592_v27  ;;  %v1553_v9 = vsel %vm8101_vm1, %v4461_v6, %v1552_v4  ;;  %v1554_v16 = vsel %vm8102_vm8, %v1552_v4, %v4461_v6  ;;  %v1543_v1 = vadd.f32 %v1541_v19, %v1526_v48  ;;  %v206_v6 = vsel %vm193_vm13, 1, %v8073_v55  ;;  %vm225_vm8 = vmand %vm4453_vm6, %vm4617_vm3 }
 0x22f   :  { %v1555_v60 = vsel %vm4594_vm2, %v1554_v16, 0.0  ;;  %v1556_v14 = vsel %vm4598_vm9, %v1553_v9, 0.0  ;;  %v4624_v16 = vpop.permute.xlu2 %1600  ;;  %v207_v52 = vperm.slane %v206_v6, 0  ;;  %v208_v19 = vperm.slane %v206_v6, 1 }
 0x230   :  { %v1557_v58 = vmul.f32 %v1555_v60, %v4026_v63  ;;  %v1558_v38 = vmul.f32 %v1556_v14, %v4026_v63  ;;  %vm254_vm13 = vcmp.ge.s32.totalorder %v253_v7, 0  ;;  %vm255_vm1 = vcmp.lt.s32.totalorder %v253_v7, 16 }
 0x231   :  { %v238_v60 = vsel %vm225_vm8, 1, %v8073_v55  ;;  %vm4641_vm15 = vmand %vm254_vm13, %vm255_vm1  ;;  %v8108_v14 = vmov 0  ;;  %vm4645_vm10 = vcmp.eq.s32.totalorder %v207_v52, 1  ;;  %v8111_v7 = vmov 0 }
 0x232   :  { %v1800_v20 = vld.sshfl [vmem:[#allocation1] sm:$0xff pattern:$0x75316420]  ;;  %v1801_v0 = vld.sshfl [vmem:[#allocation1 + $0x8] sm:$0xff pattern:$0x75316420]  ;;  %v1559_v4 = vadd.f32 %v1557_v58, %v1542_v54  ;;  %v1560_v27 = vadd.f32 %v1558_v38, %v1543_v1  ;;  %vm257_vm8 = vmand %vm4453_vm6, %vm4641_vm15 }
 0x233   :  { %1816 = vst [vmem:[#allocation1] ss:$2 sm:$0xff] %v4298_v42  ;;  %1806 = vrot.lane.b32.xlu0 %v1801_v0, %s8106_s21  ;;  %v8109_v14 = vsel %vm4641_vm15, 4294967295, %v8108_v14  ;;  %v8112_v7 = vsel %vm4645_vm10, 4294967295, %v8111_v7  ;;  %vm4649_vm3 = vcmp.eq.s32.totalorder %v208_v19, 1  ;;  %v8113_v54 = vmov 0 }
 0x234   :  { %1804 = vrot.lane.b32.xlu2 %v1800_v20, %s8106_s21  ;;  %8110 = vst [vmem:[#allocation114_spill] sm:$0xff] %v8109_v14  ;;  %v8114_v54 = vsel %vm4649_vm3, 4294967295, %v8113_v54  ;;  %v285_v1 = vadd.s32 4294967294, %v4428_v33  ;;  %v239_v38 = vperm.slane %v238_v60, 0  ;;  %v240_v6 = vperm.slane %v238_v60, 1  ;;  %s8404_s21 = smov 114  }
 0x235   :  { %v4634_v30 = vpop.permute.xlu0 %1158  ;;  %v1567_v25 = vpop.permute.xlu1 %1566  ;;  %vm8116_vm13 = vcmp.lt.s32.totalorder %v4483_v32, 51 }
 0x236   :  { %8107 = vst [vmem:[#allocation113_spill] sm:$0xff] %v4634_v30  ;;  %v1570_v48 = vsel %vm7800_vm14, %v1567_v25, %v1569_v17  ;;  %v1571_v9 = vsel %vm7800_vm14, %v1569_v17, %v1567_v25  ;;  %v76_v52 = vsel %vm8116_vm13, %v4018_v61, %v4031_v8  ;;  %vm8117_vm6 = vmmov %vm8116_vm13  ;;  %vm286_vm14 = vcmp.ge.s32.totalorder %v285_v1, 0 }
 0x237   :  { %v1572_v58 = vsel %vm4645_vm10, %v1571_v9, 0.0  ;;  %v1573_v17 = vsel %vm4649_vm3, %v1570_v48, 0.0  ;;  %v4671_v48 = vpop.permute.xlu2 %1619  ;;  %v77_v46 = vsel %vm8117_vm6, %v4031_v8, %v4018_v61  ;;  %v270_v9 = vsel %vm257_vm8, 1, %v8073_v55 }
 0x238   :  { %v1574_v19 = vmul.f32 %v1572_v58, %v4039_v15  ;;  %v1575_v25 = vmul.f32 %v1573_v17, %v4039_v15  ;;  %vm287_vm15 = vcmp.lt.s32.totalorder %v285_v1, 16  ;;  %vm4679_vm13 = vcmp.eq.s32.totalorder %v239_v38, 1 }
 0x239   :  { %v8118_v30 = vmov 0  ;;  %vm4683_vm1 = vcmp.eq.s32.totalorder %v240_v6, 1  ;;  %v8121_v58 = vmov 0  ;;  %vm8124_vm3 = vcmp.lt.s32.totalorder %v4483_v32, 46 }
 0x23a   :  { %v1817_v20 = vld.sshfl [vmem:[#allocation1] sm:$0xff pattern:$0x75316420]  ;;  %v1818_v0 = vld.sshfl [vmem:[#allocation1 + $0x8] sm:$0xff pattern:$0x75316420]  ;;  %vm8125_vm10 = vmmov %vm8124_vm3 }
 0x23b   :  { %1833 = vst [vmem:[#allocation1] ss:$2 sm:$0xff] %v4298_v42  ;;  %1821 = vrot.lane.b32.xlu1 %v1817_v20, %s8115_s23  ;;  %v8119_v30 = vsel %vm4679_vm13, 4294967295, %v8118_v30  ;;  %v8122_v58 = vsel %vm4683_vm1, 4294967295, %v8121_v58  ;;  %vm8126_vm8 = vcmp.lt.s32.totalorder %v4483_v32, 50  ;;  %v83_v50 = vsel %vm4509_vm4, %v77_v46, 0.0 }
 0x23c   :  { %1823 = vrot.lane.b32.xlu2 %v1818_v0, %s8115_s23  ;;  %8120 = vst [vmem:[#allocation115_spill] sm:$0xff] %v8119_v30  ;;  %v109_v8 = vsel %vm8126_vm8, %v4034_v13, %v4016_v57  ;;  %vm8127_vm6 = vmmov %vm8126_vm8  ;;  %v90_v43 = vmul.f32 %v4024_v62, %v83_v50  ;;  %vm8131_vm4 = vcmp.lt.s32.totalorder %v4483_v32, 49  ;;  %vm8138_vm8 = vnez %v8091_v23  ;;  %s8447_s23 = smov 113  }
 0x23d   :  { %v1586_v60 = vpop.permute.xlu1 %1585  ;;  %v1584_v20 = vpop.permute.xlu0 %1583  ;;  %8123 = vst [vmem:[#allocation116_spill] sm:$0xff] %v8122_v58  ;;  %v110_v1 = vsel %vm8127_vm6, %v4016_v57, %v4034_v13  ;;  %v84_v57 = vsel %vm4513_vm5, %v76_v52, 0.0  ;;  %v271_v13 = vperm.slane %v270_v9, 0  ;;  %vm8132_vm5 = vmmov %vm8131_vm4 }
 0x23e   :  { %v1587_v17 = vsel %vm8124_vm3, %v1584_v20, %v1586_v60  ;;  %v1588_v61 = vsel %vm8125_vm10, %v1586_v60, %v1584_v20  ;;  %vm4703_vm3 = vmand %vm286_vm14, %vm287_vm15  ;;  %v1576_v60 = vadd.f32 %v1574_v19, %v1559_v4  ;;  %v1577_v20 = vadd.f32 %v1575_v25, %v1560_v27 }
 0x23f   :  { %v1589_v38 = vsel %vm4679_vm13, %v1588_v61, 0.0  ;;  %v1590_v6 = vsel %vm4683_vm1, %v1587_v17, 0.0  ;;  %v272_v61 = vperm.slane %v270_v9, 1  ;;  %vm289_vm10 = vmand %vm4703_vm3, %vm4457_vm7  ;;  %v91_v12 = vmul.f32 %v4024_v62, %v84_v57 }
 0x240   :  { %v1591_v33 = vmul.f32 %v1589_v38, %v4049_v24  ;;  %v1592_v14 = vmul.f32 %v1590_v6, %v4049_v24  ;;  %v116_v27 = vsel %vm4530_vm11, %v110_v1, 0.0  ;;  %v141_v4 = vsel %vm8131_vm4, %v4042_v18, %v4047_v22 }
 0x241   :  { %vm267_vm14 = vcmp.lt.s32.totalorder %v4483_v32, 45  ;;  %vm4735_vm15 = vcmp.eq.s32.totalorder %v271_v13, 1  ;;  %vm4739_vm11 = vcmp.eq.s32.totalorder %v272_v61, 1  ;;  %v302_v50 = vsel %vm289_vm10, 1, %v8073_v55 }
 0x242   :  { %v1834_v45 = vld.sshfl [vmem:[#allocation1] sm:$0xff pattern:$0x75316420]  ;;  %v1835_v17 = vld.sshfl [vmem:[#allocation1 + $0x8] sm:$0xff pattern:$0x75316420]  ;;  %v1593_v58 = vadd.f32 %v1591_v33, %v1576_v60  ;;  %v1594_v30 = vadd.f32 %v1592_v14, %v1577_v20  ;;  %v122_v52 = vmul.f32 %v4004_v49, %v116_v27 }
 0x243   :  { %1850 = vst [vmem:[#allocation1] ss:$2 sm:$0xff] %v4298_v42  ;;  %1840 = vrot.lane.b32.xlu1 %v1835_v17, %s8130_s24  ;;  %1838 = vrot.lane.b32.xlu0 %v1834_v45, %s8130_s24  ;;  %v117_v33 = vsel %vm4534_vm12, %v109_v8, 0.0  ;;  %v142_v45 = vsel %vm8132_vm5, %v4047_v22, %v4042_v18  ;;  %vm8137_vm12 = vcmp.lt.s32.totalorder %v4483_v32, 48  ;;  %v303_v38 = vperm.slane %v302_v50, 0  ;;  %s8465_s24 = smov 112  }
 0x244   :  { %v123_v19 = vmul.f32 %v4004_v49, %v117_v33  ;;  %v148_v9 = vsel %vm4559_vm0, %v142_v45, 0.0  ;;  %v304_v49 = vperm.slane %v302_v50, 1  ;;  %v149_v6 = vsel %vm8138_vm8, %v141_v4, 0.0  ;;  %vm8139_vm6 = vmmov %vm8137_vm12 }
 0x245   :  { %v1603_v35 = vpop.permute.xlu0 %1602  ;;  %v172_v11 = vsel %vm8139_vm6, %v4052_v26, %v4057_v29  ;;  %v124_v61 = vadd.f32 %v122_v52, %v90_v43  ;;  %v154_v27 = vmul.f32 %v4010_v53, %v148_v9  ;;  %vm8141_vm0 = vnez %v8069_v3 }
 0x246   :  { %v1604_v14 = vsel %vm267_vm14, %v4624_v16, %v1603_v35  ;;  %v1605_v18 = vsel %vm267_vm14, %v1603_v35, %v4624_v16  ;;  %v4750_v22 = vpop.permute.xlu2 %1651  ;;  %v173_v16 = vsel %vm8137_vm12, %v4057_v29, %v4052_v26  ;;  %v125_v17 = vadd.f32 %v123_v19, %v91_v12  ;;  %vm317_vm10 = vmand %vm4703_vm3, %vm8141_vm0 }
 0x247   :  { %v1606_v25 = vsel %vm4735_vm15, %v1605_v18, 0.0  ;;  %v1607_v46 = vsel %vm4739_vm11, %v1604_v14, 0.0  ;;  %vm8142_vm4 = vcmp.lt.s32.totalorder %v4483_v32, 47  ;;  %v155_v23 = vmul.f32 %v4010_v53, %v149_v6 }
 0x248   :  { %v1608_v8 = vmul.f32 %v1606_v25, %v4059_v31  ;;  %v1609_v1 = vmul.f32 %v1607_v46, %v4059_v31  ;;  %v204_v26 = vsel %vm8142_vm4, %v4062_v34, %v4067_v36  ;;  %vm8143_vm5 = vmmov %vm8142_vm4  ;;  %vm7814_vm12 = vcmp.lt.s32.totalorder %v4483_v32, 35 }
 0x249   :  { %v205_v29 = vsel %vm8143_vm5, %v4067_v36, %v4062_v34  ;;  %vm4798_vm8 = vcmp.eq.s32.totalorder %v303_v38, 1  ;;  %vm327_vm6 = vcmp.lt.s32.totalorder %v4483_v32, 34  ;;  %vm4805_vm4 = vcmp.eq.s32.totalorder %v304_v49, 1 }
 0x24a   :  { %v1851_v60 = vld.sshfl [vmem:[#allocation1] sm:$0xff pattern:$0x75316420]  ;;  %v1852_v20 = vld.sshfl [vmem:[#allocation1 + $0x8] sm:$0xff pattern:$0x75316420]  ;;  %v4772_v57 = vadd.f32 %v1608_v8, %v1593_v58  ;;  %v4774_v13 = vadd.f32 %v1609_v1, %v1594_v30  ;;  %v156_v33 = vadd.f32 %v154_v27, %v124_v61  ;;  %v4825_v45 = vsel %vm267_vm14, %v4087_v47, %v4094_v51 }
 0x24b   :  { %1867 = vst [vmem:[#allocation1] ss:$2 sm:$0xff] %v4298_v42  ;;  %1255 = vrot.lane.b32.xlu1 %v4226_v56, %s3826_s25  ;;  %1857 = vrot.lane.b32.xlu0 %v1852_v20, %s8140_s26  ;;  %v179_v56 = vsel %vm4594_vm2, %v173_v16, 0.0  ;;  %v180_v58 = vsel %vm4598_vm9, %v172_v11, 0.0  ;;  %v330_v28 = vsel %vm317_vm10, 1, %v8073_v55  ;;  %vm8148_vm2 = vnez %v8112_v7 }
 0x24c   :  { %1855 = vrot.lane.b32.xlu2 %v1851_v60, %s8140_s26  ;;  %v211_v12 = vsel %vm8148_vm2, %v205_v29, 0.0  ;;  %vm8149_vm9 = vnez %v8114_v54  ;;  %v185_v4 = vmul.f32 %v4026_v63, %v179_v56  ;;  %v157_v35 = vadd.f32 %v155_v23, %v125_v17  ;;  %s8323_s26 = smov 127  }
 0x24d   :  { %v1618_v43 = vpop.permute.xlu1 %1617  ;;  %v212_v59 = vsel %vm8149_vm9, %v204_v26, 0.0  ;;  %v186_v7 = vmul.f32 %v4026_v63, %v180_v58  ;;  %vm8151_vm10 = vnez %v8076_v41  ;;  %v331_v18 = vperm.slane %v330_v28, 0  ;;  %v8162_v58 = vld [vmem:[#allocation4_spill] sm:$0xff] }
 0x24e   :  { %v1621_v53 = vsel %vm7814_vm12, %v1618_v43, %v4671_v48  ;;  %v1622_v36 = vsel %vm7814_vm12, %v4671_v48, %v1618_v43  ;;  %v269_v48 = vsel %vm267_vm14, %v4094_v51, %v4087_v47  ;;  %v4832_v50 = vpop.permute.xlu2 %1201  ;;  %vm373_vm5 = vmand %vm4703_vm3, %vm8151_vm10  ;;  %v332_v52 = vperm.slane %v330_v28, 1 }
 0x24f   :  { %8150 = vst [vmem:[#allocation117_spill] sm:$0xff] %v4832_v50  ;;  %v1623_v54 = vsel %vm4798_vm8, %v1622_v36, 0.0  ;;  %v1624_v14 = vsel %vm4805_vm4, %v1621_v53, 0.0  ;;  %v217_v47 = vmul.f32 %v4039_v15, %v211_v12  ;;  %vm8152_vm14 = vcmp.lt.s32.totalorder %v4483_v32, 46 }
 0x250   :  { %v237_v63 = vsel %vm8152_vm14, %v4081_v44, %v4078_v40  ;;  %vm8153_vm2 = vnez %v8071_v5  ;;  %v218_v25 = vmul.f32 %v4039_v15, %v212_v59  ;;  %vm8154_vm12 = vmmov %vm8152_vm14  ;;  %v187_v9 = vadd.f32 %v185_v4, %v156_v33  ;;  %v8163_v59 = vld [vmem:[#allocation112_spill] sm:$0xff] }
 0x251   :  { %vm345_vm9 = vmand %vm4703_vm3, %vm8153_vm2  ;;  %v236_v46 = vsel %vm8154_vm12, %v4078_v40, %v4081_v44  ;;  %v275_v8 = vsel %vm4735_vm15, %v269_v48, 0.0  ;;  %v276_v1 = vsel %vm4739_vm11, %v4825_v45, 0.0  ;;  %v1625_v15 = vmul.f32 %v1623_v54, %v4070_v37 }
 0x252   :  { %v1868_v51 = vld.sshfl [vmem:[#allocation1] sm:$0xff pattern:$0x75316420]  ;;  %v1869_v19 = vld.sshfl [vmem:[#allocation1 + $0x8] sm:$0xff pattern:$0x75316420]  ;;  %v1626_v16 = vmul.f32 %v1624_v14, %v4070_v37  ;;  %v188_v44 = vadd.f32 %v186_v7, %v157_v35  ;;  %v219_v61 = vadd.f32 %v217_v47, %v187_v9  ;;  %v281_v54 = vmul.f32 %v4059_v31, %v275_v8 }
 0x253   :  { %1884 = vst [vmem:[#allocation1] ss:$2 sm:$0xff] %v4298_v42  ;;  %1242 = vperm.xlu0 %3671, %v4400_v2   ;;  %1872 = vrot.lane.b32.xlu1 %v1868_v51, %s8155_s27  ;;  %v386_v40 = vsel %vm373_vm5, 1, %v8073_v55  ;;  %v243_v38 = vsel %vm4679_vm13, %v237_v63, 0.0  ;;  %vm4882_vm15 = vcmp.eq.s32.totalorder %v331_v18, 1  ;;  %vm4886_vm11 = vcmp.eq.s32.totalorder %v332_v52, 1 }
 0x254   :  { %1257 = vrot.lane.b32.xlu2 %v4228_v10, %s3826_s25  ;;  %v358_v10 = vsel %vm345_vm9, 1, %v8073_v55  ;;  %v244_v27 = vsel %vm4683_vm1, %v236_v46, 0.0  ;;  %v1627_v23 = vadd.f32 %v1625_v15, %v4772_v57  ;;  %v1628_v56 = vadd.f32 %v1626_v16, %v4774_v13  ;;  %v8165_v7 = vld [vmem:[#allocation43_spill] sm:$0xff]  ;;  %v8167_v18 = vld [vmem:[#allocation6_spill] sm:$0xff] }
 0x255   :  { %v1637_v21 = vpop.permute.xlu1 %1636  ;;  %v1635_v49 = vpop.permute.xlu0 %1634  ;;  %v249_v36 = vmul.f32 %v4049_v24, %v243_v38  ;;  %v359_v28 = vperm.slane %v358_v10, 0  ;;  %v360_v12 = vperm.slane %v358_v10, 1  ;;  %vm8164_vm1 = vnez %v8163_v59  ;;  %v8168_v52 = vld [vmem:[#allocation7_spill] sm:$0xff]  ;;  %v8177_v10 = vld [vmem:[#allocation10_spill] sm:$0xff] }
 0x256   :  { %v1638_v60 = vsel %vm327_vm6, %v1635_v49, %v1637_v21  ;;  %v1639_v20 = vsel %vm327_vm6, %v1637_v21, %v1635_v49  ;;  %vm429_vm13 = vmand %vm4703_vm3, %vm8164_vm1  ;;  %v4911_v48 = vpop.permute.xlu2 %1670  ;;  %vm7815_vm12 = vcmp.lt.s32.totalorder %v4483_v32, 33  ;;  %v220_v13 = vadd.f32 %v218_v25, %v188_v44  ;;  %v8176_v49 = vld [vmem:[#allocation9_spill] sm:$0xff] }
 0x257   :  { %v1640_v26 = vsel %vm4882_vm15, %v1639_v20, 0.0  ;;  %v1641_v29 = vsel %vm4886_vm11, %v1638_v60, 0.0  ;;  %v250_v35 = vmul.f32 %v4049_v24, %v244_v27  ;;  %v282_v14 = vmul.f32 %v4059_v31, %v276_v1  ;;  %v8178_v20 = vld [vmem:[#allocation5_spill] sm:$0xff] }
 0x258   :  { %v1642_v43 = vmul.f32 %v1640_v26, %v8162_v58  ;;  %v1643_v53 = vmul.f32 %v1641_v29, %v8162_v58  ;;  %vm8169_vm14 = vcmp.lt.s32.totalorder %v4483_v32, 35  ;;  %v387_v63 = vperm.slane %v386_v40, 0  ;;  %v8183_v29 = vld [vmem:[#allocation114_spill] sm:$0xff] }
 0x259   :  { %v301_v47 = vsel %vm8169_vm14, %v8168_v52, %v8167_v18  ;;  %v3828_v51 = vmov 41   ;;  %vm8170_vm9 = vmmov %vm8169_vm14  ;;  %v388_v25 = vperm.slane %v386_v40, 1  ;;  %v442_v31 = vsel %vm429_vm13, 1, %v8073_v55 }
 0x25a   :  { %v1885_v33 = vld.sshfl [vmem:[#allocation1] sm:$0xff pattern:$0x75316420]  ;;  %v4909_v4 = vld.sshfl [vmem:[#allocation1 + $0x8] sm:$0xff pattern:$0x75316420]  ;;  %v1644_v45 = vadd.f32 %v1642_v43, %v1627_v23  ;;  %v1645_v57 = vadd.f32 %v1643_v53, %v1628_v56  ;;  %v300_v24 = vsel %vm8170_vm9, %v8167_v18, %v8168_v52  ;;  %v251_v46 = vadd.f32 %v249_v36, %v219_v61 }
 0x25b   :  { %1901 = vst [vmem:[#allocation1] ss:$2 sm:$0xff] %v4298_v42  ;;  %1287 = vrot.lane.b32.xlu1 %v8165_v7, %s3827_s28  ;;  %1889 = vrot.lane.b32.xlu0 %v1885_v33, %s8166_s29  ;;  %vm4939_vm14 = vcmp.eq.s32.totalorder %v359_v28, 1  ;;  %vm4943_vm5 = vcmp.eq.s32.totalorder %v360_v12, 1  ;;  %v307_v40 = vsel %vm4798_vm8, %v301_v47, 0.0  ;;  %v252_v44 = vadd.f32 %v250_v35, %v220_v13  ;;  %v8187_v7 = vld [vmem:[#allocation47_spill] sm:$0xff] }
 0x25c   :  { %3672 = vset.pattern.permute.xlu0 %v3828_v51  ;;  %1874 = vrot.lane.b32.xlu2 %v1869_v19, %s8155_s27  ;;  %v308_v21 = vsel %vm4805_vm4, %v300_v24, 0.0  ;;  %v329_v60 = vsel %vm327_vm6, %v8177_v10, %v8176_v49  ;;  %v328_v61 = vsel %vm327_vm6, %v8176_v49, %v8177_v10  ;;  %vm4971_vm8 = vcmp.eq.s32.totalorder %v387_v63, 1  ;;  %v8191_v18 = vld [vmem:[#allocation15_spill] sm:$0xff]  ;;  %v8196_v47 = vld [vmem:[#allocation44_spill] sm:$0xff]  ;;  %s8339_s27 = smov 126  }
 0x25d   :  { %v4937_v9 = vpop.permute.xlu1 %1199  ;;  %v1654_v8 = vpop.permute.xlu0 %1653  ;;  %vm4975_vm13 = vcmp.eq.s32.totalorder %v388_v25, 1  ;;  %v443_v27 = vperm.slane %v442_v31, 0  ;;  %v313_v26 = vmul.f32 %v4070_v37, %v307_v40  ;;  %vm8184_vm9 = vnez %v8183_v29  ;;  %v8198_v24 = vld [vmem:[#allocation103_spill] sm:$0xff] }
 0x25e   :  { %8171 = vst [vmem:[#allocation115_spill] sm:$0xff] %v4937_v9  ;;  %v1655_v15 = vsel %vm7815_vm12, %v4750_v22, %v1654_v8  ;;  %v1656_v16 = vsel %vm7815_vm12, %v1654_v8, %v4750_v22  ;;  %v283_v43 = vadd.f32 %v281_v54, %v251_v46  ;;  %v4993_v28 = vpop.permute.xlu2 %1702  ;;  %v314_v12 = vmul.f32 %v4070_v37, %v308_v21  ;;  %v8192_v37 = vld [vmem:[#allocation16_spill] sm:$0xff]  ;;  %v8456_v9 = vld [vmem:[#allocation79_spill] sm:$0xff] }
 0x25f   :  { %v1657_v62 = vsel %vm4939_vm14, %v1656_v16, 0.0  ;;  %v1658_v38 = vsel %vm4943_vm5, %v1655_v15, 0.0  ;;  %v444_v33 = vperm.slane %v442_v31, 1  ;;  %v284_v13 = vadd.f32 %v282_v14, %v252_v44  ;;  %v8194_v14 = vld [vmem:[#allocation110_spill] sm:$0xff] }
 0x260   :  { %v1659_v22 = vmul.f32 %v1657_v62, %v8178_v20  ;;  %v1660_v30 = vmul.f32 %v1658_v38, %v8178_v20  ;;  %v335_v35 = vsel %vm4882_vm15, %v329_v60, 0.0  ;;  %vm8190_vm6 = vcmp.lt.s32.totalorder %v4483_v32, 33  ;;  %v8237_v38 = vld [vmem:[#allocation27_spill] sm:$0xff] }
 0x261   :  { %vm8193_vm4 = vcmp.lt.s32.totalorder %v4483_v32, 32  ;;  %v336_v6 = vsel %vm4886_vm11, %v328_v61, 0.0  ;;  %vm8195_vm15 = vnez %v8194_v14  ;;  %vm8197_vm11 = vmand %vm4703_vm3, %vm8184_vm9  ;;  %v485_v25 = vadd.s32 4294967295, %v8198_v24 }
 0x262   :  { %v4985_v23 = vld.sshfl [vmem:[#allocation1] sm:$0xff pattern:$0x75316420]  ;;  %v4987_v56 = vld.sshfl [vmem:[#allocation1 + $0x8] sm:$0xff pattern:$0x75316420]  ;;  %v4989_v53 = vadd.f32 %v1659_v22, %v1644_v45  ;;  %v4991_v36 = vadd.f32 %v1660_v30, %v1645_v57  ;;  %v385_v52 = vsel %vm8193_vm4, %v8192_v37, %v8191_v18  ;;  %vm401_vm1 = vmand %vm4703_vm3, %vm8195_vm15  ;;  %v384_v51 = vsel %vm8193_vm4, %v8191_v18, %v8192_v37 }
 0x263   :  { %8185 = vst [vmem:[#allocation116_spill] sm:$0xff] %v4985_v23  ;;  %1315 = vrot.lane.b32.xlu1 %v8187_v7, %s3829_s30  ;;  %1270 = vperm.xlu0 %3672, %v4400_v2   ;;  %v8188_v45 = vld [vmem:[#allocation13_spill] sm:$0xff]  ;;  %v8189_v57 = vld [vmem:[#allocation12_spill] sm:$0xff]  ;;  %v5033_v11 = vsel %vm8197_vm11, 1, %v8073_v55  ;;  %vm5038_vm12 = vcmp.eq.s32.totalorder %v443_v27, 1  ;;  %v315_v15 = vadd.f32 %v313_v26, %v283_v43  ;;  %v341_v16 = vmul.f32 %v8162_v58, %v335_v35  ;;  %v8210_v18 = vld [vmem:[#allocation19_spill] sm:$0xff] }
 0x264   :  { %8186 = vst [vmem:[#allocation4_spill] sm:$0xff] %v4987_v56  ;;  %v356_v54 = vsel %vm8190_vm6, %v8189_v57, %v8188_v45  ;;  %1289 = vrot.lane.b32.xlu2 %v8196_v47, %s3827_s28  ;;  %v357_v63 = vsel %vm8190_vm6, %v8188_v45, %v8189_v57  ;;  %vm8202_vm6 = vmmov %vm8193_vm4  ;;  %v391_v62 = vsel %vm4971_vm8, %v385_v52, 0.0  ;;  %vm5051_vm11 = vcmp.eq.s32.totalorder %v444_v33, 1  ;;  %v8205_v30 = vld [vmem:[#allocation8_spill] sm:$0xff]  ;;  %v8211_v37 = vld [vmem:[#allocation18_spill] sm:$0xff] }
 0x265   :  { %1912 = vst [vmem:[#allocation1] ss:$2 sm:$0xff] %v4298_v42  ;;  %v5036_v31 = vpop.permute.xlu0 %1186  ;;  %v1669_v46 = vpop.permute.xlu1 %1668  ;;  %v316_v21 = vadd.f32 %v314_v12, %v284_v13  ;;  %v342_v49 = vmul.f32 %v8162_v58, %v336_v6  ;;  %v414_v10 = vsel %vm401_vm1, 1, %v8073_v55  ;;  %v363_v60 = vsel %vm4939_vm14, %v357_v63, 0.0  ;;  %v8206_v13 = vld [vmem:[#allocation52_spill] sm:$0xff]  ;;  %v8214_v47 = vld [vmem:[#allocation22_spill] sm:$0xff] }
 0x266   :  { %8199 = vst [vmem:[#allocation112_spill] sm:$0xff] %v5036_v31  ;;  %v1672_v40 = vsel %vm8202_vm6, %v1669_v46, %v4911_v48  ;;  %v1673_v44 = vsel %vm8193_vm4, %v4911_v48, %v1669_v46  ;;  %v392_v48 = vsel %vm4975_vm13, %v384_v51, 0.0  ;;  %v364_v22 = vsel %vm4943_vm5, %v356_v54, 0.0  ;;  %v8209_v57 = vld [vmem:[#allocation48_spill] sm:$0xff]  ;;  %v5091_v54 = vpop.permute.xlu2 %1721  ;;  %v8215_v63 = vld [vmem:[#allocation21_spill] sm:$0xff]  ;;  %v8329_v23 = vld [vmem:[#allocation54_spill] sm:$0xff] }
 0x267   :  { %vm486_vm6 = vcmp.ge.s32.totalorder %v485_v25, 0  ;;  %vm487_vm4 = vcmp.lt.s32.totalorder %v485_v25, 16  ;;  %v1674_v58 = vsel %vm4971_vm8, %v1673_v44, 0.0  ;;  %v1675_v0 = vsel %vm4975_vm13, %v1672_v40, 0.0  ;;  %v8330_v31 = vld [vmem:[#allocation58_spill] sm:$0xff] }
 0x268   :  { %v397_v61 = vmul.f32 %v8205_v30, %v391_v62  ;;  %v343_v27 = vadd.f32 %v341_v16, %v315_v15  ;;  %v415_v26 = vperm.slane %v414_v10, 0  ;;  %v416_v43 = vperm.slane %v414_v10, 1  ;;  %vm5082_vm3 = vmand %vm486_vm6, %vm487_vm4 }
 0x269   :  { %v471_v12 = vperm.slane %v5033_v11, 0  ;;  %v344_v1 = vadd.f32 %v342_v49, %v316_v21  ;;  %v369_v33 = vmul.f32 %v8178_v20, %v363_v60  ;;  %v370_v19 = vmul.f32 %v8178_v20, %v364_v22  ;;  %v8223_v60 = vld [vmem:[#allocation11_spill] sm:$0xff] }
 0x26a   :  { %v3831_v17 = vmov 42   ;;  %v398_v34 = vmul.f32 %v8205_v30, %v392_v48  ;;  %v472_v35 = vperm.slane %v5033_v11, 1  ;;  %v1676_v45 = vmul.f32 %v1674_v58, %v8205_v30 }
 0x26b   :  { %1343 = vrot.lane.b32.xlu1 %v8206_v13, %s3830_s2  ;;  %3673 = vset.pattern.permute.xlu0 %v3831_v17  ;;  %v1677_v20 = vmul.f32 %v1675_v0, %v8205_v30  ;;  %vm8212_vm1 = vcmp.lt.s32.totalorder %v4483_v32, 31  ;;  %vm8216_vm14 = vcmp.lt.s32.totalorder %v4483_v32, 30  ;;  %vm5109_vm13 = vcmp.eq.s32.totalorder %v415_v26, 1  ;;  %v8228_v13 = vld [vmem:[#allocation55_spill] sm:$0xff] }
 0x26c   :  { %1302 = vperm.xlu0 %3673, %v4400_v2   ;;  %1317 = vrot.lane.b32.xlu2 %v8209_v57, %s3829_s30  ;;  %v412_v52 = vsel %vm8212_vm1, %v8211_v37, %v8210_v18  ;;  %vm8213_vm5 = vmmov %vm8212_vm1  ;;  %v440_v51 = vsel %vm8216_vm14, %v8215_v63, %v8214_v47  ;;  %vm5113_vm6 = vcmp.eq.s32.totalorder %v416_v43, 1  ;;  %v371_v44 = vadd.f32 %v369_v33, %v343_v27  ;;  %v8229_v57 = vld [vmem:[#allocation53_spill] sm:$0xff] }
 0x26d   :  { %v413_v6 = vsel %vm8213_vm5, %v8210_v18, %v8211_v37  ;;  %vm8217_vm8 = vmmov %vm8216_vm14  ;;  %v1688_v24 = vpop.permute.xlu1 %1687  ;;  %v1686_v25 = vpop.permute.xlu0 %1685  ;;  %v372_v62 = vadd.f32 %v370_v19, %v344_v1  ;;  %v1678_v10 = vadd.f32 %v1676_v45, %v4989_v53  ;;  %v1679_v48 = vadd.f32 %v1677_v20, %v4991_v36 }
 0x26e   :  { %v441_v11 = vsel %vm8217_vm8, %v8214_v47, %v8215_v63  ;;  %vm8222_vm4 = vmmov %vm8212_vm1  ;;  %v1690_v40 = vsel %vm8212_vm1, %v1688_v24, %v1686_v25  ;;  %v419_v30 = vsel %vm5109_vm13, %v413_v6, 0.0  ;;  %v420_v27 = vsel %vm5113_vm6, %v412_v52, 0.0  ;;  %v8231_v6 = vld [vmem:[#allocation25_spill] sm:$0xff]  ;;  %v8232_v47 = vld [vmem:[#allocation24_spill] sm:$0xff] }
 0x26f   :  { %v1689_v16 = vsel %vm8222_vm4, %v1686_v25, %v1688_v24  ;;  %v1691_v21 = vsel %vm5109_vm13, %v1690_v40, 0.0  ;;  %vm489_vm5 = vmand %vm5082_vm3, %vm4457_vm7  ;;  %v447_v0 = vsel %vm5038_vm12, %v441_v11, 0.0  ;;  %v448_v26 = vsel %vm5051_vm11, %v440_v51, 0.0 }
 0x270   :  { %v1692_v49 = vsel %vm5113_vm6, %v1689_v16, 0.0  ;;  %v1693_v22 = vmul.f32 %v1691_v21, %v8223_v60  ;;  %vm545_vm14 = vmand %vm5082_vm3, %vm8153_vm2  ;;  %v502_v43 = vsel %vm489_vm5, 1, %v8073_v55  ;;  %vm467_vm8 = vcmp.lt.s32.totalorder %v4483_v32, 29 }
 0x271   :  { %v1694_v58 = vmul.f32 %v1692_v49, %v8223_v60  ;;  %vm5147_vm4 = vcmp.eq.s32.totalorder %v471_v12, 1  ;;  %vm5151_vm13 = vcmp.eq.s32.totalorder %v472_v35, 1  ;;  %v399_v19 = vadd.f32 %v397_v61, %v371_v44  ;;  %vm517_vm1 = vmand %vm5082_vm3, %vm8141_vm0  ;;  %v8230_v61 = vld [vmem:[#allocation14_spill] sm:$0xff] }
 0x272   :  { %v1695_v53 = vadd.f32 %v1693_v22, %v1678_v10  ;;  %vm7817_vm6 = vcmp.lt.s32.totalorder %v4483_v32, 19  ;;  %v400_v17 = vadd.f32 %v398_v34, %v372_v62  ;;  %v425_v45 = vmul.f32 %v8223_v60, %v419_v30  ;;  %v8238_v10 = vld [vmem:[#allocation28_spill] sm:$0xff] }
 0x273   :  { %v1696_v36 = vadd.f32 %v1694_v58, %v1679_v48  ;;  %1371 = vrot.lane.b32.xlu1 %v8228_v13, %s3832_s17  ;;  %v426_v20 = vmul.f32 %v8223_v60, %v420_v27  ;;  %v3833_v12 = vmov 43   ;;  %v453_v35 = vmul.f32 %v8230_v61, %v447_v0  ;;  %v5214_v58 = vld.sshfl [vmem:[#allocation1] sm:$0xff pattern:$0x75316420]  ;;  %v8239_v27 = vld [vmem:[#allocation60_spill] sm:$0xff] }
 0x274   :  { %3674 = vset.pattern.permute.xlu0 %v3833_v12  ;;  %1345 = vrot.lane.b32.xlu2 %v8229_v57, %s3830_s2  ;;  %v454_v18 = vmul.f32 %v8230_v61, %v448_v26  ;;  %v558_v34 = vsel %vm545_vm14, 1, %v8073_v55  ;;  %v503_v52 = vperm.slane %v502_v43, 0  ;;  %v468_v63 = vsel %vm467_vm8, %v8232_v47, %v8231_v6  ;;  %v5216_v0 = vld.sshfl [vmem:[#allocation1 + $0x8] sm:$0xff pattern:$0x75316420]  ;;  %v8270_v26 = vld [vmem:[#allocation23_spill] sm:$0xff] }
 0x275   :  { %v1705_v37 = vpop.permute.xlu0 %1704  ;;  %1330 = vperm.xlu0 %3674, %v4400_v2   ;;  %v469_v51 = vsel %vm467_vm8, %v8231_v6, %v8232_v47  ;;  %vm8233_vm5 = vcmp.lt.s32.totalorder %v4483_v32, 30  ;;  %v504_v15 = vperm.slane %v502_v43, 1  ;;  %v530_v16 = vsel %vm517_vm1, 1, %v8073_v55  ;;  %1929 = vst [vmem:[#allocation1] ss:$2 sm:$0xff] %v4298_v42  ;;  %v8242_v43 = vld [vmem:[#allocation17_spill] sm:$0xff] }
 0x276   :  { %v1706_v11 = vsel %vm8233_vm5, %v4993_v28, %v1705_v37  ;;  %vm8234_vm14 = vmmov %vm8233_vm5  ;;  %v5189_v2 = vpop.permute.xlu2 %1753  ;;  %v427_v40 = vadd.f32 %v425_v45, %v399_v19  ;;  %v428_v44 = vadd.f32 %v426_v20, %v400_v17  ;;  %v476_v49 = vsel %vm5151_vm13, %v468_v63, 0.0  ;;  %v8243_v20 = vld [vmem:[#allocation56_spill] sm:$0xff]  ;;  %v8293_v63 = vld [vmem:[#allocation39_spill] sm:$0xff] }
 0x277   :  { %v1707_v24 = vsel %vm8234_vm14, %v1705_v37, %v4993_v28  ;;  %v1709_v46 = vsel %vm5051_vm11, %v1706_v11, 0.0  ;;  %v475_v28 = vsel %vm5147_vm4, %v469_v51, 0.0  ;;  %vm5202_vm5 = vcmp.eq.s32.totalorder %v503_v52, 1  ;;  %vm8245_vm11 = vmand %vm5082_vm3, %vm8195_vm15 }
 0x278   :  { %v1708_v25 = vsel %vm5038_vm12, %v1707_v24, 0.0  ;;  %v1711_v21 = vmul.f32 %v1709_v46, %v8230_v61  ;;  %v501_v48 = vsel %vm7817_vm6, %v8238_v10, %v8237_v38  ;;  %v500_v30 = vsel %vm7817_vm6, %v8237_v38, %v8238_v10  ;;  %v8250_v24 = vld [vmem:[#allocation20_spill] sm:$0xff]  ;;  %v8258_v10 = vld [vmem:[#allocation31_spill] sm:$0xff] }
 0x279   :  { %v1710_v62 = vmul.f32 %v1708_v25, %v8230_v61  ;;  %vm5224_vm12 = vcmp.eq.s32.totalorder %v504_v15, 1  ;;  %v481_v19 = vmul.f32 %v8242_v43, %v475_v28  ;;  %v482_v13 = vmul.f32 %v8242_v43, %v476_v49 }
 0x27a   :  { %v5212_v22 = vadd.f32 %v1711_v21, %v1696_v36  ;;  %v532_v36 = vperm.slane %v530_v16, 1  ;;  %v455_v17 = vadd.f32 %v453_v35, %v427_v40  ;;  %v456_v45 = vadd.f32 %v454_v18, %v428_v44 }
 0x27b   :  { %v5210_v60 = vadd.f32 %v1710_v62, %v1695_v53  ;;  %1399 = vrot.lane.b32.xlu1 %v8239_v27, %s3834_s18  ;;  %v531_v53 = vperm.slane %v530_v16, 0  ;;  %v559_v12 = vperm.slane %v558_v34, 0  ;;  %v560_v57 = vperm.slane %v558_v34, 1  ;;  %v5257_v34 = vld [vmem:[%s7618_s3] sm:$0xf]  ;;  %s3836_s3 = smov 78  }
 0x27c   :  { %1373 = vrot.lane.b32.xlu2 %v8243_v20, %s3832_s17  ;;  %v3835_v37 = vmov 44   ;;  %v507_v52 = vsel %vm5202_vm5, %v501_v48, 0.0  ;;  %vm8244_vm6 = vnez %v8163_v59  ;;  %v508_v6 = vsel %vm5224_vm12, %v500_v30, 0.0  ;;  %v5310_v49 = vld.sshfl [vmem:[#allocation1] sm:$0xff pattern:$0x75316420] }
 0x27d   :  { %v1720_v61 = vpop.permute.xlu1 %1719  ;;  %3675 = vset.pattern.permute.xlu0 %v3835_v37  ;;  %v5269_v47 = vsel %vm8245_vm11, 1, %v8073_v55  ;;  %vm5275_vm1 = vcmp.eq.s32.totalorder %v532_v36, 1  ;;  %v483_v51 = vadd.f32 %v481_v19, %v455_v17  ;;  %v484_v11 = vadd.f32 %v482_v13, %v456_v45  ;;  %vm8252_vm11 = vmand %vm5082_vm3, %vm8151_vm10  ;;  %v5312_v38 = vld.sshfl [vmem:[#allocation1 + $0x8] sm:$0xff pattern:$0x75316420]  ;;  %v8262_v27 = vld [vmem:[#allocation65_spill] sm:$0xff] }
 0x27e   :  { %v1723_v35 = vsel %vm467_vm8, %v1720_v61, %v5091_v54  ;;  %v1724_v18 = vsel %vm467_vm8, %v5091_v54, %v1720_v61  ;;  %1358 = vperm.xlu0 %3675, %v5257_v34   ;;  %vm5271_vm8 = vcmp.eq.s32.totalorder %v531_v53, 1  ;;  %v513_v25 = vmul.f32 %v8250_v24, %v507_v52  ;;  %v5280_v46 = vpop.permute.xlu2 %1229  ;;  %vm8257_vm2 = vmand %vm5082_vm3, %vm8244_vm6  ;;  %v8259_v48 = vld [vmem:[#allocation30_spill] sm:$0xff]  ;;  %1946 = vst [vmem:[#allocation1] ss:$2 sm:$0xff] %v4298_v42  ;;  %v8263_v13 = vld [vmem:[#allocation61_spill] sm:$0xff] }
 0x27f   :  { %8251 = vst [vmem:[#allocation43_spill] sm:$0xff] %v5280_v46  ;;  %v586_v15 = vsel %vm8252_vm11, 1, %v8073_v55  ;;  %vm5288_vm14 = vcmp.eq.s32.totalorder %v559_v12, 1  ;;  %v8253_v16 = vmov 0  ;;  %vm5292_vm15 = vcmp.eq.s32.totalorder %v560_v57, 1 }
 0x280   :  { %v8254_v16 = vsel %vm5288_vm14, 4294967295, %v8253_v16  ;;  %v8255_v40 = vmov 0  ;;  %v5302_v44 = vsel %vm8257_vm2, 1, %v8073_v55  ;;  %v1725_v62 = vsel %vm5147_vm4, %v1724_v18, 0.0 }
 0x281   :  { %v8256_v40 = vsel %vm5292_vm15, 4294967295, %v8255_v40  ;;  %v1726_v21 = vsel %vm5151_vm13, %v1723_v35, 0.0  ;;  %v514_v28 = vmul.f32 %v8250_v24, %v508_v6  ;;  %vm7824_vm11 = vcmp.lt.s32.totalorder %v4483_v32, 16 }
 0x282   :  { %vm8260_vm6 = vcmp.lt.s32.totalorder %v4483_v32, 18  ;;  %v615_v33 = vperm.slane %v5269_v47, 0  ;;  %v616_v53 = vperm.slane %v5269_v47, 1  ;;  %v1727_v36 = vmul.f32 %v1725_v62, %v8242_v43  ;;  %v5343_v47 = vld [vmem:[%s7620_s1] sm:$0x3]  ;;  %s3838_s1 = smov 77  }
 0x283   :  { %v528_v30 = vsel %vm8260_vm6, %v8259_v48, %v8258_v10  ;;  %vm8261_vm2 = vmmov %vm8260_vm6  ;;  %1427 = vrot.lane.b32.xlu1 %v8262_v27, %s3836_s3  ;;  %v1728_v19 = vmul.f32 %v1726_v21, %v8242_v43  ;;  %v587_v17 = vperm.slane %v586_v15, 0  ;;  %v643_v45 = vperm.slane %v5302_v44, 0 }
 0x284   :  { %v529_v1 = vsel %vm8261_vm2, %v8258_v10, %v8259_v48  ;;  %1401 = vrot.lane.b32.xlu2 %v8263_v13, %s3834_s18  ;;  %v515_v12 = vadd.f32 %v513_v25, %v483_v51  ;;  %v516_v57 = vadd.f32 %v514_v28, %v484_v11  ;;  %v588_v37 = vperm.slane %v586_v15, 1  ;;  %v8266_v28 = vld [vmem:[#allocation34_spill] sm:$0xff]  ;;  %v8267_v10 = vld [vmem:[#allocation33_spill] sm:$0xff]  ;;  %v8360_v13 = vld [vmem:[#allocation68_spill] sm:$0xff] }
 0x285   :  { %v1739_v20 = vpop.permute.xlu1 %1738  ;;  %v1737_v61 = vpop.permute.xlu0 %1736  ;;  %vm8264_vm4 = vcmp.lt.s32.totalorder %v4483_v32, 19  ;;  %v3837_v18 = vmov 45   ;;  %v535_v43 = vsel %vm5271_vm8, %v529_v1, 0.0  ;;  %v536_v6 = vsel %vm5275_vm1, %v528_v30, 0.0 }
 0x286   :  { %v1740_v52 = vsel %vm8264_vm4, %v1737_v61, %v1739_v20  ;;  %vm8265_vm13 = vmmov %vm8264_vm4  ;;  %3676 = vset.pattern.permute.xlu0 %v3837_v18  ;;  %vm685_vm6 = vcmp.ge.s32.totalorder %v5343_v47, 0  ;;  %vm686_vm2 = vcmp.lt.s32.totalorder %v5343_v47, 16  ;;  %v1729_v25 = vadd.f32 %v1727_v36, %v5210_v60  ;;  %v5370_v27 = vpop.permute.xlu2 %1772  ;;  %v5372_v36 = vld.sshfl [vmem:[#allocation1] sm:$0xff pattern:$0x75316420]  ;;  %v8281_v18 = vld [vmem:[#allocation36_spill] sm:$0xff] }
 0x287   :  { %v1741_v35 = vsel %vm8265_vm13, %v1739_v20, %v1737_v61  ;;  %v1743_v11 = vsel %vm5224_vm12, %v1740_v52, 0.0  ;;  %1386 = vperm.xlu0 %3676, %v5257_v34   ;;  %v1730_v15 = vadd.f32 %v1728_v19, %v5212_v22  ;;  %vm8268_vm4 = vcmp.lt.s32.totalorder %v4483_v32, 17  ;;  %vm5366_vm12 = vmand %vm685_vm6, %vm686_vm2  ;;  %v5374_v19 = vld.sshfl [vmem:[#allocation1 + $0x8] sm:$0xff pattern:$0x75316420]  ;;  %v8275_v20 = vld [vmem:[#allocation69_spill] sm:$0xff] }
 0x288   :  { %v1742_v51 = vsel %vm5202_vm5, %v1741_v35, 0.0  ;;  %v1745_v21 = vmul.f32 %v1743_v11, %v8250_v24  ;;  %v556_v48 = vsel %vm8268_vm4, %v8267_v10, %v8266_v28  ;;  %vm8269_vm5 = vmmov %vm8268_vm4  ;;  %v541_v30 = vmul.f32 %v8270_v26, %v535_v43  ;;  %1963 = vst [vmem:[#allocation1] ss:$2 sm:$0xff] %v4298_v42  ;;  %v8282_v43 = vld [vmem:[#allocation37_spill] sm:$0xff] }
 0x289   :  { %v1744_v62 = vmul.f32 %v1742_v51, %v8250_v24  ;;  %v557_v8 = vsel %vm8269_vm5, %v8266_v28, %v8267_v10  ;;  %v542_v60 = vmul.f32 %v8270_v26, %v536_v6  ;;  %vm5377_vm4 = vcmp.eq.s32.totalorder %v615_v33, 1  ;;  %v8291_v28 = vld [vmem:[#allocation26_spill] sm:$0xff] }
 0x28a   :  { %v1747_v24 = vadd.f32 %v1745_v21, %v1730_v15  ;;  %vm5383_vm6 = vcmp.eq.s32.totalorder %v587_v17, 1  ;;  %vm5387_vm2 = vcmp.eq.s32.totalorder %v588_v37, 1  ;;  %v563_v33 = vsel %vm5288_vm14, %v557_v8, 0.0  ;;  %v8280_v37 = vld [vmem:[#allocation66_spill] sm:$0xff] }
 0x28b   :  { %v1746_v1 = vadd.f32 %v1744_v62, %v1729_v25  ;;  %1455 = vrot.lane.b32.xlu1 %v8275_v20, %s3838_s1  ;;  %v564_v17 = vsel %vm5292_vm15, %v556_v48, 0.0  ;;  %v644_v35 = vperm.slane %v5302_v44, 1  ;;  %v585_v6 = vsel %vm7824_vm11, %v8282_v43, %v8281_v18  ;;  %vm8290_vm15 = vmand %vm5082_vm3, %vm8184_vm9  ;;  %v8294_v20 = vld [vmem:[#allocation40_spill] sm:$0xff] }
 0x28c   :  { %1429 = vrot.lane.b32.xlu2 %v8280_v37, %s3836_s3  ;;  %vm5407_vm13 = vcmp.eq.s32.totalorder %v616_v53, 1  ;;  %v543_v25 = vadd.f32 %v541_v30, %v515_v12  ;;  %v544_v15 = vadd.f32 %v542_v60, %v516_v57  ;;  %v584_v44 = vsel %vm7824_vm11, %v8281_v18, %v8282_v43  ;;  %vm716_vm3 = vmand %vm5366_vm12, %vm8141_vm0 }
 0x28d   :  { %v5412_v11 = vpop.permute.xlu1 %1227  ;;  %v1756_v62 = vpop.permute.xlu0 %1755  ;;  %vm5422_vm14 = vcmp.eq.s32.totalorder %v643_v45, 1  ;;  %vm8288_vm5 = vcmp.lt.s32.totalorder %v4483_v32, 18  ;;  %v670_v21 = vsel %vm8290_vm15, 1, %v8073_v55  ;;  %v569_v45 = vmul.f32 %v8291_v28, %v563_v33 }
 0x28e   :  { %8285 = vst [vmem:[#allocation6_spill] sm:$0xff] %v5412_v11  ;;  %v1757_v12 = vsel %vm8288_vm5, %v5189_v2, %v1756_v62  ;;  %vm8289_vm10 = vmmov %vm8288_vm5  ;;  %v570_v10 = vmul.f32 %v8291_v28, %v564_v17  ;;  %v3839_v30 = vmov 46   ;;  %v591_v60 = vsel %vm5383_vm6, %v585_v6, 0.0  ;;  %v5465_v6 = vpop.permute.xlu2 %1804 }
 0x28f   :  { %v1758_v57 = vsel %vm8289_vm10, %v1756_v62, %v5189_v2  ;;  %v1760_v8 = vsel %vm5275_vm1, %v1757_v12, 0.0  ;;  %3677 = vset.pattern.permute.xlu0 %v3839_v30  ;;  %vm8292_vm10 = vmand %vm5366_vm12, %vm4457_vm7  ;;  %vm8295_vm15 = vcmp.lt.s32.totalorder %v4483_v32, 15  ;;  %v671_v17 = vperm.slane %v670_v21, 0  ;;  %v5467_v62 = vld.sshfl [vmem:[#allocation1] sm:$0xff pattern:$0x75316420] }
 0x290   :  { %v1759_v48 = vsel %vm5271_vm8, %v1758_v57, 0.0  ;;  %v1762_v7 = vmul.f32 %v1760_v8, %v8270_v26  ;;  %1414 = vperm.xlu0 %3677, %v5257_v34   ;;  %v701_v54 = vsel %vm8292_vm10, 1, %v8073_v55  ;;  %v613_v33 = vsel %vm8295_vm15, %v8294_v20, %v8293_v63  ;;  %v5469_v12 = vld.sshfl [vmem:[#allocation1 + $0x8] sm:$0xff pattern:$0x75316420]  ;;  %vm8300_vm5 = vmmov %vm8295_vm15 }
 0x291   :  { %v1761_v2 = vmul.f32 %v1759_v48, %v8270_v26  ;;  %v592_v26 = vsel %vm5387_vm2, %v584_v44, 0.0  ;;  %v672_v37 = vperm.slane %v670_v21, 1  ;;  %vm5475_vm1 = vcmp.eq.s32.totalorder %v644_v35, 1  ;;  %1980 = vst [vmem:[#allocation1] ss:$2 sm:$0xff] %v4298_v42  ;;  %v8299_v35 = vld [vmem:[#allocation70_spill] sm:$0xff] }
 0x292   :  { %v5463_v43 = vadd.f32 %v1762_v7, %v1747_v24  ;;  %v8296_v57 = vmov 0  ;;  %v8298_v24 = vld [vmem:[#allocation29_spill] sm:$0xff]  ;;  %v702_v21 = vperm.slane %v701_v54, 0  ;;  %v619_v48 = vsel %vm5377_vm4, %v613_v33, 0.0  ;;  %v8304_v7 = vld [vmem:[#allocation42_spill] sm:$0xff] }
 0x293   :  { %v5461_v18 = vadd.f32 %v1761_v2, %v1746_v1  ;;  %v8297_v57 = vsel %vm5475_vm1, 4294967295, %v8296_v57  ;;  %1891 = vrot.lane.b32.xlu1 %v4909_v4, %s8166_s29  ;;  %v571_v1 = vadd.f32 %v569_v45, %v543_v25  ;;  %v597_v44 = vmul.f32 %v8298_v24, %v591_v60  ;;  %s8366_s29 = smov 125  }
 0x294   :  { %v572_v8 = vadd.f32 %v570_v10, %v544_v15  ;;  %1457 = vrot.lane.b32.xlu2 %v8299_v35, %s3838_s1  ;;  %v703_v30 = vperm.slane %v701_v54, 1  ;;  %v612_v4 = vsel %vm8300_vm5, %v8293_v63, %v8294_v20  ;;  %v598_v2 = vmul.f32 %v8298_v24, %v592_v26  ;;  %v8303_v10 = vld [vmem:[#allocation45_spill] sm:$0xff]  ;;  %v8313_v35 = vld [vmem:[#allocation32_spill] sm:$0xff] }
 0x295   :  { %v5492_v25 = vpop.permute.xlu0 %1214  ;;  %v1771_v45 = vpop.permute.xlu1 %1770  ;;  %v729_v15 = vsel %vm716_vm3, 1, %v8073_v55  ;;  %vm8302_vm10 = vnez %v8071_v5  ;;  %vm8305_vm5 = vcmp.lt.s32.totalorder %v4483_v32, 14  ;;  %vm8307_vm8 = vcmp.lt.s32.totalorder %v4483_v32, 17 }
 0x296   :  { %8301 = vst [vmem:[#allocation7_spill] sm:$0xff] %v5492_v25  ;;  %v640_v60 = vsel %vm8305_vm5, %v8304_v7, %v8303_v10  ;;  %vm8306_vm11 = vmmov %vm8305_vm5  ;;  %v1774_v63 = vsel %vm8307_vm8, %v1771_v45, %v5370_v27  ;;  %vm5519_vm0 = vcmp.eq.s32.totalorder %v671_v17, 1  ;;  %vm5523_vm15 = vcmp.eq.s32.totalorder %v672_v37, 1 }
 0x297   :  { %v641_v54 = vsel %vm8306_vm11, %v8303_v10, %v8304_v7  ;;  %vm8308_vm3 = vmmov %vm8307_vm8  ;;  %v8311_v26 = vmov 0  ;;  %v625_v25 = vmul.f32 %v8313_v35, %v619_v48  ;;  %v599_v10 = vadd.f32 %v597_v44, %v571_v1 }
 0x298   :  { %v1775_v20 = vsel %vm8308_vm3, %v5370_v27, %v1771_v45  ;;  %v8312_v26 = vsel %vm5523_vm15, 4294967295, %v8311_v26  ;;  %vm5529_vm5 = vcmp.eq.s32.totalorder %v702_v21, 1  ;;  %v8314_v7 = vmov 0  ;;  %vm8316_vm8 = vmand %vm5366_vm12, %vm8302_vm10 }
 0x299   :  { %v8315_v7 = vsel %vm5529_vm5, 4294967295, %v8314_v7  ;;  %v620_v27 = vsel %vm5407_vm13, %v612_v4, 0.0  ;;  %v3840_v17 = vmov 47   ;;  %v730_v45 = vperm.slane %v729_v15, 0 }
 0x29a   :  { %3678 = vset.pattern.permute.xlu0 %v3840_v17  ;;  %v731_v11 = vperm.slane %v729_v15, 1  ;;  %v757_v37 = vsel %vm8316_vm8, 1, %v8073_v55  ;;  %v647_v1 = vsel %vm5422_vm14, %v641_v54, 0.0  ;;  %v648_v44 = vsel %vm5475_vm1, %v640_v60, 0.0 }
 0x29b   :  { %vm8317_vm3 = vnez %v8076_v41  ;;  %vm8318_vm7 = vnez %v8254_v16  ;;  %vm8319_vm9 = vnez %v8256_v40  ;;  %1442 = vperm.xlu0 %3678, %v5257_v34   ;;  %vm5554_vm8 = vcmp.eq.s32.totalorder %v703_v30, 1  ;;  %v5558_v54 = vld.sshfl [vmem:[#allocation1] sm:$0xff pattern:$0x75316420]  ;;  %1917 = vrot.lane.b32.xlu1 %v5214_v58, %s8323_s26 }
 0x29c   :  { %vm772_vm11 = vmand %vm5366_vm12, %vm8317_vm3  ;;  %v1776_v21 = vsel %vm8318_vm7, %v1775_v20, 0.0  ;;  %v1777_v48 = vsel %vm8319_vm9, %v1774_v63, 0.0  ;;  %v8320_v4 = vmov 0  ;;  %v600_v15 = vadd.f32 %v598_v2, %v572_v8  ;;  %v5560_v60 = vld.sshfl [vmem:[#allocation1 + $0x8] sm:$0xff pattern:$0x75316420]  ;;  %v5570_v2 = vpop.permute.xlu2 %1823  ;;  %1919 = vrot.lane.b32.xlu2 %v5216_v0, %s8323_s26 }
 0x29d   :  { %v8321_v4 = vsel %vm5554_vm8, 4294967295, %v8320_v4  ;;  %8322 = vst [vmem:[#allocation9_spill] sm:$0xff] %v5560_v60  ;;  %v626_v17 = vmul.f32 %v8313_v35, %v620_v27  ;;  %v627_v16 = vadd.f32 %v625_v25, %v599_v10  ;;  %v758_v40 = vperm.slane %v757_v37, 0  ;;  %v8324_v27 = vld [vmem:[#allocation35_spill] sm:$0xff]  ;;  %v8325_v25 = vld [vmem:[#allocation50_spill] sm:$0xff]  ;;  %v8326_v10 = vld [vmem:[#allocation49_spill] sm:$0xff] }
 0x29e   :  { %1997 = vst [vmem:[#allocation1] ss:$2 sm:$0xff] %v4298_v42  ;;  %v773_v30 = vsel %vm772_vm11, 1, %v8073_v55  ;;  %v1778_v63 = vmul.f32 %v1776_v21, %v8291_v28  ;;  %v1779_v8 = vmul.f32 %v1777_v48, %v8291_v28  ;;  %v759_v20 = vperm.slane %v757_v37, 1  ;;  %v1790_v21 = vpop.permute.xlu1 %1789  ;;  %v1788_v48 = vpop.permute.xlu0 %1787  ;;  %s8492_s26 = smov 111  }
 0x29f   :  { %v653_v46 = vmul.f32 %v8324_v27, %v647_v1  ;;  %v654_v58 = vmul.f32 %v8324_v27, %v648_v44  ;;  %vm8327_vm7 = vcmp.lt.s32.totalorder %v4483_v32, 13  ;;  %vm8331_vm11 = vcmp.lt.s32.totalorder %v4483_v32, 3 }
 0x2a0   :  { %v668_v56 = vsel %vm8327_vm7, %v8326_v10, %v8325_v25  ;;  %vm8328_vm9 = vmmov %vm8327_vm7  ;;  %v700_v0 = vsel %vm8331_vm11, %v8330_v31, %v8329_v23  ;;  %vm8332_vm3 = vcmp.lt.s32.totalorder %v4483_v32, 16  ;;  %vm5592_vm1 = vcmp.eq.s32.totalorder %v730_v45, 1 }
 0x2a1   :  { %v669_v28 = vsel %vm8328_vm9, %v8325_v25, %v8326_v10  ;;  %v1791_v37 = vsel %vm8332_vm3, %v1788_v48, %v1790_v21  ;;  %vm8333_vm10 = vmmov %vm8332_vm3  ;;  %vm5596_vm7 = vcmp.eq.s32.totalorder %v731_v11, 1  ;;  %v774_v25 = vperm.slane %v773_v30, 0 }
 0x2a2   :  { %v1792_v1 = vsel %vm8333_vm10, %v1790_v21, %v1788_v48  ;;  %v775_v10 = vperm.slane %v773_v30, 1  ;;  %v1794_v41 = vsel %vm5387_vm2, %v1791_v37, 0.0  ;;  %v1780_v60 = vadd.f32 %v1778_v63, %v5461_v18  ;;  %vm8338_vm10 = vmmov %vm8331_vm11 }
 0x2a3   :  { %v1793_v50 = vsel %vm5383_vm6, %v1792_v1, 0.0  ;;  %v1781_v21 = vadd.f32 %v1779_v8, %v5463_v43  ;;  %v1796_v48 = vmul.f32 %v1794_v41, %v8298_v24  ;;  %v699_v11 = vsel %vm8338_vm10, %v8329_v23, %v8330_v31  ;;  %1934 = vrot.lane.b32.xlu1 %v5310_v49, %s8339_s27 }
 0x2a4   :  { %v1795_v45 = vmul.f32 %v1793_v50, %v8298_v24  ;;  %v3841_v30 = vmov 48   ;;  %v675_v61 = vsel %vm5519_vm0, %v669_v28, 0.0  ;;  %v676_v52 = vsel %vm5523_vm15, %v668_v56, 0.0  ;;  %1936 = vrot.lane.b32.xlu2 %v5312_v38, %s8339_s27  ;;  %v8353_v38 = vld [vmem:[#allocation63_spill] sm:$0xff]  ;;  %s8571_s27 = smov 99  }
 0x2a5   :  { %3679 = vset.pattern.permute.xlu0 %v3841_v30  ;;  %v706_v18 = vsel %vm5529_vm5, %v700_v0, 0.0  ;;  %v628_v43 = vadd.f32 %v626_v17, %v600_v15  ;;  %v1798_v63 = vadd.f32 %v1796_v48, %v1781_v21  ;;  %v5619_v41 = vld.sshfl [vmem:[#allocation1] sm:$0xff pattern:$0x75316420]  ;;  %v655_v23 = vadd.f32 %v653_v46, %v627_v16  ;;  %v8351_v16 = vld [vmem:[#allocation38_spill] sm:$0xff]  ;;  %v8354_v28 = vld [vmem:[#allocation59_spill] sm:$0xff] }
 0x2a6   :  { %v1797_v50 = vadd.f32 %v1795_v45, %v1780_v60  ;;  %1470 = vperm.xlu0 %3679, %v5257_v34   ;;  %v5621_v24 = vld.sshfl [vmem:[#allocation1 + $0x8] sm:$0xff pattern:$0x75316420]  ;;  %vm5627_vm2 = vcmp.eq.s32.totalorder %v758_v40, 1  ;;  %v8340_v56 = vmov 0  ;;  %vm5631_vm3 = vcmp.eq.s32.totalorder %v759_v20, 1  ;;  %v1807_v17 = vpop.permute.xlu0 %1806 }
 0x2a7   :  { %2014 = vst [vmem:[#allocation1] ss:$2 sm:$0xff] %v4298_v42  ;;  %v8341_v56 = vsel %vm5627_vm2, 4294967295, %v8340_v56  ;;  %v8343_v31 = vmov 0  ;;  %vm5635_vm9 = vcmp.eq.s32.totalorder %v774_v25, 1  ;;  %v8346_v34 = vmov 0 }
 0x2a8   :  { %8342 = vst [vmem:[#allocation10_spill] sm:$0xff] %v8341_v56  ;;  %v8344_v31 = vsel %vm5631_vm3, 4294967295, %v8343_v31  ;;  %v8347_v34 = vsel %vm5635_vm9, 4294967295, %v8346_v34  ;;  %v877_v15 = vadd.s32 1, %v5343_v47  ;;  %v656_v60 = vadd.f32 %v654_v58, %v628_v43  ;;  %v8352_v20 = vld [vmem:[#allocation41_spill] sm:$0xff] }
 0x2a9   :  { %8345 = vst [vmem:[#allocation5_spill] sm:$0xff] %v8344_v31  ;;  %v707_v46 = vsel %vm5554_vm8, %v699_v11, 0.0  ;;  %vm8348_vm11 = vnez %v8194_v14  ;;  %vm5648_vm6 = vcmp.eq.s32.totalorder %v775_v10, 1  ;;  %v8349_v49 = vmov 0  ;;  %v5669_v10 = vpop.permute.xlu2 %1855  ;;  %v8399_v31 = vld [vmem:[#allocation72_spill] sm:$0xff] }
 0x2aa   :  { %vm793_vm10 = vmand %vm5366_vm12, %vm8348_vm11  ;;  %v8350_v49 = vsel %vm5648_vm6, 4294967295, %v8349_v49  ;;  %v681_v40 = vmul.f32 %v8351_v16, %v675_v61  ;;  %v682_v8 = vmul.f32 %v8351_v16, %v676_v52  ;;  %v712_v58 = vmul.f32 %v8352_v20, %v706_v18 }
 0x2ab   :  { %vm8355_vm8 = vcmp.lt.s32.totalorder %v4483_v32, 2  ;;  %vm8357_vm5 = vcmp.lt.s32.totalorder %v4483_v32, 15  ;;  %v713_v48 = vmul.f32 %v8352_v20, %v707_v46  ;;  %v806_v11 = vsel %vm793_vm10, 1, %v8073_v55  ;;  %1951 = vrot.lane.b32.xlu1 %v5372_v36, %s8366_s29 }
 0x2ac   :  { %v727_v0 = vsel %vm8355_vm8, %v8354_v28, %v8353_v38  ;;  %vm8356_vm11 = vmmov %vm8355_vm8  ;;  %v1808_v1 = vsel %vm8357_vm5, %v5465_v6, %v1807_v17  ;;  %vm878_vm8 = vcmp.ge.s32.totalorder %v877_v15, 0  ;;  %1953 = vrot.lane.b32.xlu2 %v5374_v19, %s8366_s29  ;;  %s8591_s29 = smov 98  }
 0x2ad   :  { %v728_v37 = vsel %vm8356_vm11, %v8353_v38, %v8354_v28  ;;  %vm8358_vm15 = vmmov %vm8357_vm5  ;;  %v1811_v45 = vsel %vm5407_vm13, %v1808_v1, 0.0  ;;  %vm879_vm11 = vcmp.lt.s32.totalorder %v877_v15, 16  ;;  %v8367_v15 = vld [vmem:[#allocation46_spill] sm:$0xff] }
 0x2ae   :  { %v1809_v25 = vsel %vm8358_vm15, %v1807_v17, %v5465_v6  ;;  %v1813_v61 = vmul.f32 %v1811_v45, %v8313_v35  ;;  %vm8359_vm15 = vnez %v8163_v59  ;;  %v8361_v6 = vld [vmem:[#allocation64_spill] sm:$0xff]  ;;  %v734_v18 = vsel %vm5592_vm1, %v728_v37, 0.0  ;;  %v5699_v38 = vld.sshfl [vmem:[#allocation1] sm:$0xff pattern:$0x75316420]  ;;  %3681 = vset.pattern.permute.xlu0 %v8073_v55  ;;  %vm5705_vm10 = vmand %vm878_vm8, %vm879_vm11 }
 0x2af   :  { %v1810_v21 = vsel %vm5377_vm4, %v1809_v25, 0.0  ;;  %vm821_vm5 = vmand %vm5366_vm12, %vm8359_vm15  ;;  %vm8362_vm4 = vcmp.lt.s32.totalorder %v4483_v32, 1  ;;  %v683_v17 = vadd.f32 %v681_v40, %v655_v23  ;;  %v5701_v28 = vld.sshfl [vmem:[#allocation1 + $0x8] sm:$0xff pattern:$0x75316420]  ;;  %v740_v40 = vmul.f32 %v8367_v15, %v734_v18 }
 0x2b0   :  { %v1812_v30 = vmul.f32 %v1810_v21, %v8313_v35  ;;  %v755_v51 = vsel %vm8362_vm4, %v8361_v6, %v8360_v13  ;;  %vm8363_vm13 = vmmov %vm8362_vm4  ;;  %v735_v35 = vsel %vm5596_vm7, %v727_v0, 0.0  ;;  %v5697_v46 = vadd.f32 %v1813_v61, %v1798_v63  ;;  %2031 = vst [vmem:[#allocation1] ss:$2 sm:$0xff] %v4298_v42  ;;  %v8369_v21 = vld [vmem:[#allocation3_spill] sm:$0xff] }
 0x2b1   :  { %v756_v52 = vsel %vm8363_vm13, %v8360_v13, %v8361_v6  ;;  %v684_v0 = vadd.f32 %v682_v8, %v656_v60  ;;  %v808_v63 = vperm.slane %v806_v11, 1  ;;  %v834_v23 = vsel %vm821_vm5, 1, %v8073_v55  ;;  %v8368_v8 = vld [vmem:[#allocation2_spill] sm:$0xff]  ;;  %v8374_v6 = vld [vmem:[#allocation51_spill] sm:$0xff] }
 0x2b2   :  { %v5695_v43 = vadd.f32 %v1812_v30, %v1797_v50  ;;  %v807_v50 = vperm.slane %v806_v11, 0  ;;  %v741_v37 = vmul.f32 %v8367_v15, %v735_v35  ;;  %v762_v36 = vsel %vm5627_vm2, %v756_v52, 0.0  ;;  %v1822_v11 = vpop.permute.xlu1 %1821 }
 0x2b3   :  { %v763_v60 = vsel %vm5631_vm3, %v755_v51, 0.0  ;;  %v783_v25 = vsel %vm5635_vm9, %v8368_v8, 0.0  ;;  %v784_v45 = vsel %vm5648_vm6, %v8369_v21, 0.0  ;;  %v714_v19 = vadd.f32 %v712_v58, %v683_v17  ;;  %1968 = vrot.lane.b32.xlu1 %v5467_v62, %s8387_s19  ;;  %v8392_v21 = vld [vmem:[#allocation74_spill] sm:$0xff] }
 0x2b4   :  { %v715_v30 = vadd.f32 %v713_v48, %v684_v0  ;;  %vm8370_vm8 = vnez %v8183_v29  ;;  %vm8371_vm4 = vnez %v8067_v39  ;;  %vm8372_vm3 = vcmp.lt.s32.totalorder %v4483_v32, 14  ;;  %v5747_v48 = vpop.permute.xlu2 %1257  ;;  %1970 = vrot.lane.b32.xlu2 %v5469_v12, %s8387_s19  ;;  %s8614_s19 = smov 97  }
 0x2b5   :  { %vm881_vm13 = vmand %vm5705_vm10, %vm8371_vm4  ;;  %v1825_v61 = vsel %vm8372_vm3, %v1822_v11, %v5570_v2  ;;  %v835_v13 = vperm.slane %v834_v23, 0  ;;  %v768_v51 = vmul.f32 %v8374_v6, %v762_v36  ;;  %v769_v52 = vmul.f32 %v8374_v6, %v763_v60  ;;  %v8391_v60 = vld [vmem:[#allocation57_spill] sm:$0xff] }
 0x2b6   :  { %vm8373_vm2 = vmmov %vm8372_vm3  ;;  %vm5751_vm5 = vcmp.eq.s32.totalorder %v807_v50, 1  ;;  %v8375_v18 = vmov 0  ;;  %v836_v35 = vperm.slane %v834_v23, 1  ;;  %v742_v17 = vadd.f32 %v740_v40, %v714_v19 }
 0x2b7   :  { %v1826_v58 = vsel %vm8373_vm2, %v5570_v2, %v1822_v11  ;;  %v8376_v18 = vsel %vm5751_vm5, 4294967295, %v8375_v18  ;;  %v743_v0 = vadd.f32 %v741_v37, %v715_v30  ;;  %vm5756_vm3 = vcmp.eq.s32.totalorder %v808_v63, 1  ;;  %vm8382_vm11 = vmand %vm5366_vm12, %vm8370_vm8  ;;  %v5771_v40 = vld.sshfl [vmem:[#allocation1] sm:$0xff pattern:$0x75316420] }
 0x2b8   :  { %8377 = vst [vmem:[#allocation114_spill] sm:$0xff] %v8376_v18  ;;  %v8378_v8 = vmov 0  ;;  %v894_v2 = vsel %vm881_vm13, 1, %v8073_v55  ;;  %v1827_v36 = vsel %vm5422_vm14, %v1826_v58, 0.0  ;;  %vm8381_vm2 = vnez %v8297_v57 }
 0x2b9   :  { %v8379_v8 = vsel %vm5756_vm3, 4294967295, %v8378_v8  ;;  %v1828_v50 = vsel %vm8381_vm2, %v1825_v61, 0.0  ;;  %v862_v23 = vsel %vm8382_vm11, 1, %v8073_v55  ;;  %v5773_v63 = vld.sshfl [vmem:[#allocation1 + $0x8] sm:$0xff pattern:$0x75316420]  ;;  %vm8386_vm13 = vnez %v8069_v3 }
 0x2ba   :  { %8380 = vst [vmem:[#allocation47_spill] sm:$0xff] %v8379_v8  ;;  %vm5775_vm6 = vcmp.eq.s32.totalorder %v835_v13, 1  ;;  %v8383_v37 = vmov 0  ;;  %vm909_vm2 = vmand %vm5705_vm10, %vm8386_vm13  ;;  %v770_v22 = vadd.f32 %v768_v51, %v742_v17  ;;  %v771_v53 = vadd.f32 %v769_v52, %v743_v0  ;;  %v8394_v61 = vld [vmem:[#allocation71_spill] sm:$0xff]  ;;  %v1841_v52 = vpop.permute.xlu1 %1840 }
 0x2bb   :  { %v8384_v37 = vsel %vm5775_vm6, 4294967295, %v8383_v37  ;;  %2048 = vst [vmem:[#allocation1] ss:$2 sm:$0xff] %v4298_v42  ;;  %vm5787_vm12 = vcmp.eq.s32.totalorder %v836_v35, 1  ;;  %v8388_v57 = vmov 0  ;;  %vm8393_vm11 = vcmp.lt.s32.totalorder %v4483_v32, 127  ;;  %v1839_v35 = vpop.permute.xlu0 %1838  ;;  %1985 = vrot.lane.b32.xlu1 %v5558_v54, %s8404_s21 }
 0x2bc   :  { %8385 = vst [vmem:[#allocation13_spill] sm:$0xff] %v8384_v37  ;;  %v8389_v57 = vsel %vm5787_vm12, 4294967295, %v8388_v57  ;;  %v805_v11 = vsel %vm8393_vm11, %v8392_v21, %v8391_v60  ;;  %v1829_v19 = vmul.f32 %v1827_v36, %v8324_v27  ;;  %v1830_v30 = vmul.f32 %v1828_v50, %v8324_v27 }
 0x2bd   :  { %8390 = vst [vmem:[#allocation12_spill] sm:$0xff] %v8389_v57  ;;  %v863_v62 = vperm.slane %v862_v23, 0  ;;  %v789_v58 = vmul.f32 %v8394_v61, %v783_v25  ;;  %v790_v13 = vmul.f32 %v8394_v61, %v784_v45  ;;  %v895_v51 = vperm.slane %v894_v2, 0  ;;  %v5815_v45 = vpop.permute.xlu2 %1874 }
 0x2be   :  { %v864_v17 = vperm.slane %v862_v23, 1  ;;  %v804_v0 = vsel %vm8393_vm11, %v8391_v60, %v8392_v21  ;;  %v922_v12 = vsel %vm909_vm2, 1, %v8073_v55  ;;  %vm8395_vm14 = vcmp.lt.s32.totalorder %v4483_v32, 13 }
 0x2bf   :  { %v1842_v27 = vsel %vm8395_vm14, %v1839_v35, %v1841_v52  ;;  %vm8396_vm9 = vmmov %vm8395_vm14  ;;  %v896_v36 = vperm.slane %v894_v2, 1  ;;  %vm8397_vm11 = vnez %v8312_v26  ;;  %v812_v60 = vsel %vm5756_vm3, %v805_v11, 0.0 }
 0x2c0   :  { %v1843_v25 = vsel %vm8396_vm9, %v1841_v52, %v1839_v35  ;;  %v1845_v23 = vsel %vm8397_vm11, %v1842_v27, 0.0  ;;  %v1831_v21 = vadd.f32 %v1829_v19, %v5695_v43  ;;  %v1832_v61 = vadd.f32 %v1830_v30, %v5697_v46  ;;  %v8398_v35 = vld [vmem:[#allocation62_spill] sm:$0xff]  ;;  %v8403_v30 = vld [vmem:[#allocation77_spill] sm:$0xff] }
 0x2c1   :  { %v1844_v50 = vsel %vm5519_vm0, %v1843_v25, 0.0  ;;  %v1847_v52 = vmul.f32 %v1845_v23, %v8351_v16  ;;  %vm8400_vm9 = vcmp.lt.s32.totalorder %v4483_v32, 126  ;;  %v923_v2 = vperm.slane %v922_v12, 0 }
 0x2c2   :  { %v1846_v6 = vmul.f32 %v1844_v50, %v8351_v16  ;;  %v832_v33 = vsel %vm8400_vm9, %v8399_v31, %v8398_v35  ;;  %v924_v25 = vperm.slane %v922_v12, 1  ;;  %vm8401_vm0 = vnez %v8071_v5  ;;  %vm8402_vm2 = vmmov %vm8400_vm9  ;;  %v5841_v11 = vld.sshfl [vmem:[#allocation1] sm:$0xff pattern:$0x75316420] }
 0x2c3   :  { %v811_v26 = vsel %vm5751_vm5, %v804_v0, 0.0  ;;  %v833_v16 = vsel %vm8402_vm2, %v8398_v35, %v8399_v31  ;;  %v1849_v46 = vadd.f32 %v1847_v52, %v1832_v61  ;;  %v5843_v19 = vld.sshfl [vmem:[#allocation1 + $0x8] sm:$0xff pattern:$0x75316420]  ;;  %v818_v12 = vmul.f32 %v8403_v30, %v812_v60  ;;  %vm8417_vm5 = vmand %vm5705_vm10, %vm8401_vm0  ;;  %v1858_v61 = vpop.permute.xlu0 %1857  ;;  %v8428_v52 = vld [vmem:[#allocation108_spill] sm:$0xff]  ;;  %2002 = vrot.lane.b32.xlu1 %v5619_v41, %s8447_s23 }
 0x2c4   :  { %v1848_v43 = vadd.f32 %v1846_v6, %v1831_v21  ;;  %2065 = vst [vmem:[#allocation1] ss:$2 sm:$0xff] %v4298_v42  ;;  %v792_v27 = vadd.f32 %v790_v13, %v771_v53  ;;  %v791_v0 = vadd.f32 %v789_v58, %v770_v22  ;;  %vm5849_vm11 = vcmp.eq.s32.totalorder %v863_v62, 1  ;;  %v8418_v53 = vld [vmem:[#allocation9_spill] sm:$0xff]  ;;  %v5875_v62 = vpop.permute.xlu1 %1255 }
 0x2c5   :  { %v8405_v50 = vmov 0  ;;  %vm5853_vm9 = vcmp.eq.s32.totalorder %v864_v17, 1  ;;  %v8408_v31 = vmov 0  ;;  %vm5858_vm14 = vcmp.eq.s32.totalorder %v895_v51, 1  ;;  %1987 = vrot.lane.b32.xlu2 %v8418_v53, %s8404_s21  ;;  %v8419_v17 = vld [vmem:[#allocation67_spill] sm:$0xff] }
 0x2c6   :  { %v8406_v50 = vsel %vm5849_vm11, 4294967295, %v8405_v50  ;;  %v8409_v31 = vsel %vm5853_vm9, 4294967295, %v8408_v31  ;;  %v8411_v6 = vmov 0  ;;  %vm5862_vm3 = vcmp.eq.s32.totalorder %v896_v36, 1  ;;  %v8420_v36 = vld [vmem:[#allocation75_spill] sm:$0xff] }
 0x2c7   :  { %8407 = vst [vmem:[#allocation15_spill] sm:$0xff] %v8406_v50  ;;  %v8412_v6 = vsel %vm5858_vm14, 4294967295, %v8411_v6  ;;  %v8414_v54 = vmov 0  ;;  %v950_v22 = vsel %vm8417_vm5, 1, %v8073_v55  ;;  %v817_v58 = vmul.f32 %v8403_v30, %v811_v26 }
 0x2c8   :  { %8410 = vst [vmem:[#allocation16_spill] sm:$0xff] %v8409_v31  ;;  %v8415_v54 = vsel %vm5862_vm3, 4294967295, %v8414_v54  ;;  %v839_v13 = vsel %vm5775_vm6, %v832_v33, 0.0  ;;  %v840_v51 = vsel %vm5787_vm12, %v833_v16, 0.0  ;;  %vm8421_vm5 = vcmp.lt.s32.totalorder %v4483_v32, 125 }
 0x2c9   :  { %8413 = vst [vmem:[#allocation110_spill] sm:$0xff] %v8412_v6  ;;  %v860_v23 = vsel %vm8421_vm5, %v8420_v36, %v8419_v17  ;;  %vm5886_vm0 = vcmp.eq.s32.totalorder %v923_v2, 1  ;;  %v8422_v60 = vmov 0  ;;  %vm5890_vm2 = vcmp.eq.s32.totalorder %v924_v25, 1  ;;  %v5904_v2 = vpop.permute.xlu2 %1289 }
 0x2ca   :  { %8416 = vst [vmem:[#allocation44_spill] sm:$0xff] %v8415_v54  ;;  %v8423_v60 = vsel %vm5886_vm0, 4294967295, %v8422_v60  ;;  %v8425_v21 = vmov 0  ;;  %vm8429_vm13 = vnez %v8428_v52  ;;  %vm8430_vm12 = vcmp.lt.s32.totalorder %v4483_v32, 3 }
 0x2cb   :  { %8424 = vst [vmem:[#allocation103_spill] sm:$0xff] %v8423_v60  ;;  %v8426_v21 = vsel %vm5890_vm2, 4294967295, %v8425_v21  ;;  %vm965_vm6 = vmand %vm5705_vm10, %vm8429_vm13  ;;  %v1859_v35 = vsel %vm8430_vm12, %v5669_v10, %v1858_v61  ;;  %v820_v26 = vadd.f32 %v818_v12, %v792_v27  ;;  %v951_v25 = vperm.slane %v950_v22, 0  ;;  %v8436_v12 = vld [vmem:[#allocation73_spill] sm:$0xff]  ;;  %v8437_v27 = vld [vmem:[#allocation78_spill] sm:$0xff]  ;;  %2019 = vrot.lane.b32.xlu1 %v5699_v38, %s8465_s24 }
 0x2cc   :  { %8427 = vst [vmem:[#allocation8_spill] sm:$0xff] %v8426_v21  ;;  %vm8431_vm5 = vmmov %vm8430_vm12  ;;  %v952_v16 = vperm.slane %v950_v22, 1  ;;  %vm8432_vm4 = vnez %v8315_v7  ;;  %vm8433_vm8 = vnez %v8321_v4  ;;  %vm8434_vm13 = vcmp.lt.s32.totalorder %v4483_v32, 125 }
 0x2cd   :  { %v1860_v33 = vsel %vm8431_vm5, %v1858_v61, %v5669_v10  ;;  %v1862_v57 = vsel %vm8433_vm8, %v1859_v35, 0.0  ;;  %v861_v37 = vsel %vm8434_vm13, %v8419_v17, %v8420_v36  ;;  %v8435_v61 = vld [vmem:[#allocation80_spill] sm:$0xff]  ;;  %vm8438_vm12 = vcmp.lt.s32.totalorder %v4483_v32, 115  ;;  %2004 = vrot.lane.b32.xlu2 %v5621_v24, %s8447_s23 }
 0x2ce   :  { %v1861_v53 = vsel %vm8432_vm4, %v1860_v33, 0.0  ;;  %v1864_v10 = vmul.f32 %v1862_v57, %v8352_v20  ;;  %v846_v8 = vmul.f32 %v8435_v61, %v840_v51  ;;  %v892_v7 = vsel %vm8438_vm12, %v8437_v27, %v8436_v12  ;;  %vm8439_vm8 = vmmov %vm8438_vm12  ;;  %v5930_v57 = vld.sshfl [vmem:[#allocation1 + $0x8] sm:$0xff pattern:$0x75316420] }
 0x2cf   :  { %v1863_v30 = vmul.f32 %v1861_v53, %v8352_v20  ;;  %v893_v4 = vsel %vm8439_vm8, %v8436_v12, %v8437_v27  ;;  %v978_v22 = vsel %vm965_vm6, 1, %v8073_v55  ;;  %v867_v17 = vsel %vm5849_vm11, %v860_v23, 0.0  ;;  %v5928_v20 = vld.sshfl [vmem:[#allocation1] sm:$0xff pattern:$0x75316420]  ;;  %v8451_v27 = vld [vmem:[#allocation83_spill] sm:$0xff] }
 0x2d0   :  { %v1866_v35 = vadd.f32 %v1864_v10, %v1849_v46  ;;  %v819_v51 = vadd.f32 %v817_v58, %v791_v0  ;;  %v845_v33 = vmul.f32 %v8435_v61, %v839_v13  ;;  %vm5934_vm13 = vcmp.eq.s32.totalorder %v951_v25, 1  ;;  %2082 = vst [vmem:[#allocation1] ss:$2 sm:$0xff] %v4298_v42  ;;  %v8448_v13 = vld [vmem:[#allocation76_spill] sm:$0xff]  ;;  %v8449_v23 = vld [vmem:[#allocation81_spill] sm:$0xff]  ;;  %v1873_v10 = vpop.permute.xlu1 %1872 }
 0x2d1   :  { %v1865_v36 = vadd.f32 %v1863_v30, %v1848_v43  ;;  %v8440_v53 = vmov 0  ;;  %vm5938_vm5 = vcmp.eq.s32.totalorder %v952_v16, 1  ;;  %v8443_v12 = vmov 0 }
 0x2d2   :  { %v8441_v53 = vsel %vm5934_vm13, 4294967295, %v8440_v53  ;;  %v8444_v12 = vsel %vm5938_vm5, 4294967295, %v8443_v12  ;;  %vm8446_vm6 = vnez %v8194_v14  ;;  %v868_v43 = vsel %vm5853_vm9, %v861_v37, 0.0  ;;  %v5962_v37 = vpop.permute.xlu0 %1242 }
 0x2d3   :  { %8442 = vst [vmem:[#allocation52_spill] sm:$0xff] %v8441_v53  ;;  %vm993_vm12 = vmand %vm5705_vm10, %vm8446_vm6  ;;  %v899_v46 = vsel %vm5858_vm14, %v892_v7, 0.0  ;;  %v900_v30 = vsel %vm5862_vm3, %v893_v4, 0.0  ;;  %v1077_v0 = vadd.s32 2, %v5343_v47  ;;  %v848_v58 = vadd.f32 %v846_v8, %v820_v26  ;;  %2036 = vrot.lane.b32.xlu1 %v5771_v40, %s8492_s26  ;;  %v8498_v40 = vld [vmem:[#allocation93_spill] sm:$0xff] }
 0x2d4   :  { %8445 = vst [vmem:[#allocation48_spill] sm:$0xff] %v8444_v12  ;;  %vm8450_vm8 = vcmp.lt.s32.totalorder %v4483_v32, 114  ;;  %v979_v25 = vperm.slane %v978_v22, 0  ;;  %v980_v16 = vperm.slane %v978_v22, 1  ;;  %v873_v7 = vmul.f32 %v8451_v27, %v867_v17  ;;  %v5985_v22 = vpop.permute.xlu2 %1317 }
 0x2d5   :  { %v920_v41 = vsel %vm8450_vm8, %v8449_v23, %v8448_v13  ;;  %vm8452_vm4 = vmmov %vm8450_vm8  ;;  %v1006_v24 = vsel %vm993_vm12, 1, %v8073_v55  ;;  %vm8453_vm3 = vcmp.lt.s32.totalorder %v4483_v32, 2  ;;  %vm1078_vm12 = vcmp.ge.s32.totalorder %v1077_v0, 0  ;;  %2021 = vrot.lane.b32.xlu2 %v5701_v28, %s8465_s24 }
 0x2d6   :  { %v921_v4 = vsel %vm8452_vm4, %v8448_v13, %v8449_v23  ;;  %vm1021_vm8 = vmand %vm5705_vm10, %vm8359_vm15  ;;  %v1876_v8 = vsel %vm8453_vm3, %v1873_v10, %v5815_v45  ;;  %v874_v23 = vmul.f32 %v8451_v27, %v868_v43  ;;  %vm1079_vm9 = vcmp.lt.s32.totalorder %v1077_v0, 16 }
 0x2d7   :  { %vm8454_vm14 = vmmov %vm8453_vm3  ;;  %v1879_v13 = vsel %vm5596_vm7, %v1876_v8, 0.0  ;;  %v1007_v31 = vperm.slane %v1006_v24, 0  ;;  %v1034_v44 = vsel %vm1021_vm8, 1, %v8073_v55  ;;  %vm8458_vm7 = vnez %v8183_v29 }
 0x2d8   :  { %v1877_v26 = vsel %vm8454_vm14, %v5815_v45, %v1873_v10  ;;  %v1881_v6 = vmul.f32 %v1879_v13, %v8367_v15  ;;  %v927_v45 = vsel %vm5886_vm0, %v920_v41, 0.0  ;;  %v928_v10 = vsel %vm5890_vm2, %v921_v4, 0.0  ;;  %vm1049_vm3 = vmand %vm5705_vm10, %vm8458_vm7  ;;  %v6012_v41 = vld.sshfl [vmem:[#allocation1] sm:$0xff pattern:$0x75316420]  ;;  %v8461_v13 = vld [vmem:[#allocation86_spill] sm:$0xff] }
 0x2d9   :  { %v1878_v17 = vsel %vm5592_vm1, %v1877_v26, 0.0  ;;  %v8455_v26 = vld [vmem:[#allocation84_spill] sm:$0xff]  ;;  %vm8457_vm1 = vcmp.lt.s32.totalorder %v4483_v32, 113  ;;  %v6014_v4 = vld.sshfl [vmem:[#allocation1 + $0x8] sm:$0xff pattern:$0x75316420]  ;;  %v905_v21 = vmul.f32 %v8461_v13, %v899_v46  ;;  %v906_v60 = vmul.f32 %v8461_v13, %v900_v30  ;;  %vm6024_vm8 = vmand %vm1078_vm12, %vm1079_vm9  ;;  %v6048_v30 = vpop.permute.xlu1 %1287 }
 0x2da   :  { %v1880_v54 = vmul.f32 %v1878_v17, %v8367_v15  ;;  %v949_v43 = vsel %vm8457_vm1, %v8456_v9, %v8455_v26  ;;  %v6010_v8 = vadd.f32 %v1881_v6, %v1866_v35  ;;  %v847_v17 = vadd.f32 %v845_v33, %v819_v51  ;;  %vm8462_vm14 = vmmov %vm8457_vm1  ;;  %2099 = vst [vmem:[#allocation1] ss:$2 sm:$0xff] %v4298_v42  ;;  %v6050_v0 = vpop.permute.xlu0 %1889 }
 0x2db   :  { %v948_v27 = vsel %vm8462_vm14, %v8455_v26, %v8456_v9  ;;  %v1008_v50 = vperm.slane %v1006_v24, 1  ;;  %vm6031_vm1 = vcmp.eq.s32.totalorder %v979_v25, 1  ;;  %vm6035_vm4 = vcmp.eq.s32.totalorder %v980_v16, 1  ;;  %v8475_v25 = vld [vmem:[#allocation89_spill] sm:$0xff]  ;;  %v8481_v26 = vld [vmem:[#allocation82_spill] sm:$0xff]  ;;  %v8482_v9 = vld [vmem:[#allocation87_spill] sm:$0xff]  ;;  %2053 = vrot.lane.b32.xlu1 %v5841_v11, %s3809_s20 }
 0x2dc   :  { %v6008_v15 = vadd.f32 %v1880_v54, %v1865_v36  ;;  %8460 = vst [vmem:[#allocation18_spill] sm:$0xff] %v6010_v8  ;;  %v8466_v54 = vmov 0  ;;  %v8469_v36 = vmov 0  ;;  %v876_v35 = vadd.f32 %v874_v23, %v848_v58 }
 0x2dd   :  { %v8467_v54 = vsel %vm6031_vm1, 4294967295, %v8466_v54  ;;  %v8470_v36 = vsel %vm6035_vm4, 4294967295, %v8469_v36  ;;  %v875_v51 = vadd.f32 %v873_v7, %v847_v17  ;;  %v956_v33 = vsel %vm5938_vm5, %v949_v43, 0.0  ;;  %v6066_v7 = vpop.permute.xlu2 %1345  ;;  %2038 = vrot.lane.b32.xlu2 %v5773_v63, %s8492_s26 }
 0x2de   :  { %8459 = vst [vmem:[#allocation19_spill] sm:$0xff] %v6008_v15  ;;  %vm6044_vm12 = vcmp.eq.s32.totalorder %v1007_v31, 1  ;;  %v8472_v38 = vmov 0  ;;  %v1035_v46 = vperm.slane %v1034_v44, 0  ;;  %v933_v16 = vmul.f32 %v8475_v25, %v927_v45 }
 0x2df   :  { %8468 = vst [vmem:[#allocation22_spill] sm:$0xff] %v8467_v54  ;;  %v8473_v38 = vsel %vm6044_vm12, 4294967295, %v8472_v38  ;;  %v934_v28 = vmul.f32 %v8475_v25, %v928_v10  ;;  %v955_v58 = vsel %vm5934_vm13, %v948_v27, 0.0  ;;  %v1062_v31 = vsel %vm1049_vm3, 1, %v8073_v55  ;;  %v8480_v10 = vld [vmem:[#allocation92_spill] sm:$0xff] }
 0x2e0   :  { %8471 = vst [vmem:[#allocation21_spill] sm:$0xff] %v8470_v36  ;;  %vm8476_vm14 = vnez %v8067_v39  ;;  %vm6068_vm5 = vcmp.eq.s32.totalorder %v1008_v50, 1  ;;  %v8477_v24 = vmov 0  ;;  %v1036_v23 = vperm.slane %v1034_v44, 1 }
 0x2e1   :  { %8474 = vst [vmem:[#allocation11_spill] sm:$0xff] %v8473_v38  ;;  %vm1081_vm9 = vmand %vm6024_vm8, %vm8476_vm14  ;;  %v8478_v24 = vsel %vm6068_vm5, 4294967295, %v8477_v24  ;;  %v908_v27 = vadd.f32 %v906_v60, %v876_v35  ;;  %v907_v45 = vadd.f32 %v905_v21, %v875_v51  ;;  %v962_v1 = vmul.f32 %v8480_v10, %v956_v33  ;;  %v6088_v35 = vld.sshfl [vmem:[#allocation1] sm:$0xff pattern:$0x75316420]  ;;  %v6126_v54 = vpop.permute.xlu1 %1315 }
 0x2e2   :  { %8479 = vst [vmem:[#allocation55_spill] sm:$0xff] %v8478_v24  ;;  %vm8483_vm10 = vcmp.lt.s32.totalorder %v4483_v32, 112  ;;  %v961_v50 = vmul.f32 %v8480_v10, %v955_v58  ;;  %vm6083_vm2 = vcmp.eq.s32.totalorder %v1035_v46, 1  ;;  %v8485_v44 = vmov 0  ;;  %v6128_v10 = vpop.permute.xlu0 %1270 }
 0x2e3   :  { %v976_v43 = vsel %vm8483_vm10, %v8482_v9, %v8481_v26  ;;  %vm8484_vm3 = vmmov %vm8483_vm10  ;;  %v8486_v44 = vsel %vm6083_vm2, 4294967295, %v8485_v44  ;;  %v1063_v60 = vperm.slane %v1062_v31, 0  ;;  %v1094_v21 = vsel %vm1081_vm9, 1, %v8073_v55  ;;  %v6090_v51 = vld.sshfl [vmem:[#allocation1 + $0x8] sm:$0xff pattern:$0x75316420] }
 0x2e4   :  { %v977_v17 = vsel %vm8484_vm3, %v8481_v26, %v8482_v9  ;;  %8487 = vst [vmem:[#allocation53_spill] sm:$0xff] %v8486_v44  ;;  %v936_v33 = vadd.f32 %v934_v28, %v908_v27  ;;  %v935_v12 = vadd.f32 %v933_v16, %v907_v45  ;;  %v983_v26 = vsel %vm6031_vm1, %v976_v43, 0.0  ;;  %v8493_v16 = vld [vmem:[#allocation85_spill] sm:$0xff]  ;;  %v8494_v28 = vld [vmem:[#allocation90_spill] sm:$0xff]  ;;  %v8497_v45 = vld [vmem:[#allocation88_spill] sm:$0xff] }
 0x2e5   :  { %v984_v9 = vsel %vm6035_vm4, %v977_v17, 0.0  ;;  %vm6096_vm10 = vcmp.eq.s32.totalorder %v1036_v23, 1  ;;  %v8488_v46 = vmov 0  ;;  %v1064_v58 = vperm.slane %v1062_v31, 1  ;;  %2116 = vst [vmem:[#allocation1] ss:$2 sm:$0xff] %v4298_v42  ;;  %2055 = vrot.lane.b32.xlu2 %v5843_v19, %s3809_s20 }
 0x2e6   :  { %v8489_v46 = vsel %vm6096_vm10, 4294967295, %v8488_v46  ;;  %vm8491_vm3 = vnez %v8069_v3  ;;  %vm8495_vm13 = vcmp.lt.s32.totalorder %v4483_v32, 111  ;;  %vm7891_vm1 = vcmp.lt.s32.totalorder %v4483_v32, 109  ;;  %v8514_v44 = vld [vmem:[#allocation98_spill] sm:$0xff]  ;;  %s8539_s20 = smov 109  }
 0x2e7   :  { %8490 = vst [vmem:[#allocation14_spill] sm:$0xff] %v8489_v46  ;;  %v1004_v27 = vsel %vm8495_vm13, %v8494_v28, %v8493_v16  ;;  %vm8496_vm4 = vmmov %vm8495_vm13  ;;  %v964_v23 = vadd.f32 %v962_v1, %v936_v33  ;;  %vm8499_vm9 = vcmp.lt.s32.totalorder %v4483_v32, 110  ;;  %vm6122_vm0 = vcmp.eq.s32.totalorder %v1063_v60, 1  ;;  %v6142_v33 = vpop.permute.xlu2 %1373  ;;  %2070 = vrot.lane.b32.xlu1 %v5928_v20, %s8539_s20  ;;  %v8546_v20 = vld [vmem:[#allocation99_spill] sm:$0xff] }
 0x2e8   :  { %v1005_v31 = vsel %vm8496_vm4, %v8493_v16, %v8494_v28  ;;  %v1032_v43 = vsel %vm8499_vm9, %v8498_v40, %v8497_v45  ;;  %v8500_v17 = vmov 0  ;;  %v1095_v36 = vperm.slane %v1094_v21, 0  ;;  %v8503_v28 = vld [vmem:[#allocation95_spill] sm:$0xff]  ;;  %vm8504_vm13 = vmmov %vm8499_vm9 }
 0x2e9   :  { %v8501_v17 = vsel %vm6122_vm0, 4294967295, %v8500_v17  ;;  %v963_v16 = vadd.f32 %v961_v50, %v935_v12  ;;  %v989_v53 = vmul.f32 %v8503_v28, %v983_v26  ;;  %v990_v63 = vmul.f32 %v8503_v28, %v984_v9  ;;  %vm8505_vm4 = vmand %vm6024_vm8, %vm8491_vm3  ;;  %v8510_v28 = vld [vmem:[#allocation96_spill] sm:$0xff] }
 0x2ea   :  { %8502 = vst [vmem:[#allocation25_spill] sm:$0xff] %v8501_v17  ;;  %v1033_v1 = vsel %vm8504_vm13, %v8497_v45, %v8498_v40  ;;  %v1122_v60 = vsel %vm8505_vm4, 1, %v8073_v55  ;;  %v1011_v12 = vsel %vm6044_vm12, %v1004_v27, 0.0  ;;  %v1012_v50 = vsel %vm6068_vm5, %v1005_v31, 0.0  ;;  %v8509_v40 = vld [vmem:[#allocation91_spill] sm:$0xff] }
 0x2eb   :  { %vm6148_vm9 = vcmp.eq.s32.totalorder %v1064_v58, 1  ;;  %v8506_v26 = vmov 0  ;;  %v1096_v9 = vperm.slane %v1094_v21, 1  ;;  %v1039_v45 = vsel %vm6083_vm2, %v1032_v43, 0.0 }
 0x2ec   :  { %v8507_v26 = vsel %vm6148_vm9, 4294967295, %v8506_v26  ;;  %v1060_v25 = vsel %vm7891_vm1, %v8510_v28, %v8509_v40  ;;  %v1061_v27 = vsel %vm7891_vm1, %v8509_v40, %v8510_v28  ;;  %v1040_v58 = vsel %vm6096_vm10, %v1033_v1, 0.0  ;;  %v6175_v28 = vld.sshfl [vmem:[#allocation1] sm:$0xff pattern:$0x75316420] }
 0x2ed   :  { %8508 = vst [vmem:[#allocation24_spill] sm:$0xff] %v8507_v26  ;;  %vm6165_vm4 = vcmp.eq.s32.totalorder %v1095_v36, 1  ;;  %v8511_v21 = vmov 0  ;;  %v1123_v31 = vperm.slane %v1122_v60, 0  ;;  %v1124_v43 = vperm.slane %v1122_v60, 1  ;;  %2072 = vrot.lane.b32.xlu2 %v5930_v57, %s8539_s20 }
 0x2ee   :  { %v8512_v21 = vsel %vm6165_vm4, 4294967295, %v8511_v21  ;;  %v1017_v24 = vmul.f32 %v8514_v44, %v1011_v12  ;;  %v1018_v38 = vmul.f32 %v8514_v44, %v1012_v50  ;;  %vm8515_vm2 = vnez %v8071_v5  ;;  %v6177_v40 = vld.sshfl [vmem:[#allocation1 + $0x8] sm:$0xff pattern:$0x75316420]  ;;  %v8519_v50 = vld [vmem:[#allocation101_spill] sm:$0xff] }
 0x2ef   :  { %8513 = vst [vmem:[#allocation27_spill] sm:$0xff] %v8512_v21  ;;  %v992_v1 = vadd.f32 %v990_v63, %v964_v23  ;;  %v991_v36 = vadd.f32 %v989_v53, %v963_v16  ;;  %v1067_v46 = vsel %vm6122_vm0, %v1060_v25, 0.0  ;;  %v1068_v60 = vsel %vm6148_vm9, %v1061_v27, 0.0  ;;  %v8520_v16 = vld [vmem:[#allocation94_spill] sm:$0xff]  ;;  %v8521_v25 = vld [vmem:[#allocation100_spill] sm:$0xff]  ;;  %vm8527_vm0 = vmand %vm6024_vm8, %vm8515_vm2  ;;  %v6213_v27 = vpop.permute.xlu1 %1343  ;;  %v6229_v26 = vpop.permute.xlu2 %1401  ;;  %2087 = vrot.lane.b32.xlu1 %v6012_v41, %s8571_s27 }
 0x2f0   :  { %vm6183_vm13 = vcmp.eq.s32.totalorder %v1096_v9, 1  ;;  %v8516_v12 = vmov 0  ;;  %2133 = vst [vmem:[#allocation1] ss:$2 sm:$0xff] %v4298_v42  ;;  %v1045_v23 = vmul.f32 %v8519_v50, %v1039_v45  ;;  %v1046_v53 = vmul.f32 %v8519_v50, %v1040_v58  ;;  %v8592_v21 = vld [vmem:[#allocation7_spill] sm:$0xff] }
 0x2f1   :  { %v8517_v12 = vsel %vm6183_vm13, 4294967295, %v8516_v12  ;;  %vm8522_vm1 = vcmp.lt.s32.totalorder %v4483_v32, 99  ;;  %vm6203_vm10 = vcmp.eq.s32.totalorder %v1123_v31, 1  ;;  %v8524_v11 = vmov 0  ;;  %v6227_v31 = vpop.permute.xlu0 %1302  ;;  %8535 = vst [vmem:[#allocation56_spill] sm:$0xff] %v6229_v26 }
 0x2f2   :  { %8518 = vst [vmem:[#allocation28_spill] sm:$0xff] %v8517_v12  ;;  %v1092_v63 = vsel %vm8522_vm1, %v8521_v25, %v8520_v16  ;;  %vm8523_vm9 = vmmov %vm8522_vm1  ;;  %v8525_v11 = vsel %vm6203_vm10, 4294967295, %v8524_v11  ;;  %v1150_v45 = vsel %vm8527_vm0, 1, %v8073_v55  ;;  %vm6215_vm1 = vcmp.eq.s32.totalorder %v1124_v43, 1  ;;  %v8536_v43 = vld [vmem:[#allocation104_spill] sm:$0xff] }
 0x2f3   :  { %v1093_v9 = vsel %vm8523_vm9, %v8520_v16, %v8521_v25  ;;  %8526 = vst [vmem:[#allocation60_spill] sm:$0xff] %v8525_v11  ;;  %v8528_v58 = vmov 0  ;;  %v8531_v16 = vld [vmem:[#allocation97_spill] sm:$0xff]  ;;  %v8532_v25 = vld [vmem:[#allocation102_spill] sm:$0xff]  ;;  %vm8533_vm9 = vcmp.lt.s32.totalorder %v4483_v32, 98  ;;  %vm8534_vm5 = vnez %v8428_v52 }
 0x2f4   :  { %v8529_v58 = vsel %vm6215_vm1, 4294967295, %v8528_v58  ;;  %v1120_v19 = vsel %vm8533_vm9, %v8532_v25, %v8531_v16  ;;  %vm1165_vm12 = vmand %vm6024_vm8, %vm8534_vm5  ;;  %v1020_v17 = vadd.f32 %v1018_v38, %v992_v1  ;;  %v1019_v50 = vadd.f32 %v1017_v24, %v991_v36 }
 0x2f5   :  { %8530 = vst [vmem:[#allocation17_spill] sm:$0xff] %v8529_v58  ;;  %v1073_v44 = vmul.f32 %v8536_v43, %v1067_v46  ;;  %v1074_v13 = vmul.f32 %v8536_v43, %v1068_v60  ;;  %v1099_v61 = vsel %vm6165_vm4, %v1092_v63, 0.0  ;;  %v1100_v18 = vsel %vm6183_vm13, %v1093_v9, 0.0  ;;  %vm8537_vm0 = vmmov %vm8533_vm9  ;;  %2089 = vrot.lane.b32.xlu2 %v6014_v4, %s8571_s27 }
 0x2f6   :  { %v1121_v8 = vsel %vm8537_vm0, %v8531_v16, %v8532_v25  ;;  %v1151_v15 = vperm.slane %v1150_v45, 0  ;;  %v1048_v56 = vadd.f32 %v1046_v53, %v1020_v17  ;;  %v1047_v26 = vadd.f32 %v1045_v23, %v1019_v50  ;;  %vm1193_vm0 = vmand %vm6024_vm8, %vm8446_vm6  ;;  %v8538_v17 = vld [vmem:[#allocation106_spill] sm:$0xff] }
 0x2f7   :  { %v1127_v38 = vsel %vm6203_vm10, %v1120_v19, 0.0  ;;  %v1152_v24 = vperm.slane %v1150_v45, 1  ;;  %v1178_v46 = vsel %vm1165_vm12, 1, %v8073_v55  ;;  %v1106_v1 = vmul.f32 %v8538_v17, %v1100_v18  ;;  %v6255_v36 = vld.sshfl [vmem:[#allocation1] sm:$0xff pattern:$0x75316420]  ;;  %vm1221_vm13 = vmand %vm6024_vm8, %vm8359_vm15  ;;  %v6294_v25 = vpop.permute.xlu2 %1429  ;;  %2104 = vrot.lane.b32.xlu1 %v6088_v35, %s8591_s29 }
 0x2f8   :  { %v6257_v60 = vld.sshfl [vmem:[#allocation1 + $0x8] sm:$0xff pattern:$0x75316420]  ;;  %v1128_v50 = vsel %vm6215_vm1, %v1121_v8, 0.0  ;;  %v1277_v23 = vadd.s32 3, %v5343_v47  ;;  %v1076_v53 = vadd.f32 %v1074_v13, %v1048_v56  ;;  %v1075_v63 = vadd.f32 %v1073_v44, %v1047_v26  ;;  %v8547_v8 = vld [vmem:[#allocation105_spill] sm:$0xff]  ;;  %v6285_v13 = vpop.permute.xlu1 %1371 }
 0x2f9   :  { %2150 = vst [vmem:[#allocation1] ss:$2 sm:$0xff] %v4298_v42  ;;  %v1105_v9 = vmul.f32 %v8538_v17, %v1099_v61  ;;  %vm6266_vm12 = vcmp.eq.s32.totalorder %v1151_v15, 1  ;;  %v8540_v18 = vmov 0  ;;  %v1179_v45 = vperm.slane %v1178_v46, 0  ;;  %v8550_v44 = vld [vmem:[#allocation107_spill] sm:$0xff] }
 0x2fa   :  { %v8541_v18 = vsel %vm6266_vm12, 4294967295, %v8540_v18  ;;  %v1206_v16 = vsel %vm1193_vm0, 1, %v8073_v55  ;;  %vm6273_vm9 = vcmp.eq.s32.totalorder %v1152_v24, 1  ;;  %v8543_v47 = vmov 0 }
 0x2fb   :  { %8542 = vst [vmem:[#allocation20_spill] sm:$0xff] %v8541_v18  ;;  %v8544_v47 = vsel %vm6273_vm9, 4294967295, %v8543_v47  ;;  %vm8548_vm1 = vcmp.lt.s32.totalorder %v4483_v32, 97  ;;  %v1180_v15 = vperm.slane %v1178_v46, 1  ;;  %v1133_v26 = vmul.f32 %v8550_v44, %v1127_v38  ;;  %v6296_v46 = vpop.permute.xlu0 %1330 }
 0x2fc   :  { %8545 = vst [vmem:[#allocation31_spill] sm:$0xff] %v8544_v47  ;;  %v1148_v56 = vsel %vm8548_vm1, %v8547_v8, %v8546_v20  ;;  %vm8549_vm10 = vmmov %vm8548_vm1  ;;  %v1134_v57 = vmul.f32 %v8550_v44, %v1128_v50  ;;  %v1108_v19 = vadd.f32 %v1106_v1, %v1076_v53  ;;  %v1207_v24 = vperm.slane %v1206_v16, 0  ;;  %v8558_v1 = vld [vmem:[#allocation113_spill] sm:$0xff] }
 0x2fd   :  { %v1149_v61 = vsel %vm8549_vm10, %v8546_v20, %v8547_v8  ;;  %v1208_v58 = vperm.slane %v1206_v16, 1  ;;  %vm1278_vm10 = vcmp.ge.s32.totalorder %v1277_v23, 0  ;;  %vm1279_vm1 = vcmp.lt.s32.totalorder %v1277_v23, 16  ;;  %8551 = vst [vmem:[#allocation30_spill] sm:$0xff] %v6296_v46  ;;  %v8559_v16 = vld [vmem:[#allocation109_spill] sm:$0xff]  ;;  %2106 = vrot.lane.b32.xlu2 %v6090_v51, %s8591_s29 }
 0x2fe   :  { %v1155_v38 = vsel %vm6266_vm12, %v1148_v56, 0.0  ;;  %v1156_v50 = vsel %vm6273_vm9, %v1149_v61, 0.0  ;;  %vm6302_vm0 = vcmp.eq.s32.totalorder %v1179_v45, 1  ;;  %v8552_v20 = vmov 0  ;;  %v8560_v56 = vld [vmem:[#allocation111_spill] sm:$0xff]  ;;  %vm6322_vm15 = vmand %vm1278_vm10, %vm1279_vm1 }
 0x2ff   :  { %v8553_v20 = vsel %vm6302_vm0, 4294967295, %v8552_v20  ;;  %v1107_v8 = vadd.f32 %v1105_v9, %v1075_v63  ;;  %vm6306_vm4 = vcmp.eq.s32.totalorder %v1180_v15, 1  ;;  %v8555_v44 = vmov 0  ;;  %2121 = vrot.lane.b32.xlu1 %v6175_v28, %s8614_s19 }
 0x300   :  { %8554 = vst [vmem:[#allocation65_spill] sm:$0xff] %v8553_v20  ;;  %v8556_v44 = vsel %vm6306_vm4, 4294967295, %v8555_v44  ;;  %v1162_v53 = vmul.f32 %v8558_v1, %v1156_v50  ;;  %vm7922_vm11 = vcmp.lt.s32.totalorder %v4483_v32, 95  ;;  %v1234_v23 = vsel %vm1221_vm13, 1, %v8073_v55 }
 0x301   :  { %8557 = vst [vmem:[#allocation61_spill] sm:$0xff] %v8556_v44  ;;  %vm8561_vm12 = vcmp.lt.s32.totalorder %v4483_v32, 96  ;;  %v1161_v9 = vmul.f32 %v8558_v1, %v1155_v38  ;;  %v6326_v15 = vld.sshfl [vmem:[#allocation1] sm:$0xff pattern:$0x75316420]  ;;  %vm6330_vm13 = vcmp.eq.s32.totalorder %v1207_v24, 1  ;;  %v1136_v38 = vadd.f32 %v1134_v57, %v1108_v19  ;;  %v6364_v57 = vpop.permute.xlu1 %1399 }
 0x302   :  { %v1176_v61 = vsel %vm8561_vm12, %v8560_v56, %v8559_v16  ;;  %vm8562_vm9 = vmmov %vm8561_vm12  ;;  %v6328_v50 = vld.sshfl [vmem:[#allocation1 + $0x8] sm:$0xff pattern:$0x75316420]  ;;  %v8565_v47 = vmov 0  ;;  %vm6334_vm12 = vcmp.eq.s32.totalorder %v1208_v58, 1  ;;  %v8568_v18 = vmov 0 }
 0x303   :  { %v1177_v63 = vsel %vm8562_vm9, %v8559_v16, %v8560_v56  ;;  %v8566_v47 = vsel %vm6330_vm13, 4294967295, %v8565_v47  ;;  %v8569_v18 = vsel %vm6334_vm12, 4294967295, %v8568_v18  ;;  %vm1249_vm9 = vmand %vm6024_vm8, %vm8458_vm7  ;;  %2167 = vst [vmem:[#allocation1] ss:$2 sm:$0xff] %v4298_v42  ;;  %v1135_v16 = vadd.f32 %v1133_v26, %v1107_v8  ;;  %v8572_v24 = vld [vmem:[#allocation117_spill] sm:$0xff]  ;;  %v8573_v56 = vld [vmem:[#allocation115_spill] sm:$0xff] }
 0x304   :  { %8567 = vst [vmem:[#allocation34_spill] sm:$0xff] %v8566_v47  ;;  %v1204_v58 = vsel %vm7922_vm11, %v8573_v56, %v8572_v24  ;;  %v1205_v1 = vsel %vm7922_vm11, %v8572_v24, %v8573_v56  ;;  %v1235_v11 = vperm.slane %v1234_v23, 0  ;;  %v1236_v17 = vperm.slane %v1234_v23, 1  ;;  %v8574_v8 = vld [vmem:[#allocation112_spill] sm:$0xff] }
 0x305   :  { %8570 = vst [vmem:[#allocation33_spill] sm:$0xff] %v8569_v18  ;;  %v1183_v41 = vsel %vm6302_vm0, %v1176_v61, 0.0  ;;  %v1184_v26 = vsel %vm6306_vm4, %v1177_v63, 0.0  ;;  %v1164_v19 = vadd.f32 %v1162_v53, %v1136_v38  ;;  %v1262_v61 = vsel %vm1249_vm9, 1, %v8073_v55  ;;  %v6378_v63 = vpop.permute.xlu2 %1457  ;;  %v8575_v53 = vld [vmem:[#allocation116_spill] sm:$0xff]  ;;  %v8586_v38 = vld [vmem:[#allocation6_spill] sm:$0xff]  ;;  %2123 = vrot.lane.b32.xlu2 %v6177_v40, %s8614_s19 }
 0x306   :  { %v1189_v23 = vmul.f32 %v8574_v8, %v1183_v41  ;;  %v1190_v4 = vmul.f32 %v8574_v8, %v1184_v26  ;;  %v1163_v24 = vadd.f32 %v1161_v9, %v1135_v16  ;;  %vm8576_vm1 = vnez %v8347_v34  ;;  %v8577_v56 = vld [vmem:[#allocation4_spill] sm:$0xff]  ;;  %v8585_v16 = vld [vmem:[#allocation43_spill] sm:$0xff] }
 0x307   :  { %vm8578_vm10 = vnez %v8350_v49  ;;  %v1211_v41 = vsel %vm6330_vm13, %v1204_v58, 0.0  ;;  %v1212_v26 = vsel %vm6334_vm12, %v1205_v1, 0.0  ;;  %vm6390_vm8 = vcmp.eq.s32.totalorder %v1235_v11, 1  ;;  %vm8588_vm13 = vmand %vm6322_vm15, %vm8476_vm14  ;;  %v6412_v11 = vpop.permute.xlu0 %1358  ;;  %2138 = vrot.lane.b32.xlu1 %v6255_v36, %s3820_s0 }
 0x308   :  { %v8579_v8 = vmov 0  ;;  %vm6394_vm9 = vcmp.eq.s32.totalorder %v1236_v17, 1  ;;  %v8582_v9 = vmov 0  ;;  %vm8587_vm11 = vcmp.lt.s32.totalorder %v4483_v32, 94  ;;  %vm1337_vm12 = vmand %vm6322_vm15, %vm8515_vm2 }
 0x309   :  { %v8580_v8 = vsel %vm6390_vm8, 4294967295, %v8579_v8  ;;  %v8583_v9 = vsel %vm6394_vm9, 4294967295, %v8582_v9  ;;  %v1232_v44 = vsel %vm8587_vm11, %v8586_v38, %v8585_v16  ;;  %v1294_v1 = vsel %vm8588_vm13, 1, %v8073_v55  ;;  %vm8589_vm4 = vmmov %vm8587_vm11 }
 0x30a   :  { %8581 = vst [vmem:[#allocation23_spill] sm:$0xff] %v8580_v8  ;;  %v1233_v17 = vsel %vm8589_vm4, %v8585_v16, %v8586_v38  ;;  %v1263_v58 = vperm.slane %v1262_v61, 0  ;;  %v1264_v6 = vperm.slane %v1262_v61, 1  ;;  %vm8590_vm11 = vmand %vm6322_vm15, %vm8491_vm3  ;;  %v6428_v5 = vld.sshfl [vmem:[#allocation1] sm:$0xff pattern:$0x75316420]  ;;  %v1192_v47 = vadd.f32 %v1190_v4, %v1164_v19 }
 0x30b   :  { %8584 = vst [vmem:[#allocation69_spill] sm:$0xff] %v8583_v9  ;;  %v1322_v39 = vsel %vm8590_vm11, 1, %v8073_v55  ;;  %vm1365_vm2 = vmand %vm6322_vm15, %vm8534_vm5  ;;  %v6430_v18 = vld.sshfl [vmem:[#allocation1 + $0x8] sm:$0xff pattern:$0x75316420]  ;;  %v1191_v38 = vadd.f32 %v1189_v23, %v1163_v24  ;;  %vm7934_vm14 = vcmp.lt.s32.totalorder %v4483_v32, 93  ;;  %v1217_v19 = vmul.f32 %v8592_v21, %v1211_v41 }
 0x30c   :  { %v1295_v61 = vperm.slane %v1294_v1, 0  ;;  %v1296_v16 = vperm.slane %v1294_v1, 1  ;;  %v1350_v20 = vsel %vm1337_vm12, 1, %v8073_v55  ;;  %2184 = vst [vmem:[#allocation1] ss:$2 sm:$0xff] %v4298_v42  ;;  %v1239_v3 = vsel %vm6390_vm8, %v1232_v44, 0.0  ;;  %v6455_v1 = vpop.permute.xlu1 %1427 }
 0x30d   :  { %v1240_v12 = vsel %vm6394_vm9, %v1233_v17, 0.0  ;;  %v1323_v23 = vperm.slane %v1322_v39, 0  ;;  %v1218_v4 = vmul.f32 %v8592_v21, %v1212_v26  ;;  %vm6445_vm3 = vcmp.eq.s32.totalorder %v1263_v58, 1  ;;  %v6469_v52 = vpop.permute.xlu2 %1919  ;;  %2140 = vrot.lane.b32.xlu2 %v6257_v60, %s3820_s0  ;;  %v8790_v9 = vld [vmem:[#allocation30_spill] sm:$0xff] }
 0x30e   :  { %v8593_v24 = vmov 0  ;;  %v1324_v35 = vperm.slane %v1322_v39, 1  ;;  %v1378_v44 = vsel %vm1365_vm2, 1, %v8073_v55  ;;  %vm6457_vm4 = vcmp.eq.s32.totalorder %v1264_v6, 1 }
 0x30f   :  { %v8594_v24 = vsel %vm6445_vm3, 4294967295, %v8593_v24  ;;  %v8596_v41 = vmov 0  ;;  %v1260_v51 = vsel %vm7934_vm14, %v5875_v62, %v5747_v48  ;;  %v1261_v26 = vsel %vm7934_vm14, %v5747_v48, %v5875_v62  ;;  %2155 = vrot.lane.b32.xlu1 %v6326_v15, %s3822_s22 }
 0x310   :  { %8595 = vst [vmem:[#allocation66_spill] sm:$0xff] %v8594_v24  ;;  %v8597_v41 = vsel %vm6457_vm4, 4294967295, %v8596_v41  ;;  %v1351_v17 = vperm.slane %v1350_v20, 0  ;;  %vm6472_vm13 = vcmp.eq.s32.totalorder %v1295_v61, 1  ;;  %vm6476_vm12 = vcmp.eq.s32.totalorder %v1296_v16, 1 }
 0x311   :  { %8598 = vst [vmem:[#allocation36_spill] sm:$0xff] %v8597_v41  ;;  %v1352_v39 = vperm.slane %v1350_v20, 1  ;;  %vm6481_vm2 = vcmp.eq.s32.totalorder %v1323_v23, 1  ;;  %v1379_v48 = vperm.slane %v1378_v44, 0  ;;  %v1380_v62 = vperm.slane %v1378_v44, 1  ;;  %v6498_v23 = vpop.permute.xlu0 %1386 }
 0x312   :  { %v1267_v61 = vsel %vm6445_vm3, %v1260_v51, 0.0  ;;  %v1268_v16 = vsel %vm6457_vm4, %v1261_v26, 0.0  ;;  %vm6493_vm5 = vcmp.eq.s32.totalorder %v1324_v35, 1  ;;  %v1245_v44 = vmul.f32 %v5962_v37, %v1239_v3  ;;  %vm8613_vm3 = vmand %vm6322_vm15, %vm8446_vm6 }
 0x313   :  { %vm6501_vm9 = vcmp.eq.s32.totalorder %v1351_v17, 1  ;;  %v8607_v8 = vmov 0  ;;  %vm8609_vm14 = vnez %v8163_v59  ;;  %v6509_v51 = vld.sshfl [vmem:[#allocation1] sm:$0xff pattern:$0x75316420]  ;;  %v1219_v26 = vadd.f32 %v1217_v19, %v1191_v38 }
 0x314   :  { %v8608_v8 = vsel %vm6501_vm9, 4294967295, %v8607_v8  ;;  %v6511_v35 = vld.sshfl [vmem:[#allocation1 + $0x8] sm:$0xff pattern:$0x75316420]  ;;  %v1220_v41 = vadd.f32 %v1218_v4, %v1192_v47  ;;  %v1246_v24 = vmul.f32 %v5962_v37, %v1240_v12  ;;  %vm6514_vm11 = vcmp.eq.s32.totalorder %v1352_v39, 1  ;;  %v6561_v40 = vpop.permute.xlu1 %1455 }
 0x315   :  { %v8610_v21 = vmov 0  ;;  %v1406_v3 = vsel %vm8613_vm3, 1, %v8073_v55  ;;  %2201 = vst [vmem:[#allocation1] ss:$2 sm:$0xff] %v4298_v42  ;;  %vm8615_vm8 = vcmp.lt.s32.totalorder %v4483_v32, 83  ;;  %vm6536_vm0 = vcmp.eq.s32.totalorder %v1379_v48, 1  ;;  %2157 = vrot.lane.b32.xlu2 %v6328_v50, %s3822_s22 }
 0x316   :  { %v8611_v21 = vsel %vm6514_vm11, 4294967295, %v8610_v21  ;;  %v1292_v12 = vsel %vm8615_vm8, %v6048_v30, %v5904_v2  ;;  %vm8616_vm4 = vmmov %vm8615_vm8  ;;  %v8617_v38 = vmov 0  ;;  %vm6540_vm6 = vcmp.eq.s32.totalorder %v1380_v62, 1 }
 0x317   :  { %8612 = vst [vmem:[#allocation37_spill] sm:$0xff] %v8611_v21  ;;  %v1293_v47 = vsel %vm8616_vm4, %v5904_v2, %v6048_v30  ;;  %v8618_v38 = vsel %vm6536_vm0, 4294967295, %v8617_v38  ;;  %v8620_v14 = vmov 0  ;;  %vm8623_vm8 = vcmp.lt.s32.totalorder %v4483_v32, 82  ;;  %vm8625_vm4 = vmand %vm6322_vm15, %vm8609_vm14  ;;  %v8645_v21 = vld [vmem:[#allocation56_spill] sm:$0xff]  ;;  %2172 = vrot.lane.b32.xlu1 %v6428_v5, %s3824_s16 }
 0x318   :  { %8619 = vst [vmem:[#allocation26_spill] sm:$0xff] %v8618_v38  ;;  %v8621_v14 = vsel %vm6540_vm6, 4294967295, %v8620_v14  ;;  %v1320_v28 = vsel %vm8623_vm8, %v6126_v54, %v5985_v22  ;;  %vm8624_vm3 = vmmov %vm8623_vm8  ;;  %v1273_v30 = vmul.f32 %v6128_v10, %v1267_v61  ;;  %v1434_v19 = vsel %vm8625_vm4, 1, %v8073_v55 }
 0x319   :  { %8622 = vst [vmem:[#allocation39_spill] sm:$0xff] %v8621_v14  ;;  %v1321_v2 = vsel %vm8624_vm3, %v5985_v22, %v6126_v54  ;;  %v1274_v4 = vmul.f32 %v6128_v10, %v1268_v16  ;;  %v1407_v17 = vperm.slane %v1406_v3, 0  ;;  %v1408_v39 = vperm.slane %v1406_v3, 1  ;;  %vm1449_vm8 = vmand %vm6322_vm15, %vm8458_vm7  ;;  %v6568_v22 = vpop.permute.xlu2 %1936  ;;  %v8644_v14 = vld [vmem:[#allocation51_spill] sm:$0xff] }
 0x31a   :  { %v1247_v54 = vadd.f32 %v1245_v44, %v1219_v26  ;;  %v1299_v48 = vsel %vm6472_vm13, %v1292_v12, 0.0  ;;  %v1300_v59 = vsel %vm6476_vm12, %v1293_v47, 0.0  ;;  %v1248_v62 = vadd.f32 %v1246_v24, %v1220_v41 }
 0x31b   :  { %v1327_v61 = vsel %vm6481_vm2, %v1320_v28, 0.0  ;;  %v1328_v29 = vsel %vm6493_vm5, %v1321_v2, 0.0  ;;  %v1435_v45 = vperm.slane %v1434_v19, 0  ;;  %v1436_v16 = vperm.slane %v1434_v19, 1 }
 0x31c   :  { %v1305_v3 = vmul.f32 %v6227_v31, %v1299_v48  ;;  %v1306_v44 = vmul.f32 %v6227_v31, %v1300_v59  ;;  %v1462_v26 = vsel %vm1449_vm8, 1, %v8073_v55  ;;  %v1275_v12 = vadd.f32 %v1273_v30, %v1247_v54  ;;  %v6602_v30 = vpop.permute.xlu0 %1414  ;;  %v6604_v54 = vld.sshfl [vmem:[#allocation1] sm:$0xff pattern:$0x75316420] }
 0x31d   :  { %vm8626_vm15 = vcmp.lt.s32.totalorder %v4483_v32, 81  ;;  %vm8628_vm3 = vcmp.lt.s32.totalorder %v4483_v32, 80  ;;  %vm6594_vm4 = vcmp.eq.s32.totalorder %v1407_v17, 1  ;;  %vm6598_vm8 = vcmp.eq.s32.totalorder %v1408_v39, 1  ;;  %2174 = vrot.lane.b32.xlu2 %v6430_v18, %s3824_s16  ;;  %v8672_v18 = vld [vmem:[#allocation12_spill] sm:$0xff] }
 0x31e   :  { %v1348_v24 = vsel %vm8626_vm15, %v6213_v27, %v6066_v7  ;;  %vm8627_vm7 = vmmov %vm8626_vm15  ;;  %v1376_v47 = vsel %vm8628_vm3, %v6285_v13, %v6142_v33  ;;  %v1276_v19 = vadd.f32 %v1274_v4, %v1248_v62  ;;  %v6606_v48 = vld.sshfl [vmem:[#allocation1 + $0x8] sm:$0xff pattern:$0x75316420]  ;;  %v1334_v17 = vmul.f32 %v6296_v46, %v1328_v29  ;;  %v1892_v62 = vpop.permute.xlu1 %1891 }
 0x31f   :  { %v1349_v41 = vsel %vm8627_vm7, %v6066_v7, %v6213_v27  ;;  %vm8633_vm15 = vmmov %vm8628_vm3  ;;  %v1333_v27 = vmul.f32 %v6296_v46, %v1327_v61  ;;  %2218 = vst [vmem:[#allocation1] ss:$2 sm:$0xff] %v4298_v42  ;;  %vm6618_vm3 = vcmp.eq.s32.totalorder %v1435_v45, 1  ;;  %vm6622_vm14 = vcmp.eq.s32.totalorder %v1436_v16, 1  ;;  %2189 = vrot.lane.b32.xlu1 %v6509_v51, %s3826_s25 }
 0x320   :  { %v1377_v7 = vsel %vm8633_vm15, %v6142_v33, %v6285_v13  ;;  %v8636_v39 = vmov 0  ;;  %v1463_v33 = vperm.slane %v1462_v26, 0  ;;  %v1464_v13 = vperm.slane %v1462_v26, 1 }
 0x321   :  { %v8637_v39 = vsel %vm6622_vm14, 4294967295, %v8636_v39  ;;  %v1355_v59 = vsel %vm6501_vm9, %v1348_v24, 0.0  ;;  %v1356_v36 = vsel %vm6514_vm11, %v1349_v41, 0.0  ;;  %v1307_v61 = vadd.f32 %v1305_v3, %v1275_v12  ;;  %v6642_v24 = vpop.permute.xlu2 %1953  ;;  %v8640_v41 = vld [vmem:[#allocation10_spill] sm:$0xff] }
 0x322   :  { %v1308_v29 = vadd.f32 %v1306_v44, %v1276_v19  ;;  %v1383_v45 = vsel %vm6536_vm0, %v1376_v47, 0.0  ;;  %v1384_v16 = vsel %vm6540_vm6, %v1377_v7, 0.0  ;;  %vm8638_vm15 = vcmp.lt.s32.totalorder %v4483_v32, 1  ;;  %v8642_v44 = vld [vmem:[#allocation5_spill] sm:$0xff] }
 0x323   :  { %v1893_v26 = vsel %vm8638_vm15, %v6050_v0, %v1892_v62  ;;  %vm8639_vm7 = vmmov %vm8638_vm15  ;;  %vm8641_vm11 = vnez %v8640_v41  ;;  %vm8643_vm9 = vnez %v8642_v44  ;;  %v1335_v47 = vadd.f32 %v1333_v27, %v1307_v61 }
 0x324   :  { %v1894_v60 = vsel %vm8639_vm7, %v1892_v62, %v6050_v0  ;;  %v1896_v12 = vsel %vm8643_vm9, %v1893_v26, 0.0  ;;  %v1336_v19 = vadd.f32 %v1334_v17, %v1308_v29  ;;  %v1361_v7 = vmul.f32 %v6412_v11, %v1355_v59  ;;  %v8651_v29 = vld [vmem:[#allocation18_spill] sm:$0xff] }
 0x325   :  { %v1895_v3 = vsel %vm8641_vm11, %v1894_v60, 0.0  ;;  %v1362_v55 = vmul.f32 %v6412_v11, %v1356_v36  ;;  %v1898_v46 = vmul.f32 %v1896_v12, %v8644_v14  ;;  %vm8646_vm7 = vcmp.lt.s32.totalorder %v4483_v32, 79  ;;  %v8650_v36 = vld [vmem:[#allocation19_spill] sm:$0xff]  ;;  %2191 = vrot.lane.b32.xlu2 %v6511_v35, %s3826_s25 }
 0x326   :  { %v1897_v38 = vmul.f32 %v1895_v3, %v8644_v14  ;;  %v1404_v0 = vsel %vm8646_vm7, %v6364_v57, %v8645_v21  ;;  %vm8647_vm11 = vmmov %vm8646_vm7  ;;  %vm8648_vm9 = vcmp.lt.s32.totalorder %v4483_v32, 78  ;;  %v1389_v17 = vmul.f32 %v6498_v23, %v1383_v45  ;;  %v6672_v60 = vld.sshfl [vmem:[#allocation1] sm:$0xff pattern:$0x75316420]  ;;  %v1918_v45 = vpop.permute.xlu1 %1917 }
 0x327   :  { %v1405_v62 = vsel %vm8647_vm11, %v8645_v21, %v6364_v57  ;;  %v1432_v27 = vsel %vm8648_vm9, %v6455_v1, %v6294_v25  ;;  %vm8649_vm15 = vmmov %vm8648_vm9  ;;  %v1390_v59 = vmul.f32 %v6498_v23, %v1384_v16  ;;  %v1900_v26 = vadd.f32 %v1898_v46, %v8651_v29  ;;  %v6674_v21 = vld.sshfl [vmem:[#allocation1 + $0x8] sm:$0xff pattern:$0x75316420]  ;;  %v8652_v57 = vld [vmem:[#allocation71_spill] sm:$0xff]  ;;  %2206 = vrot.lane.b32.xlu1 %v6604_v54, %s3827_s28 }
 0x328   :  { %v1433_v14 = vsel %vm8649_vm15, %v6294_v25, %v6455_v1  ;;  %v1899_v61 = vadd.f32 %v1897_v38, %v8650_v36  ;;  %v8653_v41 = vsel %vm8576_vm1, %v8575_v53, 0.0  ;;  %v8654_v25 = vsel %vm8578_vm10, %v8577_v56, 0.0  ;;  %v6687_v38 = vpop.permute.xlu0 %1442  ;;  %2235 = vst [vmem:[#allocation1] ss:$2 sm:$0xff] %v4298_v42  ;;  %v8665_v29 = vld [vmem:[#allocation77_spill] sm:$0xff] }
 0x329   :  { %v1908_v3 = vmul.f32 %v8653_v41, %v8652_v57  ;;  %v1909_v1 = vmul.f32 %v8654_v25, %v8652_v57  ;;  %vm6692_vm11 = vcmp.eq.s32.totalorder %v1463_v33, 1  ;;  %v8655_v34 = vmov 0  ;;  %v6716_v12 = vpop.permute.xlu2 %1970 }
 0x32a   :  { %v8656_v34 = vsel %vm6692_vm11, 4294967295, %v8655_v34  ;;  %vm6696_vm1 = vcmp.eq.s32.totalorder %v1464_v13, 1  ;;  %v8657_v46 = vmov 0  ;;  %v1363_v49 = vadd.f32 %v1361_v7, %v1335_v47  ;;  %v8661_v7 = vld [vmem:[#allocation114_spill] sm:$0xff] }
 0x32b   :  { %v8658_v46 = vsel %vm6696_vm1, 4294967295, %v8657_v46  ;;  %v1364_v53 = vadd.f32 %v1362_v55, %v1336_v19  ;;  %v1411_v56 = vsel %vm6594_vm4, %v1404_v0, 0.0  ;;  %v1412_v15 = vsel %vm6598_vm8, %v1405_v62, 0.0  ;;  %v8663_v62 = vld [vmem:[#allocation47_spill] sm:$0xff] }
 0x32c   :  { %v1439_v33 = vsel %vm6618_vm3, %v1432_v27, 0.0  ;;  %v1440_v13 = vsel %vm6622_vm14, %v1433_v14, 0.0  ;;  %vm8659_vm10 = vcmp.lt.s32.totalorder %v4483_v32, 127  ;;  %v1391_v16 = vadd.f32 %v1389_v17, %v1363_v49 }
 0x32d   :  { %v1921_v55 = vsel %vm8659_vm10, %v1918_v45, %v6469_v52  ;;  %vm8660_vm9 = vmmov %vm8659_vm10  ;;  %v1392_v44 = vadd.f32 %v1390_v59, %v1364_v53  ;;  %v1417_v47 = vmul.f32 %v6602_v30, %v1411_v56  ;;  %v1418_v19 = vmul.f32 %v6602_v30, %v1412_v15  ;;  %2208 = vrot.lane.b32.xlu2 %v6606_v48, %s3827_s28 }
 0x32e   :  { %v1922_v50 = vsel %vm8660_vm9, %v6469_v52, %v1918_v45  ;;  %vm8662_vm15 = vnez %v8661_v7  ;;  %vm8664_vm7 = vnez %v8663_v62  ;;  %v1911_v14 = vadd.f32 %v1909_v1, %v1900_v26  ;;  %v1935_v5 = vpop.permute.xlu1 %1934  ;;  %v8674_v62 = vld [vmem:[#allocation80_spill] sm:$0xff] }
 0x32f   :  { %v1923_v0 = vsel %vm8662_vm15, %v1921_v55, 0.0  ;;  %v1924_v27 = vsel %vm8664_vm7, %v1922_v50, 0.0  ;;  %v1910_v36 = vadd.f32 %v1908_v3, %v1899_v61  ;;  %vm8666_vm10 = vcmp.lt.s32.totalorder %v4483_v32, 77  ;;  %v6736_v3 = vld.sshfl [vmem:[#allocation1] sm:$0xff pattern:$0x75316420]  ;;  %2223 = vrot.lane.b32.xlu1 %v6672_v60, %s3829_s30 }
 0x330   :  { %v1925_v57 = vmul.f32 %v1923_v0, %v8665_v29  ;;  %v1926_v52 = vmul.f32 %v1924_v27, %v8665_v29  ;;  %v1460_v17 = vsel %vm8666_vm10, %v6561_v40, %v6378_v63  ;;  %vm8667_vm9 = vmmov %vm8666_vm10  ;;  %v1445_v41 = vmul.f32 %v6687_v38, %v1439_v33  ;;  %v6738_v1 = vld.sshfl [vmem:[#allocation1 + $0x8] sm:$0xff pattern:$0x75316420]  ;;  %v6747_v56 = vpop.permute.xlu0 %1470  ;;  %v8695_v60 = vld [vmem:[#allocation89_spill] sm:$0xff] }
 0x331   :  { %v1461_v59 = vsel %vm8667_vm9, %v6378_v63, %v6561_v40  ;;  %v1446_v25 = vmul.f32 %v6687_v38, %v1440_v13  ;;  %v1419_v49 = vadd.f32 %v1417_v47, %v1391_v16  ;;  %v1420_v53 = vadd.f32 %v1418_v19, %v1392_v44  ;;  %2252 = vst [vmem:[#allocation1] ss:$2 sm:$0xff] %v4298_v42  ;;  %v1988_v16 = vpop.permute.xlu2 %1987  ;;  %v8670_v44 = vld [vmem:[#allocation13_spill] sm:$0xff] }
 0x332   :  { %v1927_v26 = vadd.f32 %v1925_v57, %v1910_v36  ;;  %v1928_v61 = vadd.f32 %v1926_v52, %v1911_v14  ;;  %v1467_v63 = vsel %vm6692_vm11, %v1460_v17, 0.0  ;;  %v1468_v40 = vsel %vm6696_vm1, %v1461_v59, 0.0 }
 0x333   :  { %v1473_v15 = vmul.f32 %v6747_v56, %v1467_v63  ;;  %v1474_v33 = vmul.f32 %v6747_v56, %v1468_v40  ;;  %v1447_v13 = vadd.f32 %v1445_v41, %v1419_v49  ;;  %v1448_v45 = vadd.f32 %v1446_v25, %v1420_v53  ;;  %v8677_v53 = vld [vmem:[#allocation15_spill] sm:$0xff]  ;;  %v8679_v40 = vld [vmem:[#allocation16_spill] sm:$0xff] }
 0x334   :  { %vm8668_vm7 = vcmp.lt.s32.totalorder %v4483_v32, 126  ;;  %vm8671_vm10 = vnez %v8670_v44  ;;  %vm8673_vm9 = vnez %v8672_v18  ;;  %vm8730_vm1 = vcmp.lt.s32.totalorder %v4483_v32, 99 }
 0x335   :  { %v1938_v55 = vsel %vm8668_vm7, %v1935_v5, %v6568_v22  ;;  %vm8669_vm15 = vmmov %vm8668_vm7  ;;  %v6763_v7 = vadd.f32 %v1473_v15, %v1447_v13  ;;  %v6765_v0 = vadd.f32 %v1474_v33, %v1448_v45  ;;  %vm7952_vm7 = vcmask 1043456   ;;  %v8681_v33 = vld [vmem:[#allocation83_spill] sm:$0xff]  ;;  %2225 = vrot.lane.b32.xlu2 %v6674_v21, %s3829_s30 }
 0x336   :  { %v1939_v50 = vsel %vm8669_vm15, %v6568_v22, %v1935_v5  ;;  %v1940_v47 = vsel %vm8671_vm10, %v1938_v55, 0.0  ;;  %v1952_v49 = vpop.permute.xlu1 %1951  ;;  %vm8675_vm15 = vcmp.lt.s32.totalorder %v4483_v32, 125 }
 0x337   :  { %v1941_v19 = vsel %vm8673_vm9, %v1939_v50, 0.0  ;;  %v1942_v27 = vmul.f32 %v1940_v47, %v8674_v62  ;;  %v1483_v36 = vmul.f32 %v6763_v7, %v6763_v7  ;;  %v1484_v22 = vmul.f32 %v6765_v0, %v6765_v0  ;;  %vm8676_vm10 = vmmov %vm8675_vm15  ;;  %2240 = vrot.lane.b32.xlu1 %v6736_v3, %s3830_s2 }
 0x338   :  { %v1943_v14 = vmul.f32 %v1941_v19, %v8674_v62  ;;  %v2253_v52 = vld.sshfl [vmem:[#allocation1] sm:$0xff pattern:$0x75316420]  ;;  %v2254_v17 = vld.sshfl [vmem:[#allocation1 + $0x8] sm:$0xff pattern:$0x75316420]  ;;  %vm8678_vm9 = vnez %v8677_v53 }
 0x339   :  { %v1944_v29 = vadd.f32 %v1942_v27, %v1927_v26  ;;  %v1485_v59 = vsel %vm7952_vm7, %v1483_v36, 0.0  ;;  %v1486_v41 = vsel %vm7952_vm7, %v1484_v22, 0.0  ;;  %2269 = vst [vmem:[#allocation1] ss:$2 sm:$0xff] %v4298_v42  ;;  %v1955_v26 = vsel %vm8675_vm15, %v1952_v49, %v6642_v24  ;;  %v2005_v51 = vpop.permute.xlu2 %2004  ;;  %v8684_v19 = vld [vmem:[#allocation110_spill] sm:$0xff]  ;;  %v8686_v27 = vld [vmem:[#allocation44_spill] sm:$0xff] }
 0x33a   :  { %v1945_v57 = vadd.f32 %v1943_v14, %v1928_v61  ;;  %v1487_v25 = vadd.f32 %v1486_v41, %v1485_v59  ;;  %v1956_v61 = vsel %vm8676_vm10, %v6642_v24, %v1952_v49  ;;  %v1957_v63 = vsel %vm8678_vm9, %v1955_v26, 0.0  ;;  %v8688_v14 = vld [vmem:[#allocation86_spill] sm:$0xff]  ;;  %v8691_v26 = vld [vmem:[#allocation103_spill] sm:$0xff]  ;;  %v8693_v53 = vld [vmem:[#allocation8_spill] sm:$0xff] }
 0x33b   :  { %vm8680_vm7 = vnez %v8679_v40  ;;  %v1959_v5 = vmul.f32 %v1957_v63, %v8681_v33  ;;  %vm8685_vm10 = vnez %v8684_v19  ;;  %vm8687_vm9 = vnez %v8686_v27 }
 0x33c   :  { %1488 = vadd.xlane.f32.xlu0 %v1487_v25  ;;  %v1958_v15 = vsel %vm8680_vm7, %v1956_v61, 0.0  ;;  %vm8682_vm7 = vcmp.lt.s32.totalorder %v4483_v32, 115 }
 0x33d   :  { %v1960_v35 = vmul.f32 %v1958_v15, %v8681_v33  ;;  %v1961_v13 = vadd.f32 %v1959_v5, %v1944_v29  ;;  %vm8683_vm15 = vmmov %vm8682_vm7  ;;  %2242 = vrot.lane.b32.xlu2 %v6738_v1, %s3830_s2 }
 0x33e   :  { %v1969_v24 = vpop.permute.xlu1 %1968 }
 0x33f   :  { %v1962_v45 = vadd.f32 %v1960_v35, %v1945_v57  ;;  %v1972_v44 = vsel %vm8682_vm7, %v1969_v24, %v6716_v12  ;;  %v1973_v47 = vsel %vm8683_vm15, %v6716_v12, %v1969_v24  ;;  %vm8689_vm7 = vcmp.lt.s32.totalorder %v4483_v32, 114  ;;  %v8700_v24 = vld [vmem:[#allocation48_spill] sm:$0xff]  ;;  %2257 = vrot.lane.b32.xlu1 %v2253_v52, %s3832_s17 }
 0x340   :  { %v2270_v55 = vld.sshfl [vmem:[#allocation1] sm:$0xff pattern:$0x75316420]  ;;  %v2271_v50 = vld.sshfl [vmem:[#allocation1 + $0x8] sm:$0xff pattern:$0x75316420]  ;;  %vm8690_vm15 = vmmov %vm8689_vm7 }
 0x341   :  { %2286 = vst [vmem:[#allocation1] ss:$2 sm:$0xff] %v4298_v42  ;;  %v2022_v18 = vpop.permute.xlu2 %2021  ;;  %v1974_v62 = vsel %vm8685_vm10, %v1972_v44, 0.0  ;;  %v1975_v54 = vsel %vm8687_vm9, %v1973_v47, 0.0  ;;  %vm8692_vm10 = vnez %v8691_v26  ;;  %vm8694_vm9 = vnez %v8693_v53  ;;  %v8702_v47 = vld [vmem:[#allocation92_spill] sm:$0xff] }
 0x342   :  { %v1976_v36 = vmul.f32 %v1974_v62, %v8688_v14  ;;  %v1977_v48 = vmul.f32 %v1975_v54, %v8688_v14 }
 0x344   :  { %v1978_v22 = vadd.f32 %v1976_v36, %v1961_v13  ;;  %v1979_v29 = vadd.f32 %v1977_v48, %v1962_v45  ;;  %v8698_v13 = vld [vmem:[#allocation52_spill] sm:$0xff]  ;;  %v8705_v36 = vld [vmem:[#allocation22_spill] sm:$0xff] }
 0x345   :  { %2259 = vrot.lane.b32.xlu2 %v2254_v17, %s3832_s17 }
 0x346   :  { %v1986_v12 = vpop.permute.xlu1 %1985 }
 0x347   :  { %v1989_v41 = vsel %vm8689_vm7, %v1986_v12, %v1988_v16  ;;  %v1990_v25 = vsel %vm8690_vm15, %v1988_v16, %v1986_v12  ;;  %vm8696_vm7 = vcmp.lt.s32.totalorder %v4483_v32, 113  ;;  %v8709_v12 = vld [vmem:[#allocation95_spill] sm:$0xff]  ;;  %2274 = vrot.lane.b32.xlu1 %v2270_v55, %s3834_s18 }
 0x348   :  { %v2287_v57 = vld.sshfl [vmem:[#allocation1] sm:$0xff pattern:$0x75316420]  ;;  %v2288_v59 = vld.sshfl [vmem:[#allocation1 + $0x8] sm:$0xff pattern:$0x75316420]  ;;  %vm8697_vm15 = vmmov %vm8696_vm7 }
 0x349   :  { %2303 = vst [vmem:[#allocation1] ss:$2 sm:$0xff] %v4298_v42  ;;  %v2039_v49 = vpop.permute.xlu2 %2038  ;;  %v1991_v61 = vsel %vm8692_vm10, %v1989_v41, 0.0  ;;  %v1992_v63 = vsel %vm8694_vm9, %v1990_v25, 0.0  ;;  %vm8699_vm10 = vnez %v8698_v13  ;;  %vm8701_vm9 = vnez %v8700_v24 }
 0x34a   :  { %v1993_v40 = vmul.f32 %v1991_v61, %v8695_v60  ;;  %v1994_v42 = vmul.f32 %v1992_v63, %v8695_v60  ;;  %v8712_v63 = vld [vmem:[#allocation11_spill] sm:$0xff] }
 0x34c   :  { %v1995_v15 = vadd.f32 %v1993_v40, %v1978_v22  ;;  %v1996_v21 = vadd.f32 %v1994_v42, %v1979_v29  ;;  %v8707_v22 = vld [vmem:[#allocation21_spill] sm:$0xff]  ;;  %v8714_v40 = vld [vmem:[#allocation55_spill] sm:$0xff] }
 0x34d   :  { %2276 = vrot.lane.b32.xlu2 %v2271_v50, %s3834_s18 }
 0x34e   :  { %v2003_v16 = vpop.permute.xlu1 %2002 }
 0x34f   :  { %v2006_v33 = vsel %vm8696_vm7, %v2003_v16, %v2005_v51  ;;  %v2007_v5 = vsel %vm8697_vm15, %v2005_v51, %v2003_v16  ;;  %vm8703_vm7 = vcmp.lt.s32.totalorder %v4483_v32, 112  ;;  %2291 = vrot.lane.b32.xlu1 %v2287_v57, %s3836_s3 }
 0x350   :  { %v2008_v45 = vsel %vm8699_vm10, %v2006_v33, 0.0  ;;  %v2009_v44 = vsel %vm8701_vm9, %v2007_v5, 0.0  ;;  %vm8704_vm15 = vmmov %vm8703_vm7  ;;  %vm8706_vm10 = vnez %v8705_v36  ;;  %vm8708_vm9 = vnez %v8707_v22 }
 0x351   :  { %v2056_v35 = vpop.permute.xlu2 %2055  ;;  %v2010_v19 = vmul.f32 %v2008_v45, %v8702_v47  ;;  %v2011_v3 = vmul.f32 %v2009_v44, %v8702_v47  ;;  %v8719_v45 = vld [vmem:[#allocation53_spill] sm:$0xff]  ;;  %v8721_v44 = vld [vmem:[#allocation14_spill] sm:$0xff] }
 0x353   :  { %v2012_v62 = vadd.f32 %v2010_v19, %v1995_v15  ;;  %v2013_v1 = vadd.f32 %v2011_v3, %v1996_v21  ;;  %v8716_v15 = vld [vmem:[#allocation98_spill] sm:$0xff]  ;;  %v8723_v19 = vld [vmem:[#allocation101_spill] sm:$0xff] }
 0x355   :  { %2293 = vrot.lane.b32.xlu2 %v2288_v59, %s3836_s3  ;;  %v2305_v59 = vld.sshfl [vmem:[#allocation1 + $0x8] sm:$0xff pattern:$0x75316420] }
 0x356   :  { %v2020_v27 = vpop.permute.xlu1 %2019 }
 0x357   :  { %v2023_v51 = vsel %vm8703_vm7, %v2020_v27, %v2022_v18  ;;  %v2024_v54 = vsel %vm8704_vm15, %v2022_v18, %v2020_v27  ;;  %vm8710_vm7 = vcmp.lt.s32.totalorder %v4483_v32, 111 }
 0x358   :  { %v2025_v48 = vsel %vm8706_vm10, %v2023_v51, 0.0  ;;  %v2026_v29 = vsel %vm8708_vm9, %v2024_v54, 0.0  ;;  %vm8711_vm15 = vmmov %vm8710_vm7  ;;  %vm8713_vm10 = vnez %v8712_v63  ;;  %vm8715_vm9 = vnez %v8714_v40 }
 0x359   :  { %v2073_v14 = vpop.permute.xlu2 %2072  ;;  %v2027_v41 = vmul.f32 %v2025_v48, %v8709_v12  ;;  %v2028_v52 = vmul.f32 %v2026_v29, %v8709_v12  ;;  %v8726_v48 = vld [vmem:[#allocation25_spill] sm:$0xff]  ;;  %v8728_v29 = vld [vmem:[#allocation24_spill] sm:$0xff] }
 0x35b   :  { %v2029_v25 = vadd.f32 %v2027_v41, %v2012_v62  ;;  %v2030_v17 = vadd.f32 %v2028_v52, %v2013_v1  ;;  %v2304_v62 = vld.sshfl [vmem:[#allocation1] sm:$0xff pattern:$0x75316420] }
 0x35c   :  { %2308 = vrot.lane.b32.xlu1 %v2304_v62, %s3838_s1 }
 0x35d   :  { %2310 = vrot.lane.b32.xlu2 %v2305_v59, %s3838_s1 }
 0x35e   :  { %v2037_v26 = vpop.permute.xlu1 %2036 }
 0x35f   :  { %v2040_v18 = vsel %vm8710_vm7, %v2037_v26, %v2039_v49  ;;  %v2041_v61 = vsel %vm8711_vm15, %v2039_v49, %v2037_v26  ;;  %vm8717_vm7 = vcmp.lt.s32.totalorder %v4483_v32, 110 }
 0x360   :  { %v2042_v60 = vsel %vm8713_vm10, %v2040_v18, 0.0  ;;  %v2043_v42 = vsel %vm8715_vm9, %v2041_v61, 0.0  ;;  %vm8718_vm15 = vmmov %vm8717_vm7  ;;  %vm8720_vm10 = vnez %v8719_v45  ;;  %vm8722_vm9 = vnez %v8721_v44  ;;  %v8732_v61 = vld [vmem:[#allocation27_spill] sm:$0xff]  ;;  %v8741_v45 = vld [vmem:[#allocation17_spill] sm:$0xff] }
 0x361   :  { %v2090_v53 = vpop.permute.xlu2 %2089  ;;  %v2044_v21 = vmul.f32 %v2042_v60, %v8716_v15  ;;  %v2045_v55 = vmul.f32 %v2043_v42, %v8716_v15  ;;  %v8734_v60 = vld [vmem:[#allocation28_spill] sm:$0xff]  ;;  %v8736_v15 = vld [vmem:[#allocation106_spill] sm:$0xff]  ;;  %v8743_v44 = vld [vmem:[#allocation107_spill] sm:$0xff] }
 0x363   :  { %v2046_v16 = vadd.f32 %v2044_v21, %v2029_v25  ;;  %v2047_v50 = vadd.f32 %v2045_v55, %v2030_v17 }
 0x366   :  { %v2054_v33 = vpop.permute.xlu1 %2053 }
 0x367   :  { %v2057_v49 = vsel %vm8717_vm7, %v2054_v33, %v2056_v35  ;;  %v2058_v5 = vsel %vm8718_vm15, %v2056_v35, %v2054_v33  ;;  %vm8724_vm7 = vcmp.lt.s32.totalorder %v4483_v32, 109 }
 0x368   :  { %v2059_v24 = vsel %vm8720_vm10, %v2057_v49, 0.0  ;;  %v2060_v47 = vsel %vm8722_vm9, %v2058_v5, 0.0  ;;  %vm8725_vm15 = vmmov %vm8724_vm7  ;;  %vm8727_vm10 = vnez %v8726_v48  ;;  %vm8729_vm9 = vnez %v8728_v29  ;;  %v8739_v49 = vld [vmem:[#allocation60_spill] sm:$0xff]  ;;  %v8750_v48 = vld [vmem:[#allocation113_spill] sm:$0xff] }
 0x369   :  { %v2107_v13 = vpop.permute.xlu2 %2106  ;;  %v2061_v3 = vmul.f32 %v2059_v24, %v8723_v19  ;;  %v2062_v57 = vmul.f32 %v2060_v47, %v8723_v19 }
 0x36b   :  { %v2063_v1 = vadd.f32 %v2061_v3, %v2046_v16  ;;  %v2064_v27 = vadd.f32 %v2062_v57, %v2047_v50 }
 0x36e   :  { %v2071_v35 = vpop.permute.xlu1 %2070 }
 0x36f   :  { %v2074_v51 = vsel %vm8724_vm7, %v2071_v35, %v2073_v14  ;;  %v2075_v54 = vsel %vm8725_vm15, %v2073_v14, %v2071_v35  ;;  %vm8731_vm7 = vmmov %vm8730_vm1  ;;  %vm8733_vm15 = vnez %v8732_v61 }
 0x370   :  { %v2076_v22 = vsel %vm8727_vm10, %v2074_v51, 0.0  ;;  %v2077_v12 = vsel %vm8729_vm9, %v2075_v54, 0.0  ;;  %vm8735_vm10 = vnez %v8734_v60  ;;  %vm8737_vm9 = vcmp.lt.s32.totalorder %v4483_v32, 98  ;;  %v8748_v51 = vld [vmem:[#allocation31_spill] sm:$0xff] }
 0x371   :  { %v2124_v36 = vpop.permute.xlu2 %2123  ;;  %v2078_v41 = vmul.f32 %v2076_v22, %v8536_v43  ;;  %v2079_v52 = vmul.f32 %v2077_v12, %v8536_v43 }
 0x373   :  { %v2080_v25 = vadd.f32 %v2078_v41, %v2063_v1  ;;  %v2081_v17 = vadd.f32 %v2079_v52, %v2064_v27  ;;  %v8746_v27 = vld [vmem:[#allocation20_spill] sm:$0xff] }
 0x376   :  { %v2088_v26 = vpop.permute.xlu1 %2087 }
 0x377   :  { %v2091_v18 = vsel %vm8730_vm1, %v2088_v26, %v2090_v53  ;;  %v2092_v14 = vsel %vm8731_vm7, %v2090_v53, %v2088_v26  ;;  %vm8738_vm1 = vmmov %vm8737_vm9  ;;  %vm8740_vm7 = vnez %v8739_v49 }
 0x378   :  { %v2093_v63 = vsel %vm8733_vm15, %v2091_v18, 0.0  ;;  %v2094_v40 = vsel %vm8735_vm10, %v2092_v14, 0.0  ;;  %vm8742_vm15 = vnez %v8741_v45  ;;  %vm8744_vm10 = vcmp.lt.s32.totalorder %v4483_v32, 97 }
 0x379   :  { %v2141_v42 = vpop.permute.xlu2 %2140  ;;  %v2095_v21 = vmul.f32 %v2093_v63, %v8736_v15  ;;  %v2096_v43 = vmul.f32 %v2094_v40, %v8736_v15 }
 0x37b   :  { %v2097_v55 = vadd.f32 %v2095_v21, %v2080_v25  ;;  %v2098_v16 = vadd.f32 %v2096_v43, %v2081_v17 }
 0x37e   :  { %v2105_v50 = vpop.permute.xlu1 %2104 }
 0x37f   :  { %v2108_v33 = vsel %vm8737_vm9, %v2105_v50, %v2107_v13  ;;  %v2109_v53 = vsel %vm8738_vm1, %v2107_v13, %v2105_v50  ;;  %vm8745_vm9 = vmmov %vm8744_vm10  ;;  %vm8747_vm1 = vnez %v8746_v27 }
 0x380   :  { %v2110_v5 = vsel %vm8740_vm7, %v2108_v33, 0.0  ;;  %v2111_v24 = vsel %vm8742_vm15, %v2109_v53, 0.0  ;;  %vm8749_vm7 = vnez %v8748_v51  ;;  %vm8751_vm15 = vcmask 1043456   ;;  %v8768_v51 = vld [vmem:[#allocation7_spill] sm:$0xff] }
 0x381   :  { %v2112_v47 = vmul.f32 %v2110_v5, %v8743_v44  ;;  %v2113_v19 = vmul.f32 %v2111_v24, %v8743_v44  ;;  %v2158_v3 = vpop.permute.xlu2 %2157  ;;  %v1478_v17 = vsel %vm8751_vm15, %v6763_v7, 0.0  ;;  %v8757_v5 = vld [vmem:[#allocation65_spill] sm:$0xff] }
 0x382   :  { %v8759_v24 = vld [vmem:[#allocation61_spill] sm:$0xff] }
 0x383   :  { %v2114_v57 = vadd.f32 %v2112_v47, %v2097_v55  ;;  %v2115_v62 = vadd.f32 %v2113_v19, %v2098_v16  ;;  %vm8760_vm11 = vnez %v8759_v24  ;;  %v8761_v47 = vld [vmem:[#allocation34_spill] sm:$0xff] }
 0x384   :  { %vm8762_vm14 = vnez %v8761_v47 }
 0x386   :  { %v2122_v59 = vpop.permute.xlu1 %2121 }
 0x387   :  { %v2125_v1 = vsel %vm8744_vm10, %v2122_v59, %v2124_v36  ;;  %v2126_v13 = vsel %vm8745_vm9, %v2124_v36, %v2122_v59  ;;  %vm8752_vm10 = vmmov %vm8751_vm15  ;;  %vm8753_vm9 = vcmp.lt.s32.totalorder %v4483_v32, 96 }
 0x388   :  { %v2127_v35 = vsel %vm8747_vm1, %v2125_v1, 0.0  ;;  %v2128_v54 = vsel %vm8749_vm7, %v2126_v13, 0.0  ;;  %v1479_v36 = vsel %vm8752_vm10, %v6765_v0, 0.0  ;;  %vm8754_vm1 = vmmov %vm8753_vm9  ;;  %vm8755_vm7 = vcmp.lt.s32.totalorder %v4483_v32, 95 }
 0x389   :  { %v2129_v22 = vmul.f32 %v2127_v35, %v8750_v48  ;;  %v2130_v29 = vmul.f32 %v2128_v54, %v8750_v48  ;;  %v2175_v52 = vpop.permute.xlu2 %2174  ;;  %v1480_v26 = vadd.f32 %v1479_v36, %v1478_v17  ;;  %vm8756_vm15 = vmmov %vm8755_vm7  ;;  %vm8758_vm10 = vnez %v8757_v5 }
 0x38b   :  { %v2131_v12 = vadd.f32 %v2129_v22, %v2114_v57  ;;  %v2132_v41 = vadd.f32 %v2130_v29, %v2115_v62  ;;  %1481 = vadd.xlane.f32.xlu1 %v1480_v26  ;;  %v8763_v57 = vld [vmem:[#allocation33_spill] sm:$0xff]  ;;  %v8769_v22 = vld [vmem:[#allocation23_spill] sm:$0xff] }
 0x38e   :  { %v2139_v25 = vpop.permute.xlu1 %2138 }
 0x38f   :  { %v2142_v50 = vsel %vm8753_vm9, %v2139_v25, %v2141_v42  ;;  %v2143_v33 = vsel %vm8754_vm1, %v2141_v42, %v2139_v25  ;;  %vm8764_vm9 = vnez %v8763_v57  ;;  %vm8765_vm1 = vcmp.lt.s32.totalorder %v4483_v32, 94  ;;  %v8771_v25 = vld [vmem:[#allocation69_spill] sm:$0xff] }
 0x390   :  { %v2144_v45 = vsel %vm8758_vm10, %v2142_v50, 0.0  ;;  %v2145_v44 = vsel %vm8760_vm11, %v2143_v33, 0.0  ;;  %vm8772_vm11 = vnez %v8771_v25 }
 0x391   :  { %v2192_v14 = vpop.permute.xlu2 %2191 }
 0x396   :  { %v2156_v18 = vpop.permute.xlu1 %2155 }
 0x397   :  { %v2159_v53 = vsel %vm8755_vm7, %v2156_v18, %v2158_v3  ;;  %v2160_v49 = vsel %vm8756_vm15, %v2158_v3, %v2156_v18  ;;  %vm8766_vm7 = vmmov %vm8765_vm1  ;;  %v8767_v3 = vld [vmem:[#allocation112_spill] sm:$0xff]  ;;  %vm8773_vm15 = vcmp.lt.s32.totalorder %v4483_v32, 93 }
 0x398   :  { %v2161_v19 = vsel %vm8762_vm14, %v2159_v53, 0.0  ;;  %v2162_v62 = vsel %vm8764_vm9, %v2160_v49, 0.0  ;;  %v2146_v13 = vmul.f32 %v2144_v45, %v8767_v3  ;;  %v2147_v27 = vmul.f32 %v2145_v44, %v8767_v3  ;;  %vm8774_vm10 = vmmov %vm8773_vm15  ;;  %v8777_v49 = vld [vmem:[#allocation66_spill] sm:$0xff]  ;;  %v8779_v45 = vld [vmem:[#allocation36_spill] sm:$0xff] }
 0x399   :  { %v2209_v63 = vpop.permute.xlu2 %2208  ;;  %v2163_v54 = vmul.f32 %v2161_v19, %v8768_v51  ;;  %v2164_v48 = vmul.f32 %v2162_v62, %v8768_v51  ;;  %vm8770_vm14 = vnez %v8769_v22  ;;  %vm8775_vm9 = vcmp.lt.s32.totalorder %v4483_v32, 83 }
 0x39a   :  { %v2148_v26 = vadd.f32 %v2146_v13, %v2131_v12  ;;  %v2149_v18 = vadd.f32 %v2147_v27, %v2132_v41 }
 0x39c   :  { %v2165_v44 = vadd.f32 %v2163_v54, %v2148_v26 }
 0x39e   :  { %v2173_v61 = vpop.permute.xlu1 %2172 }
 0x39f   :  { %v2176_v42 = vsel %vm8765_vm1, %v2173_v61, %v2175_v52  ;;  %v2177_v1 = vsel %vm8766_vm7, %v2175_v52, %v2173_v61  ;;  %vm8776_vm1 = vmmov %vm8775_vm9  ;;  %vm8778_vm7 = vnez %v8777_v49 }
 0x3a0   :  { %v2178_v29 = vsel %vm8770_vm14, %v2176_v42, 0.0  ;;  %v2179_v17 = vsel %vm8772_vm11, %v2177_v1, 0.0  ;;  %vm8780_vm14 = vnez %v8779_v45  ;;  %vm8781_vm11 = vcmp.lt.s32.totalorder %v4483_v32, 82 }
 0x3a1   :  { %v2226_v40 = vpop.permute.xlu2 %2225  ;;  %v2180_v33 = vmul.f32 %v2178_v29, %v5962_v37  ;;  %v2181_v53 = vmul.f32 %v2179_v17, %v5962_v37 }
 0x3a3   :  { %v2182_v19 = vadd.f32 %v2180_v33, %v2165_v44 }
 0x3a6   :  { %v2190_v60 = vpop.permute.xlu1 %2189 }
 0x3a7   :  { %v2193_v36 = vsel %vm8773_vm15, %v2190_v60, %v2192_v14  ;;  %v2194_v52 = vsel %vm8774_vm10, %v2192_v14, %v2190_v60  ;;  %v2166_v14 = vadd.f32 %v2164_v48, %v2149_v18  ;;  %vm8782_vm15 = vmmov %vm8781_vm11  ;;  %vm8783_vm10 = vcmp.lt.s32.totalorder %v4483_v32, 81 }
 0x3a8   :  { %v2195_v5 = vsel %vm8778_vm7, %v2193_v36, 0.0  ;;  %v2196_v24 = vsel %vm8780_vm14, %v2194_v52, 0.0  ;;  %vm8795_vm14 = vcmp.lt.s32.totalorder %v4483_v32, 78 }
 0x3a9   :  { %v2243_v21 = vpop.permute.xlu2 %2242  ;;  %v2198_v47 = vmul.f32 %v2196_v24, %v6128_v10  ;;  %v2183_v57 = vadd.f32 %v2181_v53, %v2166_v14 }
 0x3ab   :  { %v2200_v27 = vadd.f32 %v2198_v47, %v2183_v57 }
 0x3ae   :  { %v2207_v15 = vpop.permute.xlu1 %2206 }
 0x3af   :  { %v2210_v61 = vsel %vm8775_vm9, %v2207_v15, %v2209_v63  ;;  %v2211_v50 = vsel %vm8776_vm1, %v2209_v63, %v2207_v15  ;;  %v2197_v15 = vmul.f32 %v2195_v5, %v6128_v10  ;;  %vm8787_vm1 = vnez %v8608_v8 }
 0x3b0   :  { %v2212_v41 = vsel %vm6472_vm13, %v2210_v61, 0.0  ;;  %v2213_v60 = vsel %vm6476_vm12, %v2211_v50, 0.0  ;;  %vm8784_vm13 = vmmov %vm8783_vm10  ;;  %vm8785_vm12 = vcmp.lt.s32.totalorder %v4483_v32, 80 }
 0x3b1   :  { %v2260_v16 = vpop.permute.xlu2 %2259  ;;  %v2214_v58 = vmul.f32 %v2212_v41, %v6227_v31  ;;  %v2215_v42 = vmul.f32 %v2213_v60, %v6227_v31  ;;  %vm8786_vm9 = vmmov %vm8785_vm12  ;;  %v2199_v13 = vadd.f32 %v2197_v15, %v2182_v19 }
 0x3b3   :  { %v2216_v22 = vadd.f32 %v2214_v58, %v2199_v13 }
 0x3b6   :  { %v2224_v43 = vpop.permute.xlu1 %2223 }
 0x3b7   :  { %v2227_v63 = vsel %vm8781_vm11, %v2224_v43, %v2226_v40  ;;  %v2228_v37 = vsel %vm8782_vm15, %v2226_v40, %v2224_v43  ;;  %vm8796_vm11 = vmmov %vm8795_vm14  ;;  %vm8802_vm15 = vcmask 1043456  }
 0x3b8   :  { %v2229_v1 = vsel %vm6481_vm2, %v2227_v63, 0.0  ;;  %v2230_v40 = vsel %vm6493_vm5, %v2228_v37, 0.0  ;;  %vm8791_vm5 = vcmp.lt.s32.totalorder %v4483_v32, 79 }
 0x3b9   :  { %v2277_v35 = vpop.permute.xlu2 %2276  ;;  %v2231_v51 = vmul.f32 %v2229_v1, %v8790_v9  ;;  %v2232_v20 = vmul.f32 %v2230_v40, %v8790_v9  ;;  %vm8792_vm2 = vmmov %vm8791_vm5 }
 0x3bb   :  { %v2233_v50 = vadd.f32 %v2231_v51, %v2216_v22 }
 0x3be   :  { %v2241_v55 = vpop.permute.xlu1 %2240 }
 0x3bf   :  { %v2244_v62 = vsel %vm8783_vm10, %v2241_v55, %v2243_v21  ;;  %v2245_v6 = vsel %vm8784_vm13, %v2243_v21, %v2241_v55  ;;  %v8788_v55 = vld [vmem:[#allocation37_spill] sm:$0xff]  ;;  %vm8803_vm10 = vmmov %vm8802_vm15 }
 0x3c0   :  { %v2246_v21 = vsel %vm8787_vm1, %v2244_v62, 0.0  ;;  %vm8789_vm7 = vnez %v8788_v55  ;;  %vm8804_vm13 = vmmov %vm8803_vm10 }
 0x3c1   :  { %v2294_v43 = vpop.permute.xlu2 %2293  ;;  %v2247_v31 = vsel %vm8789_vm7, %v2245_v6, 0.0  ;;  %v2248_v36 = vmul.f32 %v2246_v21, %v6412_v11 }
 0x3c2   :  { %v2249_v52 = vmul.f32 %v2247_v31, %v6412_v11 }
 0x3c3   :  { %v2250_v45 = vadd.f32 %v2248_v36, %v2233_v50  ;;  %v8807_v50 = vmov 2  }
 0x3c6   :  { %v2258_v59 = vpop.permute.xlu1 %2257 }
 0x3c7   :  { %v2261_v10 = vsel %vm8785_vm12, %v2258_v59, %v2260_v16  ;;  %v2262_v3 = vsel %vm8786_vm9, %v2260_v16, %v2258_v59  ;;  %v2217_v16 = vadd.f32 %v2215_v42, %v2200_v27  ;;  %vm8805_vm12 = vmmov %vm8803_vm10  ;;  %v1489_v27 = vpop.xlane.xlu0 %1488 }
 0x3c8   :  { %v2263_v29 = vsel %vm6536_vm0, %v2261_v10, 0.0  ;;  %v2264_v25 = vsel %vm6540_vm6, %v2262_v3, 0.0  ;;  %vm8797_vm0 = vnez %v8637_v39  ;;  %vm8798_vm6 = vcmp.lt.s32.totalorder %v4483_v32, 77 }
 0x3c9   :  { %v2234_v33 = vadd.f32 %v2232_v20, %v2217_v16  ;;  %v2265_v53 = vmul.f32 %v2263_v29, %v6498_v23  ;;  %v2266_v49 = vmul.f32 %v2264_v25, %v6498_v23  ;;  %v2311_v2 = vpop.permute.xlu2 %2310  ;;  %v2334_v25 = vld [vmem:[%s7623_s7] sm:$0xf] }
 0x3cb   :  { %v2251_v24 = vadd.f32 %v2249_v52, %v2234_v33  ;;  %v2267_v14 = vadd.f32 %v2265_v53, %v2250_v45  ;;  %v8808_v33 = vmov 3   ;;  %v8809_v53 = vmov 0  }
 0x3ce   :  { %v2275_v12 = vpop.permute.xlu1 %2274 }
 0x3cf   :  { %v2278_v54 = vsel %vm8791_vm5, %v2275_v12, %v2277_v35  ;;  %v2279_v48 = vsel %vm8792_vm2, %v2277_v35, %v2275_v12  ;;  %v2268_v12 = vadd.f32 %v2266_v49, %v2251_v24 }
 0x3d0   :  { %v2280_v35 = vsel %vm6594_vm4, %v2278_v54, 0.0  ;;  %v2281_v61 = vsel %vm6598_vm8, %v2279_v48, 0.0  ;;  %vm8799_vm4 = vmmov %vm8798_vm6  ;;  %vm8800_vm8 = vnez %v8656_v34  ;;  %v2355_v54 = vld [vmem:[%s7622_s4] sm:$0xf] }
 0x3d1   :  { %v2282_v28 = vmul.f32 %v2280_v35, %v6602_v30  ;;  %v2283_v44 = vmul.f32 %v2281_v61, %v6602_v30  ;;  %2460 = vperm.xlu0 %3681, %v2355_v54   ;;  %v8806_v61 = vmov 1  }
 0x3d3   :  { %v2284_v63 = vadd.f32 %v2282_v28, %v2267_v14  ;;  %v2285_v4 = vadd.f32 %v2283_v44, %v2268_v12 }
 0x3d6   :  { %v2292_v17 = vpop.permute.xlu1 %2291 }
 0x3d7   :  { %v2295_v26 = vsel %vm8795_vm14, %v2292_v17, %v2294_v43  ;;  %v2296_v18 = vsel %vm8796_vm11, %v2294_v43, %v2292_v17 }
 0x3d8   :  { %v2297_v11 = vsel %vm6618_vm3, %v2295_v26, 0.0  ;;  %v2298_v5 = vsel %vm8797_vm0, %v2296_v18, 0.0  ;;  %vm8801_vm3 = vnez %v8658_v46  ;;  %v2335_v26 = vld [vmem:[%s7624_s8] sm:$0xf] }
 0x3d9   :  { %v2299_v41 = vmul.f32 %v2297_v11, %v6687_v38  ;;  %v2300_v60 = vmul.f32 %v2298_v5, %v6687_v38 }
 0x3db   :  { %v2301_v47 = vadd.f32 %v2299_v41, %v2284_v63  ;;  %v2302_v19 = vadd.f32 %v2300_v60, %v2285_v4 }
 0x3de   :  { %v2309_v23 = vpop.permute.xlu1 %2308 }
 0x3df   :  { %v2312_v39 = vsel %vm8798_vm6, %v2309_v23, %v2311_v2  ;;  %v2313_v37 = vsel %vm8799_vm4, %v2311_v2, %v2309_v23 }
 0x3e0   :  { %v2314_v15 = vsel %vm8800_vm8, %v2312_v39, 0.0  ;;  %v2315_v30 = vsel %vm8801_vm3, %v2313_v37, 0.0 }
 0x3e1   :  { %v2316_v57 = vmul.f32 %v2314_v15, %v6747_v56  ;;  %v2317_v38 = vmul.f32 %v2315_v30, %v6747_v56 }
 0x3e3   :  { %v2318_v62 = vadd.f32 %v2316_v57, %v2301_v47  ;;  %v2319_v6 = vadd.f32 %v2317_v38, %v2302_v19 }
 0x3e5   :  { %v2320_v58 = vsel %vm8802_vm15, %v2318_v62, 0.0  ;;  %v2321_v42 = vsel %vm8803_vm10, %v2319_v6, 0.0  ;;  %v2325_v1 = vmul.f32 %v2318_v62, %v2318_v62  ;;  %v2326_v40 = vmul.f32 %v2319_v6, %v2319_v6 }
 0x3e6   :  { %v2322_v32 = vadd.f32 %v2321_v42, %v2320_v58 }
 0x3e7   :  { %v2327_v34 = vsel %vm8804_vm13, %v2325_v1, 0.0  ;;  %v2328_v46 = vsel %vm8805_vm12, %v2326_v40, 0.0 }
 0x3e8   :  { %2323 = vadd.xlane.f32.xlu2 %v2322_v32  ;;  %v2329_v43 = vadd.f32 %v2328_v46, %v2327_v34 }
 0x3f0   :  { %2330 = vadd.xlane.f32.xlu2 %v2329_v43 }
 0x3fe   :  { %v1482_v3 = vpop.xlane.xlu1 %1481 }
 0x45b   :  { %v2324_v10 = vpop.xlane.xlu2 %2323 }
 0x45c   :  { %v2332_v13 = vadd.f32 %v2324_v10, %v1482_v3 }
 0x45e   :  { %v2336_v56 = vmul.f32 0.001953125, %v2332_v13 }
 0x460   :  { %v2338_v31 = vmul.f32 %v2336_v56, %v2336_v56 }
 0x463   :  { %v2331_v21 = vpop.xlane.xlu2 %2330 }
 0x464   :  { %v2333_v55 = vadd.f32 %v2331_v21, %v1489_v27 }
 0x466   :  { %v2337_v9 = vmul.f32 0.001953125, %v2333_v55 }
 0x468   :  { %v2339_v51 = vsub.f32 %v2337_v9, %v2338_v31 }
 0x46a   :  { %v2340_v20 = vmax.f32 %v2339_v51, 0.0 }
 0x46c   :  { %v2341_v48 = vadd.f32 1e-05, %v2340_v20 }
 0x46e   :  { %3702 = vrsqrt.f32 %v2341_v48  ;;  %vm2348_vm1 = vweird.f32 %v2341_v48 }
 0x474   :  { %v3703_v22 = vpop.eup %3702 }
 0x475   :  { %v2343_v16 = vmul.f32 %v3703_v22, %v2341_v48  ;;  %vm2349_vm9 = vweird.f32 %v3703_v22 }
 0x476   :  { %vm2350_vm7 = vmor %vm2348_vm1, %vm2349_vm9 }
 0x477   :  { %v2344_v59 = vmul.f32 %v3703_v22, %v2343_v16 }
 0x479   :  { %v2345_v29 = vmul.f32 0.5, %v2344_v59 }
 0x47b   :  { %v2346_v8 = vsub.f32 1.5, %v2345_v29 }
 0x47d   :  { %v2347_v17 = vmul.f32 %v3703_v22, %v2346_v8 }
 0x47f   :  { %v2351_v36 = vsel %vm2350_vm7, %v3703_v22, %v2347_v17 }
 0x480   :  { %v2352_v52 = vmul.f32 %v2351_v36, %v2334_v25 }
 0x482   :  { %2358 = vperm.xlu1 %3631, %v2352_v52   ;;  %v2353_v18 = vmul.f32 %v2352_v52, %v2336_v56 }
 0x484   :  { %v2354_v35 = vsub.f32 %v2335_v26, %v2353_v18 }
 0x486   :  { %2365 = vperm.xlu2 %3680, %v2354_v35  }
 0x48a   :  { %3682 = vset.pattern.permute.xlu1 %v8806_v61 }
 0x48b   :  { %2468 = vperm.xlu1 %3682, %v2355_v54  }
 0x48e   :  { %3683 = vset.pattern.permute.xlu2 %v8807_v50 }
 0x48f   :  { %2478 = vperm.xlu2 %3683, %v2355_v54  }
 0x493   :  { %3684 = vset.pattern.permute.xlu1 %v8808_v33 }
 0x494   :  { %2488 = vperm.xlu1 %3684, %v2355_v54  }
 0x497   :  { %3686 = vset.pattern.permute.xlu2 %v8809_v53 }
 0x49c   :  { %3685 = vset.pattern.permute.xlu1 %v8809_v53 }
 0x4e0   :  { %v2366_v28 = vpop.permute.xlu2 %2365 }
 0x4f4   :  { %v2359_v49 = vpop.permute.xlu1 %2358 }
 0x4f5   :  { %v2361_v11 = vmul.f32 %v2359_v49, %v6763_v7  ;;  %v2362_v5 = vmul.f32 %v2359_v49, %v6765_v0  ;;  %v2509_v45 = vmul.f32 %v2359_v49, %v2318_v62  ;;  %v2510_v24 = vmul.f32 %v2359_v49, %v2319_v6 }
 0x4f7   :  { %v7050_v44 = vadd.f32 %v2366_v28, %v2361_v11  ;;  %v7052_v2 = vadd.f32 %v2366_v28, %v2362_v5  ;;  %v7054_v14 = vadd.f32 %v2509_v45, %v2366_v28  ;;  %v7056_v12 = vadd.f32 %v2510_v24, %v2366_v28 }
 0x4f9   :  { %v7059_v41 = vmul.f32 0.70710677, %v7050_v44  ;;  %v7062_v60 = vmul.f32 0.70710677, %v7052_v2  ;;  %v7065_v7 = vmul.f32 0.70710677, %v7054_v14 }
 0x4fa   :  { %v7068_v0 = vmul.f32 0.70710677, %v7056_v12 }
 0x4fb   :  { %v2374_v23 = vmul.f32 %v7059_v41, %v7059_v41  ;;  %v2414_v63 = vmul.f32 %v7062_v60, %v7062_v60  ;;  %v2517_v4 = vmul.f32 %v7065_v7, %v7065_v7 }
 0x4fc   :  { %v2557_v39 = vmul.f32 %v7068_v0, %v7068_v0 }
 0x4fd   :  { %v7078_v37 = vmin.f32 %v2374_v23, 16.0  ;;  %v7080_v15 = vmin.f32 %v2414_v63, 16.0  ;;  %v7082_v30 = vmin.f32 %v2517_v4, 16.0 }
 0x4fe   :  { %v7084_v47 = vmin.f32 %v2557_v39, 16.0 }
 0x4ff   :  { %v2376_v19 = vmul.f32 2.1237322e-06, %v7078_v37  ;;  %v2387_v57 = vmul.f32 3.8918573e-05, %v7078_v37  ;;  %v2416_v38 = vmul.f32 2.1237322e-06, %v7080_v15 }
 0x500   :  { %v2427_v62 = vmul.f32 3.8918573e-05, %v7080_v15  ;;  %v2519_v6 = vmul.f32 2.1237322e-06, %v7082_v30  ;;  %v2530_v58 = vmul.f32 3.8918573e-05, %v7082_v30 }
 0x501   :  { %v2377_v42 = vadd.f32 0.00028619796, %v2376_v19  ;;  %v2388_v32 = vadd.f32 0.001143296, %v2387_v57  ;;  %v2417_v1 = vadd.f32 0.00028619796, %v2416_v38 }
 0x502   :  { %v2428_v40 = vadd.f32 0.001143296, %v2427_v62  ;;  %v2520_v34 = vadd.f32 0.00028619796, %v2519_v6  ;;  %v2531_v46 = vadd.f32 0.001143296, %v2530_v58 }
 0x503   :  { %v2378_v43 = vmul.f32 %v2377_v42, %v7078_v37  ;;  %v2389_v10 = vmul.f32 %v2388_v32, %v7078_v37  ;;  %v2418_v3 = vmul.f32 %v2417_v1, %v7080_v15  ;;  %v2559_v13 = vmul.f32 2.1237322e-06, %v7084_v47 }
 0x504   :  { %v2429_v56 = vmul.f32 %v2428_v40, %v7080_v15  ;;  %v2521_v27 = vmul.f32 %v2520_v34, %v7082_v30  ;;  %v2532_v21 = vmul.f32 %v2531_v46, %v7082_v30  ;;  %v2570_v55 = vmul.f32 3.8918573e-05, %v7084_v47 }
 0x505   :  { %v2379_v31 = vadd.f32 0.0036580483, %v2378_v43  ;;  %v2390_v9 = vadd.f32 0.014752088, %v2389_v10  ;;  %v2419_v51 = vadd.f32 0.0036580483, %v2418_v3 }
 0x506   :  { %v2430_v20 = vadd.f32 0.014752088, %v2429_v56  ;;  %v2522_v54 = vadd.f32 0.0036580483, %v2521_v27  ;;  %v2533_v48 = vadd.f32 0.014752088, %v2532_v21 }
 0x507   :  { %v2380_v22 = vmul.f32 %v2379_v31, %v7078_v37  ;;  %v2391_v16 = vmul.f32 %v2390_v9, %v7078_v37  ;;  %v2420_v59 = vmul.f32 %v2419_v51, %v7080_v15  ;;  %v2560_v29 = vadd.f32 0.00028619796, %v2559_v13 }
 0x508   :  { %v2431_v8 = vmul.f32 %v2430_v20, %v7080_v15  ;;  %v2523_v25 = vmul.f32 %v2522_v54, %v7082_v30  ;;  %v2534_v17 = vmul.f32 %v2533_v48, %v7082_v30  ;;  %v2571_v36 = vadd.f32 0.001143296, %v2570_v55 }
 0x509   :  { %v2381_v52 = vadd.f32 0.05243302, %v2380_v22  ;;  %v2392_v26 = vadd.f32 0.112945676, %v2391_v16  ;;  %v2421_v18 = vadd.f32 0.05243302, %v2420_v59  ;;  %v2561_v35 = vmul.f32 %v2560_v29, %v7084_v47 }
 0x50a   :  { %v2432_v49 = vadd.f32 0.112945676, %v2431_v8  ;;  %v2524_v11 = vadd.f32 0.05243302, %v2523_v25  ;;  %v2535_v5 = vadd.f32 0.112945676, %v2534_v17  ;;  %v2572_v45 = vmul.f32 %v2571_v36, %v7084_v47 }
 0x50b   :  { %v2382_v24 = vmul.f32 %v2381_v52, %v7078_v37  ;;  %v2393_v28 = vmul.f32 %v2392_v26, %v7078_v37  ;;  %v2422_v23 = vmul.f32 %v2421_v18, %v7080_v15  ;;  %v2562_v57 = vadd.f32 0.0036580483, %v2561_v35 }
 0x50c   :  { %v2433_v63 = vmul.f32 %v2432_v49, %v7080_v15  ;;  %v2536_v4 = vmul.f32 %v2535_v5, %v7082_v30  ;;  %v2573_v39 = vadd.f32 0.014752088, %v2572_v45  ;;  %v2525_v62 = vmul.f32 %v2524_v11, %v7082_v30 }
 0x50d   :  { %v2394_v19 = vadd.f32 0.4994258, %v2393_v28  ;;  %v2383_v42 = vadd.f32 0.18741608, %v2382_v24  ;;  %v2423_v1 = vadd.f32 0.18741608, %v2422_v23  ;;  %v2563_v56 = vmul.f32 %v2562_v57, %v7084_v47 }
 0x50e   :  { %v2434_v38 = vadd.f32 0.4994258, %v2433_v63  ;;  %v2537_v6 = vadd.f32 0.4994258, %v2536_v4  ;;  %v2574_v58 = vmul.f32 %v2573_v39, %v7084_v47  ;;  %v2526_v3 = vadd.f32 0.18741608, %v2525_v62 }
 0x50f   :  { %v2395_v32 = vmul.f32 %v2394_v19, %v7078_v37  ;;  %v2384_v27 = vmul.f32 %v2383_v42, %v7078_v37  ;;  %v2424_v21 = vmul.f32 %v2423_v1, %v7080_v15  ;;  %v2564_v9 = vadd.f32 0.05243302, %v2563_v56  ;;  %v7143_v56 = vpop.permute.xlu1 %2468 }
 0x510   :  { %v2435_v40 = vmul.f32 %v2434_v38, %v7080_v15  ;;  %v2538_v34 = vmul.f32 %v2537_v6, %v7082_v30  ;;  %v2575_v46 = vadd.f32 0.112945676, %v2574_v58  ;;  %v2527_v31 = vmul.f32 %v2526_v3, %v7082_v30 }
 0x511   :  { %v2396_v43 = vadd.f32 1.0, %v2395_v32  ;;  %v2385_v51 = vadd.f32 1.1283791, %v2384_v27  ;;  %v2425_v20 = vadd.f32 1.1283791, %v2424_v21  ;;  %v2565_v37 = vmul.f32 %v2564_v9, %v7084_v47 }
 0x512   :  { %v2436_v10 = vadd.f32 1.0, %v2435_v40  ;;  %v7118_v13 = vadd.f32 1.0, %v2538_v34  ;;  %v2576_v55 = vmul.f32 %v2575_v46, %v7084_v47  ;;  %v2528_v59 = vadd.f32 1.1283791, %v2527_v31 }
 0x513   :  { %3704 = vrcp.f32 %v2396_v43  ;;  %v2386_v15 = vmul.f32 %v2385_v51, %v7059_v41  ;;  %vm2402_vm5 = vweird.f32 %v2396_v43  ;;  %v2406_v8 = vand.u32 2147483647, %v2396_v43 }
 0x514   :  { %3706 = vrcp.f32 %v2436_v10  ;;  %v2577_v54 = vadd.f32 0.4994258, %v2576_v55  ;;  %v2408_v36 = vand.u32 2147483648, %v2396_v43  ;;  %v2426_v52 = vmul.f32 %v2425_v20, %v7062_v60 }
 0x515   :  { %3708 = vrcp.f32 %v7118_v13  ;;  %vm2442_vm2 = vweird.f32 %v2436_v10  ;;  %v2448_v35 = vand.u32 2147483648, %v2436_v10  ;;  %v2566_v5 = vadd.f32 0.18741608, %v2565_v37 }
 0x516   :  { %v2578_v29 = vmul.f32 %v2577_v54, %v7084_v47  ;;  %v2446_v45 = vand.u32 2147483647, %v2436_v10  ;;  %vm2407_vm0 = vcmp.eq.f32.partialorder %v2406_v8, 8.507059e+37  ;;  %v2409_v23 = vor.u32 1.1754944e-38, %v2408_v36  ;;  %v2461_v8 = vpop.permute.xlu0 %2460 }
 0x517   :  { %v2551_v60 = vand.u32 2147483648, %v7118_v13  ;;  %v2549_v39 = vand.u32 2147483647, %v7118_v13  ;;  %v2449_v57 = vor.u32 1.1754944e-38, %v2448_v35  ;;  %vm2545_vm3 = vweird.f32 %v7118_v13 }
 0x518   :  { %v7130_v26 = vadd.f32 1.0, %v2578_v29  ;;  %v2567_v38 = vmul.f32 %v2566_v5, %v7084_v47  ;;  %vm2447_vm15 = vcmp.eq.f32.partialorder %v2446_v45, 8.507059e+37  ;;  %v2529_v40 = vmul.f32 %v2528_v59, %v7065_v7 }
 0x519   :  { %v3705_v48 = vpop.eup %3704  ;;  %v2552_v34 = vor.u32 1.1754944e-38, %v2551_v60  ;;  %vm2550_vm13 = vcmp.eq.f32.partialorder %v2549_v39, 8.507059e+37  ;;  %v2370_v7 = vmul.f32 0.5, %v7050_v44  ;;  %v2371_v9 = vmul.f32 0.5, %v7052_v2  ;;  %v2489_v60 = vpop.permute.xlu1 %2488 }
 0x51a   :  { %v3707_v22 = vpop.eup %3706  ;;  %v2398_v16 = vmul.f32 %v3705_v48, %v2396_v43  ;;  %vm2403_vm14 = vweird.f32 %v3705_v48  ;;  %3710 = vrcp.f32 %v7130_v26  ;;  %v2568_v47 = vadd.f32 1.1283791, %v2567_v38 }
 0x51b   :  { %v2438_v25 = vmul.f32 %v3707_v22, %v2436_v10  ;;  %v3709_v30 = vpop.eup %3708  ;;  %vm2443_vm11 = vweird.f32 %v3707_v22  ;;  %vm2404_vm6 = vmor %vm2402_vm5, %vm2403_vm14  ;;  %v2589_v31 = vand.u32 2147483647, %v7130_v26  ;;  %v2591_v20 = vand.u32 2147483648, %v7130_v26 }
 0x51c   :  { %v2399_v17 = vsub.f32 1.0, %v2398_v16  ;;  %v2541_v49 = vmul.f32 %v3709_v30, %v7118_v13  ;;  %vm2546_vm4 = vweird.f32 %v3709_v30  ;;  %vm2444_vm8 = vmor %vm2442_vm2, %vm2443_vm11  ;;  %v2513_v59 = vmul.f32 0.5, %v7054_v14 }
 0x51d   :  { %v2439_v18 = vsub.f32 1.0, %v2438_v25  ;;  %vm2547_vm10 = vmor %vm2545_vm3, %vm2546_vm4  ;;  %v2569_v37 = vmul.f32 %v2568_v47, %v7068_v0  ;;  %vm2585_vm9 = vweird.f32 %v7130_v26  ;;  %vm2590_vm1 = vcmp.eq.f32.partialorder %v2589_v31, 8.507059e+37 }
 0x51e   :  { %v2400_v11 = vmul.f32 %v3705_v48, %v2399_v17  ;;  %v2542_v24 = vsub.f32 1.0, %v2541_v49  ;;  %v2592_v2 = vor.u32 1.1754944e-38, %v2591_v20  ;;  %vm8810_vm5 = vcmask 1043456  }
 0x51f   :  { %v2440_v41 = vmul.f32 %v3707_v22, %v2439_v18  ;;  %vm8811_vm2 = vmmov %vm8810_vm5 }
 0x520   :  { %v2401_v28 = vadd.f32 %v3705_v48, %v2400_v11  ;;  %v2543_v4 = vmul.f32 %v3709_v30, %v2542_v24  ;;  %v3711_v42 = vpop.eup %3710  ;;  %v2479_v24 = vpop.permute.xlu2 %2478  ;;  %vm8812_vm14 = vmmov %vm8811_vm2 }
 0x521   :  { %v2441_v63 = vadd.f32 %v3707_v22, %v2440_v41  ;;  %v2581_v10 = vmul.f32 %v3711_v42, %v7130_v26  ;;  %vm2586_vm12 = vweird.f32 %v3711_v42  ;;  %vm8813_vm11 = vmmov %vm8811_vm2 }
 0x522   :  { %v2405_v19 = vsel %vm2404_vm6, %v3705_v48, %v2401_v28  ;;  %v2544_v58 = vadd.f32 %v3709_v30, %v2543_v4  ;;  %vm2587_vm7 = vmor %vm2585_vm9, %vm2586_vm12 }
 0x523   :  { %v2410_v62 = vsel %vm2407_vm0, %v2409_v23, %v2405_v19  ;;  %v2445_v6 = vsel %vm2444_vm8, %v3707_v22, %v2441_v63  ;;  %v2582_v55 = vsub.f32 1.0, %v2581_v10  ;;  %vm8814_vm0 = vmmov %vm8811_vm2 }
 0x524   :  { %v2411_v32 = vmul.f32 %v2410_v62, %v2386_v15  ;;  %v2450_v1 = vsel %vm2447_vm15, %v2449_v57, %v2445_v6  ;;  %v2548_v43 = vsel %vm2547_vm10, %v3709_v30, %v2544_v58  ;;  %v2514_v58 = vmul.f32 0.5, %v7056_v12  ;;  %vm8815_vm6 = vmmov %vm8814_vm0 }
 0x525   :  { %v2451_v46 = vmul.f32 %v2450_v1, %v2426_v52  ;;  %v2553_v13 = vsel %vm2550_vm13, %v2552_v34, %v2548_v43  ;;  %v2583_v22 = vmul.f32 %v3711_v42, %v2582_v55  ;;  %vm8816_vm4 = vmmov %vm8814_vm0 }
 0x526   :  { %v3516_v3 = vclamps-f32 %v2411_v32, 1.0  ;;  %v2554_v21 = vmul.f32 %v2553_v13, %v2529_v40  ;;  %vm8817_vm8 = vmmov %vm8814_vm0 }
 0x527   :  { %v3517_v27 = vclamps-f32 %v2451_v46, 1.0  ;;  %v2584_v15 = vadd.f32 %v3711_v42, %v2583_v22 }
 0x528   :  { %v2454_v51 = vadd.f32 1.0, %v3516_v3  ;;  %v3518_v48 = vclamps-f32 %v2554_v21, 1.0 }
 0x529   :  { %v2455_v54 = vadd.f32 1.0, %v3517_v27  ;;  %v2588_v36 = vsel %vm2587_vm7, %v3711_v42, %v2584_v15 }
 0x52a   :  { %v2456_v16 = vmul.f32 %v2454_v51, %v2370_v7  ;;  %v2597_v44 = vadd.f32 1.0, %v3518_v48  ;;  %v2593_v49 = vsel %vm2590_vm1, %v2592_v2, %v2588_v36 }
 0x52b   :  { %v2457_v29 = vmul.f32 %v2455_v54, %v2371_v9  ;;  %v2594_v26 = vmul.f32 %v2593_v49, %v2569_v37 }
 0x52c   :  { %v2471_v25 = vperm.slane %v2456_v16, 1  ;;  %v2463_v30 = vperm.slane %v2456_v16, 0  ;;  %v2491_v17 = vperm.slane %v2456_v16, 3  ;;  %v2599_v52 = vmul.f32 %v2597_v44, %v2513_v59 }
 0x52d   :  { %v2472_v18 = vperm.slane %v2457_v29, 1  ;;  %v2464_v35 = vperm.slane %v2457_v29, 0  ;;  %v2481_v11 = vperm.slane %v2456_v16, 2  ;;  %v3519_v63 = vclamps-f32 %v2594_v26, 1.0 }
 0x52e   :  { %v2473_v14 = vmul.f32 %v2471_v25, %v7143_v56  ;;  %v2465_v0 = vmul.f32 %v2463_v30, %v2461_v8  ;;  %v2605_v41 = vperm.slane %v2599_v52, 1  ;;  %v2601_v23 = vperm.slane %v2599_v52, 0 }
 0x52f   :  { %v2474_v5 = vmul.f32 %v2472_v18, %v7143_v56  ;;  %v2466_v45 = vmul.f32 %v2464_v35, %v2461_v8  ;;  %v2492_v19 = vperm.slane %v2457_v29, 3  ;;  %v2482_v38 = vperm.slane %v2457_v29, 2 }
 0x530   :  { %v2475_v28 = vadd.f32 %v2473_v14, %v2465_v0  ;;  %v2607_v4 = vmul.f32 %v2605_v41, %v7143_v56  ;;  %v2603_v57 = vmul.f32 %v2601_v23, %v2461_v8  ;;  %v2611_v62 = vperm.slane %v2599_v52, 2 }
 0x531   :  { %v2476_v39 = vadd.f32 %v2474_v5, %v2466_v45  ;;  %v2483_v6 = vmul.f32 %v2481_v11, %v2479_v24  ;;  %v2598_v42 = vadd.f32 1.0, %v3519_v63  ;;  %v2493_v32 = vmul.f32 %v2491_v17, %v2489_v60  ;;  %v2658_v11 = vld [vmem:[%s7625_s5] sm:$0xff] }
 0x532   :  { %v2617_v1 = vperm.slane %v2599_v52, 3  ;;  %v2609_v40 = vadd.f32 %v2607_v4, %v2603_v57  ;;  %v2484_v34 = vmul.f32 %v2482_v38, %v2479_v24  ;;  %v2613_v43 = vmul.f32 %v2611_v62, %v2479_v24 }
 0x533   :  { %v2485_v46 = vadd.f32 %v2483_v6, %v2475_v28  ;;  %v2600_v10 = vmul.f32 %v2598_v42, %v2514_v58  ;;  %v2494_v3 = vmul.f32 %v2492_v19, %v2489_v60  ;;  %v2637_v42 = vld [vmem:[%s7626_s9] sm:$0xf] }
 0x534   :  { %v2486_v13 = vadd.f32 %v2484_v34, %v2476_v39  ;;  %v2615_v47 = vadd.f32 %v2613_v43, %v2609_v40  ;;  %v2619_v31 = vmul.f32 %v2617_v1, %v2489_v60  ;;  %v2638_v34 = vld [vmem:[%s7627_s10] sm:$0xf] }
 0x535   :  { %v7156_v27 = vadd.f32 %v2493_v32, %v2485_v46  ;;  %v2606_v21 = vperm.slane %v2600_v10, 1  ;;  %v2602_v55 = vperm.slane %v2600_v10, 0  ;;  %v2612_v7 = vperm.slane %v2600_v10, 2 }
 0x536   :  { %v7158_v9 = vadd.f32 %v2494_v3, %v2486_v13  ;;  %v2618_v48 = vperm.slane %v2600_v10, 3  ;;  %v7165_v22 = vadd.f32 %v2619_v31, %v2615_v47 }
 0x537   :  { %v2497_v12 = vsel %vm8810_vm5, %v7156_v27, 0.0  ;;  %v2502_v51 = vmul.f32 %v7156_v27, %v7156_v27  ;;  %v2608_v20 = vmul.f32 %v2606_v21, %v7143_v56  ;;  %v2604_v54 = vmul.f32 %v2602_v55, %v2461_v8 }
 0x538   :  { %v2498_v16 = vsel %vm8811_vm2, %v7158_v9, 0.0  ;;  %v2503_v59 = vmul.f32 %v7158_v9, %v7158_v9  ;;  %v2614_v15 = vmul.f32 %v2612_v7, %v2479_v24  ;;  %v2620_v25 = vmul.f32 %v2618_v48, %v2489_v60 }
 0x539   :  { %v2504_v37 = vsel %vm8812_vm14, %v2502_v51, 0.0  ;;  %v2610_v29 = vadd.f32 %v2608_v20, %v2604_v54  ;;  %v2499_v44 = vadd.f32 %v2498_v16, %v2497_v12  ;;  %v2628_v8 = vmul.f32 %v7165_v22, %v7165_v22 }
 0x53a   :  { %v2505_v2 = vsel %vm8813_vm11, %v2503_v59, 0.0  ;;  %v2623_v36 = vsel %vm8814_vm0, %v7165_v22, 0.0 }
 0x53b   :  { %v2616_v30 = vadd.f32 %v2614_v15, %v2610_v29  ;;  %2500 = vadd.xlane.f32.xlu2 %v2499_v44  ;;  %v2506_v56 = vadd.f32 %v2505_v2, %v2504_v37  ;;  %v2630_v35 = vsel %vm8816_vm4, %v2628_v8, 0.0 }
 0x53d   :  { %v2622_v17 = vadd.f32 %v2620_v25, %v2616_v30  ;;  %2507 = vadd.xlane.f32.xlu0 %v2506_v56 }
 0x53f   :  { %v2624_v52 = vsel %vm8815_vm6, %v2622_v17, 0.0  ;;  %v2629_v18 = vmul.f32 %v2622_v17, %v2622_v17 }
 0x540   :  { %v2625_v49 = vadd.f32 %v2624_v52, %v2623_v36 }
 0x541   :  { %v2631_v14 = vsel %vm8817_vm8, %v2629_v18, 0.0 }
 0x542   :  { %2626 = vadd.xlane.f32.xlu1 %v2625_v49  ;;  %v2632_v0 = vadd.f32 %v2631_v14, %v2630_v35 }
 0x544   :  { %2633 = vadd.xlane.f32.xlu2 %v2632_v0 }
 0x551   :  { %2763 = vperm.xlu0 %3681, %v2658_v11  }
 0x5ae   :  { %v2501_v26 = vpop.xlane.xlu2 %2500 }
 0x5b0   :  { %v2508_v45 = vpop.xlane.xlu0 %2507 }
 0x5b5   :  { %v2627_v5 = vpop.xlane.xlu1 %2626 }
 0x5b6   :  { %v2635_v41 = vadd.f32 %v2627_v5, %v2501_v26 }
 0x5b7   :  { %v2634_v24 = vpop.xlane.xlu2 %2633 }
 0x5b8   :  { %v2639_v28 = vmul.f32 0.001953125, %v2635_v41  ;;  %v2636_v23 = vadd.f32 %v2634_v24, %v2508_v45 }
 0x5ba   :  { %v2641_v60 = vmul.f32 %v2639_v28, %v2639_v28  ;;  %v2640_v63 = vmul.f32 0.001953125, %v2636_v23 }
 0x5bc   :  { %v2642_v4 = vsub.f32 %v2640_v63, %v2641_v60 }
 0x5be   :  { %v2643_v39 = vmax.f32 %v2642_v4, 0.0 }
 0x5c0   :  { %v2644_v19 = vadd.f32 1e-05, %v2643_v39 }
 0x5c2   :  { %3712 = vrsqrt.f32 %v2644_v19  ;;  %vm2651_vm15 = vweird.f32 %v2644_v19 }
 0x5c8   :  { %v3713_v57 = vpop.eup %3712 }
 0x5c9   :  { %v2646_v38 = vmul.f32 %v3713_v57, %v2644_v19  ;;  %vm2652_vm3 = vweird.f32 %v3713_v57 }
 0x5ca   :  { %vm2653_vm10 = vmor %vm2651_vm15, %vm2652_vm3 }
 0x5cb   :  { %v2647_v62 = vmul.f32 %v3713_v57, %v2646_v38 }
 0x5cd   :  { %v2648_v6 = vmul.f32 0.5, %v2647_v62 }
 0x5cf   :  { %v2649_v58 = vsub.f32 1.5, %v2648_v6 }
 0x5d1   :  { %v2650_v32 = vmul.f32 %v3713_v57, %v2649_v58 }
 0x5d3   :  { %v2654_v1 = vsel %vm2653_vm10, %v3713_v57, %v2650_v32 }
 0x5d4   :  { %v2655_v40 = vmul.f32 %v2654_v1, %v2637_v42 }
 0x5d6   :  { %2661 = vperm.xlu1 %3685, %v2655_v40   ;;  %v2656_v46 = vmul.f32 %v2655_v40, %v2639_v28 }
 0x5d8   :  { %v2657_v43 = vsub.f32 %v2638_v34, %v2656_v46 }
 0x5da   :  { %2668 = vperm.xlu2 %3686, %v2657_v43  }
 0x5de   :  { %3687 = vset.pattern.permute.xlu1 %v8806_v61 }
 0x5df   :  { %2771 = vperm.xlu1 %3687, %v2658_v11  }
 0x5e2   :  { %3688 = vset.pattern.permute.xlu2 %v8807_v50 }
 0x5e3   :  { %2781 = vperm.xlu2 %3688, %v2658_v11  }
 0x5e7   :  { %3689 = vset.pattern.permute.xlu1 %v8808_v33 }
 0x5e8   :  { %2791 = vperm.xlu1 %3689, %v2658_v11  }
 0x5eb   :  { %3690 = vset.pattern.permute.xlu2 %v8809_v53 }
 0x5f0   :  { %3691 = vset.pattern.permute.xlu1 %v8809_v53 }
 0x634   :  { %v2669_v55 = vpop.permute.xlu2 %2668 }
 0x648   :  { %v2662_v10 = vpop.permute.xlu1 %2661 }
 0x649   :  { %v2664_v3 = vmul.f32 %v2662_v10, %v7156_v27  ;;  %v2665_v13 = vmul.f32 %v2662_v10, %v7158_v9  ;;  %v2808_v47 = vmul.f32 %v2662_v10, %v7165_v22  ;;  %v2809_v21 = vmul.f32 %v2662_v10, %v2622_v17 }
 0x64b   :  { %v7197_v31 = vadd.f32 %v2669_v55, %v2664_v3  ;;  %v7199_v7 = vadd.f32 %v2669_v55, %v2665_v13  ;;  %v7201_v12 = vadd.f32 %v2808_v47, %v2669_v55  ;;  %v7203_v51 = vadd.f32 %v2809_v21, %v2669_v55 }
 0x64d   :  { %v7206_v20 = vmul.f32 0.70710677, %v7197_v31  ;;  %v7209_v54 = vmul.f32 0.70710677, %v7199_v7  ;;  %v7212_v27 = vmul.f32 0.70710677, %v7201_v12 }
 0x64e   :  { %v7215_v9 = vmul.f32 0.70710677, %v7203_v51 }
 0x64f   :  { %v2677_v48 = vmul.f32 %v7206_v20, %v7206_v20  ;;  %v2717_v22 = vmul.f32 %v7209_v54, %v7209_v54  ;;  %v2816_v16 = vmul.f32 %v7212_v27, %v7212_v27 }
 0x650   :  { %v2856_v59 = vmul.f32 %v7215_v9, %v7215_v9 }
 0x651   :  { %v7225_v37 = vmin.f32 %v2677_v48, 16.0  ;;  %v7227_v29 = vmin.f32 %v2717_v22, 16.0  ;;  %v7229_v15 = vmin.f32 %v2816_v16, 16.0 }
 0x652   :  { %v7231_v44 = vmin.f32 %v2856_v59, 16.0 }
 0x653   :  { %v2679_v2 = vmul.f32 2.1237322e-06, %v7225_v37  ;;  %v2690_v25 = vmul.f32 3.8918573e-05, %v7225_v37  ;;  %v2719_v30 = vmul.f32 2.1237322e-06, %v7227_v29 }
 0x654   :  { %v2730_v56 = vmul.f32 3.8918573e-05, %v7227_v29  ;;  %v2818_v8 = vmul.f32 2.1237322e-06, %v7229_v15  ;;  %v2829_v17 = vmul.f32 3.8918573e-05, %v7229_v15 }
 0x655   :  { %v2680_v36 = vadd.f32 0.00028619796, %v2679_v2  ;;  %v2691_v52 = vadd.f32 0.001143296, %v2690_v25  ;;  %v2720_v18 = vadd.f32 0.00028619796, %v2719_v30 }
 0x656   :  { %v2731_v35 = vadd.f32 0.001143296, %v2730_v56  ;;  %v2819_v49 = vadd.f32 0.00028619796, %v2818_v8  ;;  %v2830_v14 = vadd.f32 0.001143296, %v2829_v17 }
 0x657   :  { %v2681_v0 = vmul.f32 %v2680_v36, %v7225_v37  ;;  %v2692_v11 = vmul.f32 %v2691_v52, %v7225_v37  ;;  %v2721_v26 = vmul.f32 %v2720_v18, %v7227_v29  ;;  %v2858_v5 = vmul.f32 2.1237322e-06, %v7231_v44 }
 0x658   :  { %v2732_v41 = vmul.f32 %v2731_v35, %v7227_v29  ;;  %v2820_v45 = vmul.f32 %v2819_v49, %v7229_v15  ;;  %v2831_v24 = vmul.f32 %v2830_v14, %v7229_v15  ;;  %v2869_v28 = vmul.f32 3.8918573e-05, %v7231_v44 }
 0x659   :  { %v2682_v23 = vadd.f32 0.0036580483, %v2681_v0  ;;  %v2693_v60 = vadd.f32 0.014752088, %v2692_v11  ;;  %v2722_v63 = vadd.f32 0.0036580483, %v2721_v26 }
 0x65a   :  { %v2733_v4 = vadd.f32 0.014752088, %v2732_v41  ;;  %v2821_v39 = vadd.f32 0.0036580483, %v2820_v45  ;;  %v2832_v19 = vadd.f32 0.014752088, %v2831_v24 }
 0x65b   :  { %v2683_v57 = vmul.f32 %v2682_v23, %v7225_v37  ;;  %v2694_v38 = vmul.f32 %v2693_v60, %v7225_v37  ;;  %v2723_v62 = vmul.f32 %v2722_v63, %v7227_v29  ;;  %v2859_v6 = vadd.f32 0.00028619796, %v2858_v5 }
 0x65c   :  { %v2734_v58 = vmul.f32 %v2733_v4, %v7227_v29  ;;  %v2822_v42 = vmul.f32 %v2821_v39, %v7229_v15  ;;  %v2833_v32 = vmul.f32 %v2832_v19, %v7229_v15  ;;  %v2870_v1 = vadd.f32 0.001143296, %v2869_v28 }
 0x65d   :  { %v2684_v40 = vadd.f32 0.05243302, %v2683_v57  ;;  %v2695_v34 = vadd.f32 0.112945676, %v2694_v38  ;;  %v2724_v46 = vadd.f32 0.05243302, %v2723_v62  ;;  %v2860_v43 = vmul.f32 %v2859_v6, %v7231_v44 }
 0x65e   :  { %v2735_v10 = vadd.f32 0.112945676, %v2734_v58  ;;  %v2823_v3 = vadd.f32 0.05243302, %v2822_v42  ;;  %v2834_v13 = vadd.f32 0.112945676, %v2833_v32  ;;  %v2871_v47 = vmul.f32 %v2870_v1, %v7231_v44 }
 0x65f   :  { %v2685_v21 = vmul.f32 %v2684_v40, %v7225_v37  ;;  %v2696_v55 = vmul.f32 %v2695_v34, %v7225_v37  ;;  %v2725_v48 = vmul.f32 %v2724_v46, %v7227_v29  ;;  %v2861_v25 = vadd.f32 0.0036580483, %v2860_v43 }
 0x660   :  { %v2736_v22 = vmul.f32 %v2735_v10, %v7227_v29  ;;  %v2835_v16 = vmul.f32 %v2834_v13, %v7229_v15  ;;  %v2872_v59 = vadd.f32 0.014752088, %v2871_v47  ;;  %v2824_v56 = vmul.f32 %v2823_v3, %v7229_v15 }
 0x661   :  { %v2697_v2 = vadd.f32 0.4994258, %v2696_v55  ;;  %v2686_v36 = vadd.f32 0.18741608, %v2685_v21  ;;  %v2726_v18 = vadd.f32 0.18741608, %v2725_v48  ;;  %v2862_v41 = vmul.f32 %v2861_v25, %v7231_v44 }
 0x662   :  { %v2737_v30 = vadd.f32 0.4994258, %v2736_v22  ;;  %v2836_v8 = vadd.f32 0.4994258, %v2835_v16  ;;  %v2873_v17 = vmul.f32 %v2872_v59, %v7231_v44  ;;  %v2825_v26 = vadd.f32 0.18741608, %v2824_v56 }
 0x663   :  { %v2698_v52 = vmul.f32 %v2697_v2, %v7225_v37  ;;  %v2687_v45 = vmul.f32 %v2686_v36, %v7225_v37  ;;  %v2727_v24 = vmul.f32 %v2726_v18, %v7227_v29  ;;  %v2863_v60 = vadd.f32 0.05243302, %v2862_v41 }
 0x664   :  { %v2738_v35 = vmul.f32 %v2737_v30, %v7227_v29  ;;  %v2837_v49 = vmul.f32 %v2836_v8, %v7229_v15  ;;  %v2874_v14 = vadd.f32 0.112945676, %v2873_v17  ;;  %v2826_v23 = vmul.f32 %v2825_v26, %v7229_v15 }
 0x665   :  { %v2699_v0 = vadd.f32 1.0, %v2698_v52  ;;  %v2688_v63 = vadd.f32 1.1283791, %v2687_v45  ;;  %v2728_v4 = vadd.f32 1.1283791, %v2727_v24  ;;  %v2864_v37 = vmul.f32 %v2863_v60, %v7231_v44 }
 0x666   :  { %v2739_v11 = vadd.f32 1.0, %v2738_v35  ;;  %v7265_v5 = vadd.f32 1.0, %v2837_v49  ;;  %v2875_v28 = vmul.f32 %v2874_v14, %v7231_v44  ;;  %v2827_v62 = vadd.f32 1.1283791, %v2826_v23  ;;  %v7291_v23 = vpop.permute.xlu1 %2771 }
 0x667   :  { %3714 = vrcp.f32 %v2699_v0  ;;  %v2689_v29 = vmul.f32 %v2688_v63, %v7206_v20  ;;  %vm2705_vm13 = vweird.f32 %v2699_v0  ;;  %v2709_v58 = vand.u32 2147483647, %v2699_v0 }
 0x668   :  { %3716 = vrcp.f32 %v2739_v11  ;;  %v2876_v39 = vadd.f32 0.4994258, %v2875_v28  ;;  %v2711_v1 = vand.u32 2147483648, %v2699_v0  ;;  %v2729_v40 = vmul.f32 %v2728_v4, %v7209_v54 }
 0x669   :  { %3718 = vrcp.f32 %v7265_v5  ;;  %vm2745_vm12 = vweird.f32 %v2739_v11  ;;  %v2751_v43 = vand.u32 2147483648, %v2739_v11  ;;  %v2865_v13 = vadd.f32 0.18741608, %v2864_v37 }
 0x66a   :  { %v2877_v6 = vmul.f32 %v2876_v39, %v7231_v44  ;;  %v2749_v47 = vand.u32 2147483647, %v2739_v11  ;;  %vm2710_vm7 = vcmp.eq.f32.partialorder %v2709_v58, 8.507059e+37  ;;  %v2712_v48 = vor.u32 1.1754944e-38, %v2711_v1 }
 0x66b   :  { %v2850_v54 = vand.u32 2147483648, %v7265_v5  ;;  %v2848_v59 = vand.u32 2147483647, %v7265_v5  ;;  %v2752_v25 = vor.u32 1.1754944e-38, %v2751_v43  ;;  %vm2844_vm11 = vweird.f32 %v7265_v5 }
 0x66c   :  { %v7277_v34 = vadd.f32 1.0, %v2877_v6  ;;  %v2866_v30 = vmul.f32 %v2865_v13, %v7231_v44  ;;  %vm2750_vm0 = vcmp.eq.f32.partialorder %v2749_v47, 8.507059e+37  ;;  %v2828_v35 = vmul.f32 %v2827_v62, %v7212_v27  ;;  %v2782_v47 = vpop.permute.xlu2 %2781 }
 0x66d   :  { %v3715_v19 = vpop.eup %3714  ;;  %v2851_v49 = vor.u32 1.1754944e-38, %v2850_v54  ;;  %vm2849_vm4 = vcmp.eq.f32.partialorder %v2848_v59, 8.507059e+37  ;;  %v2673_v41 = vmul.f32 0.5, %v7197_v31  ;;  %v2674_v27 = vmul.f32 0.5, %v7199_v7 }
 0x66e   :  { %v3717_v57 = vpop.eup %3716  ;;  %v2701_v38 = vmul.f32 %v3715_v19, %v2699_v0  ;;  %vm2706_vm9 = vweird.f32 %v3715_v19  ;;  %3720 = vrcp.f32 %v7277_v34  ;;  %v2867_v44 = vadd.f32 1.1283791, %v2866_v30  ;;  %v2792_v59 = vpop.permute.xlu1 %2791 }
 0x66f   :  { %v2741_v42 = vmul.f32 %v3717_v57, %v2739_v11  ;;  %v3719_v15 = vpop.eup %3718  ;;  %vm2746_vm1 = vweird.f32 %v3717_v57  ;;  %vm2707_vm5 = vmor %vm2705_vm13, %vm2706_vm9  ;;  %v2888_v63 = vand.u32 2147483647, %v7277_v34  ;;  %v2890_v4 = vand.u32 2147483648, %v7277_v34 }
 0x670   :  { %v2702_v32 = vsub.f32 1.0, %v2701_v38  ;;  %v2840_v10 = vmul.f32 %v3719_v15, %v7265_v5  ;;  %vm2845_vm2 = vweird.f32 %v3719_v15  ;;  %vm2747_vm14 = vmor %vm2745_vm12, %vm2746_vm1  ;;  %v2812_v62 = vmul.f32 0.5, %v7201_v12 }
 0x671   :  { %v2742_v46 = vsub.f32 1.0, %v2741_v42  ;;  %vm2846_vm6 = vmor %vm2844_vm11, %vm2845_vm2  ;;  %v2868_v31 = vmul.f32 %v2867_v44, %v7215_v9  ;;  %vm2884_vm3 = vweird.f32 %v7277_v34  ;;  %vm2889_vm10 = vcmp.eq.f32.partialorder %v2888_v63, 8.507059e+37 }
 0x672   :  { %v2703_v3 = vmul.f32 %v3715_v19, %v2702_v32  ;;  %v2841_v21 = vsub.f32 1.0, %v2840_v10  ;;  %v2891_v7 = vor.u32 1.1754944e-38, %v2890_v4 }
 0x673   :  { %v2743_v20 = vmul.f32 %v3717_v57, %v2742_v46 }
 0x674   :  { %v2704_v55 = vadd.f32 %v3715_v19, %v2703_v3  ;;  %v2842_v16 = vmul.f32 %v3719_v15, %v2841_v21  ;;  %v3721_v36 = vpop.eup %3720 }
 0x675   :  { %v2744_v22 = vadd.f32 %v3717_v57, %v2743_v20  ;;  %v2880_v11 = vmul.f32 %v3721_v36, %v7277_v34  ;;  %vm2885_vm8 = vweird.f32 %v3721_v36 }
 0x676   :  { %v2708_v2 = vsel %vm2707_vm5, %v3715_v19, %v2704_v55  ;;  %v2843_v17 = vadd.f32 %v3719_v15, %v2842_v16  ;;  %vm2886_vm15 = vmor %vm2884_vm3, %vm2885_vm8 }
 0x677   :  { %v2713_v56 = vsel %vm2710_vm7, %v2712_v48, %v2708_v2  ;;  %v2748_v8 = vsel %vm2747_vm14, %v3717_v57, %v2744_v22  ;;  %v2881_v28 = vsub.f32 1.0, %v2880_v11 }
 0x678   :  { %v2714_v52 = vmul.f32 %v2713_v56, %v2689_v29  ;;  %v2753_v18 = vsel %vm2750_vm0, %v2752_v25, %v2748_v8  ;;  %v2847_v0 = vsel %vm2846_vm6, %v3719_v15, %v2843_v17  ;;  %v2764_v15 = vpop.permute.xlu0 %2763  ;;  %v2813_v17 = vmul.f32 0.5, %v7203_v51 }
 0x679   :  { %v2754_v14 = vmul.f32 %v2753_v18, %v2729_v40  ;;  %v2852_v5 = vsel %vm2849_vm4, %v2851_v49, %v2847_v0  ;;  %v2882_v57 = vmul.f32 %v3721_v36, %v2881_v28 }
 0x67a   :  { %v3520_v26 = vclamps-f32 %v2714_v52, 1.0  ;;  %v2853_v24 = vmul.f32 %v2852_v5, %v2828_v35 }
 0x67b   :  { %v3521_v45 = vclamps-f32 %v2754_v14, 1.0  ;;  %v2883_v6 = vadd.f32 %v3721_v36, %v2882_v57 }
 0x67c   :  { %v2757_v60 = vadd.f32 1.0, %v3520_v26  ;;  %v3522_v19 = vclamps-f32 %v2853_v24, 1.0 }
 0x67d   :  { %v2758_v39 = vadd.f32 1.0, %v3521_v45  ;;  %v2887_v32 = vsel %vm2886_vm15, %v3721_v36, %v2883_v6 }
 0x67e   :  { %v2759_v38 = vmul.f32 %v2757_v60, %v2673_v41  ;;  %v2896_v29 = vadd.f32 1.0, %v3522_v19  ;;  %v2892_v43 = vsel %vm2889_vm10, %v2891_v7, %v2887_v32  ;;  %v2953_v32 = vld [vmem:[%s7628_s6] sm:$0xff] }
 0x67f   :  { %v2760_v37 = vmul.f32 %v2758_v39, %v2674_v27  ;;  %v2893_v3 = vmul.f32 %v2892_v43, %v2868_v31 }
 0x680   :  { %v2766_v58 = vperm.slane %v2759_v38, 0  ;;  %v2774_v42 = vperm.slane %v2759_v38, 1  ;;  %v2898_v1 = vmul.f32 %v2896_v29, %v2812_v62  ;;  %v2784_v9 = vperm.slane %v2759_v38, 2 }
 0x681   :  { %v2767_v40 = vperm.slane %v2760_v37, 0  ;;  %v2775_v46 = vperm.slane %v2760_v37, 1  ;;  %v2794_v48 = vperm.slane %v2759_v38, 3  ;;  %v3523_v54 = vclamps-f32 %v2893_v3, 1.0 }
 0x682   :  { %v2768_v10 = vmul.f32 %v2766_v58, %v2764_v15  ;;  %v2776_v12 = vmul.f32 %v2774_v42, %v7291_v23  ;;  %v2900_v20 = vperm.slane %v2898_v1, 0  ;;  %v2904_v55 = vperm.slane %v2898_v1, 1 }
 0x683   :  { %v2769_v13 = vmul.f32 %v2767_v40, %v2764_v15  ;;  %v2777_v34 = vmul.f32 %v2775_v46, %v7291_v23  ;;  %v2795_v2 = vperm.slane %v2760_v37, 3  ;;  %v2785_v30 = vperm.slane %v2760_v37, 2 }
 0x684   :  { %v2778_v21 = vadd.f32 %v2776_v12, %v2768_v10  ;;  %v2902_v16 = vmul.f32 %v2900_v20, %v2764_v15  ;;  %v2906_v25 = vmul.f32 %v2904_v55, %v7291_v23  ;;  %v2910_v56 = vperm.slane %v2898_v1, 2 }
 0x685   :  { %v2779_v22 = vadd.f32 %v2777_v34, %v2769_v13  ;;  %v2786_v8 = vmul.f32 %v2784_v9, %v2782_v47  ;;  %v2897_v36 = vadd.f32 1.0, %v3523_v54  ;;  %v2796_v18 = vmul.f32 %v2794_v48, %v2792_v59 }
 0x686   :  { %v2908_v52 = vadd.f32 %v2906_v25, %v2902_v16  ;;  %v2787_v35 = vmul.f32 %v2785_v30, %v2782_v47  ;;  %v2916_v0 = vperm.slane %v2898_v1, 3  ;;  %v2912_v11 = vmul.f32 %v2910_v56, %v2782_v47  ;;  %v2932_v16 = vld [vmem:[%s7629_s11] sm:$0xff] }
 0x687   :  { %v2788_v49 = vadd.f32 %v2786_v8, %v2778_v21  ;;  %v2899_v14 = vmul.f32 %v2897_v36, %v2813_v17  ;;  %v2797_v26 = vmul.f32 %v2795_v2, %v2792_v59  ;;  %v8818_v1 = vmov 7   ;;  %v2933_v30 = vld [vmem:[%s7630_s12] sm:$0xff] }
 0x688   :  { %v2789_v5 = vadd.f32 %v2787_v35, %v2779_v22  ;;  %v2914_v28 = vadd.f32 %v2912_v11, %v2908_v52  ;;  %v2918_v39 = vmul.f32 %v2916_v0, %v2792_v59  ;;  %v8819_v17 = vmov 4  }
 0x689   :  { %v7303_v44 = vadd.f32 %v2796_v18, %v2788_v49  ;;  %v2901_v41 = vperm.slane %v2899_v14, 0  ;;  %v2905_v45 = vperm.slane %v2899_v14, 1  ;;  %v2911_v24 = vperm.slane %v2899_v14, 2 }
 0x68a   :  { %v7305_v27 = vadd.f32 %v2797_v26, %v2789_v5  ;;  %v2917_v4 = vperm.slane %v2899_v14, 3  ;;  %v7314_v31 = vadd.f32 %v2918_v39, %v2914_v28  ;;  %v8820_v36 = vmov 5  }
 0x68b   :  { %v2803_v51 = vmul.f32 %v7303_v44, %v7303_v44  ;;  %v2903_v60 = vmul.f32 %v2901_v41, %v2764_v15  ;;  %v2907_v63 = vmul.f32 %v2905_v45, %v7291_v23  ;;  %v2913_v62 = vmul.f32 %v2911_v24, %v2782_v47 }
 0x68c   :  { %v2800_v19 = vadd.f32 %v7305_v27, %v7303_v44  ;;  %v2804_v57 = vmul.f32 %v7305_v27, %v7305_v27  ;;  %v2919_v6 = vmul.f32 %v2917_v4, %v2792_v59  ;;  %v2925_v23 = vmul.f32 %v7314_v31, %v7314_v31 }
 0x68d   :  { %v2909_v38 = vadd.f32 %v2907_v63, %v2903_v60  ;;  %v8821_v52 = vmov 6  }
 0x68e   :  { %2801 = vadd.xlane.f32.xlu0 %v2800_v19  ;;  %v2805_v37 = vadd.f32 %v2804_v57, %v2803_v51 }
 0x68f   :  { %v2915_v29 = vadd.f32 %v2913_v62, %v2909_v38 }
 0x690   :  { %2806 = vadd.xlane.f32.xlu1 %v2805_v37 }
 0x691   :  { %v7316_v7 = vadd.f32 %v2919_v6, %v2915_v29 }
 0x693   :  { %v2922_v58 = vadd.f32 %v7316_v7, %v7314_v31  ;;  %v2926_v42 = vmul.f32 %v7316_v7, %v7316_v7 }
 0x695   :  { %2923 = vadd.xlane.f32.xlu2 %v2922_v58  ;;  %v2927_v15 = vadd.f32 %v2926_v42, %v2925_v23 }
 0x697   :  { %2928 = vadd.xlane.f32.xlu0 %v2927_v15 }
 0x6ab   :  { %3058 = vperm.xlu0 %3681, %v2953_v32  }
 0x6b3   :  { %3693 = vset.pattern.permute.xlu0 %v8807_v50 }
 0x6b4   :  { %3076 = vperm.xlu0 %3693, %v2953_v32  }
 0x6bc   :  { %3698 = vset.pattern.permute.xlu0 %v8818_v1 }
 0x6bd   :  { %3126 = vperm.xlu0 %3698, %v2953_v32  }
 0x6c5   :  { %3701 = vset.pattern.permute.xlu0 %v8809_v53 }
 0x701   :  { %v2802_v40 = vpop.xlane.xlu0 %2801 }
 0x703   :  { %v2807_v10 = vpop.xlane.xlu1 %2806 }
 0x708   :  { %v2924_v46 = vpop.xlane.xlu2 %2923 }
 0x709   :  { %v2930_v43 = vadd.f32 %v2924_v46, %v2802_v40 }
 0x70a   :  { %v2929_v12 = vpop.xlane.xlu0 %2928 }
 0x70b   :  { %v2934_v9 = vmul.f32 0.001953125, %v2930_v43  ;;  %v2931_v3 = vadd.f32 %v2929_v12, %v2807_v10 }
 0x70d   :  { %v2936_v13 = vmul.f32 %v2934_v9, %v2934_v9  ;;  %v2935_v34 = vmul.f32 0.001953125, %v2931_v3 }
 0x70f   :  { %v2937_v20 = vsub.f32 %v2935_v34, %v2936_v13 }
 0x711   :  { %v2938_v47 = vmax.f32 %v2937_v20, 0.0 }
 0x713   :  { %v2939_v21 = vadd.f32 0.001, %v2938_v47 }
 0x715   :  { %3722 = vrsqrt.f32 %v2939_v21  ;;  %vm2946_vm12 = vweird.f32 %v2939_v21 }
 0x71b   :  { %v3723_v50 = vpop.eup %3722 }
 0x71c   :  { %v2941_v55 = vmul.f32 %v3723_v50, %v2939_v21  ;;  %vm2947_vm13 = vweird.f32 %v3723_v50 }
 0x71d   :  { %vm2948_vm9 = vmor %vm2946_vm12, %vm2947_vm13 }
 0x71e   :  { %v2942_v48 = vmul.f32 %v3723_v50, %v2941_v55 }
 0x720   :  { %v2943_v54 = vmul.f32 0.5, %v2942_v48 }
 0x722   :  { %v2944_v22 = vsub.f32 1.5, %v2943_v54 }
 0x724   :  { %v2945_v59 = vmul.f32 %v3723_v50, %v2944_v22 }
 0x726   :  { %v2949_v2 = vsel %vm2948_vm9, %v3723_v50, %v2945_v59 }
 0x727   :  { %v2950_v25 = vmul.f32 %v2949_v2, %v2932_v16 }
 0x729   :  { %2956 = vperm.xlu2 %3690, %v2950_v25   ;;  %v2951_v56 = vmul.f32 %v2950_v25, %v2934_v9 }
 0x72b   :  { %v2952_v8 = vsub.f32 %v2933_v30, %v2951_v56 }
 0x72d   :  { %2963 = vperm.xlu1 %3691, %v2952_v8  }
 0x731   :  { %3692 = vset.pattern.permute.xlu2 %v8806_v61 }
 0x732   :  { %3066 = vperm.xlu2 %3692, %v2953_v32  }
 0x735   :  { %3694 = vset.pattern.permute.xlu1 %v8808_v33 }
 0x736   :  { %3086 = vperm.xlu1 %3694, %v2953_v32  }
 0x73a   :  { %3695 = vset.pattern.permute.xlu2 %v8819_v17 }
 0x73b   :  { %3096 = vperm.xlu2 %3695, %v2953_v32  }
 0x73e   :  { %3696 = vset.pattern.permute.xlu1 %v8820_v36 }
 0x73f   :  { %3106 = vperm.xlu1 %3696, %v2953_v32  }
 0x743   :  { %3697 = vset.pattern.permute.xlu2 %v8821_v52 }
 0x744   :  { %3116 = vperm.xlu2 %3697, %v2953_v32  }
 0x747   :  { %3700 = vset.pattern.permute.xlu1 %v8809_v53 }
 0x74c   :  { %3699 = vset.pattern.permute.xlu2 %v8809_v53 }
 0x783   :  { %v2957_v18 = vpop.permute.xlu2 %2956 }
 0x784   :  { %v2959_v61 = vmul.f32 %v2957_v18, %v7303_v44  ;;  %v2960_v35 = vmul.f32 %v2957_v18, %v7305_v27  ;;  %v3143_v33 = vmul.f32 %v2957_v18, %v7314_v31  ;;  %v3144_v49 = vmul.f32 %v2957_v18, %v7316_v7 }
 0x79f   :  { %v2964_v14 = vpop.permute.xlu1 %2963 }
 0x7a0   :  { %v7347_v0 = vadd.f32 %v2964_v14, %v2959_v61  ;;  %v7349_v11 = vadd.f32 %v2964_v14, %v2960_v35  ;;  %v7351_v26 = vadd.f32 %v3143_v33, %v2964_v14  ;;  %v7353_v5 = vadd.f32 %v3144_v49, %v2964_v14 }
 0x7a2   :  { %v7356_v53 = vmul.f32 0.70710677, %v7347_v0  ;;  %v7359_v44 = vmul.f32 0.70710677, %v7349_v11  ;;  %v7362_v41 = vmul.f32 0.70710677, %v7351_v26 }
 0x7a3   :  { %v7365_v45 = vmul.f32 0.70710677, %v7353_v5 }
 0x7a4   :  { %v2972_v24 = vmul.f32 %v7356_v53, %v7356_v53  ;;  %v3012_v28 = vmul.f32 %v7359_v44, %v7359_v44  ;;  %v3151_v27 = vmul.f32 %v7362_v41, %v7362_v41 }
 0x7a5   :  { %v3191_v51 = vmul.f32 %v7365_v45, %v7365_v45 }
 0x7a6   :  { %v7375_v60 = vmin.f32 %v2972_v24, 16.0  ;;  %v7377_v63 = vmin.f32 %v3012_v28, 16.0  ;;  %v7379_v4 = vmin.f32 %v3151_v27, 16.0 }
 0x7a7   :  { %v7381_v39 = vmin.f32 %v3191_v51, 16.0 }
 0x7a8   :  { %v2974_v19 = vmul.f32 2.1237322e-06, %v7375_v60  ;;  %v2985_v57 = vmul.f32 3.8918573e-05, %v7375_v60  ;;  %v3014_v38 = vmul.f32 2.1237322e-06, %v7377_v63 }
 0x7a9   :  { %v3025_v62 = vmul.f32 3.8918573e-05, %v7377_v63  ;;  %v3153_v31 = vmul.f32 2.1237322e-06, %v7379_v4  ;;  %v3164_v37 = vmul.f32 3.8918573e-05, %v7379_v4 }
 0x7aa   :  { %v2975_v6 = vadd.f32 0.00028619796, %v2974_v19  ;;  %v2986_v29 = vadd.f32 0.001143296, %v2985_v57  ;;  %v3015_v7 = vadd.f32 0.00028619796, %v3014_v38 }
 0x7ab   :  { %v3026_v23 = vadd.f32 0.001143296, %v3025_v62  ;;  %v3154_v58 = vadd.f32 0.00028619796, %v3153_v31  ;;  %v3165_v42 = vadd.f32 0.001143296, %v3164_v37 }
 0x7ac   :  { %v2976_v15 = vmul.f32 %v2975_v6, %v7375_v60  ;;  %v2987_v32 = vmul.f32 %v2986_v29, %v7375_v60  ;;  %v3016_v1 = vmul.f32 %v3015_v7, %v7377_v63  ;;  %v3193_v40 = vmul.f32 2.1237322e-06, %v7381_v39 }
 0x7ad   :  { %v3027_v46 = vmul.f32 %v3026_v23, %v7377_v63  ;;  %v3155_v43 = vmul.f32 %v3154_v58, %v7379_v4  ;;  %v3166_v10 = vmul.f32 %v3165_v42, %v7379_v4  ;;  %v3204_v12 = vmul.f32 3.8918573e-05, %v7381_v39 }
 0x7ae   :  { %v2977_v9 = vadd.f32 0.0036580483, %v2976_v15  ;;  %v2988_v3 = vadd.f32 0.014752088, %v2987_v32  ;;  %v3017_v13 = vadd.f32 0.0036580483, %v3016_v1 }
 0x7af   :  { %v3028_v34 = vadd.f32 0.014752088, %v3027_v46  ;;  %v3156_v20 = vadd.f32 0.0036580483, %v3155_v43  ;;  %v3167_v47 = vadd.f32 0.014752088, %v3166_v10 }
 0x7b0   :  { %v2978_v21 = vmul.f32 %v2977_v9, %v7375_v60  ;;  %v2989_v50 = vmul.f32 %v2988_v3, %v7375_v60  ;;  %v3018_v55 = vmul.f32 %v3017_v13, %v7377_v63  ;;  %v3194_v48 = vadd.f32 0.00028619796, %v3193_v40 }
 0x7b1   :  { %v3029_v54 = vmul.f32 %v3028_v34, %v7377_v63  ;;  %v3157_v22 = vmul.f32 %v3156_v20, %v7379_v4  ;;  %v3168_v16 = vmul.f32 %v3167_v47, %v7379_v4  ;;  %v3205_v59 = vadd.f32 0.001143296, %v3204_v12 }
 0x7b2   :  { %v2979_v2 = vadd.f32 0.05243302, %v2978_v21  ;;  %v2990_v25 = vadd.f32 0.112945676, %v2989_v50  ;;  %v3019_v30 = vadd.f32 0.05243302, %v3018_v55  ;;  %v3195_v56 = vmul.f32 %v3194_v48, %v7381_v39 }
 0x7b3   :  { %v3030_v8 = vadd.f32 0.112945676, %v3029_v54  ;;  %v3158_v17 = vadd.f32 0.05243302, %v3157_v22  ;;  %v3169_v36 = vadd.f32 0.112945676, %v3168_v16  ;;  %v3206_v52 = vmul.f32 %v3205_v59, %v7381_v39 }
 0x7b4   :  { %v2980_v18 = vmul.f32 %v2979_v2, %v7375_v60  ;;  %v2991_v61 = vmul.f32 %v2990_v25, %v7375_v60  ;;  %v3020_v35 = vmul.f32 %v3019_v30, %v7377_v63  ;;  %v3196_v28 = vadd.f32 0.0036580483, %v3195_v56 }
 0x7b5   :  { %v3031_v33 = vmul.f32 %v3030_v8, %v7377_v63  ;;  %v3170_v49 = vmul.f32 %v3169_v36, %v7379_v4  ;;  %v3207_v14 = vadd.f32 0.014752088, %v3206_v52  ;;  %v3159_v51 = vmul.f32 %v3158_v17, %v7379_v4 }
 0x7b6   :  { %v2992_v24 = vadd.f32 0.4994258, %v2991_v61  ;;  %v2981_v38 = vadd.f32 0.18741608, %v2980_v18  ;;  %v3021_v31 = vadd.f32 0.18741608, %v3020_v35  ;;  %v3197_v15 = vmul.f32 %v3196_v28, %v7381_v39 }
 0x7b7   :  { %v3032_v27 = vadd.f32 0.4994258, %v3031_v33  ;;  %v3171_v19 = vadd.f32 0.4994258, %v3170_v49  ;;  %v3208_v57 = vmul.f32 %v3207_v14, %v7381_v39  ;;  %v3160_v58 = vadd.f32 0.18741608, %v3159_v51 }
 0x7b8   :  { %v2993_v62 = vmul.f32 %v2992_v24, %v7375_v60  ;;  %v2982_v32 = vmul.f32 %v2981_v38, %v7375_v60  ;;  %v3022_v1 = vmul.f32 %v3021_v31, %v7377_v63  ;;  %v3198_v43 = vadd.f32 0.05243302, %v3197_v15 }
 0x7b9   :  { %v3033_v37 = vmul.f32 %v3032_v27, %v7377_v63  ;;  %v3172_v6 = vmul.f32 %v3171_v19, %v7379_v4  ;;  %v3209_v29 = vadd.f32 0.112945676, %v3208_v57  ;;  %v3161_v46 = vmul.f32 %v3160_v58, %v7379_v4 }
 0x7ba   :  { %v2994_v7 = vadd.f32 1.0, %v2993_v62  ;;  %v2983_v10 = vadd.f32 1.1283791, %v2982_v32  ;;  %v3023_v12 = vadd.f32 1.1283791, %v3022_v1  ;;  %v3199_v60 = vmul.f32 %v3198_v43, %v7381_v39  ;;  %v7439_v62 = vpop.permute.xlu2 %3066 }
 0x7bb   :  { %v3034_v23 = vadd.f32 1.0, %v3033_v37  ;;  %v7415_v42 = vadd.f32 1.0, %v3172_v6  ;;  %v3210_v40 = vmul.f32 %v3209_v29, %v7381_v39  ;;  %v3162_v20 = vadd.f32 1.1283791, %v3161_v46 }
 0x7bc   :  { %3724 = vrcp.f32 %v2994_v7  ;;  %v2984_v63 = vmul.f32 %v2983_v10, %v7356_v53  ;;  %vm3000_vm1 = vweird.f32 %v2994_v7  ;;  %v3004_v21 = vand.u32 2147483647, %v2994_v7 }
 0x7bd   :  { %3726 = vrcp.f32 %v3034_v23  ;;  %v3211_v9 = vadd.f32 0.4994258, %v3210_v40  ;;  %v3006_v48 = vand.u32 2147483648, %v2994_v7  ;;  %v3024_v54 = vmul.f32 %v3023_v12, %v7359_v44 }
 0x7be   :  { %3728 = vrcp.f32 %v7415_v42  ;;  %vm3040_vm7 = vweird.f32 %v3034_v23  ;;  %v3046_v59 = vand.u32 2147483648, %v3034_v23  ;;  %v3200_v30 = vadd.f32 0.18741608, %v3199_v60 }
 0x7bf   :  { %v3212_v47 = vmul.f32 %v3211_v9, %v7381_v39  ;;  %v3044_v56 = vand.u32 2147483647, %v3034_v23  ;;  %vm3005_vm14 = vcmp.eq.f32.partialorder %v3004_v21, 8.507059e+37  ;;  %v3007_v36 = vor.u32 1.1754944e-38, %v3006_v48 }
 0x7c0   :  { %v3185_v44 = vand.u32 2147483648, %v7415_v42  ;;  %v3183_v61 = vand.u32 2147483647, %v7415_v42  ;;  %v3047_v33 = vor.u32 1.1754944e-38, %v3046_v59  ;;  %vm3179_vm4 = vweird.f32 %v7415_v42 }
 0x7c1   :  { %v7427_v22 = vadd.f32 1.0, %v3212_v47  ;;  %v3201_v49 = vmul.f32 %v3200_v30, %v7381_v39  ;;  %vm3045_vm8 = vcmp.eq.f32.partialorder %v3044_v56, 8.507059e+37  ;;  %v3163_v57 = vmul.f32 %v3162_v20, %v7362_v41 }
 0x7c2   :  { %v3725_v3 = vpop.eup %3724  ;;  %v3186_v38 = vor.u32 1.1754944e-38, %v3185_v44  ;;  %vm3184_vm15 = vcmp.eq.f32.partialorder %v3183_v61, 8.507059e+37  ;;  %v2968_v41 = vmul.f32 0.5, %v7347_v0  ;;  %v2969_v32 = vmul.f32 0.5, %v7349_v11 }
 0x7c3   :  { %v3727_v13 = vpop.eup %3726  ;;  %v2996_v34 = vmul.f32 %v3725_v3, %v2994_v7  ;;  %vm3001_vm5 = vweird.f32 %v3725_v3  ;;  %3730 = vrcp.f32 %v7427_v22  ;;  %v3202_v7 = vadd.f32 1.1283791, %v3201_v49 }
 0x7c4   :  { %v3036_v50 = vmul.f32 %v3727_v13, %v3034_v23  ;;  %v3729_v4 = vpop.eup %3728  ;;  %vm3041_vm2 = vweird.f32 %v3727_v13  ;;  %vm3002_vm11 = vmor %vm3000_vm1, %vm3001_vm5  ;;  %v3223_v15 = vand.u32 2147483647, %v7427_v22  ;;  %v3225_v40 = vand.u32 2147483648, %v7427_v22 }
 0x7c5   :  { %v2997_v55 = vsub.f32 1.0, %v2996_v34  ;;  %v3175_v2 = vmul.f32 %v3729_v4, %v7415_v42  ;;  %vm3180_vm0 = vweird.f32 %v3729_v4  ;;  %vm3042_vm6 = vmor %vm3040_vm7, %vm3041_vm2  ;;  %v3147_v9 = vmul.f32 0.5, %v7351_v26  ;;  %v3059_v34 = vpop.permute.xlu0 %3058 }
 0x7c6   :  { %v3037_v16 = vsub.f32 1.0, %v3036_v50  ;;  %vm3181_vm3 = vmor %vm3179_vm4, %vm3180_vm0  ;;  %vm3219_vm13 = vweird.f32 %v7427_v22  ;;  %vm3224_vm12 = vcmp.eq.f32.partialorder %v3223_v15, 8.507059e+37  ;;  %v3226_v20 = vor.u32 1.1754944e-38, %v3225_v40 }
 0x7c7   :  { %v2998_v25 = vmul.f32 %v3725_v3, %v2997_v55  ;;  %v3176_v8 = vsub.f32 1.0, %v3175_v2  ;;  %v3148_v30 = vmul.f32 0.5, %v7353_v5 }
 0x7c8   :  { %v3038_v53 = vmul.f32 %v3727_v13, %v3037_v16 }
 0x7c9   :  { %v2999_v17 = vadd.f32 %v3725_v3, %v2998_v25  ;;  %v3177_v18 = vmul.f32 %v3729_v4, %v3176_v8  ;;  %v3731_v27 = vpop.eup %3730 }
 0x7ca   :  { %v3039_v52 = vadd.f32 %v3727_v13, %v3038_v53  ;;  %v3215_v6 = vmul.f32 %v3731_v27, %v7427_v22  ;;  %vm3220_vm10 = vweird.f32 %v3731_v27 }
 0x7cb   :  { %v3003_v35 = vsel %vm3002_vm11, %v3725_v3, %v2999_v17  ;;  %v3178_v28 = vadd.f32 %v3729_v4, %v3177_v18  ;;  %v3203_v3 = vmul.f32 %v3202_v7, %v7365_v45  ;;  %vm3221_vm9 = vmor %vm3219_vm13, %vm3220_vm10  ;;  %v3087_v18 = vpop.permute.xlu1 %3086 }
 0x7cc   :  { %v3008_v14 = vsel %vm3005_vm14, %v3007_v36, %v3003_v35  ;;  %v3043_v24 = vsel %vm3042_vm6, %v3727_v13, %v3039_v52  ;;  %v3216_v42 = vsub.f32 1.0, %v3215_v6 }
 0x7cd   :  { %v3009_v51 = vmul.f32 %v3008_v14, %v2984_v63  ;;  %v3048_v19 = vsel %vm3045_vm8, %v3047_v33, %v3043_v24  ;;  %v3182_v37 = vsel %vm3181_vm3, %v3729_v4, %v3178_v28 }
 0x7ce   :  { %v3049_v31 = vmul.f32 %v3048_v19, %v3024_v54  ;;  %v3187_v29 = vsel %vm3184_vm15, %v3186_v38, %v3182_v37  ;;  %v3217_v10 = vmul.f32 %v3731_v27, %v3216_v42  ;;  %v3097_v54 = vpop.permute.xlu2 %3096  ;;  %v3077_v38 = vpop.permute.xlu0 %3076 }
 0x7cf   :  { %v3524_v39 = vclamps-f32 %v3009_v51, 1.0  ;;  %v3188_v58 = vmul.f32 %v3187_v29, %v3163_v57 }
 0x7d0   :  { %v3525_v23 = vclamps-f32 %v3049_v31, 1.0  ;;  %v3218_v0 = vadd.f32 %v3731_v27, %v3217_v10 }
 0x7d1   :  { %v3052_v1 = vadd.f32 1.0, %v3524_v39  ;;  %v3526_v43 = vclamps-f32 %v3188_v58, 1.0 }
 0x7d2   :  { %v3053_v46 = vadd.f32 1.0, %v3525_v23  ;;  %v3222_v21 = vsel %vm3221_vm9, %v3731_v27, %v3218_v0 }
 0x7d3   :  { %v7446_v12 = vmul.f32 %v3052_v1, %v2968_v41  ;;  %v3231_v11 = vadd.f32 1.0, %v3526_v43  ;;  %v3227_v4 = vsel %vm3224_vm12, %v3226_v20, %v3222_v21 }
 0x7d4   :  { %v7451_v13 = vmul.f32 %v3053_v46, %v2969_v32  ;;  %v3228_v16 = vmul.f32 %v3227_v4, %v3203_v3 }
 0x7d5   :  { %v3061_v60 = vperm.slane %v7446_v12, 0  ;;  %v3069_v47 = vperm.slane %v7446_v12, 1  ;;  %v3099_v63 = vperm.slane %v7446_v12, 4  ;;  %v7456_v26 = vmul.f32 %v3231_v11, %v3147_v9 }
 0x7d6   :  { %v3062_v45 = vperm.slane %v7451_v13, 0  ;;  %v3070_v50 = vperm.slane %v7451_v13, 1  ;;  %v3100_v22 = vperm.slane %v7451_v13, 4  ;;  %v3089_v8 = vperm.slane %v7446_v12, 3  ;;  %v3117_v10 = vpop.permute.xlu2 %3116 }
 0x7d7   :  { %v3063_v55 = vmul.f32 %v3061_v60, %v3059_v34  ;;  %v3071_v48 = vmul.f32 %v3069_v47, %v7439_v62  ;;  %v3235_v25 = vperm.slane %v7456_v26, 0  ;;  %v3239_v56 = vperm.slane %v7456_v26, 1 }
 0x7d8   :  { %v3064_v59 = vmul.f32 %v3062_v45, %v3059_v34  ;;  %v3072_v2 = vmul.f32 %v3070_v50, %v7439_v62  ;;  %v3527_v17 = vclamps-f32 %v3228_v16, 1.0  ;;  %v3101_v44 = vmul.f32 %v3099_v63, %v3097_v54 }
 0x7d9   :  { %v3073_v53 = vadd.f32 %v3071_v48, %v3063_v55  ;;  %v3237_v36 = vmul.f32 %v3235_v25, %v3059_v34  ;;  %v3257_v52 = vperm.slane %v7456_v26, 4  ;;  %v3241_v61 = vmul.f32 %v3239_v56, %v7439_v62  ;;  %v3107_v55 = vpop.permute.xlu1 %3106 }
 0x7da   :  { %v3102_v35 = vmul.f32 %v3100_v22, %v3097_v54  ;;  %v3090_v33 = vperm.slane %v7451_v13, 3  ;;  %v3251_v49 = vperm.slane %v7456_v26, 3  ;;  %v3232_v14 = vadd.f32 1.0, %v3527_v17 }
 0x7db   :  { %v3074_v5 = vadd.f32 %v3072_v2, %v3064_v59  ;;  %v3079_v24 = vperm.slane %v7446_v12, 2  ;;  %v3080_v28 = vperm.slane %v7451_v13, 2  ;;  %v3243_v27 = vadd.f32 %v3241_v61, %v3237_v36 }
 0x7dc   :  { %v3259_v51 = vmul.f32 %v3257_v52, %v3097_v54  ;;  %v3091_v19 = vmul.f32 %v3089_v8, %v3087_v18  ;;  %v3245_v57 = vperm.slane %v7456_v26, 2  ;;  %v7474_v31 = vmul.f32 %v3232_v14, %v3148_v30  ;;  %v3127_v8 = vpop.permute.xlu0 %3126 }
 0x7dd   :  { %v3092_v37 = vmul.f32 %v3090_v33, %v3087_v18  ;;  %v3253_v6 = vmul.f32 %v3251_v49, %v3087_v18  ;;  %v3081_v39 = vmul.f32 %v3079_v24, %v3077_v38  ;;  %v3082_v29 = vmul.f32 %v3080_v28, %v3077_v38 }
 0x7de   :  { %v3247_v7 = vmul.f32 %v3245_v57, %v3077_v38  ;;  %v3119_v23 = vperm.slane %v7446_v12, 6  ;;  %v3120_v58 = vperm.slane %v7451_v13, 6  ;;  %v3236_v42 = vperm.slane %v7474_v31, 0 }
 0x7df   :  { %v3240_v15 = vperm.slane %v7474_v31, 1  ;;  %v3258_v41 = vperm.slane %v7474_v31, 4  ;;  %v3252_v32 = vperm.slane %v7474_v31, 3  ;;  %v3246_v1 = vperm.slane %v7474_v31, 2 }
 0x7e0   :  { %v3083_v40 = vadd.f32 %v3081_v39, %v3073_v53  ;;  %v3084_v46 = vadd.f32 %v3082_v29, %v3074_v5  ;;  %v3249_v43 = vadd.f32 %v3247_v7, %v3243_v27  ;;  %v3238_v9 = vmul.f32 %v3236_v42, %v3059_v34 }
 0x7e1   :  { %v3242_v3 = vmul.f32 %v3240_v15, %v7439_v62  ;;  %v3269_v0 = vperm.slane %v7456_v26, 6  ;;  %v3109_v11 = vperm.slane %v7446_v12, 5  ;;  %v3260_v20 = vmul.f32 %v3258_v41, %v3097_v54 }
 0x7e2   :  { %v3093_v60 = vadd.f32 %v3091_v19, %v3083_v40  ;;  %v3094_v47 = vadd.f32 %v3092_v37, %v3084_v46  ;;  %v3255_v63 = vadd.f32 %v3253_v6, %v3249_v43  ;;  %v3254_v45 = vmul.f32 %v3252_v32, %v3087_v18 }
 0x7e3   :  { %v3244_v21 = vadd.f32 %v3242_v3, %v3238_v9  ;;  %v3248_v50 = vmul.f32 %v3246_v1, %v3077_v38  ;;  %v3121_v4 = vmul.f32 %v3119_v23, %v3117_v10  ;;  %v3122_v48 = vmul.f32 %v3120_v58, %v3117_v10 }
 0x7e4   :  { %v3270_v22 = vperm.slane %v7474_v31, 6  ;;  %v3110_v34 = vperm.slane %v7451_v13, 5  ;;  %v3263_v62 = vperm.slane %v7456_v26, 5  ;;  %v3264_v59 = vperm.slane %v7474_v31, 5 }
 0x7e5   :  { %v3250_v16 = vadd.f32 %v3248_v50, %v3244_v21  ;;  %v3103_v2 = vadd.f32 %v3101_v44, %v3093_v60  ;;  %v3104_v54 = vadd.f32 %v3102_v35, %v3094_v47  ;;  %v3111_v25 = vmul.f32 %v3109_v11, %v3107_v55 }
 0x7e6   :  { %v3112_v30 = vmul.f32 %v3110_v34, %v3107_v55  ;;  %v3261_v53 = vadd.f32 %v3259_v51, %v3255_v63  ;;  %v3265_v56 = vmul.f32 %v3263_v62, %v3107_v55  ;;  %v3271_v36 = vmul.f32 %v3269_v0, %v3117_v10  ;;  %v3292_v62 = vld [vmem:[%s7632_s14] sm:$0xff] }
 0x7e7   :  { %v3256_v17 = vadd.f32 %v3254_v45, %v3250_v16  ;;  %v3129_v52 = vperm.slane %v7446_v12, 7  ;;  %v3130_v18 = vperm.slane %v7451_v13, 7  ;;  %v3113_v61 = vadd.f32 %v3111_v25, %v3103_v2 }
 0x7e8   :  { %v3114_v33 = vadd.f32 %v3112_v30, %v3104_v54  ;;  %v3267_v49 = vadd.f32 %v3265_v56, %v3261_v53  ;;  %v3275_v14 = vperm.slane %v7456_v26, 7  ;;  %v3266_v24 = vmul.f32 %v3264_v59, %v3107_v55  ;;  %v3291_v55 = vld [vmem:[%s7631_s13] sm:$0xff] }
 0x7e9   :  { %v3262_v5 = vadd.f32 %v3260_v20, %v3256_v17  ;;  %v3276_v44 = vperm.slane %v7474_v31, 7  ;;  %v3131_v35 = vmul.f32 %v3129_v52, %v3127_v8  ;;  %v3123_v28 = vadd.f32 %v3121_v4, %v3113_v61 }
 0x7ea   :  { %v3124_v27 = vadd.f32 %v3122_v48, %v3114_v33  ;;  %v3273_v51 = vadd.f32 %v3271_v36, %v3267_v49  ;;  %v3132_v19 = vmul.f32 %v3130_v18, %v3127_v8  ;;  %v3272_v57 = vmul.f32 %v3270_v22, %v3117_v10 }
 0x7eb   :  { %v3268_v38 = vadd.f32 %v3266_v24, %v3262_v5  ;;  %v3277_v37 = vmul.f32 %v3275_v14, %v3127_v8  ;;  %v3133_v12 = vadd.f32 %v3131_v35, %v3123_v28  ;;  %v3278_v39 = vmul.f32 %v3276_v44, %v3127_v8 }
 0x7ec   :  { %v3134_v6 = vadd.f32 %v3132_v19, %v3124_v27 }
 0x7ed   :  { %v3274_v13 = vadd.f32 %v3272_v57, %v3268_v38  ;;  %v3279_v29 = vadd.f32 %v3277_v37, %v3273_v51  ;;  %v3138_v23 = vmul.f32 %v3133_v12, %v3133_v12 }
 0x7ee   :  { %v3135_v7 = vadd.f32 %v3134_v6, %v3133_v12  ;;  %v3139_v26 = vmul.f32 %v3134_v6, %v3134_v6 }
 0x7ef   :  { %v3280_v58 = vadd.f32 %v3278_v39, %v3274_v13  ;;  %v3284_v15 = vmul.f32 %v3279_v29, %v3279_v29 }
 0x7f0   :  { %3136 = vadd.xlane.f32.xlu1 %v3135_v7  ;;  %v3140_v42 = vadd.f32 %v3139_v26, %v3138_v23 }
 0x7f1   :  { %v3281_v31 = vadd.f32 %v3280_v58, %v3279_v29  ;;  %v3285_v41 = vmul.f32 %v3280_v58, %v3280_v58 }
 0x7f2   :  { %3141 = vadd.xlane.f32.xlu0 %v3140_v42 }
 0x7f3   :  { %3282 = vadd.xlane.f32.xlu2 %v3281_v31  ;;  %v3286_v32 = vadd.f32 %v3285_v41, %v3284_v15 }
 0x7f8   :  { %3287 = vadd.xlane.f32.xlu1 %v3286_v32 }
 0x863   :  { %v3137_v1 = vpop.xlane.xlu1 %3136 }
 0x865   :  { %v3142_v10 = vpop.xlane.xlu0 %3141 }
 0x866   :  { %v3283_v40 = vpop.xlane.xlu2 %3282 }
 0x867   :  { %v3289_v46 = vadd.f32 %v3283_v40, %v3137_v1 }
 0x869   :  { %v3293_v43 = vmul.f32 0.001953125, %v3289_v46 }
 0x86b   :  { %v3288_v9 = vpop.xlane.xlu1 %3287  ;;  %v3295_v0 = vmul.f32 %v3293_v43, %v3293_v43 }
 0x86c   :  { %v3290_v3 = vadd.f32 %v3288_v9, %v3142_v10 }
 0x86e   :  { %v3294_v11 = vmul.f32 0.001953125, %v3290_v3 }
 0x870   :  { %v3296_v20 = vsub.f32 %v3294_v11, %v3295_v0 }
 0x872   :  { %v3297_v60 = vmax.f32 %v3296_v20, 0.0 }
 0x874   :  { %v3298_v47 = vadd.f32 0.001, %v3297_v60 }
 0x876   :  { %3732 = vrsqrt.f32 %v3298_v47  ;;  %vm3305_vm7 = vweird.f32 %v3298_v47 }
 0x87c   :  { %v3733_v63 = vpop.eup %3732 }
 0x87d   :  { %v3300_v21 = vmul.f32 %v3733_v63, %v3298_v47  ;;  %vm3306_vm1 = vweird.f32 %v3733_v63 }
 0x87e   :  { %vm3307_vm5 = vmor %vm3305_vm7, %vm3306_vm1 }
 0x87f   :  { %v3301_v45 = vmul.f32 %v3733_v63, %v3300_v21 }
 0x881   :  { %v3302_v50 = vmul.f32 0.5, %v3301_v45 }
 0x883   :  { %v3303_v4 = vsub.f32 1.5, %v3302_v50 }
 0x885   :  { %v3304_v48 = vmul.f32 %v3733_v63, %v3303_v4 }
 0x887   :  { %v3308_v22 = vsel %vm3307_vm5, %v3733_v63, %v3304_v48 }
 0x888   :  { %v3309_v34 = vmul.f32 %v3308_v22, %v3291_v55 }
 0x88a   :  { %3314 = vperm.xlu2 %3699, %v3309_v34   ;;  %v3310_v16 = vmul.f32 %v3309_v34, %v3293_v43 }
 0x88c   :  { %v3311_v59 = vsub.f32 %v3292_v62, %v3310_v16 }
 0x88e   :  { %3321 = vperm.xlu1 %3700, %v3311_v59  }
 0x8e4   :  { %v3315_v2 = vpop.permute.xlu2 %3314 }
 0x8e5   :  { %v3317_v54 = vmul.f32 %v3315_v2, %v3133_v12  ;;  %v3318_v25 = vmul.f32 %v3315_v2, %v3134_v6  ;;  %v3416_v30 = vmul.f32 %v3315_v2, %v3279_v29  ;;  %v3417_v53 = vmul.f32 %v3315_v2, %v3280_v58 }
 0x900   :  { %v3322_v56 = vpop.permute.xlu1 %3321 }
 0x901   :  { %v7500_v8 = vadd.f32 %v3322_v56, %v3317_v54  ;;  %v7502_v17 = vadd.f32 %v3322_v56, %v3318_v25  ;;  %v7504_v36 = vadd.f32 %v3416_v30, %v3322_v56  ;;  %v7506_v52 = vadd.f32 %v3417_v53, %v3322_v56 }
 0x903   :  { %v7509_v18 = vmul.f32 0.70710677, %v7500_v8  ;;  %v7512_v61 = vmul.f32 0.70710677, %v7502_v17  ;;  %v7515_v33 = vmul.f32 0.70710677, %v7504_v36 }
 0x904   :  { %v7518_v49 = vmul.f32 0.70710677, %v7506_v52 }
 0x905   :  { %v3330_v14 = vmul.f32 %v7509_v18, %v7509_v18  ;;  %v3370_v5 = vmul.f32 %v7512_v61, %v7512_v61  ;;  %v3424_v24 = vmul.f32 %v7515_v33, %v7515_v33 }
 0x906   :  { %v3464_v44 = vmul.f32 %v7518_v49, %v7518_v49 }
 0x907   :  { %v7528_v35 = vmin.f32 %v3330_v14, 16.0  ;;  %v7530_v28 = vmin.f32 %v3370_v5, 16.0  ;;  %v7532_v27 = vmin.f32 %v3424_v24, 16.0 }
 0x908   :  { %v7534_v51 = vmin.f32 %v3464_v44, 16.0 }
 0x909   :  { %v3332_v19 = vmul.f32 2.1237322e-06, %v7528_v35  ;;  %v3343_v57 = vmul.f32 3.8918573e-05, %v7528_v35  ;;  %v3372_v38 = vmul.f32 2.1237322e-06, %v7530_v28 }
 0x90a   :  { %v3383_v37 = vmul.f32 3.8918573e-05, %v7530_v28  ;;  %v3426_v12 = vmul.f32 2.1237322e-06, %v7532_v27  ;;  %v3437_v6 = vmul.f32 3.8918573e-05, %v7532_v27 }
 0x90b   :  { %v3333_v13 = vadd.f32 0.00028619796, %v3332_v19  ;;  %v3344_v39 = vadd.f32 0.001143296, %v3343_v57  ;;  %v3373_v29 = vadd.f32 0.00028619796, %v3372_v38 }
 0x90c   :  { %v3384_v7 = vadd.f32 0.001143296, %v3383_v37  ;;  %v3427_v23 = vadd.f32 0.00028619796, %v3426_v12  ;;  %v3438_v26 = vadd.f32 0.001143296, %v3437_v6 }
 0x90d   :  { %v3334_v58 = vmul.f32 %v3333_v13, %v7528_v35  ;;  %v3345_v42 = vmul.f32 %v3344_v39, %v7528_v35  ;;  %v3374_v31 = vmul.f32 %v3373_v29, %v7530_v28  ;;  %v3466_v15 = vmul.f32 2.1237322e-06, %v7534_v51 }
 0x90e   :  { %v3385_v41 = vmul.f32 %v3384_v7, %v7530_v28  ;;  %v3428_v32 = vmul.f32 %v3427_v23, %v7532_v27  ;;  %v3439_v1 = vmul.f32 %v3438_v26, %v7532_v27  ;;  %v3477_v40 = vmul.f32 3.8918573e-05, %v7534_v51 }
 0x90f   :  { %v3335_v46 = vadd.f32 0.0036580483, %v3334_v58  ;;  %v3346_v43 = vadd.f32 0.014752088, %v3345_v42  ;;  %v3375_v10 = vadd.f32 0.0036580483, %v3374_v31 }
 0x910   :  { %v3386_v9 = vadd.f32 0.014752088, %v3385_v41  ;;  %v3429_v3 = vadd.f32 0.0036580483, %v3428_v32  ;;  %v3440_v0 = vadd.f32 0.014752088, %v3439_v1 }
 0x911   :  { %v3336_v11 = vmul.f32 %v3335_v46, %v7528_v35  ;;  %v3347_v20 = vmul.f32 %v3346_v43, %v7528_v35  ;;  %v3376_v60 = vmul.f32 %v3375_v10, %v7530_v28  ;;  %v3467_v47 = vadd.f32 0.00028619796, %v3466_v15 }
 0x912   :  { %v3387_v63 = vmul.f32 %v3386_v9, %v7530_v28  ;;  %v3430_v21 = vmul.f32 %v3429_v3, %v7532_v27  ;;  %v3441_v45 = vmul.f32 %v3440_v0, %v7532_v27  ;;  %v3478_v50 = vadd.f32 0.001143296, %v3477_v40 }
 0x913   :  { %v3337_v4 = vadd.f32 0.05243302, %v3336_v11  ;;  %v3348_v55 = vadd.f32 0.112945676, %v3347_v20  ;;  %v3377_v48 = vadd.f32 0.05243302, %v3376_v60  ;;  %v3468_v62 = vmul.f32 %v3467_v47, %v7534_v51 }
 0x914   :  { %v3388_v22 = vadd.f32 0.112945676, %v3387_v63  ;;  %v3442_v34 = vadd.f32 0.112945676, %v3441_v45  ;;  %v3479_v16 = vmul.f32 %v3478_v50, %v7534_v51  ;;  %v3431_v54 = vadd.f32 0.05243302, %v3430_v21 }
 0x915   :  { %v3338_v59 = vmul.f32 %v3337_v4, %v7528_v35  ;;  %v3349_v2 = vmul.f32 %v3348_v55, %v7528_v35  ;;  %v3378_v25 = vmul.f32 %v3377_v48, %v7530_v28  ;;  %v3469_v44 = vadd.f32 0.0036580483, %v3468_v62 }
 0x916   :  { %v3389_v30 = vmul.f32 %v3388_v22, %v7530_v28  ;;  %v3443_v53 = vmul.f32 %v3442_v34, %v7532_v27  ;;  %v3480_v56 = vadd.f32 0.014752088, %v3479_v16  ;;  %v3432_v37 = vmul.f32 %v3431_v54, %v7532_v27 }
 0x917   :  { %v3350_v14 = vadd.f32 0.4994258, %v3349_v2  ;;  %v3339_v57 = vadd.f32 0.18741608, %v3338_v59  ;;  %v3379_v12 = vadd.f32 0.18741608, %v3378_v25  ;;  %v3470_v26 = vmul.f32 %v3469_v44, %v7534_v51 }
 0x918   :  { %v3390_v5 = vadd.f32 0.4994258, %v3389_v30  ;;  %v3444_v24 = vadd.f32 0.4994258, %v3443_v53  ;;  %v3481_v19 = vmul.f32 %v3480_v56, %v7534_v51  ;;  %v3433_v42 = vadd.f32 0.18741608, %v3432_v37 }
 0x919   :  { %v3351_v38 = vmul.f32 %v3350_v14, %v7528_v35  ;;  %v3340_v58 = vmul.f32 %v3339_v57, %v7528_v35  ;;  %v3380_v31 = vmul.f32 %v3379_v12, %v7530_v28  ;;  %v3471_v41 = vadd.f32 0.05243302, %v3470_v26 }
 0x91a   :  { %v3391_v6 = vmul.f32 %v3390_v5, %v7530_v28  ;;  %v3445_v13 = vmul.f32 %v3444_v24, %v7532_v27  ;;  %v3482_v39 = vadd.f32 0.112945676, %v3481_v19  ;;  %v3434_v1 = vmul.f32 %v3433_v42, %v7532_v27 }
 0x91b   :  { %v3352_v29 = vadd.f32 1.0, %v3351_v38  ;;  %v3341_v32 = vadd.f32 1.1283791, %v3340_v58  ;;  %v3381_v40 = vadd.f32 1.1283791, %v3380_v31  ;;  %v3472_v35 = vmul.f32 %v3471_v41, %v7534_v51 }
 0x91c   :  { %v3392_v7 = vadd.f32 1.0, %v3391_v6  ;;  %v7568_v23 = vadd.f32 1.0, %v3445_v13  ;;  %v3483_v15 = vmul.f32 %v3482_v39, %v7534_v51  ;;  %v3435_v20 = vadd.f32 1.1283791, %v3434_v1 }
 0x91d   :  { %3734 = vrcp.f32 %v3352_v29  ;;  %v3362_v10 = vand.u32 2147483647, %v3352_v29  ;;  %v3342_v28 = vmul.f32 %v3341_v32, %v7509_v18  ;;  %vm3358_vm2 = vweird.f32 %v3352_v29 }
 0x91e   :  { %3736 = vrcp.f32 %v3392_v7  ;;  %v3484_v46 = vadd.f32 0.4994258, %v3483_v15  ;;  %v3364_v63 = vand.u32 2147483648, %v3352_v29  ;;  %v3382_v27 = vmul.f32 %v3381_v40, %v7512_v61 }
 0x91f   :  { %3738 = vrcp.f32 %v7568_v23  ;;  %vm7582_vm14 = vcmp.eq.f32.partialorder %v3362_v10, 8.507059e+37  ;;  %vm3398_vm11 = vweird.f32 %v3392_v7  ;;  %v3404_v18 = vand.u32 2147483648, %v3392_v7 }
 0x920   :  { %v3485_v0 = vmul.f32 %v3484_v46, %v7534_v51  ;;  %v3402_v22 = vand.u32 2147483647, %v3392_v7  ;;  %v3365_v62 = vor.u32 1.1754944e-38, %v3364_v63  ;;  %v3458_v16 = vand.u32 2147483648, %v7568_v23 }
 0x921   :  { %v3473_v59 = vadd.f32 0.18741608, %v3472_v35  ;;  %v3456_v25 = vand.u32 2147483647, %v7568_v23  ;;  %v3405_v53 = vor.u32 1.1754944e-38, %v3404_v18  ;;  %v3436_v56 = vmul.f32 %v3435_v20, %v7515_v33 }
 0x922   :  { %v7580_v21 = vadd.f32 1.0, %v3485_v0  ;;  %vm3452_vm15 = vweird.f32 %v7568_v23  ;;  %vm3403_vm10 = vcmp.eq.f32.partialorder %v3402_v22, 8.507059e+37  ;;  %v3459_v38 = vor.u32 1.1754944e-38, %v3458_v16 }
 0x923   :  { %v3735_v43 = vpop.eup %3734  ;;  %v3474_v37 = vmul.f32 %v3473_v59, %v7534_v51  ;;  %vm3457_vm12 = vcmp.eq.f32.partialorder %v3456_v25, 8.507059e+37  ;;  %v3326_v13 = vmul.f32 0.5, %v7500_v8  ;;  %v3420_v8 = vmul.f32 0.5, %v7504_v36 }
 0x924   :  { %v3737_v9 = vpop.eup %3736  ;;  %v3354_v3 = vmul.f32 %v3735_v43, %v3352_v29  ;;  %vm3359_vm0 = vweird.f32 %v3735_v43  ;;  %3740 = vrcp.f32 %v7580_v21  ;;  %v3496_v15 = vand.u32 2147483647, %v7580_v21 }
 0x925   :  { %v3394_v11 = vmul.f32 %v3737_v9, %v3392_v7  ;;  %v3739_v60 = vpop.eup %3738  ;;  %vm3399_vm6 = vweird.f32 %v3737_v9  ;;  %vm3360_vm4 = vmor %vm3358_vm2, %vm3359_vm0  ;;  %v3327_v7 = vmul.f32 0.5, %v7502_v17  ;;  %v3475_v31 = vadd.f32 1.1283791, %v3474_v37 }
 0x926   :  { %v3355_v47 = vsub.f32 1.0, %v3354_v3  ;;  %v3448_v4 = vmul.f32 %v3739_v60, %v7568_v23  ;;  %vm3453_vm8 = vweird.f32 %v3739_v60  ;;  %vm3400_vm3 = vmor %vm3398_vm11, %vm3399_vm6  ;;  %v3498_v51 = vand.u32 2147483648, %v7580_v21 }
 0x927   :  { %v3395_v50 = vsub.f32 1.0, %v3394_v11  ;;  %vm3454_vm13 = vmor %vm3452_vm15, %vm3453_vm8  ;;  %vm3492_vm1 = vweird.f32 %v7580_v21  ;;  %vm3497_vm5 = vcmp.eq.f32.partialorder %v3496_v15, 8.507059e+37  ;;  %v3421_v11 = vmul.f32 0.5, %v7506_v52 }
 0x928   :  { %v3356_v55 = vmul.f32 %v3735_v43, %v3355_v47  ;;  %v3449_v34 = vsub.f32 1.0, %v3448_v4  ;;  %v3499_v10 = vor.u32 1.1754944e-38, %v3498_v51 }
 0x929   :  { %v3396_v48 = vmul.f32 %v3737_v9, %v3395_v50 }
 0x92a   :  { %v3357_v61 = vadd.f32 %v3735_v43, %v3356_v55  ;;  %v3450_v54 = vmul.f32 %v3739_v60, %v3449_v34  ;;  %v3741_v44 = vpop.eup %3740 }
 0x92b   :  { %v3397_v2 = vadd.f32 %v3737_v9, %v3396_v48  ;;  %v3488_v33 = vmul.f32 %v3741_v44, %v7580_v21  ;;  %vm3493_vm9 = vweird.f32 %v3741_v44 }
 0x92c   :  { %v3361_v30 = vsel %vm3360_vm4, %v3735_v43, %v3357_v61  ;;  %v3451_v24 = vadd.f32 %v3739_v60, %v3450_v54  ;;  %vm3494_vm7 = vmor %vm3492_vm1, %vm3493_vm9 }
 0x92d   :  { %v3366_v14 = vsel %vm7582_vm14, %v3365_v62, %v3361_v30  ;;  %v3401_v5 = vsel %vm3400_vm3, %v3737_v9, %v3397_v2  ;;  %v3489_v58 = vsub.f32 1.0, %v3488_v33  ;;  %v3476_v9 = vmul.f32 %v3475_v31, %v7518_v49 }
 0x92e   :  { %v3367_v19 = vmul.f32 %v3366_v14, %v3342_v28  ;;  %v3406_v57 = vsel %vm3403_vm10, %v3405_v53, %v3401_v5  ;;  %v3455_v6 = vsel %vm3454_vm13, %v3739_v60, %v3451_v24 }
 0x92f   :  { %v3407_v12 = vmul.f32 %v3406_v57, %v3382_v27  ;;  %v3460_v29 = vsel %vm3457_vm12, %v3459_v38, %v3455_v6  ;;  %v3490_v1 = vmul.f32 %v3741_v44, %v3489_v58 }
 0x930   :  { %v3528_v39 = vclamps-f32 %v3367_v19, 1.0  ;;  %v3461_v26 = vmul.f32 %v3460_v29, %v3436_v56 }
 0x931   :  { %v3529_v23 = vclamps-f32 %v3407_v12, 1.0  ;;  %v3491_v43 = vadd.f32 %v3741_v44, %v3490_v1 }
 0x932   :  { %v3410_v42 = vadd.f32 1.0, %v3528_v39  ;;  %v3530_v32 = vclamps-f32 %v3461_v26, 1.0 }
 0x933   :  { %v3411_v41 = vadd.f32 1.0, %v3529_v23  ;;  %v3495_v3 = vsel %vm3494_vm7, %v3741_v44, %v3491_v43 }
 0x934   :  { %v3412_v40 = vmul.f32 %v3410_v42, %v3326_v13  ;;  %v3504_v17 = vadd.f32 1.0, %v3530_v32  ;;  %v3500_v35 = vsel %vm3497_vm5, %v3499_v10, %v3495_v3 }
 0x935   :  { %v3413_v46 = vmul.f32 %v3411_v41, %v3327_v7  ;;  %v3501_v0 = vmul.f32 %v3500_v35, %v3476_v9 }
 0x936   :  { %3414 = vst [vmem:[%s7633_s15] sm:$0xff] %v3412_v40  ;;  %v3506_v36 = vmul.f32 %v3504_v17, %v3420_v8 }
 0x937   :  { %3415 = vst [vmem:[%s7633_s15 + $0x8] sm:$0xff] %v3413_v46  ;;  %v3531_v28 = vclamps-f32 %v3501_v0, 1.0 }
 0x938   :  { %3532 = vst [vmem:[%s7633_s15 + $0x10] sm:$0xff] %v3506_v36 }
 0x939   :  { %v3505_v20 = vadd.f32 1.0, %v3531_v28 }
 0x93b   :  { %v3507_v60 = vmul.f32 %v3505_v20, %v3421_v11 }
 0x93d   :  { %3533 = vst [vmem:[%s7633_s15 + $0x18] sm:$0xff] %v3507_v60 }

</bundles_post_ra>
